<compile_context>
chip_gen: v7x
topology: tpu7x:2x2x1
jax: 0.10.0
libtpu: 0.0.40
codegen_flags: <defaults>
</compile_context>

<pallas_src>
import math

import jax
import jax.numpy as jnp
from jax.experimental import pallas as pl
from jax.experimental.pallas import tpu as pltpu


ACT_DTYPE = jnp.float32      # activations in HBM (flip to bf16 to halve HBM traffic)
MXU_DTYPE = jnp.bfloat16     # matmul operand dtype (f32 accumulation on the MXU)
_MAX_H_TILE = 128


def _vmem_capacity_bytes():
    try:
        return int(pltpu.get_tpu_info().vmem_capacity_bytes)
    except Exception:
        return 64 * 1024 * 1024


_VMEM_CAP = _vmem_capacity_bytes()
_VMEM_LIMIT = int(_VMEM_CAP * 3 // 4)


# ----------------------------------------------------------------------------
# Tiling helpers
# ----------------------------------------------------------------------------
def _largest_divisor_at_most(n, cap):
    for d in range(min(n, cap), 0, -1):
        if n % d == 0:
            return d
    return 1


def _conv_vmem_bytes(ht, W, cin, cout, fused):
    """Rough per-grid-step VMEM footprint (pipeline blocks double-buffered)."""
    wp = W + 2
    halo = 4 if fused else 2
    blocks = (ht + halo) * wp * cin * 4                      # input row blocks (f32)
    blocks += ht * wp * cout * 4                             # output block
    blocks += ht * wp * cout * 4                             # optional skip input
    blocks += (2 if fused else 1) * (9 * cin * cout * 2 + cout * 4)
    scratch = (ht + 2 + (2 if fused else 0)) * wp * cin * 2  # padded input tile (bf16)
    scratch += (ht + (2 if fused else 0)) * W * 9 * cin * 2  # im2row patch (conv1)
    if fused:
        scratch += (ht + 2) * wp * cin * 2 + ht * W * 9 * cin * 2
    return 2 * blocks + scratch


def _pick_h_tile(H, W, cin, cout, *, fused, h_tile):
    if h_tile is not None:
        return _largest_divisor_at_most(H, int(h_tile))
    budget = _VMEM_CAP // 2
    best = 1
    for d in range(1, min(H, _MAX_H_TILE) + 1):
        if H % d == 0 and _conv_vmem_bytes(d, W, cin, cout, fused) <= budget:
            best = d
    return best


def _flatten_conv_weight(w):
    """(3,3,cin,cout) [dy,dx,ci,co] -> (9*cin,cout), row k = (dx*3+dy)*cin+ci.

    dx is the (expensive) sublane-shifted slice in the im2row build, dy the
    cheap aligned row offset.  From a PyTorch Conv2d weight (cout,cin,3,3):
        w = jnp.transpose(w_torch, (2, 3, 1, 0)).
    """
    _, _, cin, cout = w.shape
    return jnp.transpose(w, (1, 0, 2, 3)).reshape(9 * cin, cout)


# ----------------------------------------------------------------------------
# Plain 3x3 conv kernel (optional ReLU / fused skip add), W-padded in/out
# ----------------------------------------------------------------------------
def _make_conv_kernel(h_tile, W, cin, cout, relu, has_skip):
    M = h_tile * W

    def kernel(*args):
        if has_skip:
            x_top, x_c, x_bot, w_ref, b_ref, skip_ref, o_ref, xpad, patch = args
        else:
            x_top, x_c, x_bot, w_ref, b_ref, o_ref, xpad, patch = args
            skip_ref = None
        i = pl.program_id(1)
        last = pl.num_programs(1) - 1

        # ---- assemble the zero-padded input tile (h_tile+2, W+2, cin), bf16 ----
        top = x_top[0].astype(MXU_DTYPE)                      # (1, W+2, cin)
        bot = x_bot[0].astype(MXU_DTYPE)
        xpad[0:1] = jnp.where(i == 0, jnp.zeros_like(top), top)
        xpad[1:h_tile + 1] = x_c[0].astype(MXU_DTYPE)
        xpad[h_tile + 1:h_tile + 2] = jnp.where(i == last, jnp.zeros_like(bot), bot)

        # ---- im2row: one (M, 9*cin) patch; 3 dx-shifted column buffers reused
        #      via aligned dy row-offsets (free when W % 8 == 0) ----
        for dx in range(3):
            col = xpad[:, dx:dx + W, :].reshape((h_tile + 2) * W, cin)
            for dy in range(3):
                k = dx * 3 + dy
                patch[:, k * cin:(k + 1) * cin] = col[dy * W:dy * W + M, :]

        # ---- single MXU matmul, K = 9*cin, f32 accumulation, fused epilogue ----
        acc = jnp.dot(patch[...], w_ref[...], preferred_element_type=jnp.float32)
        acc = acc + b_ref[...]
        if relu:
            acc = jnp.maximum(acc, 0.0)
        if has_skip:
            acc = acc + skip_ref[0, :, 1:W + 1, :].reshape(M, cout)

        out = acc.astype(o_ref.dtype).reshape(h_tile, W, cout)
        o_ref[0, :, 1:W + 1, :] = out
        zcol = jnp.zeros((h_tile, 1, cout), o_ref.dtype)
        o_ref[0, :, 0:1, :] = zcol
        o_ref[0, :, W + 1:W + 2, :] = zcol

    return kernel


def conv3x3(x, w, b, *, relu=False, skip=None, h_tile=None):
    """3x3 / stride-1 / pad-1 conv on a W-padded NHWC activation.

    x: (N, H, W+2, cin) f32 with zero border columns.  Returns the same layout.
    """
    N, H, Wp, cin = x.shape
    W = Wp - 2
    cout = w.shape[-1]
    Ht = _pick_h_tile(H, W, cin, cout, fused=False, h_tile=h_tile)
    n_tiles = H // Ht

    w_flat = _flatten_conv_weight(w).astype(MXU_DTYPE)
    b = b.reshape(1, cout).astype(jnp.float32)
    kernel = _make_conv_kernel(Ht, W, cin, cout, relu, skip is not None)

    in_specs = [
        pl.BlockSpec((1, 1, Wp, cin),
                     lambda n, i: (n, jnp.maximum(i * Ht - 1, 0), 0, 0)),
        pl.BlockSpec((1, Ht, Wp, cin), lambda n, i: (n, i, 0, 0)),
        pl.BlockSpec((1, 1, Wp, cin),
                     lambda n, i: (n, jnp.minimum(i * Ht + Ht, H - 1), 0, 0)),
        pl.BlockSpec((9 * cin, cout), lambda n, i: (0, 0)),
        pl.BlockSpec((1, cout), lambda n, i: (0, 0)),
    ]
    args = [x, x, x, w_flat, b]
    if skip is not None:
        in_specs.append(pl.BlockSpec((1, Ht, Wp, cout), lambda n, i: (n, i, 0, 0)))
        args.append(skip)

    return pl.pallas_call(
        kernel,
        out_shape=jax.ShapeDtypeStruct((N, H, Wp, cout), ACT_DTYPE),
        grid=(N, n_tiles),
        in_specs=in_specs,
        out_specs=pl.BlockSpec((1, Ht, Wp, cout), lambda n, i: (n, i, 0, 0)),
        scratch_shapes=[
            pltpu.VMEM((Ht + 2, Wp, cin), MXU_DTYPE),        # padded input tile
            pltpu.VMEM((Ht * W, 9 * cin), MXU_DTYPE),        # im2row patch
        ],
        compiler_params=pltpu.CompilerParams(
            dimension_semantics=("parallel", "parallel"),
            vmem_limit_bytes=_VMEM_LIMIT),
    )(*args)


# ----------------------------------------------------------------------------
# Fused residual block: h + res_scale * conv2(relu(conv1(h))) in one kernel
# ----------------------------------------------------------------------------
def _make_resblock_kernel(h_tile, W, F, H, res_scale):
    M1 = (h_tile + 2) * W        # conv1 pixels: tile rows + 1-row halo each side
    M2 = h_tile * W
    Wp = W + 2

    def kernel(x_t0, x_t1, x_c, x_b0, x_b1, w1_ref, b1_ref, w2_ref, b2_ref,
               o_ref, xpad, patch1, tpad, patch2):
        i = pl.program_id(1)
        last = pl.num_programs(1) - 1
        r0 = i * h_tile

        # ---- assemble 2-row-halo padded input (h_tile+4, W+2, F), bf16 ----
        def halo(ref, oob):
            v = ref[0].astype(MXU_DTYPE)                     # (1, Wp, F)
            return jnp.where(oob, jnp.zeros_like(v), v)

        xpad[0:1] = halo(x_t0, r0 - 2 < 0)
        xpad[1:2] = halo(x_t1, r0 - 1 < 0)
        xpad[2:h_tile + 2] = x_c[0].astype(MXU_DTYPE)
        xpad[h_tile + 2:h_tile + 3] = halo(x_b0, r0 + h_tile > H - 1)
        xpad[h_tile + 3:h_tile + 4] = halo(x_b1, r0 + h_tile + 1 > H - 1)

        # ---- conv1 + bias + ReLU over h_tile+2 rows (halo recompute so the
        #      intermediate activation never touches HBM) ----
        for dx in range(3):
            col = xpad[:, dx:dx + W, :].reshape((h_tile + 4) * W, F)
            for dy in range(3):
                k = dx * 3 + dy
                patch1[:, k * F:(k + 1) * F] = col[dy * W:dy * W + M1, :]
        t = jnp.dot(patch1[...], w1_ref[...], preferred_element_type=jnp.float32)
        t = jnp.maximum(t + b1_ref[...], 0.0)

        # ---- stage t as a zero-padded tile for conv2 ----
        zcol = jnp.zeros((h_tile + 2, 1, F), MXU_DTYPE)
        tpad[:, 0:1, :] = zcol
        tpad[:, W + 1:W + 2, :] = zcol
        tpad[:, 1:W + 1, :] = t.astype(MXU_DTYPE).reshape(h_tile + 2, W, F)

        # t rows falling outside the image are conv2's zero padding, not conv1 output.
        zrow = jnp.zeros((1, Wp, F), MXU_DTYPE)

        @pl.when(i == 0)
        def _():
            tpad[0:1] = zrow

        @pl.when(i == last)
        def _():
            tpad[h_tile + 1:h_tile + 2] = zrow

        # ---- conv2 + bias, residual add with the block input ----
        for dx in range(3):
            col = tpad[:, dx:dx + W, :].reshape((h_tile + 2) * W, F)
            for dy in range(3):
                k = dx * 3 + dy
                patch2[:, k * F:(k + 1) * F] = col[dy * W:dy * W + M2, :]
        y = jnp.dot(patch2[...], w2_ref[...], preferred_element_type=jnp.float32)
        y = y + b2_ref[...]
        if res_scale != 1.0:
            y = y * jnp.float32(res_scale)
        h_in = x_c[0, :, 1:W + 1, :].reshape(M2, F)
        out = (h_in + y).astype(o_ref.dtype).reshape(h_tile, W, F)

        o_ref[0, :, 1:W + 1, :] = out
        zout = jnp.zeros((h_tile, 1, F), o_ref.dtype)
        o_ref[0, :, 0:1, :] = zout
        o_ref[0, :, W + 1:W + 2, :] = zout

    return kernel


def residual_block(h, w1, b1, w2, b2, *, res_scale=1.0, h_tile=None):
    N, H, Wp, F = h.shape
    W = Wp - 2
    Ht = _pick_h_tile(H, W, F, F, fused=True, h_tile=h_tile)
    n_tiles = H // Ht

    w1f = _flatten_conv_weight(w1).astype(MXU_DTYPE)
    w2f = _flatten_conv_weight(w2).astype(MXU_DTYPE)
    b1r = b1.reshape(1, F).astype(jnp.float32)
    b2r = b2.reshape(1, F).astype(jnp.float32)
    kernel = _make_resblock_kernel(Ht, W, F, H, float(res_scale))

    def row_spec(off):
        return pl.BlockSpec(
            (1, 1, Wp, F),
            lambda n, i, off=off: (n, jnp.clip(i * Ht + off, 0, H - 1), 0, 0))

    in_specs = [
        row_spec(-2), row_spec(-1),
        pl.BlockSpec((1, Ht, Wp, F), lambda n, i: (n, i, 0, 0)),
        row_spec(Ht), row_spec(Ht + 1),
        pl.BlockSpec((9 * F, F), lambda n, i: (0, 0)),
        pl.BlockSpec((1, F), lambda n, i: (0, 0)),
        pl.BlockSpec((9 * F, F), lambda n, i: (0, 0)),
        pl.BlockSpec((1, F), lambda n, i: (0, 0)),
    ]

    return pl.pallas_call(
        kernel,
        out_shape=jax.ShapeDtypeStruct((N, H, Wp, F), ACT_DTYPE),
        grid=(N, n_tiles),
        in_specs=in_specs,
        out_specs=pl.BlockSpec((1, Ht, Wp, F), lambda n, i: (n, i, 0, 0)),
        scratch_shapes=[
            pltpu.VMEM((Ht + 4, Wp, F), MXU_DTYPE),          # padded input tile
            pltpu.VMEM(((Ht + 2) * W, 9 * F), MXU_DTYPE),    # conv1 im2row
            pltpu.VMEM((Ht + 2, Wp, F), MXU_DTYPE),          # padded intermediate
            pltpu.VMEM((Ht * W, 9 * F), MXU_DTYPE),          # conv2 im2row
        ],
        compiler_params=pltpu.CompilerParams(
            dimension_semantics=("parallel", "parallel"),
            vmem_limit_bytes=_VMEM_LIMIT),
    )(h, h, h, h, h, w1f, b1r, w2f, b2r)


# ----------------------------------------------------------------------------
# JAX glue
# ----------------------------------------------------------------------------
def pixel_shuffle_nhwc(x, r):
    """PyTorch nn.PixelShuffle semantics, NHWC layout."""
    N, H, W, C = x.shape
    c = C // (r * r)
    x = x.reshape(N, H, W, c, r, r)
    x = jnp.transpose(x, (0, 1, 4, 2, 5, 3))
    return x.reshape(N, H * r, W * r, c)


def _pad_w(x):
    return jnp.pad(x, ((0, 0), (0, 0), (1, 1), (0, 0)))


def _upscale_factor(w):
    return int(math.isqrt(w.shape[-1] // w.shape[-2]))


# ----------------------------------------------------------------------------
# Parameters (deterministic random init; weights (3,3,cin,cout), bias (1,cout))
# ----------------------------------------------------------------------------
def init_coeff_edsr_params(key, num_in_ch, num_out_ch, num_feat, num_block,
                           upscale, scale=0.05):
    def conv_init(k, cin, cout):
        kw, kb = jax.random.split(k)
        return (jax.random.normal(kw, (3, 3, cin, cout), jnp.float32) * scale,
                jax.random.normal(kb, (1, cout), jnp.float32) * scale)

    if upscale == 1:
        up_stages = []
    elif upscale == 3:
        up_stages = [(9, 3)]
    elif upscale > 1 and (upscale & (upscale - 1)) == 0:
        up_stages = [(4, 2)] * int(math.log2(upscale))
    else:
        raise ValueError("upscale must be 1, 2^n or 3")

    keys = iter(jax.random.split(key, 3 + 2 * num_block + len(up_stages)))
    params = {"conv_first": conv_init(next(keys), num_in_ch, num_feat)}
    body = []
    for _ in range(num_block):
        w1, b1 = conv_init(next(keys), num_feat, num_feat)
        w2, b2 = conv_init(next(keys), num_feat, num_feat)
        body.append((w1, b1, w2, b2))
    params["body"] = body
    params["conv_after_body"] = conv_init(next(keys), num_feat, num_feat)
    params["upsample"] = [conv_init(next(keys), num_feat, mult * num_feat)
                          for mult, _ in up_stages]
    params["conv_last"] = conv_init(next(keys), num_feat, num_out_ch)
    return params


# ----------------------------------------------------------------------------
# Forward (NCHW interface, mean=None path of the PyTorch module)
# ----------------------------------------------------------------------------
def coeff_edsr_forward(x_nchw, params, in_range=1.0, out_range=1.0,
                       res_scale=1.0, h_tile=None):
    x = jnp.transpose(x_nchw, (0, 2, 3, 1)).astype(jnp.float32)   # -> NHWC
    x = _pad_w(x)   # only host-side pad: activations stay W-padded end to end

    # (x - 0) * in_range folded into conv_first's weights.
    w0, b0 = params["conv_first"]
    feat = conv3x3(x, w0 * jnp.float32(in_range), b0, h_tile=h_tile)

    h = feat
    for (w1, b1, w2, b2) in params["body"]:
        h = residual_block(h, w1, b1, w2, b2, res_scale=res_scale, h_tile=h_tile)

    # conv_after_body with the long skip fused into its epilogue.
    res = conv3x3(h, *params["conv_after_body"], skip=feat, h_tile=h_tile)

    u = res
    for (wu, bu) in params["upsample"]:
        r = _upscale_factor(wu)
        u = conv3x3(u, wu, bu, h_tile=h_tile)
        # TODO(synk): pixel-shuffle could be fused into the conv's output store.
        u = pixel_shuffle_nhwc(u[:, :, 1:-1, :], r)
        u = _pad_w(u)

    # conv_last / out_range (+ zero output_mean) folded into its weights/bias.
    wl, bl = params["conv_last"]
    s = jnp.float32(1.0 / out_range)
    out = conv3x3(u, wl * s, bl * s, h_tile=h_tile)
    out = out[:, :, 1:-1, :]
    return jnp.transpose(out, (0, 3, 1, 2))                        # -> NCHW


# ----------------------------------------------------------------------------
# Pure-JAX reference (for correctness verification)
# ----------------------------------------------------------------------------
def _conv3x3_ref(x, w, b, relu=False):
    out = jax.lax.conv_general_dilated(
        x, w, window_strides=(1, 1), padding="SAME",
        dimension_numbers=("NHWC", "HWIO", "NHWC"),
        precision=jax.lax.Precision.HIGHEST)
    out = out + b.reshape(1, 1, 1, -1)
    return jnp.maximum(out, 0.0) if relu else out


def coeff_edsr_reference(x_nchw, params, in_range=1.0, out_range=1.0,
                         res_scale=1.0):
    x = jnp.transpose(x_nchw, (0, 2, 3, 1)).astype(jnp.float32) * in_range
    feat = _conv3x3_ref(x, *params["conv_first"])
    h = feat
    for (w1, b1, w2, b2) in params["body"]:
        t = _conv3x3_ref(h, w1, b1, relu=True)
        t = _conv3x3_ref(t, w2, b2)
        h = h + res_scale * t
    res = _conv3x3_ref(h, *params["conv_after_body"]) + feat
    u = res
    for (wu, bu) in params["upsample"]:
        u = pixel_shuffle_nhwc(_conv3x3_ref(u, wu, bu), _upscale_factor(wu))
    out = _conv3x3_ref(u, *params["conv_last"]) / out_range
    return jnp.transpose(out, (0, 3, 1, 2))


# ----------------------------------------------------------------------------
# Demo
# ----------------------------------------------------------------------------
if __name__ == "__main__":
    num_in_ch, num_out_ch = 3, 3
    num_feat, num_block, upscale = 32, 2, 2
    N, H, W = 2, 16, 16

    key = jax.random.PRNGKey(0)
    k_params, k_input = jax.random.split(key)
    params = init_coeff_edsr_params(k_params, num_in_ch, num_out_ch,
                                    num_feat, num_block, upscale)
    x = jax.random.normal(k_input, (N, num_in_ch, H, W), jnp.float32)

    # h_tile=4 exercises the multi-tile halo path; h_tile=None auto-sizes the
    # spatial tile from the device's VMEM capacity.
    fwd = jax.jit(lambda xx, pp: coeff_edsr_forward(xx, pp, h_tile=4))
    y = jax.block_until_ready(fwd(x, params))

    expected_shape = (N, num_out_ch, H * upscale, W * upscale)
    assert y.shape == expected_shape, (y.shape, expected_shape)
    assert y.dtype == jnp.float32

    y_ref = jax.block_until_ready(coeff_edsr_reference(x, params))
    err = float(jnp.max(jnp.abs(y - y_ref)))
    assert err < 5e-2, f"max abs error vs reference too large: {err}"

    print("KERNEL_OK")
</pallas_src>

<mosaic_0001>
module attributes {stable_mosaic.version = 11 : i64} {
  func.func @kernel(%arg0: i32, %arg1: i32, %arg2: memref<1x1x18x3xf32, #tpu.memory_space<vmem>>, %arg3: memref<1x4x18x3xf32, #tpu.memory_space<vmem>>, %arg4: memref<1x1x18x3xf32, #tpu.memory_space<vmem>>, %arg5: memref<27x32xbf16, #tpu.memory_space<vmem>>, %arg6: memref<1x32xf32, #tpu.memory_space<vmem>>, %arg7: memref<1x4x18x32xf32, #tpu.memory_space<vmem>>, %arg8: memref<6x18x3xbf16, #tpu.memory_space<vmem>>, %arg9: memref<64x27xbf16, #tpu.memory_space<vmem>>) attributes {dimension_semantics = [#tpu.dimension_semantics<parallel>, #tpu.dimension_semantics<parallel>], iteration_bounds = array<i64: 2, 4>, scalar_prefetch = 0 : i64, scratch_operands = 2 : i64, tpu.core_type = #tpu.core_type<tc>, window_params = [{transform_indices = @transform_0, window_bounds = array<i64: 1, 1, 18, 3>}, {transform_indices = @transform_1, window_bounds = array<i64: 1, 4, 18, 3>}, {transform_indices = @transform_2, window_bounds = array<i64: 1, 1, 18, 3>}, {pipeline_mode = #tpu.pipeline_mode<synchronous>, transform_indices = @transform_3, window_bounds = array<i64: 27, 32>}, {pipeline_mode = #tpu.pipeline_mode<synchronous>, transform_indices = @transform_4, window_bounds = array<i64: 1, 32>}, {transform_indices = @transform_5, window_bounds = array<i64: 1, 4, 18, 32>}]} {
    %c0 = arith.constant 0 : index
    %c0_0 = arith.constant 0 : index
    %c0_1 = arith.constant 0 : index
    %c0_2 = arith.constant 0 : index
    %0 = vector.load %arg2[%c0, %c0_0, %c0_1, %c0_2] : memref<1x1x18x3xf32, #tpu.memory_space<vmem>>, vector<1x1x18x3xf32>
    %1 = vector.shape_cast %0 : vector<1x1x18x3xf32> to vector<1x18x3xf32>
    %2 = arith.truncf %1 : vector<1x18x3xf32> to vector<1x18x3xbf16>
    %c0_3 = arith.constant 0 : index
    %c0_4 = arith.constant 0 : index
    %c0_5 = arith.constant 0 : index
    %c0_6 = arith.constant 0 : index
    %3 = vector.load %arg4[%c0_3, %c0_4, %c0_5, %c0_6] : memref<1x1x18x3xf32, #tpu.memory_space<vmem>>, vector<1x1x18x3xf32>
    %4 = vector.shape_cast %3 : vector<1x1x18x3xf32> to vector<1x18x3xf32>
    %5 = arith.truncf %4 : vector<1x18x3xf32> to vector<1x18x3xbf16>
    %c0_i32 = arith.constant 0 : i32
    %6 = arith.cmpi eq, %arg1, %c0_i32 : i32
    %cst = arith.constant 0.000000e+00 : bf16
    %7 = vector.broadcast %cst : bf16 to vector<1x18x3xbf16>
    %8 = arith.select %6, %7, %2 : vector<1x18x3xbf16>
    %c0_7 = arith.constant 0 : index
    %c0_8 = arith.constant 0 : index
    %c0_9 = arith.constant 0 : index
    %9 = vector.load %arg8[%c0_7, %c0_8, %c0_9] : memref<6x18x3xbf16, #tpu.memory_space<vmem>>, vector<1x18x3xbf16>
    tpu.vector_store %arg8[%c0_7, %c0_8, %c0_9], %8 {strides = array<i32>} : memref<6x18x3xbf16, #tpu.memory_space<vmem>>, vector<1x18x3xbf16>,
    %c0_10 = arith.constant 0 : index
    %c0_11 = arith.constant 0 : index
    %c0_12 = arith.constant 0 : index
    %c0_13 = arith.constant 0 : index
    %10 = vector.load %arg3[%c0_10, %c0_11, %c0_12, %c0_13] : memref<1x4x18x3xf32, #tpu.memory_space<vmem>>, vector<1x4x18x3xf32>
    %11 = vector.shape_cast %10 : vector<1x4x18x3xf32> to vector<4x18x3xf32>
    %12 = arith.truncf %11 : vector<4x18x3xf32> to vector<4x18x3xbf16>
    %c1 = arith.constant 1 : index
    %c0_14 = arith.constant 0 : index
    %c0_15 = arith.constant 0 : index
    %13 = vector.load %arg8[%c1, %c0_14, %c0_15] : memref<6x18x3xbf16, #tpu.memory_space<vmem>>, vector<4x18x3xbf16>
    tpu.vector_store %arg8[%c1, %c0_14, %c0_15], %12 {strides = array<i32>} : memref<6x18x3xbf16, #tpu.memory_space<vmem>>, vector<4x18x3xbf16>,
    %c3_i32 = arith.constant 3 : i32
    %14 = arith.cmpi eq, %arg1, %c3_i32 : i32
    %cst_16 = arith.constant 0.000000e+00 : bf16
    %15 = vector.broadcast %cst_16 : bf16 to vector<1x18x3xbf16>
    %16 = arith.select %14, %15, %5 : vector<1x18x3xbf16>
    %c5 = arith.constant 5 : index
    %c0_17 = arith.constant 0 : index
    %c0_18 = arith.constant 0 : index
    %17 = vector.load %arg8[%c5, %c0_17, %c0_18] : memref<6x18x3xbf16, #tpu.memory_space<vmem>>, vector<1x18x3xbf16>
    tpu.vector_store %arg8[%c5, %c0_17, %c0_18], %16 {strides = array<i32>} : memref<6x18x3xbf16, #tpu.memory_space<vmem>>, vector<1x18x3xbf16>,
    %c0_19 = arith.constant 0 : index
    %c0_20 = arith.constant 0 : index
    %c0_21 = arith.constant 0 : index
    %18 = vector.load %arg8[%c0_19, %c0_20, %c0_21] : memref<6x18x3xbf16, #tpu.memory_space<vmem>>, vector<6x16x3xbf16>
    %19 = vector.shape_cast %18 : vector<6x16x3xbf16> to vector<96x3xbf16>
    %20 = vector.extract_strided_slice %19 {offsets = [0, 0], sizes = [64, 3], strides = [1, 1]} : vector<96x3xbf16> to vector<64x3xbf16>
    %c0_22 = arith.constant 0 : index
    %c0_23 = arith.constant 0 : index
    %21 = vector.load %arg9[%c0_22, %c0_23] : memref<64x27xbf16, #tpu.memory_space<vmem>>, vector<64x3xbf16>
    tpu.vector_store %arg9[%c0_22, %c0_23], %20 {strides = array<i32>} : memref<64x27xbf16, #tpu.memory_space<vmem>>, vector<64x3xbf16>,
    %22 = vector.extract_strided_slice %19 {offsets = [16, 0], sizes = [64, 3], strides = [1, 1]} : vector<96x3xbf16> to vector<64x3xbf16>
    %c0_24 = arith.constant 0 : index
    %c3 = arith.constant 3 : index
    %23 = vector.load %arg9[%c0_24, %c3] : memref<64x27xbf16, #tpu.memory_space<vmem>>, vector<64x3xbf16>
    tpu.vector_store %arg9[%c0_24, %c3], %22 {strides = array<i32>} : memref<64x27xbf16, #tpu.memory_space<vmem>>, vector<64x3xbf16>,
    %24 = vector.extract_strided_slice %19 {offsets = [32, 0], sizes = [64, 3], strides = [1, 1]} : vector<96x3xbf16> to vector<64x3xbf16>
    %c0_25 = arith.constant 0 : index
    %c6 = arith.constant 6 : index
    %25 = vector.load %arg9[%c0_25, %c6] : memref<64x27xbf16, #tpu.memory_space<vmem>>, vector<64x3xbf16>
    tpu.vector_store %arg9[%c0_25, %c6], %24 {strides = array<i32>} : memref<64x27xbf16, #tpu.memory_space<vmem>>, vector<64x3xbf16>,
    %c0_26 = arith.constant 0 : index
    %c1_27 = arith.constant 1 : index
    %c0_28 = arith.constant 0 : index
    %26 = vector.load %arg8[%c0_26, %c1_27, %c0_28] : memref<6x18x3xbf16, #tpu.memory_space<vmem>>, vector<6x16x3xbf16>
    %27 = vector.shape_cast %26 : vector<6x16x3xbf16> to vector<96x3xbf16>
    %28 = vector.extract_strided_slice %27 {offsets = [0, 0], sizes = [64, 3], strides = [1, 1]} : vector<96x3xbf16> to vector<64x3xbf16>
    %c0_29 = arith.constant 0 : index
    %c9 = arith.constant 9 : index
    %29 = vector.load %arg9[%c0_29, %c9] : memref<64x27xbf16, #tpu.memory_space<vmem>>, vector<64x3xbf16>
    tpu.vector_store %arg9[%c0_29, %c9], %28 {strides = array<i32>} : memref<64x27xbf16, #tpu.memory_space<vmem>>, vector<64x3xbf16>,
    %30 = vector.extract_strided_slice %27 {offsets = [16, 0], sizes = [64, 3], strides = [1, 1]} : vector<96x3xbf16> to vector<64x3xbf16>
    %c0_30 = arith.constant 0 : index
    %c12 = arith.constant 12 : index
    %31 = vector.load %arg9[%c0_30, %c12] : memref<64x27xbf16, #tpu.memory_space<vmem>>, vector<64x3xbf16>
    tpu.vector_store %arg9[%c0_30, %c12], %30 {strides = array<i32>} : memref<64x27xbf16, #tpu.memory_space<vmem>>, vector<64x3xbf16>,
    %32 = vector.extract_strided_slice %27 {offsets = [32, 0], sizes = [64, 3], strides = [1, 1]} : vector<96x3xbf16> to vector<64x3xbf16>
    %c0_31 = arith.constant 0 : index
    %c15 = arith.constant 15 : index
    %33 = vector.load %arg9[%c0_31, %c15] : memref<64x27xbf16, #tpu.memory_space<vmem>>, vector<64x3xbf16>
    tpu.vector_store %arg9[%c0_31, %c15], %32 {strides = array<i32>} : memref<64x27xbf16, #tpu.memory_space<vmem>>, vector<64x3xbf16>,
    %c0_32 = arith.constant 0 : index
    %c2 = arith.constant 2 : index
    %c0_33 = arith.constant 0 : index
    %34 = vector.load %arg8[%c0_32, %c2, %c0_33] : memref<6x18x3xbf16, #tpu.memory_space<vmem>>, vector<6x16x3xbf16>
    %35 = vector.shape_cast %34 : vector<6x16x3xbf16> to vector<96x3xbf16>
    %36 = vector.extract_strided_slice %35 {offsets = [0, 0], sizes = [64, 3], strides = [1, 1]} : vector<96x3xbf16> to vector<64x3xbf16>
    %c0_34 = arith.constant 0 : index
    %c18 = arith.constant 18 : index
    %37 = vector.load %arg9[%c0_34, %c18] : memref<64x27xbf16, #tpu.memory_space<vmem>>, vector<64x3xbf16>
    tpu.vector_store %arg9[%c0_34, %c18], %36 {strides = array<i32>} : memref<64x27xbf16, #tpu.memory_space<vmem>>, vector<64x3xbf16>,
    %38 = vector.extract_strided_slice %35 {offsets = [16, 0], sizes = [64, 3], strides = [1, 1]} : vector<96x3xbf16> to vector<64x3xbf16>
    %c0_35 = arith.constant 0 : index
    %c21 = arith.constant 21 : index
    %39 = vector.load %arg9[%c0_35, %c21] : memref<64x27xbf16, #tpu.memory_space<vmem>>, vector<64x3xbf16>
    tpu.vector_store %arg9[%c0_35, %c21], %38 {strides = array<i32>} : memref<64x27xbf16, #tpu.memory_space<vmem>>, vector<64x3xbf16>,
    %40 = vector.extract_strided_slice %35 {offsets = [32, 0], sizes = [64, 3], strides = [1, 1]} : vector<96x3xbf16> to vector<64x3xbf16>
    %c0_36 = arith.constant 0 : index
    %c24 = arith.constant 24 : index
    %41 = vector.load %arg9[%c0_36, %c24] : memref<64x27xbf16, #tpu.memory_space<vmem>>, vector<64x3xbf16>
    tpu.vector_store %arg9[%c0_36, %c24], %40 {strides = array<i32>} : memref<64x27xbf16, #tpu.memory_space<vmem>>, vector<64x3xbf16>,
    %c0_37 = arith.constant 0 : index
    %c0_38 = arith.constant 0 : index
    %42 = vector.load %arg9[%c0_37, %c0_38] : memref<64x27xbf16, #tpu.memory_space<vmem>>, vector<64x27xbf16>
    %c0_39 = arith.constant 0 : index
    %c0_40 = arith.constant 0 : index
    %43 = vector.load %arg5[%c0_39, %c0_40] : memref<27x32xbf16, #tpu.memory_space<vmem>>, vector<27x32xbf16>
    %cst_41 = arith.constant dense<0.000000e+00> : vector<64x32xf32>
    %44 = tpu.matmul %42, %43, %cst_41 {dimension_numbers = #tpu.dot_dimension_numbers<[1], [0], [0], [1], [0, 0, 1, 1], [], []>} : vector<64x27xbf16>, vector<27x32xbf16>, vector<64x32xf32> -> vector<64x32xf32>
    %c0_42 = arith.constant 0 : index
    %c0_43 = arith.constant 0 : index
    %45 = vector.load %arg6[%c0_42, %c0_43] : memref<1x32xf32, #tpu.memory_space<vmem>>, vector<1x32xf32>
    %46 = vector.broadcast %45 : vector<1x32xf32> to vector<64x32xf32>
    %47 = arith.addf %44, %46 : vector<64x32xf32>
    %48 = vector.shape_cast %47 : vector<64x32xf32> to vector<4x16x32xf32>
    %c0_44 = arith.constant 0 : index
    %c0_45 = arith.constant 0 : index
    %c1_46 = arith.constant 1 : index
    %c0_47 = arith.constant 0 : index
    %49 = vector.load %arg7[%c0_44, %c0_45, %c1_46, %c0_47] : memref<1x4x18x32xf32, #tpu.memory_space<vmem>>, vector<1x4x16x32xf32>
    %50 = vector.shape_cast %49 : vector<1x4x16x32xf32> to vector<4x16x32xf32>
    %51 = vector.shape_cast %48 : vector<4x16x32xf32> to vector<1x4x16x32xf32>
    tpu.vector_store %arg7[%c0_44, %c0_45, %c1_46, %c0_47], %51 {strides = array<i32>} : memref<1x4x18x32xf32, #tpu.memory_space<vmem>>, vector<1x4x16x32xf32>,
    %cst_48 = arith.constant 0.000000e+00 : f32
    %52 = vector.broadcast %cst_48 : f32 to vector<4x1x32xf32>
    %c0_49 = arith.constant 0 : index
    %c0_50 = arith.constant 0 : index
    %c0_51 = arith.constant 0 : index
    %c0_52 = arith.constant 0 : index
    %53 = vector.load %arg7[%c0_49, %c0_50, %c0_51, %c0_52] : memref<1x4x18x32xf32, #tpu.memory_space<vmem>>, vector<1x4x1x32xf32>
    %54 = vector.shape_cast %53 : vector<1x4x1x32xf32> to vector<4x1x32xf32>
    %55 = vector.shape_cast %52 : vector<4x1x32xf32> to vector<1x4x1x32xf32>
    tpu.vector_store %arg7[%c0_49, %c0_50, %c0_51, %c0_52], %55 {strides = array<i32>} : memref<1x4x18x32xf32, #tpu.memory_space<vmem>>, vector<1x4x1x32xf32>,
    %c0_53 = arith.constant 0 : index
    %c0_54 = arith.constant 0 : index
    %c17 = arith.constant 17 : index
    %c0_55 = arith.constant 0 : index
    %56 = vector.load %arg7[%c0_53, %c0_54, %c17, %c0_55] : memref<1x4x18x32xf32, #tpu.memory_space<vmem>>, vector<1x4x1x32xf32>
    %57 = vector.shape_cast %56 : vector<1x4x1x32xf32> to vector<4x1x32xf32>
    %58 = vector.shape_cast %52 : vector<4x1x32xf32> to vector<1x4x1x32xf32>
    tpu.vector_store %arg7[%c0_53, %c0_54, %c17, %c0_55], %58 {strides = array<i32>} : memref<1x4x18x32xf32, #tpu.memory_space<vmem>>, vector<1x4x1x32xf32>,
    return
  }
  func.func @transform_0(%arg0: i32, %arg1: i32) -> (i32, i32, i32, i32) {
    %c4_i32 = arith.constant 4 : i32
    %0 = arith.muli %arg1, %c4_i32 : i32
    %c1_i32 = arith.constant 1 : i32
    %1 = arith.subi %0, %c1_i32 : i32
    %c0_i32 = arith.constant 0 : i32
    %2 = arith.maxsi %1, %c0_i32 : i32
    %c0_i32_0 = arith.constant 0 : i32
    %c0_i32_1 = arith.constant 0 : i32
    %c0_i32_2 = arith.constant 0 : i32
    return %arg0, %2, %c0_i32_0, %c0_i32_1 : i32, i32, i32, i32
  }
  func.func @transform_1(%arg0: i32, %arg1: i32) -> (i32, i32, i32, i32) {
    %c0_i32 = arith.constant 0 : i32
    %c0_i32_0 = arith.constant 0 : i32
    %c0_i32_1 = arith.constant 0 : i32
    return %arg0, %arg1, %c0_i32, %c0_i32_0 : i32, i32, i32, i32
  }
  func.func @transform_2(%arg0: i32, %arg1: i32) -> (i32, i32, i32, i32) {
    %c4_i32 = arith.constant 4 : i32
    %0 = arith.muli %arg1, %c4_i32 : i32
    %c4_i32_0 = arith.constant 4 : i32
    %1 = arith.addi %0, %c4_i32_0 : i32
    %c15_i32 = arith.constant 15 : i32
    %2 = arith.minsi %1, %c15_i32 : i32
    %c0_i32 = arith.constant 0 : i32
    %c0_i32_1 = arith.constant 0 : i32
    %c0_i32_2 = arith.constant 0 : i32
    return %arg0, %2, %c0_i32, %c0_i32_1 : i32, i32, i32, i32
  }
  func.func @transform_3(%arg0: i32, %arg1: i32) -> (i32, i32) {
    %c0_i32 = arith.constant 0 : i32
    %c0_i32_0 = arith.constant 0 : i32
    %c0_i32_1 = arith.constant 0 : i32
    return %c0_i32, %c0_i32_0 : i32, i32
  }
  func.func @transform_4(%arg0: i32, %arg1: i32) -> (i32, i32) {
    %c0_i32 = arith.constant 0 : i32
    %c0_i32_0 = arith.constant 0 : i32
    %c0_i32_1 = arith.constant 0 : i32
    return %c0_i32, %c0_i32_0 : i32, i32
  }
  func.func @transform_5(%arg0: i32, %arg1: i32) -> (i32, i32, i32, i32) {
    %c0_i32 = arith.constant 0 : i32
    %c0_i32_0 = arith.constant 0 : i32
    %c0_i32_1 = arith.constant 0 : i32
    return %arg0, %arg1, %c0_i32, %c0_i32_0 : i32, i32, i32, i32
  }
}

module attributes {stable_mosaic.version = 11 : i64} {
  func.func @kernel(%arg0: i32, %arg1: i32, %arg2: memref<1x1x18x32xf32, #tpu.memory_space<vmem>>, %arg3: memref<1x4x18x32xf32, #tpu.memory_space<vmem>>, %arg4: memref<1x1x18x32xf32, #tpu.memory_space<vmem>>, %arg5: memref<288x32xbf16, #tpu.memory_space<vmem>>, %arg6: memref<1x32xf32, #tpu.memory_space<vmem>>, %arg7: memref<1x4x18x32xf32, #tpu.memory_space<vmem>>, %arg8: memref<1x4x18x32xf32, #tpu.memory_space<vmem>>, %arg9: memref<6x18x32xbf16, #tpu.memory_space<vmem>>, %arg10: memref<64x288xbf16, #tpu.memory_space<vmem>>) attributes {dimension_semantics = [#tpu.dimension_semantics<parallel>, #tpu.dimension_semantics<parallel>], iteration_bounds = array<i64: 2, 4>, scalar_prefetch = 0 : i64, scratch_operands = 2 : i64, tpu.core_type = #tpu.core_type<tc>, window_params = [{transform_indices = @transform_0, window_bounds = array<i64: 1, 1, 18, 32>}, {transform_indices = @transform_1, window_bounds = array<i64: 1, 4, 18, 32>}, {transform_indices = @transform_2, window_bounds = array<i64: 1, 1, 18, 32>}, {pipeline_mode = #tpu.pipeline_mode<synchronous>, transform_indices = @transform_3, window_bounds = array<i64: 288, 32>}, {pipeline_mode = #tpu.pipeline_mode<synchronous>, transform_indices = @transform_4, window_bounds = array<i64: 1, 32>}, {transform_indices = @transform_5, window_bounds = array<i64: 1, 4, 18, 32>}, {transform_indices = @transform_6, window_bounds = array<i64: 1, 4, 18, 32>}]} {
    %c0 = arith.constant 0 : index
    %c0_0 = arith.constant 0 : index
    %c0_1 = arith.constant 0 : index
    %c0_2 = arith.constant 0 : index
    %0 = vector.load %arg2[%c0, %c0_0, %c0_1, %c0_2] : memref<1x1x18x32xf32, #tpu.memory_space<vmem>>, vector<1x1x18x32xf32>
    %1 = vector.shape_cast %0 : vector<1x1x18x32xf32> to vector<1x18x32xf32>
    %2 = arith.truncf %1 : vector<1x18x32xf32> to vector<1x18x32xbf16>
    %c0_3 = arith.constant 0 : index
    %c0_4 = arith.constant 0 : index
    %c0_5 = arith.constant 0 : index
    %c0_6 = arith.constant 0 : index
    %3 = vector.load %arg4[%c0_3, %c0_4, %c0_5, %c0_6] : memref<1x1x18x32xf32, #tpu.memory_space<vmem>>, vector<1x1x18x32xf32>
    %4 = vector.shape_cast %3 : vector<1x1x18x32xf32> to vector<1x18x32xf32>
    %5 = arith.truncf %4 : vector<1x18x32xf32> to vector<1x18x32xbf16>
    %c0_i32 = arith.constant 0 : i32
    %6 = arith.cmpi eq, %arg1, %c0_i32 : i32
    %cst = arith.constant 0.000000e+00 : bf16
    %7 = vector.broadcast %cst : bf16 to vector<1x18x32xbf16>
    %8 = arith.select %6, %7, %2 : vector<1x18x32xbf16>
    %c0_7 = arith.constant 0 : index
    %c0_8 = arith.constant 0 : index
    %c0_9 = arith.constant 0 : index
    %9 = vector.load %arg9[%c0_7, %c0_8, %c0_9] : memref<6x18x32xbf16, #tpu.memory_space<vmem>>, vector<1x18x32xbf16>
    tpu.vector_store %arg9[%c0_7, %c0_8, %c0_9], %8 {strides = array<i32>} : memref<6x18x32xbf16, #tpu.memory_space<vmem>>, vector<1x18x32xbf16>,
    %c0_10 = arith.constant 0 : index
    %c0_11 = arith.constant 0 : index
    %c0_12 = arith.constant 0 : index
    %c0_13 = arith.constant 0 : index
    %10 = vector.load %arg3[%c0_10, %c0_11, %c0_12, %c0_13] : memref<1x4x18x32xf32, #tpu.memory_space<vmem>>, vector<1x4x18x32xf32>
    %11 = vector.shape_cast %10 : vector<1x4x18x32xf32> to vector<4x18x32xf32>
    %12 = arith.truncf %11 : vector<4x18x32xf32> to vector<4x18x32xbf16>
    %c1 = arith.constant 1 : index
    %c0_14 = arith.constant 0 : index
    %c0_15 = arith.constant 0 : index
    %13 = vector.load %arg9[%c1, %c0_14, %c0_15] : memref<6x18x32xbf16, #tpu.memory_space<vmem>>, vector<4x18x32xbf16>
    tpu.vector_store %arg9[%c1, %c0_14, %c0_15], %12 {strides = array<i32>} : memref<6x18x32xbf16, #tpu.memory_space<vmem>>, vector<4x18x32xbf16>,
    %c3_i32 = arith.constant 3 : i32
    %14 = arith.cmpi eq, %arg1, %c3_i32 : i32
    %cst_16 = arith.constant 0.000000e+00 : bf16
    %15 = vector.broadcast %cst_16 : bf16 to vector<1x18x32xbf16>
    %16 = arith.select %14, %15, %5 : vector<1x18x32xbf16>
    %c5 = arith.constant 5 : index
    %c0_17 = arith.constant 0 : index
    %c0_18 = arith.constant 0 : index
    %17 = vector.load %arg9[%c5, %c0_17, %c0_18] : memref<6x18x32xbf16, #tpu.memory_space<vmem>>, vector<1x18x32xbf16>
    tpu.vector_store %arg9[%c5, %c0_17, %c0_18], %16 {strides = array<i32>} : memref<6x18x32xbf16, #tpu.memory_space<vmem>>, vector<1x18x32xbf16>,
    %c0_19 = arith.constant 0 : index
    %c0_20 = arith.constant 0 : index
    %c0_21 = arith.constant 0 : index
    %18 = vector.load %arg9[%c0_19, %c0_20, %c0_21] : memref<6x18x32xbf16, #tpu.memory_space<vmem>>, vector<6x16x32xbf16>
    %19 = vector.shape_cast %18 : vector<6x16x32xbf16> to vector<96x32xbf16>
    %20 = vector.extract_strided_slice %19 {offsets = [0, 0], sizes = [64, 32], strides = [1, 1]} : vector<96x32xbf16> to vector<64x32xbf16>
    %c0_22 = arith.constant 0 : index
    %c0_23 = arith.constant 0 : index
    %21 = vector.load %arg10[%c0_22, %c0_23] : memref<64x288xbf16, #tpu.memory_space<vmem>>, vector<64x32xbf16>
    tpu.vector_store %arg10[%c0_22, %c0_23], %20 {strides = array<i32>} : memref<64x288xbf16, #tpu.memory_space<vmem>>, vector<64x32xbf16>,
    %22 = vector.extract_strided_slice %19 {offsets = [16, 0], sizes = [64, 32], strides = [1, 1]} : vector<96x32xbf16> to vector<64x32xbf16>
    %c0_24 = arith.constant 0 : index
    %c32 = arith.constant 32 : index
    %23 = vector.load %arg10[%c0_24, %c32] : memref<64x288xbf16, #tpu.memory_space<vmem>>, vector<64x32xbf16>
    tpu.vector_store %arg10[%c0_24, %c32], %22 {strides = array<i32>} : memref<64x288xbf16, #tpu.memory_space<vmem>>, vector<64x32xbf16>,
    %24 = vector.extract_strided_slice %19 {offsets = [32, 0], sizes = [64, 32], strides = [1, 1]} : vector<96x32xbf16> to vector<64x32xbf16>
    %c0_25 = arith.constant 0 : index
    %c64 = arith.constant 64 : index
    %25 = vector.load %arg10[%c0_25, %c64] : memref<64x288xbf16, #tpu.memory_space<vmem>>, vector<64x32xbf16>
    tpu.vector_store %arg10[%c0_25, %c64], %24 {strides = array<i32>} : memref<64x288xbf16, #tpu.memory_space<vmem>>, vector<64x32xbf16>,
    %c0_26 = arith.constant 0 : index
    %c1_27 = arith.constant 1 : index
    %c0_28 = arith.constant 0 : index
    %26 = vector.load %arg9[%c0_26, %c1_27, %c0_28] : memref<6x18x32xbf16, #tpu.memory_space<vmem>>, vector<6x16x32xbf16>
    %27 = vector.shape_cast %26 : vector<6x16x32xbf16> to vector<96x32xbf16>
    %28 = vector.extract_strided_slice %27 {offsets = [0, 0], sizes = [64, 32], strides = [1, 1]} : vector<96x32xbf16> to vector<64x32xbf16>
    %c0_29 = arith.constant 0 : index
    %c96 = arith.constant 96 : index
    %29 = vector.load %arg10[%c0_29, %c96] : memref<64x288xbf16, #tpu.memory_space<vmem>>, vector<64x32xbf16>
    tpu.vector_store %arg10[%c0_29, %c96], %28 {strides = array<i32>} : memref<64x288xbf16, #tpu.memory_space<vmem>>, vector<64x32xbf16>,
    %30 = vector.extract_strided_slice %27 {offsets = [16, 0], sizes = [64, 32], strides = [1, 1]} : vector<96x32xbf16> to vector<64x32xbf16>
    %c0_30 = arith.constant 0 : index
    %c128 = arith.constant 128 : index
    %31 = vector.load %arg10[%c0_30, %c128] : memref<64x288xbf16, #tpu.memory_space<vmem>>, vector<64x32xbf16>
    tpu.vector_store %arg10[%c0_30, %c128], %30 {strides = array<i32>} : memref<64x288xbf16, #tpu.memory_space<vmem>>, vector<64x32xbf16>,
    %32 = vector.extract_strided_slice %27 {offsets = [32, 0], sizes = [64, 32], strides = [1, 1]} : vector<96x32xbf16> to vector<64x32xbf16>
    %c0_31 = arith.constant 0 : index
    %c160 = arith.constant 160 : index
    %33 = vector.load %arg10[%c0_31, %c160] : memref<64x288xbf16, #tpu.memory_space<vmem>>, vector<64x32xbf16>
    tpu.vector_store %arg10[%c0_31, %c160], %32 {strides = array<i32>} : memref<64x288xbf16, #tpu.memory_space<vmem>>, vector<64x32xbf16>,
    %c0_32 = arith.constant 0 : index
    %c2 = arith.constant 2 : index
    %c0_33 = arith.constant 0 : index
    %34 = vector.load %arg9[%c0_32, %c2, %c0_33] : memref<6x18x32xbf16, #tpu.memory_space<vmem>>, vector<6x16x32xbf16>
    %35 = vector.shape_cast %34 : vector<6x16x32xbf16> to vector<96x32xbf16>
    %36 = vector.extract_strided_slice %35 {offsets = [0, 0], sizes = [64, 32], strides = [1, 1]} : vector<96x32xbf16> to vector<64x32xbf16>
    %c0_34 = arith.constant 0 : index
    %c192 = arith.constant 192 : index
    %37 = vector.load %arg10[%c0_34, %c192] : memref<64x288xbf16, #tpu.memory_space<vmem>>, vector<64x32xbf16>
    tpu.vector_store %arg10[%c0_34, %c192], %36 {strides = array<i32>} : memref<64x288xbf16, #tpu.memory_space<vmem>>, vector<64x32xbf16>,
    %38 = vector.extract_strided_slice %35 {offsets = [16, 0], sizes = [64, 32], strides = [1, 1]} : vector<96x32xbf16> to vector<64x32xbf16>
    %c0_35 = arith.constant 0 : index
    %c224 = arith.constant 224 : index
    %39 = vector.load %arg10[%c0_35, %c224] : memref<64x288xbf16, #tpu.memory_space<vmem>>, vector<64x32xbf16>
    tpu.vector_store %arg10[%c0_35, %c224], %38 {strides = array<i32>} : memref<64x288xbf16, #tpu.memory_space<vmem>>, vector<64x32xbf16>,
    %40 = vector.extract_strided_slice %35 {offsets = [32, 0], sizes = [64, 32], strides = [1, 1]} : vector<96x32xbf16> to vector<64x32xbf16>
    %c0_36 = arith.constant 0 : index
    %c256 = arith.constant 256 : index
    %41 = vector.load %arg10[%c0_36, %c256] : memref<64x288xbf16, #tpu.memory_space<vmem>>, vector<64x32xbf16>
    tpu.vector_store %arg10[%c0_36, %c256], %40 {strides = array<i32>} : memref<64x288xbf16, #tpu.memory_space<vmem>>, vector<64x32xbf16>,
    %c0_37 = arith.constant 0 : index
    %c0_38 = arith.constant 0 : index
    %42 = vector.load %arg10[%c0_37, %c0_38] : memref<64x288xbf16, #tpu.memory_space<vmem>>, vector<64x288xbf16>
    %c0_39 = arith.constant 0 : index
    %c0_40 = arith.constant 0 : index
    %43 = vector.load %arg5[%c0_39, %c0_40] : memref<288x32xbf16, #tpu.memory_space<vmem>>, vector<288x32xbf16>
    %cst_41 = arith.constant dense<0.000000e+00> : vector<64x32xf32>
    %44 = tpu.matmul %42, %43, %cst_41 {dimension_numbers = #tpu.dot_dimension_numbers<[1], [0], [0], [1], [0, 0, 1, 1], [], []>} : vector<64x288xbf16>, vector<288x32xbf16>, vector<64x32xf32> -> vector<64x32xf32>
    %c0_42 = arith.constant 0 : index
    %c0_43 = arith.constant 0 : index
    %45 = vector.load %arg6[%c0_42, %c0_43] : memref<1x32xf32, #tpu.memory_space<vmem>>, vector<1x32xf32>
    %46 = vector.broadcast %45 : vector<1x32xf32> to vector<64x32xf32>
    %47 = arith.addf %44, %46 : vector<64x32xf32>
    %c0_44 = arith.constant 0 : index
    %c0_45 = arith.constant 0 : index
    %c1_46 = arith.constant 1 : index
    %c0_47 = arith.constant 0 : index
    %48 = vector.load %arg7[%c0_44, %c0_45, %c1_46, %c0_47] : memref<1x4x18x32xf32, #tpu.memory_space<vmem>>, vector<1x4x16x32xf32>
    %49 = vector.shape_cast %48 : vector<1x4x16x32xf32> to vector<4x16x32xf32>
    %50 = vector.shape_cast %49 : vector<4x16x32xf32> to vector<64x32xf32>
    %51 = arith.addf %47, %50 : vector<64x32xf32>
    %52 = vector.shape_cast %51 : vector<64x32xf32> to vector<4x16x32xf32>
    %c0_48 = arith.constant 0 : index
    %c0_49 = arith.constant 0 : index
    %c1_50 = arith.constant 1 : index
    %c0_51 = arith.constant 0 : index
    %53 = vector.load %arg8[%c0_48, %c0_49, %c1_50, %c0_51] : memref<1x4x18x32xf32, #tpu.memory_space<vmem>>, vector<1x4x16x32xf32>
    %54 = vector.shape_cast %53 : vector<1x4x16x32xf32> to vector<4x16x32xf32>
    %55 = vector.shape_cast %52 : vector<4x16x32xf32> to vector<1x4x16x32xf32>
    tpu.vector_store %arg8[%c0_48, %c0_49, %c1_50, %c0_51], %55 {strides = array<i32>} : memref<1x4x18x32xf32, #tpu.memory_space<vmem>>, vector<1x4x16x32xf32>,
    %cst_52 = arith.constant 0.000000e+00 : f32
    %56 = vector.broadcast %cst_52 : f32 to vector<4x1x32xf32>
    %c0_53 = arith.constant 0 : index
    %c0_54 = arith.constant 0 : index
    %c0_55 = arith.constant 0 : index
    %c0_56 = arith.constant 0 : index
    %57 = vector.load %arg8[%c0_53, %c0_54, %c0_55, %c0_56] : memref<1x4x18x32xf32, #tpu.memory_space<vmem>>, vector<1x4x1x32xf32>
    %58 = vector.shape_cast %57 : vector<1x4x1x32xf32> to vector<4x1x32xf32>
    %59 = vector.shape_cast %56 : vector<4x1x32xf32> to vector<1x4x1x32xf32>
    tpu.vector_store %arg8[%c0_53, %c0_54, %c0_55, %c0_56], %59 {strides = array<i32>} : memref<1x4x18x32xf32, #tpu.memory_space<vmem>>, vector<1x4x1x32xf32>,
    %c0_57 = arith.constant 0 : index
    %c0_58 = arith.constant 0 : index
    %c17 = arith.constant 17 : index
    %c0_59 = arith.constant 0 : index
    %60 = vector.load %arg8[%c0_57, %c0_58, %c17, %c0_59] : memref<1x4x18x32xf32, #tpu.memory_space<vmem>>, vector<1x4x1x32xf32>
    %61 = vector.shape_cast %60 : vector<1x4x1x32xf32> to vector<4x1x32xf32>
    %62 = vector.shape_cast %56 : vector<4x1x32xf32> to vector<1x4x1x32xf32>
    tpu.vector_store %arg8[%c0_57, %c0_58, %c17, %c0_59], %62 {strides = array<i32>} : memref<1x4x18x32xf32, #tpu.memory_space<vmem>>, vector<1x4x1x32xf32>,
    return
  }
  func.func @transform_0(%arg0: i32, %arg1: i32) -> (i32, i32, i32, i32) {
    %c4_i32 = arith.constant 4 : i32
    %0 = arith.muli %arg1, %c4_i32 : i32
    %c1_i32 = arith.constant 1 : i32
    %1 = arith.subi %0, %c1_i32 : i32
    %c0_i32 = arith.constant 0 : i32
    %2 = arith.maxsi %1, %c0_i32 : i32
    %c0_i32_0 = arith.constant 0 : i32
    %c0_i32_1 = arith.constant 0 : i32
    %c0_i32_2 = arith.constant 0 : i32
    return %arg0, %2, %c0_i32_0, %c0_i32_1 : i32, i32, i32, i32
  }
  func.func @transform_1(%arg0: i32, %arg1: i32) -> (i32, i32, i32, i32) {
    %c0_i32 = arith.constant 0 : i32
    %c0_i32_0 = arith.constant 0 : i32
    %c0_i32_1 = arith.constant 0 : i32
    return %arg0, %arg1, %c0_i32, %c0_i32_0 : i32, i32, i32, i32
  }
  func.func @transform_2(%arg0: i32, %arg1: i32) -> (i32, i32, i32, i32) {
    %c4_i32 = arith.constant 4 : i32
    %0 = arith.muli %arg1, %c4_i32 : i32
    %c4_i32_0 = arith.constant 4 : i32
    %1 = arith.addi %0, %c4_i32_0 : i32
    %c15_i32 = arith.constant 15 : i32
    %2 = arith.minsi %1, %c15_i32 : i32
    %c0_i32 = arith.constant 0 : i32
    %c0_i32_1 = arith.constant 0 : i32
    %c0_i32_2 = arith.constant 0 : i32
    return %arg0, %2, %c0_i32, %c0_i32_1 : i32, i32, i32, i32
  }
  func.func @transform_3(%arg0: i32, %arg1: i32) -> (i32, i32) {
    %c0_i32 = arith.constant 0 : i32
    %c0_i32_0 = arith.constant 0 : i32
    %c0_i32_1 = arith.constant 0 : i32
    return %c0_i32, %c0_i32_0 : i32, i32
  }
  func.func @transform_4(%arg0: i32, %arg1: i32) -> (i32, i32) {
    %c0_i32 = arith.constant 0 : i32
    %c0_i32_0 = arith.constant 0 : i32
    %c0_i32_1 = arith.constant 0 : i32
    return %c0_i32, %c0_i32_0 : i32, i32
  }
  func.func @transform_5(%arg0: i32, %arg1: i32) -> (i32, i32, i32, i32) {
    %c0_i32 = arith.constant 0 : i32
    %c0_i32_0 = arith.constant 0 : i32
    %c0_i32_1 = arith.constant 0 : i32
    return %arg0, %arg1, %c0_i32, %c0_i32_0 : i32, i32, i32, i32
  }
  func.func @transform_6(%arg0: i32, %arg1: i32) -> (i32, i32, i32, i32) {
    %c0_i32 = arith.constant 0 : i32
    %c0_i32_0 = arith.constant 0 : i32
    %c0_i32_1 = arith.constant 0 : i32
    return %arg0, %arg1, %c0_i32, %c0_i32_0 : i32, i32, i32, i32
  }
}

module attributes {stable_mosaic.version = 11 : i64} {
  func.func @kernel(%arg0: i32, %arg1: i32, %arg2: memref<1x1x18x32xf32, #tpu.memory_space<vmem>>, %arg3: memref<1x4x18x32xf32, #tpu.memory_space<vmem>>, %arg4: memref<1x1x18x32xf32, #tpu.memory_space<vmem>>, %arg5: memref<288x128xbf16, #tpu.memory_space<vmem>>, %arg6: memref<1x128xf32, #tpu.memory_space<vmem>>, %arg7: memref<1x4x18x128xf32, #tpu.memory_space<vmem>>, %arg8: memref<6x18x32xbf16, #tpu.memory_space<vmem>>, %arg9: memref<64x288xbf16, #tpu.memory_space<vmem>>) attributes {dimension_semantics = [#tpu.dimension_semantics<parallel>, #tpu.dimension_semantics<parallel>], iteration_bounds = array<i64: 2, 4>, scalar_prefetch = 0 : i64, scratch_operands = 2 : i64, tpu.core_type = #tpu.core_type<tc>, window_params = [{transform_indices = @transform_0, window_bounds = array<i64: 1, 1, 18, 32>}, {transform_indices = @transform_1, window_bounds = array<i64: 1, 4, 18, 32>}, {transform_indices = @transform_2, window_bounds = array<i64: 1, 1, 18, 32>}, {pipeline_mode = #tpu.pipeline_mode<synchronous>, transform_indices = @transform_3, window_bounds = array<i64: 288, 128>}, {pipeline_mode = #tpu.pipeline_mode<synchronous>, transform_indices = @transform_4, window_bounds = array<i64: 1, 128>}, {transform_indices = @transform_5, window_bounds = array<i64: 1, 4, 18, 128>}]} {
    %c0 = arith.constant 0 : index
    %c0_0 = arith.constant 0 : index
    %c0_1 = arith.constant 0 : index
    %c0_2 = arith.constant 0 : index
    %0 = vector.load %arg2[%c0, %c0_0, %c0_1, %c0_2] : memref<1x1x18x32xf32, #tpu.memory_space<vmem>>, vector<1x1x18x32xf32>
    %1 = vector.shape_cast %0 : vector<1x1x18x32xf32> to vector<1x18x32xf32>
    %2 = arith.truncf %1 : vector<1x18x32xf32> to vector<1x18x32xbf16>
    %c0_3 = arith.constant 0 : index
    %c0_4 = arith.constant 0 : index
    %c0_5 = arith.constant 0 : index
    %c0_6 = arith.constant 0 : index
    %3 = vector.load %arg4[%c0_3, %c0_4, %c0_5, %c0_6] : memref<1x1x18x32xf32, #tpu.memory_space<vmem>>, vector<1x1x18x32xf32>
    %4 = vector.shape_cast %3 : vector<1x1x18x32xf32> to vector<1x18x32xf32>
    %5 = arith.truncf %4 : vector<1x18x32xf32> to vector<1x18x32xbf16>
    %c0_i32 = arith.constant 0 : i32
    %6 = arith.cmpi eq, %arg1, %c0_i32 : i32
    %cst = arith.constant 0.000000e+00 : bf16
    %7 = vector.broadcast %cst : bf16 to vector<1x18x32xbf16>
    %8 = arith.select %6, %7, %2 : vector<1x18x32xbf16>
    %c0_7 = arith.constant 0 : index
    %c0_8 = arith.constant 0 : index
    %c0_9 = arith.constant 0 : index
    %9 = vector.load %arg8[%c0_7, %c0_8, %c0_9] : memref<6x18x32xbf16, #tpu.memory_space<vmem>>, vector<1x18x32xbf16>
    tpu.vector_store %arg8[%c0_7, %c0_8, %c0_9], %8 {strides = array<i32>} : memref<6x18x32xbf16, #tpu.memory_space<vmem>>, vector<1x18x32xbf16>,
    %c0_10 = arith.constant 0 : index
    %c0_11 = arith.constant 0 : index
    %c0_12 = arith.constant 0 : index
    %c0_13 = arith.constant 0 : index
    %10 = vector.load %arg3[%c0_10, %c0_11, %c0_12, %c0_13] : memref<1x4x18x32xf32, #tpu.memory_space<vmem>>, vector<1x4x18x32xf32>
    %11 = vector.shape_cast %10 : vector<1x4x18x32xf32> to vector<4x18x32xf32>
    %12 = arith.truncf %11 : vector<4x18x32xf32> to vector<4x18x32xbf16>
    %c1 = arith.constant 1 : index
    %c0_14 = arith.constant 0 : index
    %c0_15 = arith.constant 0 : index
    %13 = vector.load %arg8[%c1, %c0_14, %c0_15] : memref<6x18x32xbf16, #tpu.memory_space<vmem>>, vector<4x18x32xbf16>
    tpu.vector_store %arg8[%c1, %c0_14, %c0_15], %12 {strides = array<i32>} : memref<6x18x32xbf16, #tpu.memory_space<vmem>>, vector<4x18x32xbf16>,
    %c3_i32 = arith.constant 3 : i32
    %14 = arith.cmpi eq, %arg1, %c3_i32 : i32
    %cst_16 = arith.constant 0.000000e+00 : bf16
    %15 = vector.broadcast %cst_16 : bf16 to vector<1x18x32xbf16>
    %16 = arith.select %14, %15, %5 : vector<1x18x32xbf16>
    %c5 = arith.constant 5 : index
    %c0_17 = arith.constant 0 : index
    %c0_18 = arith.constant 0 : index
    %17 = vector.load %arg8[%c5, %c0_17, %c0_18] : memref<6x18x32xbf16, #tpu.memory_space<vmem>>, vector<1x18x32xbf16>
    tpu.vector_store %arg8[%c5, %c0_17, %c0_18], %16 {strides = array<i32>} : memref<6x18x32xbf16, #tpu.memory_space<vmem>>, vector<1x18x32xbf16>,
    %c0_19 = arith.constant 0 : index
    %c0_20 = arith.constant 0 : index
    %c0_21 = arith.constant 0 : index
    %18 = vector.load %arg8[%c0_19, %c0_20, %c0_21] : memref<6x18x32xbf16, #tpu.memory_space<vmem>>, vector<6x16x32xbf16>
    %19 = vector.shape_cast %18 : vector<6x16x32xbf16> to vector<96x32xbf16>
    %20 = vector.extract_strided_slice %19 {offsets = [0, 0], sizes = [64, 32], strides = [1, 1]} : vector<96x32xbf16> to vector<64x32xbf16>
    %c0_22 = arith.constant 0 : index
    %c0_23 = arith.constant 0 : index
    %21 = vector.load %arg9[%c0_22, %c0_23] : memref<64x288xbf16, #tpu.memory_space<vmem>>, vector<64x32xbf16>
    tpu.vector_store %arg9[%c0_22, %c0_23], %20 {strides = array<i32>} : memref<64x288xbf16, #tpu.memory_space<vmem>>, vector<64x32xbf16>,
    %22 = vector.extract_strided_slice %19 {offsets = [16, 0], sizes = [64, 32], strides = [1, 1]} : vector<96x32xbf16> to vector<64x32xbf16>
    %c0_24 = arith.constant 0 : index
    %c32 = arith.constant 32 : index
    %23 = vector.load %arg9[%c0_24, %c32] : memref<64x288xbf16, #tpu.memory_space<vmem>>, vector<64x32xbf16>
    tpu.vector_store %arg9[%c0_24, %c32], %22 {strides = array<i32>} : memref<64x288xbf16, #tpu.memory_space<vmem>>, vector<64x32xbf16>,
    %24 = vector.extract_strided_slice %19 {offsets = [32, 0], sizes = [64, 32], strides = [1, 1]} : vector<96x32xbf16> to vector<64x32xbf16>
    %c0_25 = arith.constant 0 : index
    %c64 = arith.constant 64 : index
    %25 = vector.load %arg9[%c0_25, %c64] : memref<64x288xbf16, #tpu.memory_space<vmem>>, vector<64x32xbf16>
    tpu.vector_store %arg9[%c0_25, %c64], %24 {strides = array<i32>} : memref<64x288xbf16, #tpu.memory_space<vmem>>, vector<64x32xbf16>,
    %c0_26 = arith.constant 0 : index
    %c1_27 = arith.constant 1 : index
    %c0_28 = arith.constant 0 : index
    %26 = vector.load %arg8[%c0_26, %c1_27, %c0_28] : memref<6x18x32xbf16, #tpu.memory_space<vmem>>, vector<6x16x32xbf16>
    %27 = vector.shape_cast %26 : vector<6x16x32xbf16> to vector<96x32xbf16>
    %28 = vector.extract_strided_slice %27 {offsets = [0, 0], sizes = [64, 32], strides = [1, 1]} : vector<96x32xbf16> to vector<64x32xbf16>
    %c0_29 = arith.constant 0 : index
    %c96 = arith.constant 96 : index
    %29 = vector.load %arg9[%c0_29, %c96] : memref<64x288xbf16, #tpu.memory_space<vmem>>, vector<64x32xbf16>
    tpu.vector_store %arg9[%c0_29, %c96], %28 {strides = array<i32>} : memref<64x288xbf16, #tpu.memory_space<vmem>>, vector<64x32xbf16>,
    %30 = vector.extract_strided_slice %27 {offsets = [16, 0], sizes = [64, 32], strides = [1, 1]} : vector<96x32xbf16> to vector<64x32xbf16>
    %c0_30 = arith.constant 0 : index
    %c128 = arith.constant 128 : index
    %31 = vector.load %arg9[%c0_30, %c128] : memref<64x288xbf16, #tpu.memory_space<vmem>>, vector<64x32xbf16>
    tpu.vector_store %arg9[%c0_30, %c128], %30 {strides = array<i32>} : memref<64x288xbf16, #tpu.memory_space<vmem>>, vector<64x32xbf16>,
    %32 = vector.extract_strided_slice %27 {offsets = [32, 0], sizes = [64, 32], strides = [1, 1]} : vector<96x32xbf16> to vector<64x32xbf16>
    %c0_31 = arith.constant 0 : index
    %c160 = arith.constant 160 : index
    %33 = vector.load %arg9[%c0_31, %c160] : memref<64x288xbf16, #tpu.memory_space<vmem>>, vector<64x32xbf16>
    tpu.vector_store %arg9[%c0_31, %c160], %32 {strides = array<i32>} : memref<64x288xbf16, #tpu.memory_space<vmem>>, vector<64x32xbf16>,
    %c0_32 = arith.constant 0 : index
    %c2 = arith.constant 2 : index
    %c0_33 = arith.constant 0 : index
    %34 = vector.load %arg8[%c0_32, %c2, %c0_33] : memref<6x18x32xbf16, #tpu.memory_space<vmem>>, vector<6x16x32xbf16>
    %35 = vector.shape_cast %34 : vector<6x16x32xbf16> to vector<96x32xbf16>
    %36 = vector.extract_strided_slice %35 {offsets = [0, 0], sizes = [64, 32], strides = [1, 1]} : vector<96x32xbf16> to vector<64x32xbf16>
    %c0_34 = arith.constant 0 : index
    %c192 = arith.constant 192 : index
    %37 = vector.load %arg9[%c0_34, %c192] : memref<64x288xbf16, #tpu.memory_space<vmem>>, vector<64x32xbf16>
    tpu.vector_store %arg9[%c0_34, %c192], %36 {strides = array<i32>} : memref<64x288xbf16, #tpu.memory_space<vmem>>, vector<64x32xbf16>,
    %38 = vector.extract_strided_slice %35 {offsets = [16, 0], sizes = [64, 32], strides = [1, 1]} : vector<96x32xbf16> to vector<64x32xbf16>
    %c0_35 = arith.constant 0 : index
    %c224 = arith.constant 224 : index
    %39 = vector.load %arg9[%c0_35, %c224] : memref<64x288xbf16, #tpu.memory_space<vmem>>, vector<64x32xbf16>
    tpu.vector_store %arg9[%c0_35, %c224], %38 {strides = array<i32>} : memref<64x288xbf16, #tpu.memory_space<vmem>>, vector<64x32xbf16>,
    %40 = vector.extract_strided_slice %35 {offsets = [32, 0], sizes = [64, 32], strides = [1, 1]} : vector<96x32xbf16> to vector<64x32xbf16>
    %c0_36 = arith.constant 0 : index
    %c256 = arith.constant 256 : index
    %41 = vector.load %arg9[%c0_36, %c256] : memref<64x288xbf16, #tpu.memory_space<vmem>>, vector<64x32xbf16>
    tpu.vector_store %arg9[%c0_36, %c256], %40 {strides = array<i32>} : memref<64x288xbf16, #tpu.memory_space<vmem>>, vector<64x32xbf16>,
    %c0_37 = arith.constant 0 : index
    %c0_38 = arith.constant 0 : index
    %42 = vector.load %arg9[%c0_37, %c0_38] : memref<64x288xbf16, #tpu.memory_space<vmem>>, vector<64x288xbf16>
    %c0_39 = arith.constant 0 : index
    %c0_40 = arith.constant 0 : index
    %43 = vector.load %arg5[%c0_39, %c0_40] : memref<288x128xbf16, #tpu.memory_space<vmem>>, vector<288x128xbf16>
    %cst_41 = arith.constant dense<0.000000e+00> : vector<64x128xf32>
    %44 = tpu.matmul %42, %43, %cst_41 {dimension_numbers = #tpu.dot_dimension_numbers<[1], [0], [0], [1], [0, 0, 1, 1], [], []>} : vector<64x288xbf16>, vector<288x128xbf16>, vector<64x128xf32> -> vector<64x128xf32>
    %c0_42 = arith.constant 0 : index
    %c0_43 = arith.constant 0 : index
    %45 = vector.load %arg6[%c0_42, %c0_43] : memref<1x128xf32, #tpu.memory_space<vmem>>, vector<1x128xf32>
    %46 = vector.broadcast %45 : vector<1x128xf32> to vector<64x128xf32>
    %47 = arith.addf %44, %46 : vector<64x128xf32>
    %48 = vector.shape_cast %47 : vector<64x128xf32> to vector<4x16x128xf32>
    %c0_44 = arith.constant 0 : index
    %c0_45 = arith.constant 0 : index
    %c1_46 = arith.constant 1 : index
    %c0_47 = arith.constant 0 : index
    %49 = vector.load %arg7[%c0_44, %c0_45, %c1_46, %c0_47] : memref<1x4x18x128xf32, #tpu.memory_space<vmem>>, vector<1x4x16x128xf32>
    %50 = vector.shape_cast %49 : vector<1x4x16x128xf32> to vector<4x16x128xf32>
    %51 = vector.shape_cast %48 : vector<4x16x128xf32> to vector<1x4x16x128xf32>
    tpu.vector_store %arg7[%c0_44, %c0_45, %c1_46, %c0_47], %51 {strides = array<i32>} : memref<1x4x18x128xf32, #tpu.memory_space<vmem>>, vector<1x4x16x128xf32>,
    %cst_48 = arith.constant 0.000000e+00 : f32
    %52 = vector.broadcast %cst_48 : f32 to vector<4x1x128xf32>
    %c0_49 = arith.constant 0 : index
    %c0_50 = arith.constant 0 : index
    %c0_51 = arith.constant 0 : index
    %c0_52 = arith.constant 0 : index
    %53 = vector.load %arg7[%c0_49, %c0_50, %c0_51, %c0_52] : memref<1x4x18x128xf32, #tpu.memory_space<vmem>>, vector<1x4x1x128xf32>
    %54 = vector.shape_cast %53 : vector<1x4x1x128xf32> to vector<4x1x128xf32>
    %55 = vector.shape_cast %52 : vector<4x1x128xf32> to vector<1x4x1x128xf32>
    tpu.vector_store %arg7[%c0_49, %c0_50, %c0_51, %c0_52], %55 {strides = array<i32>} : memref<1x4x18x128xf32, #tpu.memory_space<vmem>>, vector<1x4x1x128xf32>,
    %c0_53 = arith.constant 0 : index
    %c0_54 = arith.constant 0 : index
    %c17 = arith.constant 17 : index
    %c0_55 = arith.constant 0 : index
    %56 = vector.load %arg7[%c0_53, %c0_54, %c17, %c0_55] : memref<1x4x18x128xf32, #tpu.memory_space<vmem>>, vector<1x4x1x128xf32>
    %57 = vector.shape_cast %56 : vector<1x4x1x128xf32> to vector<4x1x128xf32>
    %58 = vector.shape_cast %52 : vector<4x1x128xf32> to vector<1x4x1x128xf32>
    tpu.vector_store %arg7[%c0_53, %c0_54, %c17, %c0_55], %58 {strides = array<i32>} : memref<1x4x18x128xf32, #tpu.memory_space<vmem>>, vector<1x4x1x128xf32>,
    return
  }
  func.func @transform_0(%arg0: i32, %arg1: i32) -> (i32, i32, i32, i32) {
    %c4_i32 = arith.constant 4 : i32
    %0 = arith.muli %arg1, %c4_i32 : i32
    %c1_i32 = arith.constant 1 : i32
    %1 = arith.subi %0, %c1_i32 : i32
    %c0_i32 = arith.constant 0 : i32
    %2 = arith.maxsi %1, %c0_i32 : i32
    %c0_i32_0 = arith.constant 0 : i32
    %c0_i32_1 = arith.constant 0 : i32
    %c0_i32_2 = arith.constant 0 : i32
    return %arg0, %2, %c0_i32_0, %c0_i32_1 : i32, i32, i32, i32
  }
  func.func @transform_1(%arg0: i32, %arg1: i32) -> (i32, i32, i32, i32) {
    %c0_i32 = arith.constant 0 : i32
    %c0_i32_0 = arith.constant 0 : i32
    %c0_i32_1 = arith.constant 0 : i32
    return %arg0, %arg1, %c0_i32, %c0_i32_0 : i32, i32, i32, i32
  }
  func.func @transform_2(%arg0: i32, %arg1: i32) -> (i32, i32, i32, i32) {
    %c4_i32 = arith.constant 4 : i32
    %0 = arith.muli %arg1, %c4_i32 : i32
    %c4_i32_0 = arith.constant 4 : i32
    %1 = arith.addi %0, %c4_i32_0 : i32
    %c15_i32 = arith.constant 15 : i32
    %2 = arith.minsi %1, %c15_i32 : i32
    %c0_i32 = arith.constant 0 : i32
    %c0_i32_1 = arith.constant 0 : i32
    %c0_i32_2 = arith.constant 0 : i32
    return %arg0, %2, %c0_i32, %c0_i32_1 : i32, i32, i32, i32
  }
  func.func @transform_3(%arg0: i32, %arg1: i32) -> (i32, i32) {
    %c0_i32 = arith.constant 0 : i32
    %c0_i32_0 = arith.constant 0 : i32
    %c0_i32_1 = arith.constant 0 : i32
    return %c0_i32, %c0_i32_0 : i32, i32
  }
  func.func @transform_4(%arg0: i32, %arg1: i32) -> (i32, i32) {
    %c0_i32 = arith.constant 0 : i32
    %c0_i32_0 = arith.constant 0 : i32
    %c0_i32_1 = arith.constant 0 : i32
    return %c0_i32, %c0_i32_0 : i32, i32
  }
  func.func @transform_5(%arg0: i32, %arg1: i32) -> (i32, i32, i32, i32) {
    %c0_i32 = arith.constant 0 : i32
    %c0_i32_0 = arith.constant 0 : i32
    %c0_i32_1 = arith.constant 0 : i32
    return %arg0, %arg1, %c0_i32, %c0_i32_0 : i32, i32, i32, i32
  }
}

module attributes {stable_mosaic.version = 11 : i64} {
  func.func @kernel(%arg0: i32, %arg1: i32, %arg2: memref<1x1x18x32xf32, #tpu.memory_space<vmem>>, %arg3: memref<1x1x18x32xf32, #tpu.memory_space<vmem>>, %arg4: memref<1x4x18x32xf32, #tpu.memory_space<vmem>>, %arg5: memref<1x1x18x32xf32, #tpu.memory_space<vmem>>, %arg6: memref<1x1x18x32xf32, #tpu.memory_space<vmem>>, %arg7: memref<288x32xbf16, #tpu.memory_space<vmem>>, %arg8: memref<1x32xf32, #tpu.memory_space<vmem>>, %arg9: memref<288x32xbf16, #tpu.memory_space<vmem>>, %arg10: memref<1x32xf32, #tpu.memory_space<vmem>>, %arg11: memref<1x4x18x32xf32, #tpu.memory_space<vmem>>, %arg12: memref<8x18x32xbf16, #tpu.memory_space<vmem>>, %arg13: memref<96x288xbf16, #tpu.memory_space<vmem>>, %arg14: memref<6x18x32xbf16, #tpu.memory_space<vmem>>, %arg15: memref<64x288xbf16, #tpu.memory_space<vmem>>) attributes {dimension_semantics = [#tpu.dimension_semantics<parallel>, #tpu.dimension_semantics<parallel>], iteration_bounds = array<i64: 2, 4>, scalar_prefetch = 0 : i64, scratch_operands = 4 : i64, tpu.core_type = #tpu.core_type<tc>, window_params = [{transform_indices = @transform_0, window_bounds = array<i64: 1, 1, 18, 32>}, {transform_indices = @transform_1, window_bounds = array<i64: 1, 1, 18, 32>}, {transform_indices = @transform_2, window_bounds = array<i64: 1, 4, 18, 32>}, {transform_indices = @transform_3, window_bounds = array<i64: 1, 1, 18, 32>}, {transform_indices = @transform_4, window_bounds = array<i64: 1, 1, 18, 32>}, {pipeline_mode = #tpu.pipeline_mode<synchronous>, transform_indices = @transform_5, window_bounds = array<i64: 288, 32>}, {pipeline_mode = #tpu.pipeline_mode<synchronous>, transform_indices = @transform_6, window_bounds = array<i64: 1, 32>}, {pipeline_mode = #tpu.pipeline_mode<synchronous>, transform_indices = @transform_7, window_bounds = array<i64: 288, 32>}, {pipeline_mode = #tpu.pipeline_mode<synchronous>, transform_indices = @transform_8, window_bounds = array<i64: 1, 32>}, {transform_indices = @transform_9, window_bounds = array<i64: 1, 4, 18, 32>}]} {
    %c4_i32 = arith.constant 4 : i32
    %0 = arith.muli %arg1, %c4_i32 : i32
    %c2_i32 = arith.constant 2 : i32
    %1 = arith.subi %0, %c2_i32 : i32
    %c0_i32 = arith.constant 0 : i32
    %2 = arith.cmpi slt, %1, %c0_i32 : i32
    %c0 = arith.constant 0 : index
    %c0_0 = arith.constant 0 : index
    %c0_1 = arith.constant 0 : index
    %c0_2 = arith.constant 0 : index
    %3 = vector.load %arg2[%c0, %c0_0, %c0_1, %c0_2] : memref<1x1x18x32xf32, #tpu.memory_space<vmem>>, vector<1x1x18x32xf32>
    %4 = vector.shape_cast %3 : vector<1x1x18x32xf32> to vector<1x18x32xf32>
    %5 = arith.truncf %4 : vector<1x18x32xf32> to vector<1x18x32xbf16>
    %cst = arith.constant 0.000000e+00 : bf16
    %6 = vector.broadcast %cst : bf16 to vector<1x18x32xbf16>
    %7 = arith.select %2, %6, %5 : vector<1x18x32xbf16>
    %c0_3 = arith.constant 0 : index
    %c0_4 = arith.constant 0 : index
    %c0_5 = arith.constant 0 : index
    %8 = vector.load %arg12[%c0_3, %c0_4, %c0_5] : memref<8x18x32xbf16, #tpu.memory_space<vmem>>, vector<1x18x32xbf16>
    tpu.vector_store %arg12[%c0_3, %c0_4, %c0_5], %7 {strides = array<i32>} : memref<8x18x32xbf16, #tpu.memory_space<vmem>>, vector<1x18x32xbf16>,
    %c1_i32 = arith.constant 1 : i32
    %9 = arith.subi %0, %c1_i32 : i32
    %c0_i32_6 = arith.constant 0 : i32
    %10 = arith.cmpi slt, %9, %c0_i32_6 : i32
    %c0_7 = arith.constant 0 : index
    %c0_8 = arith.constant 0 : index
    %c0_9 = arith.constant 0 : index
    %c0_10 = arith.constant 0 : index
    %11 = vector.load %arg3[%c0_7, %c0_8, %c0_9, %c0_10] : memref<1x1x18x32xf32, #tpu.memory_space<vmem>>, vector<1x1x18x32xf32>
    %12 = vector.shape_cast %11 : vector<1x1x18x32xf32> to vector<1x18x32xf32>
    %13 = arith.truncf %12 : vector<1x18x32xf32> to vector<1x18x32xbf16>
    %cst_11 = arith.constant 0.000000e+00 : bf16
    %14 = vector.broadcast %cst_11 : bf16 to vector<1x18x32xbf16>
    %15 = arith.select %10, %14, %13 : vector<1x18x32xbf16>
    %c1 = arith.constant 1 : index
    %c0_12 = arith.constant 0 : index
    %c0_13 = arith.constant 0 : index
    %16 = vector.load %arg12[%c1, %c0_12, %c0_13] : memref<8x18x32xbf16, #tpu.memory_space<vmem>>, vector<1x18x32xbf16>
    tpu.vector_store %arg12[%c1, %c0_12, %c0_13], %15 {strides = array<i32>} : memref<8x18x32xbf16, #tpu.memory_space<vmem>>, vector<1x18x32xbf16>,
    %c0_14 = arith.constant 0 : index
    %c0_15 = arith.constant 0 : index
    %c0_16 = arith.constant 0 : index
    %c0_17 = arith.constant 0 : index
    %17 = vector.load %arg4[%c0_14, %c0_15, %c0_16, %c0_17] : memref<1x4x18x32xf32, #tpu.memory_space<vmem>>, vector<1x4x18x32xf32>
    %18 = vector.shape_cast %17 : vector<1x4x18x32xf32> to vector<4x18x32xf32>
    %19 = arith.truncf %18 : vector<4x18x32xf32> to vector<4x18x32xbf16>
    %c2 = arith.constant 2 : index
    %c0_18 = arith.constant 0 : index
    %c0_19 = arith.constant 0 : index
    %20 = vector.load %arg12[%c2, %c0_18, %c0_19] : memref<8x18x32xbf16, #tpu.memory_space<vmem>>, vector<4x18x32xbf16>
    tpu.vector_store %arg12[%c2, %c0_18, %c0_19], %19 {strides = array<i32>} : memref<8x18x32xbf16, #tpu.memory_space<vmem>>, vector<4x18x32xbf16>,
    %c4_i32_20 = arith.constant 4 : i32
    %21 = arith.addi %0, %c4_i32_20 : i32
    %c15_i32 = arith.constant 15 : i32
    %22 = arith.cmpi sgt, %21, %c15_i32 : i32
    %c0_21 = arith.constant 0 : index
    %c0_22 = arith.constant 0 : index
    %c0_23 = arith.constant 0 : index
    %c0_24 = arith.constant 0 : index
    %23 = vector.load %arg5[%c0_21, %c0_22, %c0_23, %c0_24] : memref<1x1x18x32xf32, #tpu.memory_space<vmem>>, vector<1x1x18x32xf32>
    %24 = vector.shape_cast %23 : vector<1x1x18x32xf32> to vector<1x18x32xf32>
    %25 = arith.truncf %24 : vector<1x18x32xf32> to vector<1x18x32xbf16>
    %cst_25 = arith.constant 0.000000e+00 : bf16
    %26 = vector.broadcast %cst_25 : bf16 to vector<1x18x32xbf16>
    %27 = arith.select %22, %26, %25 : vector<1x18x32xbf16>
    %c6 = arith.constant 6 : index
    %c0_26 = arith.constant 0 : index
    %c0_27 = arith.constant 0 : index
    %28 = vector.load %arg12[%c6, %c0_26, %c0_27] : memref<8x18x32xbf16, #tpu.memory_space<vmem>>, vector<1x18x32xbf16>
    tpu.vector_store %arg12[%c6, %c0_26, %c0_27], %27 {strides = array<i32>} : memref<8x18x32xbf16, #tpu.memory_space<vmem>>, vector<1x18x32xbf16>,
    %c4_i32_28 = arith.constant 4 : i32
    %29 = arith.addi %0, %c4_i32_28 : i32
    %c1_i32_29 = arith.constant 1 : i32
    %30 = arith.addi %29, %c1_i32_29 : i32
    %c15_i32_30 = arith.constant 15 : i32
    %31 = arith.cmpi sgt, %30, %c15_i32_30 : i32
    %c0_31 = arith.constant 0 : index
    %c0_32 = arith.constant 0 : index
    %c0_33 = arith.constant 0 : index
    %c0_34 = arith.constant 0 : index
    %32 = vector.load %arg6[%c0_31, %c0_32, %c0_33, %c0_34] : memref<1x1x18x32xf32, #tpu.memory_space<vmem>>, vector<1x1x18x32xf32>
    %33 = vector.shape_cast %32 : vector<1x1x18x32xf32> to vector<1x18x32xf32>
    %34 = arith.truncf %33 : vector<1x18x32xf32> to vector<1x18x32xbf16>
    %cst_35 = arith.constant 0.000000e+00 : bf16
    %35 = vector.broadcast %cst_35 : bf16 to vector<1x18x32xbf16>
    %36 = arith.select %31, %35, %34 : vector<1x18x32xbf16>
    %c7 = arith.constant 7 : index
    %c0_36 = arith.constant 0 : index
    %c0_37 = arith.constant 0 : index
    %37 = vector.load %arg12[%c7, %c0_36, %c0_37] : memref<8x18x32xbf16, #tpu.memory_space<vmem>>, vector<1x18x32xbf16>
    tpu.vector_store %arg12[%c7, %c0_36, %c0_37], %36 {strides = array<i32>} : memref<8x18x32xbf16, #tpu.memory_space<vmem>>, vector<1x18x32xbf16>,
    %c0_38 = arith.constant 0 : index
    %c0_39 = arith.constant 0 : index
    %c0_40 = arith.constant 0 : index
    %38 = vector.load %arg12[%c0_38, %c0_39, %c0_40] : memref<8x18x32xbf16, #tpu.memory_space<vmem>>, vector<8x16x32xbf16>
    %39 = vector.shape_cast %38 : vector<8x16x32xbf16> to vector<128x32xbf16>
    %40 = vector.extract_strided_slice %39 {offsets = [0, 0], sizes = [96, 32], strides = [1, 1]} : vector<128x32xbf16> to vector<96x32xbf16>
    %c0_41 = arith.constant 0 : index
    %c0_42 = arith.constant 0 : index
    %41 = vector.load %arg13[%c0_41, %c0_42] : memref<96x288xbf16, #tpu.memory_space<vmem>>, vector<96x32xbf16>
    tpu.vector_store %arg13[%c0_41, %c0_42], %40 {strides = array<i32>} : memref<96x288xbf16, #tpu.memory_space<vmem>>, vector<96x32xbf16>,
    %42 = vector.extract_strided_slice %39 {offsets = [16, 0], sizes = [96, 32], strides = [1, 1]} : vector<128x32xbf16> to vector<96x32xbf16>
    %c0_43 = arith.constant 0 : index
    %c32 = arith.constant 32 : index
    %43 = vector.load %arg13[%c0_43, %c32] : memref<96x288xbf16, #tpu.memory_space<vmem>>, vector<96x32xbf16>
    tpu.vector_store %arg13[%c0_43, %c32], %42 {strides = array<i32>} : memref<96x288xbf16, #tpu.memory_space<vmem>>, vector<96x32xbf16>,
    %44 = vector.extract_strided_slice %39 {offsets = [32, 0], sizes = [96, 32], strides = [1, 1]} : vector<128x32xbf16> to vector<96x32xbf16>
    %c0_44 = arith.constant 0 : index
    %c64 = arith.constant 64 : index
    %45 = vector.load %arg13[%c0_44, %c64] : memref<96x288xbf16, #tpu.memory_space<vmem>>, vector<96x32xbf16>
    tpu.vector_store %arg13[%c0_44, %c64], %44 {strides = array<i32>} : memref<96x288xbf16, #tpu.memory_space<vmem>>, vector<96x32xbf16>,
    %c0_45 = arith.constant 0 : index
    %c1_46 = arith.constant 1 : index
    %c0_47 = arith.constant 0 : index
    %46 = vector.load %arg12[%c0_45, %c1_46, %c0_47] : memref<8x18x32xbf16, #tpu.memory_space<vmem>>, vector<8x16x32xbf16>
    %47 = vector.shape_cast %46 : vector<8x16x32xbf16> to vector<128x32xbf16>
    %48 = vector.extract_strided_slice %47 {offsets = [0, 0], sizes = [96, 32], strides = [1, 1]} : vector<128x32xbf16> to vector<96x32xbf16>
    %c0_48 = arith.constant 0 : index
    %c96 = arith.constant 96 : index
    %49 = vector.load %arg13[%c0_48, %c96] : memref<96x288xbf16, #tpu.memory_space<vmem>>, vector<96x32xbf16>
    tpu.vector_store %arg13[%c0_48, %c96], %48 {strides = array<i32>} : memref<96x288xbf16, #tpu.memory_space<vmem>>, vector<96x32xbf16>,
    %50 = vector.extract_strided_slice %47 {offsets = [16, 0], sizes = [96, 32], strides = [1, 1]} : vector<128x32xbf16> to vector<96x32xbf16>
    %c0_49 = arith.constant 0 : index
    %c128 = arith.constant 128 : index
    %51 = vector.load %arg13[%c0_49, %c128] : memref<96x288xbf16, #tpu.memory_space<vmem>>, vector<96x32xbf16>
    tpu.vector_store %arg13[%c0_49, %c128], %50 {strides = array<i32>} : memref<96x288xbf16, #tpu.memory_space<vmem>>, vector<96x32xbf16>,
    %52 = vector.extract_strided_slice %47 {offsets = [32, 0], sizes = [96, 32], strides = [1, 1]} : vector<128x32xbf16> to vector<96x32xbf16>
    %c0_50 = arith.constant 0 : index
    %c160 = arith.constant 160 : index
    %53 = vector.load %arg13[%c0_50, %c160] : memref<96x288xbf16, #tpu.memory_space<vmem>>, vector<96x32xbf16>
    tpu.vector_store %arg13[%c0_50, %c160], %52 {strides = array<i32>} : memref<96x288xbf16, #tpu.memory_space<vmem>>, vector<96x32xbf16>,
    %c0_51 = arith.constant 0 : index
    %c2_52 = arith.constant 2 : index
    %c0_53 = arith.constant 0 : index
    %54 = vector.load %arg12[%c0_51, %c2_52, %c0_53] : memref<8x18x32xbf16, #tpu.memory_space<vmem>>, vector<8x16x32xbf16>
    %55 = vector.shape_cast %54 : vector<8x16x32xbf16> to vector<128x32xbf16>
    %56 = vector.extract_strided_slice %55 {offsets = [0, 0], sizes = [96, 32], strides = [1, 1]} : vector<128x32xbf16> to vector<96x32xbf16>
    %c0_54 = arith.constant 0 : index
    %c192 = arith.constant 192 : index
    %57 = vector.load %arg13[%c0_54, %c192] : memref<96x288xbf16, #tpu.memory_space<vmem>>, vector<96x32xbf16>
    tpu.vector_store %arg13[%c0_54, %c192], %56 {strides = array<i32>} : memref<96x288xbf16, #tpu.memory_space<vmem>>, vector<96x32xbf16>,
    %58 = vector.extract_strided_slice %55 {offsets = [16, 0], sizes = [96, 32], strides = [1, 1]} : vector<128x32xbf16> to vector<96x32xbf16>
    %c0_55 = arith.constant 0 : index
    %c224 = arith.constant 224 : index
    %59 = vector.load %arg13[%c0_55, %c224] : memref<96x288xbf16, #tpu.memory_space<vmem>>, vector<96x32xbf16>
    tpu.vector_store %arg13[%c0_55, %c224], %58 {strides = array<i32>} : memref<96x288xbf16, #tpu.memory_space<vmem>>, vector<96x32xbf16>,
    %60 = vector.extract_strided_slice %55 {offsets = [32, 0], sizes = [96, 32], strides = [1, 1]} : vector<128x32xbf16> to vector<96x32xbf16>
    %c0_56 = arith.constant 0 : index
    %c256 = arith.constant 256 : index
    %61 = vector.load %arg13[%c0_56, %c256] : memref<96x288xbf16, #tpu.memory_space<vmem>>, vector<96x32xbf16>
    tpu.vector_store %arg13[%c0_56, %c256], %60 {strides = array<i32>} : memref<96x288xbf16, #tpu.memory_space<vmem>>, vector<96x32xbf16>,
    %c0_57 = arith.constant 0 : index
    %c0_58 = arith.constant 0 : index
    %62 = vector.load %arg13[%c0_57, %c0_58] : memref<96x288xbf16, #tpu.memory_space<vmem>>, vector<96x288xbf16>
    %c0_59 = arith.constant 0 : index
    %c0_60 = arith.constant 0 : index
    %63 = vector.load %arg7[%c0_59, %c0_60] : memref<288x32xbf16, #tpu.memory_space<vmem>>, vector<288x32xbf16>
    %cst_61 = arith.constant dense<0.000000e+00> : vector<96x32xf32>
    %64 = tpu.matmul %62, %63, %cst_61 {dimension_numbers = #tpu.dot_dimension_numbers<[1], [0], [0], [1], [0, 0, 1, 1], [], []>} : vector<96x288xbf16>, vector<288x32xbf16>, vector<96x32xf32> -> vector<96x32xf32>
    %c0_62 = arith.constant 0 : index
    %c0_63 = arith.constant 0 : index
    %65 = vector.load %arg8[%c0_62, %c0_63] : memref<1x32xf32, #tpu.memory_space<vmem>>, vector<1x32xf32>
    %66 = vector.broadcast %65 : vector<1x32xf32> to vector<96x32xf32>
    %67 = arith.addf %64, %66 : vector<96x32xf32>
    %cst_64 = arith.constant 0.000000e+00 : f32
    %68 = vector.broadcast %cst_64 : f32 to vector<96x32xf32>
    %69 = arith.maximumf %67, %68 : vector<96x32xf32>
    %cst_65 = arith.constant 0.000000e+00 : bf16
    %70 = vector.broadcast %cst_65 : bf16 to vector<6x1x32xbf16>
    %c0_66 = arith.constant 0 : index
    %c0_67 = arith.constant 0 : index
    %c0_68 = arith.constant 0 : index
    %71 = vector.load %arg14[%c0_66, %c0_67, %c0_68] : memref<6x18x32xbf16, #tpu.memory_space<vmem>>, vector<6x1x32xbf16>
    tpu.vector_store %arg14[%c0_66, %c0_67, %c0_68], %70 {strides = array<i32>} : memref<6x18x32xbf16, #tpu.memory_space<vmem>>, vector<6x1x32xbf16>,
    %c0_69 = arith.constant 0 : index
    %c17 = arith.constant 17 : index
    %c0_70 = arith.constant 0 : index
    %72 = vector.load %arg14[%c0_69, %c17, %c0_70] : memref<6x18x32xbf16, #tpu.memory_space<vmem>>, vector<6x1x32xbf16>
    tpu.vector_store %arg14[%c0_69, %c17, %c0_70], %70 {strides = array<i32>} : memref<6x18x32xbf16, #tpu.memory_space<vmem>>, vector<6x1x32xbf16>,
    %73 = arith.truncf %69 : vector<96x32xf32> to vector<96x32xbf16>
    %74 = vector.shape_cast %73 : vector<96x32xbf16> to vector<6x16x32xbf16>
    %c0_71 = arith.constant 0 : index
    %c1_72 = arith.constant 1 : index
    %c0_73 = arith.constant 0 : index
    %75 = vector.load %arg14[%c0_71, %c1_72, %c0_73] : memref<6x18x32xbf16, #tpu.memory_space<vmem>>, vector<6x16x32xbf16>
    tpu.vector_store %arg14[%c0_71, %c1_72, %c0_73], %74 {strides = array<i32>} : memref<6x18x32xbf16, #tpu.memory_space<vmem>>, vector<6x16x32xbf16>,
    %cst_74 = arith.constant 0.000000e+00 : bf16
    %76 = vector.broadcast %cst_74 : bf16 to vector<1x18x32xbf16>
    %c0_i32_75 = arith.constant 0 : i32
    %77 = arith.cmpi eq, %arg1, %c0_i32_75 : i32
    %78 = arith.extui %77 : i1 to i32
    %c0_i32_76 = arith.constant 0 : i32
    %79 = arith.cmpi ne, %78, %c0_i32_76 : i32
    scf.if %79 {
      %c0_129 = arith.constant 0 : index
      %c0_130 = arith.constant 0 : index
      %c0_131 = arith.constant 0 : index
      %128 = vector.load %arg14[%c0_129, %c0_130, %c0_131] : memref<6x18x32xbf16, #tpu.memory_space<vmem>>, vector<1x18x32xbf16>
      tpu.vector_store %arg14[%c0_129, %c0_130, %c0_131], %76 {strides = array<i32>} : memref<6x18x32xbf16, #tpu.memory_space<vmem>>, vector<1x18x32xbf16>,
    } else {
    }
    %c3_i32 = arith.constant 3 : i32
    %80 = arith.cmpi eq, %arg1, %c3_i32 : i32
    %81 = arith.extui %80 : i1 to i32
    %c0_i32_77 = arith.constant 0 : i32
    %82 = arith.cmpi ne, %81, %c0_i32_77 : i32
    scf.if %82 {
      %c5 = arith.constant 5 : index
      %c0_129 = arith.constant 0 : index
      %c0_130 = arith.constant 0 : index
      %128 = vector.load %arg14[%c5, %c0_129, %c0_130] : memref<6x18x32xbf16, #tpu.memory_space<vmem>>, vector<1x18x32xbf16>
      tpu.vector_store %arg14[%c5, %c0_129, %c0_130], %76 {strides = array<i32>} : memref<6x18x32xbf16, #tpu.memory_space<vmem>>, vector<1x18x32xbf16>,
    } else {
    }
    %c0_78 = arith.constant 0 : index
    %c0_79 = arith.constant 0 : index
    %c0_80 = arith.constant 0 : index
    %83 = vector.load %arg14[%c0_78, %c0_79, %c0_80] : memref<6x18x32xbf16, #tpu.memory_space<vmem>>, vector<6x16x32xbf16>
    %84 = vector.shape_cast %83 : vector<6x16x32xbf16> to vector<96x32xbf16>
    %85 = vector.extract_strided_slice %84 {offsets = [0, 0], sizes = [64, 32], strides = [1, 1]} : vector<96x32xbf16> to vector<64x32xbf16>
    %c0_81 = arith.constant 0 : index
    %c0_82 = arith.constant 0 : index
    %86 = vector.load %arg15[%c0_81, %c0_82] : memref<64x288xbf16, #tpu.memory_space<vmem>>, vector<64x32xbf16>
    tpu.vector_store %arg15[%c0_81, %c0_82], %85 {strides = array<i32>} : memref<64x288xbf16, #tpu.memory_space<vmem>>, vector<64x32xbf16>,
    %87 = vector.extract_strided_slice %84 {offsets = [16, 0], sizes = [64, 32], strides = [1, 1]} : vector<96x32xbf16> to vector<64x32xbf16>
    %c0_83 = arith.constant 0 : index
    %c32_84 = arith.constant 32 : index
    %88 = vector.load %arg15[%c0_83, %c32_84] : memref<64x288xbf16, #tpu.memory_space<vmem>>, vector<64x32xbf16>
    tpu.vector_store %arg15[%c0_83, %c32_84], %87 {strides = array<i32>} : memref<64x288xbf16, #tpu.memory_space<vmem>>, vector<64x32xbf16>,
    %89 = vector.extract_strided_slice %84 {offsets = [32, 0], sizes = [64, 32], strides = [1, 1]} : vector<96x32xbf16> to vector<64x32xbf16>
    %c0_85 = arith.constant 0 : index
    %c64_86 = arith.constant 64 : index
    %90 = vector.load %arg15[%c0_85, %c64_86] : memref<64x288xbf16, #tpu.memory_space<vmem>>, vector<64x32xbf16>
    tpu.vector_store %arg15[%c0_85, %c64_86], %89 {strides = array<i32>} : memref<64x288xbf16, #tpu.memory_space<vmem>>, vector<64x32xbf16>,
    %c0_87 = arith.constant 0 : index
    %c1_88 = arith.constant 1 : index
    %c0_89 = arith.constant 0 : index
    %91 = vector.load %arg14[%c0_87, %c1_88, %c0_89] : memref<6x18x32xbf16, #tpu.memory_space<vmem>>, vector<6x16x32xbf16>
    %92 = vector.shape_cast %91 : vector<6x16x32xbf16> to vector<96x32xbf16>
    %93 = vector.extract_strided_slice %92 {offsets = [0, 0], sizes = [64, 32], strides = [1, 1]} : vector<96x32xbf16> to vector<64x32xbf16>
    %c0_90 = arith.constant 0 : index
    %c96_91 = arith.constant 96 : index
    %94 = vector.load %arg15[%c0_90, %c96_91] : memref<64x288xbf16, #tpu.memory_space<vmem>>, vector<64x32xbf16>
    tpu.vector_store %arg15[%c0_90, %c96_91], %93 {strides = array<i32>} : memref<64x288xbf16, #tpu.memory_space<vmem>>, vector<64x32xbf16>,
    %95 = vector.extract_strided_slice %92 {offsets = [16, 0], sizes = [64, 32], strides = [1, 1]} : vector<96x32xbf16> to vector<64x32xbf16>
    %c0_92 = arith.constant 0 : index
    %c128_93 = arith.constant 128 : index
    %96 = vector.load %arg15[%c0_92, %c128_93] : memref<64x288xbf16, #tpu.memory_space<vmem>>, vector<64x32xbf16>
    tpu.vector_store %arg15[%c0_92, %c128_93], %95 {strides = array<i32>} : memref<64x288xbf16, #tpu.memory_space<vmem>>, vector<64x32xbf16>,
    %97 = vector.extract_strided_slice %92 {offsets = [32, 0], sizes = [64, 32], strides = [1, 1]} : vector<96x32xbf16> to vector<64x32xbf16>
    %c0_94 = arith.constant 0 : index
    %c160_95 = arith.constant 160 : index
    %98 = vector.load %arg15[%c0_94, %c160_95] : memref<64x288xbf16, #tpu.memory_space<vmem>>, vector<64x32xbf16>
    tpu.vector_store %arg15[%c0_94, %c160_95], %97 {strides = array<i32>} : memref<64x288xbf16, #tpu.memory_space<vmem>>, vector<64x32xbf16>,
    %c0_96 = arith.constant 0 : index
    %c2_97 = arith.constant 2 : index
    %c0_98 = arith.constant 0 : index
    %99 = vector.load %arg14[%c0_96, %c2_97, %c0_98] : memref<6x18x32xbf16, #tpu.memory_space<vmem>>, vector<6x16x32xbf16>
    %100 = vector.shape_cast %99 : vector<6x16x32xbf16> to vector<96x32xbf16>
    %101 = vector.extract_strided_slice %100 {offsets = [0, 0], sizes = [64, 32], strides = [1, 1]} : vector<96x32xbf16> to vector<64x32xbf16>
    %c0_99 = arith.constant 0 : index
    %c192_100 = arith.constant 192 : index
    %102 = vector.load %arg15[%c0_99, %c192_100] : memref<64x288xbf16, #tpu.memory_space<vmem>>, vector<64x32xbf16>
    tpu.vector_store %arg15[%c0_99, %c192_100], %101 {strides = array<i32>} : memref<64x288xbf16, #tpu.memory_space<vmem>>, vector<64x32xbf16>,
    %103 = vector.extract_strided_slice %100 {offsets = [16, 0], sizes = [64, 32], strides = [1, 1]} : vector<96x32xbf16> to vector<64x32xbf16>
    %c0_101 = arith.constant 0 : index
    %c224_102 = arith.constant 224 : index
    %104 = vector.load %arg15[%c0_101, %c224_102] : memref<64x288xbf16, #tpu.memory_space<vmem>>, vector<64x32xbf16>
    tpu.vector_store %arg15[%c0_101, %c224_102], %103 {strides = array<i32>} : memref<64x288xbf16, #tpu.memory_space<vmem>>, vector<64x32xbf16>,
    %105 = vector.extract_strided_slice %100 {offsets = [32, 0], sizes = [64, 32], strides = [1, 1]} : vector<96x32xbf16> to vector<64x32xbf16>
    %c0_103 = arith.constant 0 : index
    %c256_104 = arith.constant 256 : index
    %106 = vector.load %arg15[%c0_103, %c256_104] : memref<64x288xbf16, #tpu.memory_space<vmem>>, vector<64x32xbf16>
    tpu.vector_store %arg15[%c0_103, %c256_104], %105 {strides = array<i32>} : memref<64x288xbf16, #tpu.memory_space<vmem>>, vector<64x32xbf16>,
    %c0_105 = arith.constant 0 : index
    %c0_106 = arith.constant 0 : index
    %107 = vector.load %arg15[%c0_105, %c0_106] : memref<64x288xbf16, #tpu.memory_space<vmem>>, vector<64x288xbf16>
    %c0_107 = arith.constant 0 : index
    %c0_108 = arith.constant 0 : index
    %108 = vector.load %arg9[%c0_107, %c0_108] : memref<288x32xbf16, #tpu.memory_space<vmem>>, vector<288x32xbf16>
    %cst_109 = arith.constant dense<0.000000e+00> : vector<64x32xf32>
    %109 = tpu.matmul %107, %108, %cst_109 {dimension_numbers = #tpu.dot_dimension_numbers<[1], [0], [0], [1], [0, 0, 1, 1], [], []>} : vector<64x288xbf16>, vector<288x32xbf16>, vector<64x32xf32> -> vector<64x32xf32>
    %c0_110 = arith.constant 0 : index
    %c0_111 = arith.constant 0 : index
    %110 = vector.load %arg10[%c0_110, %c0_111] : memref<1x32xf32, #tpu.memory_space<vmem>>, vector<1x32xf32>
    %111 = vector.broadcast %110 : vector<1x32xf32> to vector<64x32xf32>
    %112 = arith.addf %109, %111 : vector<64x32xf32>
    %c0_112 = arith.constant 0 : index
    %c0_113 = arith.constant 0 : index
    %c1_114 = arith.constant 1 : index
    %c0_115 = arith.constant 0 : index
    %113 = vector.load %arg4[%c0_112, %c0_113, %c1_114, %c0_115] : memref<1x4x18x32xf32, #tpu.memory_space<vmem>>, vector<1x4x16x32xf32>
    %114 = vector.shape_cast %113 : vector<1x4x16x32xf32> to vector<4x16x32xf32>
    %115 = vector.shape_cast %114 : vector<4x16x32xf32> to vector<64x32xf32>
    %116 = arith.addf %115, %112 : vector<64x32xf32>
    %117 = vector.shape_cast %116 : vector<64x32xf32> to vector<4x16x32xf32>
    %c0_116 = arith.constant 0 : index
    %c0_117 = arith.constant 0 : index
    %c1_118 = arith.constant 1 : index
    %c0_119 = arith.constant 0 : index
    %118 = vector.load %arg11[%c0_116, %c0_117, %c1_118, %c0_119] : memref<1x4x18x32xf32, #tpu.memory_space<vmem>>, vector<1x4x16x32xf32>
    %119 = vector.shape_cast %118 : vector<1x4x16x32xf32> to vector<4x16x32xf32>
    %120 = vector.shape_cast %117 : vector<4x16x32xf32> to vector<1x4x16x32xf32>
    tpu.vector_store %arg11[%c0_116, %c0_117, %c1_118, %c0_119], %120 {strides = array<i32>} : memref<1x4x18x32xf32, #tpu.memory_space<vmem>>, vector<1x4x16x32xf32>,
    %cst_120 = arith.constant 0.000000e+00 : f32
    %121 = vector.broadcast %cst_120 : f32 to vector<4x1x32xf32>
    %c0_121 = arith.constant 0 : index
    %c0_122 = arith.constant 0 : index
    %c0_123 = arith.constant 0 : index
    %c0_124 = arith.constant 0 : index
    %122 = vector.load %arg11[%c0_121, %c0_122, %c0_123, %c0_124] : memref<1x4x18x32xf32, #tpu.memory_space<vmem>>, vector<1x4x1x32xf32>
    %123 = vector.shape_cast %122 : vector<1x4x1x32xf32> to vector<4x1x32xf32>
    %124 = vector.shape_cast %121 : vector<4x1x32xf32> to vector<1x4x1x32xf32>
    tpu.vector_store %arg11[%c0_121, %c0_122, %c0_123, %c0_124], %124 {strides = array<i32>} : memref<1x4x18x32xf32, #tpu.memory_space<vmem>>, vector<1x4x1x32xf32>,
    %c0_125 = arith.constant 0 : index
    %c0_126 = arith.constant 0 : index
    %c17_127 = arith.constant 17 : index
    %c0_128 = arith.constant 0 : index
    %125 = vector.load %arg11[%c0_125, %c0_126, %c17_127, %c0_128] : memref<1x4x18x32xf32, #tpu.memory_space<vmem>>, vector<1x4x1x32xf32>
    %126 = vector.shape_cast %125 : vector<1x4x1x32xf32> to vector<4x1x32xf32>
    %127 = vector.shape_cast %121 : vector<4x1x32xf32> to vector<1x4x1x32xf32>
    tpu.vector_store %arg11[%c0_125, %c0_126, %c17_127, %c0_128], %127 {strides = array<i32>} : memref<1x4x18x32xf32, #tpu.memory_space<vmem>>, vector<1x4x1x32xf32>,
    return
  }
  func.func @transform_0(%arg0: i32, %arg1: i32) -> (i32, i32, i32, i32) {
    %c4_i32 = arith.constant 4 : i32
    %0 = arith.muli %arg1, %c4_i32 : i32
    %c-2_i32 = arith.constant -2 : i32
    %1 = arith.addi %0, %c-2_i32 : i32
    %c0_i32 = arith.constant 0 : i32
    %c15_i32 = arith.constant 15 : i32
    %2 = arith.maxsi %c0_i32, %1 : i32
    %3 = arith.minsi %c15_i32, %2 : i32
    %c0_i32_0 = arith.constant 0 : i32
    %c0_i32_1 = arith.constant 0 : i32
    %c0_i32_2 = arith.constant 0 : i32
    return %arg0, %3, %c0_i32_0, %c0_i32_1 : i32, i32, i32, i32
  }
  func.func @transform_1(%arg0: i32, %arg1: i32) -> (i32, i32, i32, i32) {
    %c4_i32 = arith.constant 4 : i32
    %0 = arith.muli %arg1, %c4_i32 : i32
    %c-1_i32 = arith.constant -1 : i32
    %1 = arith.addi %0, %c-1_i32 : i32
    %c0_i32 = arith.constant 0 : i32
    %c15_i32 = arith.constant 15 : i32
    %2 = arith.maxsi %c0_i32, %1 : i32
    %3 = arith.minsi %c15_i32, %2 : i32
    %c0_i32_0 = arith.constant 0 : i32
    %c0_i32_1 = arith.constant 0 : i32
    %c0_i32_2 = arith.constant 0 : i32
    return %arg0, %3, %c0_i32_0, %c0_i32_1 : i32, i32, i32, i32
  }
  func.func @transform_2(%arg0: i32, %arg1: i32) -> (i32, i32, i32, i32) {
    %c0_i32 = arith.constant 0 : i32
    %c0_i32_0 = arith.constant 0 : i32
    %c0_i32_1 = arith.constant 0 : i32
    return %arg0, %arg1, %c0_i32, %c0_i32_0 : i32, i32, i32, i32
  }
  func.func @transform_3(%arg0: i32, %arg1: i32) -> (i32, i32, i32, i32) {
    %c4_i32 = arith.constant 4 : i32
    %0 = arith.muli %arg1, %c4_i32 : i32
    %c4_i32_0 = arith.constant 4 : i32
    %1 = arith.addi %0, %c4_i32_0 : i32
    %c0_i32 = arith.constant 0 : i32
    %c15_i32 = arith.constant 15 : i32
    %2 = arith.maxsi %c0_i32, %1 : i32
    %3 = arith.minsi %c15_i32, %2 : i32
    %c0_i32_1 = arith.constant 0 : i32
    %c0_i32_2 = arith.constant 0 : i32
    %c0_i32_3 = arith.constant 0 : i32
    return %arg0, %3, %c0_i32_1, %c0_i32_2 : i32, i32, i32, i32
  }
  func.func @transform_4(%arg0: i32, %arg1: i32) -> (i32, i32, i32, i32) {
    %c4_i32 = arith.constant 4 : i32
    %0 = arith.muli %arg1, %c4_i32 : i32
    %c5_i32 = arith.constant 5 : i32
    %1 = arith.addi %0, %c5_i32 : i32
    %c0_i32 = arith.constant 0 : i32
    %c15_i32 = arith.constant 15 : i32
    %2 = arith.maxsi %c0_i32, %1 : i32
    %3 = arith.minsi %c15_i32, %2 : i32
    %c0_i32_0 = arith.constant 0 : i32
    %c0_i32_1 = arith.constant 0 : i32
    %c0_i32_2 = arith.constant 0 : i32
    return %arg0, %3, %c0_i32_0, %c0_i32_1 : i32, i32, i32, i32
  }
  func.func @transform_5(%arg0: i32, %arg1: i32) -> (i32, i32) {
    %c0_i32 = arith.constant 0 : i32
    %c0_i32_0 = arith.constant 0 : i32
    %c0_i32_1 = arith.constant 0 : i32
    return %c0_i32, %c0_i32_0 : i32, i32
  }
  func.func @transform_6(%arg0: i32, %arg1: i32) -> (i32, i32) {
    %c0_i32 = arith.constant 0 : i32
    %c0_i32_0 = arith.constant 0 : i32
    %c0_i32_1 = arith.constant 0 : i32
    return %c0_i32, %c0_i32_0 : i32, i32
  }
  func.func @transform_7(%arg0: i32, %arg1: i32) -> (i32, i32) {
    %c0_i32 = arith.constant 0 : i32
    %c0_i32_0 = arith.constant 0 : i32
    %c0_i32_1 = arith.constant 0 : i32
    return %c0_i32, %c0_i32_0 : i32, i32
  }
  func.func @transform_8(%arg0: i32, %arg1: i32) -> (i32, i32) {
    %c0_i32 = arith.constant 0 : i32
    %c0_i32_0 = arith.constant 0 : i32
    %c0_i32_1 = arith.constant 0 : i32
    return %c0_i32, %c0_i32_0 : i32, i32
  }
  func.func @transform_9(%arg0: i32, %arg1: i32) -> (i32, i32, i32, i32) {
    %c0_i32 = arith.constant 0 : i32
    %c0_i32_0 = arith.constant 0 : i32
    %c0_i32_1 = arith.constant 0 : i32
    return %arg0, %arg1, %c0_i32, %c0_i32_0 : i32, i32, i32, i32
  }
}

module attributes {stable_mosaic.version = 11 : i64} {
  func.func @kernel(%arg0: i32, %arg1: i32, %arg2: memref<1x1x34x32xf32, #tpu.memory_space<vmem>>, %arg3: memref<1x4x34x32xf32, #tpu.memory_space<vmem>>, %arg4: memref<1x1x34x32xf32, #tpu.memory_space<vmem>>, %arg5: memref<288x3xbf16, #tpu.memory_space<vmem>>, %arg6: memref<1x3xf32, #tpu.memory_space<vmem>>, %arg7: memref<1x4x34x3xf32, #tpu.memory_space<vmem>>, %arg8: memref<6x34x32xbf16, #tpu.memory_space<vmem>>, %arg9: memref<128x288xbf16, #tpu.memory_space<vmem>>) attributes {dimension_semantics = [#tpu.dimension_semantics<parallel>, #tpu.dimension_semantics<parallel>], iteration_bounds = array<i64: 2, 8>, scalar_prefetch = 0 : i64, scratch_operands = 2 : i64, tpu.core_type = #tpu.core_type<tc>, window_params = [{transform_indices = @transform_0, window_bounds = array<i64: 1, 1, 34, 32>}, {transform_indices = @transform_1, window_bounds = array<i64: 1, 4, 34, 32>}, {transform_indices = @transform_2, window_bounds = array<i64: 1, 1, 34, 32>}, {pipeline_mode = #tpu.pipeline_mode<synchronous>, transform_indices = @transform_3, window_bounds = array<i64: 288, 3>}, {pipeline_mode = #tpu.pipeline_mode<synchronous>, transform_indices = @transform_4, window_bounds = array<i64: 1, 3>}, {transform_indices = @transform_5, window_bounds = array<i64: 1, 4, 34, 3>}]} {
    %c0 = arith.constant 0 : index
    %c0_0 = arith.constant 0 : index
    %c0_1 = arith.constant 0 : index
    %c0_2 = arith.constant 0 : index
    %0 = vector.load %arg2[%c0, %c0_0, %c0_1, %c0_2] : memref<1x1x34x32xf32, #tpu.memory_space<vmem>>, vector<1x1x34x32xf32>
    %1 = vector.shape_cast %0 : vector<1x1x34x32xf32> to vector<1x34x32xf32>
    %2 = arith.truncf %1 : vector<1x34x32xf32> to vector<1x34x32xbf16>
    %c0_3 = arith.constant 0 : index
    %c0_4 = arith.constant 0 : index
    %c0_5 = arith.constant 0 : index
    %c0_6 = arith.constant 0 : index
    %3 = vector.load %arg4[%c0_3, %c0_4, %c0_5, %c0_6] : memref<1x1x34x32xf32, #tpu.memory_space<vmem>>, vector<1x1x34x32xf32>
    %4 = vector.shape_cast %3 : vector<1x1x34x32xf32> to vector<1x34x32xf32>
    %5 = arith.truncf %4 : vector<1x34x32xf32> to vector<1x34x32xbf16>
    %c0_i32 = arith.constant 0 : i32
    %6 = arith.cmpi eq, %arg1, %c0_i32 : i32
    %cst = arith.constant 0.000000e+00 : bf16
    %7 = vector.broadcast %cst : bf16 to vector<1x34x32xbf16>
    %8 = arith.select %6, %7, %2 : vector<1x34x32xbf16>
    %c0_7 = arith.constant 0 : index
    %c0_8 = arith.constant 0 : index
    %c0_9 = arith.constant 0 : index
    %9 = vector.load %arg8[%c0_7, %c0_8, %c0_9] : memref<6x34x32xbf16, #tpu.memory_space<vmem>>, vector<1x34x32xbf16>
    tpu.vector_store %arg8[%c0_7, %c0_8, %c0_9], %8 {strides = array<i32>} : memref<6x34x32xbf16, #tpu.memory_space<vmem>>, vector<1x34x32xbf16>,
    %c0_10 = arith.constant 0 : index
    %c0_11 = arith.constant 0 : index
    %c0_12 = arith.constant 0 : index
    %c0_13 = arith.constant 0 : index
    %10 = vector.load %arg3[%c0_10, %c0_11, %c0_12, %c0_13] : memref<1x4x34x32xf32, #tpu.memory_space<vmem>>, vector<1x4x34x32xf32>
    %11 = vector.shape_cast %10 : vector<1x4x34x32xf32> to vector<4x34x32xf32>
    %12 = arith.truncf %11 : vector<4x34x32xf32> to vector<4x34x32xbf16>
    %c1 = arith.constant 1 : index
    %c0_14 = arith.constant 0 : index
    %c0_15 = arith.constant 0 : index
    %13 = vector.load %arg8[%c1, %c0_14, %c0_15] : memref<6x34x32xbf16, #tpu.memory_space<vmem>>, vector<4x34x32xbf16>
    tpu.vector_store %arg8[%c1, %c0_14, %c0_15], %12 {strides = array<i32>} : memref<6x34x32xbf16, #tpu.memory_space<vmem>>, vector<4x34x32xbf16>,
    %c7_i32 = arith.constant 7 : i32
    %14 = arith.cmpi eq, %arg1, %c7_i32 : i32
    %cst_16 = arith.constant 0.000000e+00 : bf16
    %15 = vector.broadcast %cst_16 : bf16 to vector<1x34x32xbf16>
    %16 = arith.select %14, %15, %5 : vector<1x34x32xbf16>
    %c5 = arith.constant 5 : index
    %c0_17 = arith.constant 0 : index
    %c0_18 = arith.constant 0 : index
    %17 = vector.load %arg8[%c5, %c0_17, %c0_18] : memref<6x34x32xbf16, #tpu.memory_space<vmem>>, vector<1x34x32xbf16>
    tpu.vector_store %arg8[%c5, %c0_17, %c0_18], %16 {strides = array<i32>} : memref<6x34x32xbf16, #tpu.memory_space<vmem>>, vector<1x34x32xbf16>,
    %c0_19 = arith.constant 0 : index
    %c0_20 = arith.constant 0 : index
    %c0_21 = arith.constant 0 : index
    %18 = vector.load %arg8[%c0_19, %c0_20, %c0_21] : memref<6x34x32xbf16, #tpu.memory_space<vmem>>, vector<6x32x32xbf16>
    %19 = vector.shape_cast %18 : vector<6x32x32xbf16> to vector<192x32xbf16>
    %20 = vector.extract_strided_slice %19 {offsets = [0, 0], sizes = [128, 32], strides = [1, 1]} : vector<192x32xbf16> to vector<128x32xbf16>
    %c0_22 = arith.constant 0 : index
    %c0_23 = arith.constant 0 : index
    %21 = vector.load %arg9[%c0_22, %c0_23] : memref<128x288xbf16, #tpu.memory_space<vmem>>, vector<128x32xbf16>
    tpu.vector_store %arg9[%c0_22, %c0_23], %20 {strides = array<i32>} : memref<128x288xbf16, #tpu.memory_space<vmem>>, vector<128x32xbf16>,
    %22 = vector.extract_strided_slice %19 {offsets = [32, 0], sizes = [128, 32], strides = [1, 1]} : vector<192x32xbf16> to vector<128x32xbf16>
    %c0_24 = arith.constant 0 : index
    %c32 = arith.constant 32 : index
    %23 = vector.load %arg9[%c0_24, %c32] : memref<128x288xbf16, #tpu.memory_space<vmem>>, vector<128x32xbf16>
    tpu.vector_store %arg9[%c0_24, %c32], %22 {strides = array<i32>} : memref<128x288xbf16, #tpu.memory_space<vmem>>, vector<128x32xbf16>,
    %24 = vector.extract_strided_slice %19 {offsets = [64, 0], sizes = [128, 32], strides = [1, 1]} : vector<192x32xbf16> to vector<128x32xbf16>
    %c0_25 = arith.constant 0 : index
    %c64 = arith.constant 64 : index
    %25 = vector.load %arg9[%c0_25, %c64] : memref<128x288xbf16, #tpu.memory_space<vmem>>, vector<128x32xbf16>
    tpu.vector_store %arg9[%c0_25, %c64], %24 {strides = array<i32>} : memref<128x288xbf16, #tpu.memory_space<vmem>>, vector<128x32xbf16>,
    %c0_26 = arith.constant 0 : index
    %c1_27 = arith.constant 1 : index
    %c0_28 = arith.constant 0 : index
    %26 = vector.load %arg8[%c0_26, %c1_27, %c0_28] : memref<6x34x32xbf16, #tpu.memory_space<vmem>>, vector<6x32x32xbf16>
    %27 = vector.shape_cast %26 : vector<6x32x32xbf16> to vector<192x32xbf16>
    %28 = vector.extract_strided_slice %27 {offsets = [0, 0], sizes = [128, 32], strides = [1, 1]} : vector<192x32xbf16> to vector<128x32xbf16>
    %c0_29 = arith.constant 0 : index
    %c96 = arith.constant 96 : index
    %29 = vector.load %arg9[%c0_29, %c96] : memref<128x288xbf16, #tpu.memory_space<vmem>>, vector<128x32xbf16>
    tpu.vector_store %arg9[%c0_29, %c96], %28 {strides = array<i32>} : memref<128x288xbf16, #tpu.memory_space<vmem>>, vector<128x32xbf16>,
    %30 = vector.extract_strided_slice %27 {offsets = [32, 0], sizes = [128, 32], strides = [1, 1]} : vector<192x32xbf16> to vector<128x32xbf16>
    %c0_30 = arith.constant 0 : index
    %c128 = arith.constant 128 : index
    %31 = vector.load %arg9[%c0_30, %c128] : memref<128x288xbf16, #tpu.memory_space<vmem>>, vector<128x32xbf16>
    tpu.vector_store %arg9[%c0_30, %c128], %30 {strides = array<i32>} : memref<128x288xbf16, #tpu.memory_space<vmem>>, vector<128x32xbf16>,
    %32 = vector.extract_strided_slice %27 {offsets = [64, 0], sizes = [128, 32], strides = [1, 1]} : vector<192x32xbf16> to vector<128x32xbf16>
    %c0_31 = arith.constant 0 : index
    %c160 = arith.constant 160 : index
    %33 = vector.load %arg9[%c0_31, %c160] : memref<128x288xbf16, #tpu.memory_space<vmem>>, vector<128x32xbf16>
    tpu.vector_store %arg9[%c0_31, %c160], %32 {strides = array<i32>} : memref<128x288xbf16, #tpu.memory_space<vmem>>, vector<128x32xbf16>,
    %c0_32 = arith.constant 0 : index
    %c2 = arith.constant 2 : index
    %c0_33 = arith.constant 0 : index
    %34 = vector.load %arg8[%c0_32, %c2, %c0_33] : memref<6x34x32xbf16, #tpu.memory_space<vmem>>, vector<6x32x32xbf16>
    %35 = vector.shape_cast %34 : vector<6x32x32xbf16> to vector<192x32xbf16>
    %36 = vector.extract_strided_slice %35 {offsets = [0, 0], sizes = [128, 32], strides = [1, 1]} : vector<192x32xbf16> to vector<128x32xbf16>
    %c0_34 = arith.constant 0 : index
    %c192 = arith.constant 192 : index
    %37 = vector.load %arg9[%c0_34, %c192] : memref<128x288xbf16, #tpu.memory_space<vmem>>, vector<128x32xbf16>
    tpu.vector_store %arg9[%c0_34, %c192], %36 {strides = array<i32>} : memref<128x288xbf16, #tpu.memory_space<vmem>>, vector<128x32xbf16>,
    %38 = vector.extract_strided_slice %35 {offsets = [32, 0], sizes = [128, 32], strides = [1, 1]} : vector<192x32xbf16> to vector<128x32xbf16>
    %c0_35 = arith.constant 0 : index
    %c224 = arith.constant 224 : index
    %39 = vector.load %arg9[%c0_35, %c224] : memref<128x288xbf16, #tpu.memory_space<vmem>>, vector<128x32xbf16>
    tpu.vector_store %arg9[%c0_35, %c224], %38 {strides = array<i32>} : memref<128x288xbf16, #tpu.memory_space<vmem>>, vector<128x32xbf16>,
    %40 = vector.extract_strided_slice %35 {offsets = [64, 0], sizes = [128, 32], strides = [1, 1]} : vector<192x32xbf16> to vector<128x32xbf16>
    %c0_36 = arith.constant 0 : index
    %c256 = arith.constant 256 : index
    %41 = vector.load %arg9[%c0_36, %c256] : memref<128x288xbf16, #tpu.memory_space<vmem>>, vector<128x32xbf16>
    tpu.vector_store %arg9[%c0_36, %c256], %40 {strides = array<i32>} : memref<128x288xbf16, #tpu.memory_space<vmem>>, vector<128x32xbf16>,
    %c0_37 = arith.constant 0 : index
    %c0_38 = arith.constant 0 : index
    %42 = vector.load %arg9[%c0_37, %c0_38] : memref<128x288xbf16, #tpu.memory_space<vmem>>, vector<128x288xbf16>
    %c0_39 = arith.constant 0 : index
    %c0_40 = arith.constant 0 : index
    %43 = vector.load %arg5[%c0_39, %c0_40] : memref<288x3xbf16, #tpu.memory_space<vmem>>, vector<288x3xbf16>
    %cst_41 = arith.constant dense<0.000000e+00> : vector<128x3xf32>
    %44 = tpu.matmul %42, %43, %cst_41 {dimension_numbers = #tpu.dot_dimension_numbers<[1], [0], [0], [1], [0, 0, 1, 1], [], []>} : vector<128x288xbf16>, vector<288x3xbf16>, vector<128x3xf32> -> vector<128x3xf32>
    %c0_42 = arith.constant 0 : index
    %c0_43 = arith.constant 0 : index
    %45 = vector.load %arg6[%c0_42, %c0_43] : memref<1x3xf32, #tpu.memory_space<vmem>>, vector<1x3xf32>
    %46 = vector.broadcast %45 : vector<1x3xf32> to vector<128x3xf32>
    %47 = arith.addf %44, %46 : vector<128x3xf32>
    %48 = vector.shape_cast %47 : vector<128x3xf32> to vector<4x32x3xf32>
    %c0_44 = arith.constant 0 : index
    %c0_45 = arith.constant 0 : index
    %c1_46 = arith.constant 1 : index
    %c0_47 = arith.constant 0 : index
    %49 = vector.load %arg7[%c0_44, %c0_45, %c1_46, %c0_47] : memref<1x4x34x3xf32, #tpu.memory_space<vmem>>, vector<1x4x32x3xf32>
    %50 = vector.shape_cast %49 : vector<1x4x32x3xf32> to vector<4x32x3xf32>
    %51 = vector.shape_cast %48 : vector<4x32x3xf32> to vector<1x4x32x3xf32>
    tpu.vector_store %arg7[%c0_44, %c0_45, %c1_46, %c0_47], %51 {strides = array<i32>} : memref<1x4x34x3xf32, #tpu.memory_space<vmem>>, vector<1x4x32x3xf32>,
    %cst_48 = arith.constant 0.000000e+00 : f32
    %52 = vector.broadcast %cst_48 : f32 to vector<4x1x3xf32>
    %c0_49 = arith.constant 0 : index
    %c0_50 = arith.constant 0 : index
    %c0_51 = arith.constant 0 : index
    %c0_52 = arith.constant 0 : index
    %53 = vector.load %arg7[%c0_49, %c0_50, %c0_51, %c0_52] : memref<1x4x34x3xf32, #tpu.memory_space<vmem>>, vector<1x4x1x3xf32>
    %54 = vector.shape_cast %53 : vector<1x4x1x3xf32> to vector<4x1x3xf32>
    %55 = vector.shape_cast %52 : vector<4x1x3xf32> to vector<1x4x1x3xf32>
    tpu.vector_store %arg7[%c0_49, %c0_50, %c0_51, %c0_52], %55 {strides = array<i32>} : memref<1x4x34x3xf32, #tpu.memory_space<vmem>>, vector<1x4x1x3xf32>,
    %c0_53 = arith.constant 0 : index
    %c0_54 = arith.constant 0 : index
    %c33 = arith.constant 33 : index
    %c0_55 = arith.constant 0 : index
    %56 = vector.load %arg7[%c0_53, %c0_54, %c33, %c0_55] : memref<1x4x34x3xf32, #tpu.memory_space<vmem>>, vector<1x4x1x3xf32>
    %57 = vector.shape_cast %56 : vector<1x4x1x3xf32> to vector<4x1x3xf32>
    %58 = vector.shape_cast %52 : vector<4x1x3xf32> to vector<1x4x1x3xf32>
    tpu.vector_store %arg7[%c0_53, %c0_54, %c33, %c0_55], %58 {strides = array<i32>} : memref<1x4x34x3xf32, #tpu.memory_space<vmem>>, vector<1x4x1x3xf32>,
    return
  }
  func.func @transform_0(%arg0: i32, %arg1: i32) -> (i32, i32, i32, i32) {
    %c4_i32 = arith.constant 4 : i32
    %0 = arith.muli %arg1, %c4_i32 : i32
    %c1_i32 = arith.constant 1 : i32
    %1 = arith.subi %0, %c1_i32 : i32
    %c0_i32 = arith.constant 0 : i32
    %2 = arith.maxsi %1, %c0_i32 : i32
    %c0_i32_0 = arith.constant 0 : i32
    %c0_i32_1 = arith.constant 0 : i32
    %c0_i32_2 = arith.constant 0 : i32
    return %arg0, %2, %c0_i32_0, %c0_i32_1 : i32, i32, i32, i32
  }
  func.func @transform_1(%arg0: i32, %arg1: i32) -> (i32, i32, i32, i32) {
    %c0_i32 = arith.constant 0 : i32
    %c0_i32_0 = arith.constant 0 : i32
    %c0_i32_1 = arith.constant 0 : i32
    return %arg0, %arg1, %c0_i32, %c0_i32_0 : i32, i32, i32, i32
  }
  func.func @transform_2(%arg0: i32, %arg1: i32) -> (i32, i32, i32, i32) {
    %c4_i32 = arith.constant 4 : i32
    %0 = arith.muli %arg1, %c4_i32 : i32
    %c4_i32_0 = arith.constant 4 : i32
    %1 = arith.addi %0, %c4_i32_0 : i32
    %c31_i32 = arith.constant 31 : i32
    %2 = arith.minsi %1, %c31_i32 : i32
    %c0_i32 = arith.constant 0 : i32
    %c0_i32_1 = arith.constant 0 : i32
    %c0_i32_2 = arith.constant 0 : i32
    return %arg0, %2, %c0_i32, %c0_i32_1 : i32, i32, i32, i32
  }
  func.func @transform_3(%arg0: i32, %arg1: i32) -> (i32, i32) {
    %c0_i32 = arith.constant 0 : i32
    %c0_i32_0 = arith.constant 0 : i32
    %c0_i32_1 = arith.constant 0 : i32
    return %c0_i32, %c0_i32_0 : i32, i32
  }
  func.func @transform_4(%arg0: i32, %arg1: i32) -> (i32, i32) {
    %c0_i32 = arith.constant 0 : i32
    %c0_i32_0 = arith.constant 0 : i32
    %c0_i32_1 = arith.constant 0 : i32
    return %c0_i32, %c0_i32_0 : i32, i32
  }
  func.func @transform_5(%arg0: i32, %arg1: i32) -> (i32, i32, i32, i32) {
    %c0_i32 = arith.constant 0 : i32
    %c0_i32_0 = arith.constant 0 : i32
    %c0_i32_1 = arith.constant 0 : i32
    return %arg0, %arg1, %c0_i32, %c0_i32_0 : i32, i32, i32, i32
  }
}

</mosaic_0001>

<bundles_post_ra>
// kernel: _lambda_.6
= control target key start
LH: loop header
LB: loop body
LE: loop exit
PB: predicated region body
PF: predicated region fallthrough
CT: control target
= control target key end

     0   :  { %10 = vsyncpa [#allocation5], 0  ;;  %s1591_s18 = smov 0   ;;  %s1593_s19 = smov 0   ;;  %s1917_s0 = inlined_call_operand.vmem [shape: f32[2,16,18,3], index: 0, kind: input, shape index: {}, may-alias: {0,1,2}]   ;;  %s1918_s1 = inlined_call_operand.vmem [shape: f32[2,16,18,3], index: 1, kind: input, shape index: {}, may-alias: {0,1,2}]   ;;  %s1919_s2 = inlined_call_operand.vmem [shape: f32[2,16,18,3], index: 2, kind: input, shape index: {}, may-alias: {0,1,2}]   ;;  %s1920_s3 = inlined_call_operand.vmem [shape: bf16[27,32], index: 3, kind: input, shape index: {}]   ;;  %s1921_s4 = inlined_call_operand.hbm [shape: f32[1,32], index: 4, kind: input, shape index: {}]   ;;  %s1922_s5 = inlined_call_operand.vmem [shape: f32[2,16,18,32], index: 5, kind: output, shape index: {}]  }
   0x1   :  { %s1595_s20 = smov 0   ;;  %s1597_s21 = smov 0  }
   0x2   :  { %s1599_s22 = smov 0  }
   0x3 LB: > { %s1288_s23 = sadd.s32 4294967295, %s1548_s22   ;;  %s25_s24 = sadd.s32 1, %s1540_s20  ;;  %s1548_s22 = sphi %s1599_s22, %s16_s22   ;;  %s1544_s21 = sphi %s1597_s21, %s1941_s21   ;;  %s1540_s20 = sphi %s1595_s20, %s1940_s20   ;;  %s1536_s19 = sphi %s1593_s19, %s1939_s19   ;;  %s1532_s18 = sphi %s1591_s18, %s1938_s18  }
   0x4   : > { %p26_p0 = scmp.ge.s32.totalorder %s25_s24, 4  ;;  %s28_s25 = sadd.s32 1, %s1544_s21 }
   0x5   : > { %p1296_p1 = scmp.ge.s32.totalorder %s1548_s22, 1  ;;  %p203_p2 = scmp.lt.s32.totalorder %s1548_s22, 9 }
   0x6   : > { %s1943_s24 = smov (%p26_p0, %s25_s24), 0  ;;  %s1945_s25 = smov (!%p26_p0, %s28_s25), %s1544_s21 }
   0x7   : > { %p1624_p3 = pnand %p1296_p1, %p203_p2  ;;  %p30_p4 = scmp.ge.s32.totalorder %s1945_s25, 2 }
   0x8   : > { %p1628_p5 = scmp.eq.s32.totalorder %s1288_s23, 0  ;;  %s1550_s28 = smov [#allocation4]  }
   0x9   : > { %s1926_s26 = scalar_select %p1624_p3, 1, 0 }
   0xa   : > { %s1927_s27 = scalar_select %p1628_p5, 1, 0 }
   0xb   : > { %p1413_p6 = pneg %p1624_p3  ;;  %s1947_s25 = smov (%p30_p4, %s1945_s25), 0 }
   0xc   : > { %s219_s29 = sshll.u32 %s1550_s28, 4  ;;  %s1478_s8 = scalar_lea.hbm %s1921_s4, 16  ;;  %s220_s29 = int_to_ptr.vmem [resolvable:$true] %s219_s29 }
   0xd   : > { %p1638_p7 = pnand %p1628_p5, %p1413_p6  ;;  %p1479_p8 = scmp.ne.s32.totalorder %s1921_s4, %s1478_s8 }
   0xe   : > { %p1485_p12 = scmp.lt.u32.totalorder %s1478_s8, %s1921_s4 }
   0xf   : > { %p1480_p9 = pneg %p1638_p7 }
  0x11   : > { %p1481_p10 = pnand %p1480_p9, %p1479_p8 }
  0x13   : > { %p1482_p11 = pneg %p1481_p10 }
  0x15   : > { %p1487_p13 = pnand %p1485_p12, %p1482_p11 }
  0x17   : > { %1490 = shalt.err (!%p1487_p13)
}
  0x18   : > { %s1491_s13 = scalar_lea.vmem %s220_s29, 16  ;;  %s1498_s14 = scalar_lea.vmem %s220_s29, 32 }
  0x19   : > { %p1492_p0 = scmp.ne.s32.totalorder %s220_s29, %s1491_s13  ;;  %p1499_p4 = scmp.lt.s32.totalorder %s220_s29, %s220_s29 }
  0x1a   : > { %p1500_p6 = scmp.lt.s32.totalorder %s1498_s14, %s1491_s13 }
  0x1b   : > { %p1494_p1 = pnand %p1492_p0, %p1480_p9 }
  0x1c   : > { %p1501_p5 = por %p1500_p6, %p1499_p4 }
  0x1d   : > { %p1495_p2 = pneg %p1494_p1 }
  0x1f   : > { %p1502_p3 = pnand %p1501_p5, %p1495_p2 }
  0x21   : > { %1505 = shalt.err (!%p1502_p3)
}
  0x22   : > { %1416 = dma.hbm_to_vmem [thread:$0]  (!%p1638_p7), %s1921_s4, 16, %s220_s29, [#allocation5]  }
  0x23   : > { %p1929_p8 = scmp.ne.s32.totalorder %s1926_s26, 0 }
  0x24   : > { %p1930_p10 = scmp.ne.s32.totalorder (!%p1929_p8), %s1927_s27, 0 }
  0x25   : > { %286 = sbr.rel (%p1929_p8) target bundleno = 478 (0x1de), region = 40 }
  0x2c   : > { %1527 = dma.done.wait (%p1930_p10), [#allocation5], 16  }
  0x2d   : > { %1529 = vsyncadd (%p1930_p10), [#allocation5], 4294967280  ;;  %s1665_s17 = sshll.u32 %s1532_s18, 2  ;;  %p354_p3 = scmp.lt.s32.totalorder %s1536_s19, 1  ;;  %vm434_vm0 = vcmask 19456   ;;  %vm437_vm1 = vcmask 16384  }
  0x2e   : > { %p370_p5 = scmp.lt.s32.totalorder %s1665_s17, 15  ;;  %s379_s29 = sadd.s32 4, %s1665_s17  ;;  %vm573_vm2 = vcmask 23552   ;;  %vm640_vm4 = vsmask.f32 3328  ;;  %vm892_vm8 = vcmask 1042432  }
  0x2f   : > { %s1949_s19 = smov (!%p354_p3, %s1536_s19), 1  ;;  %p1674_p7 = scmp.lt.s32.totalorder %s379_s29, 15  ;;  %vm641_vm5 = vsmask.f32 7440  ;;  %vm893_vm9 = vcmask 1046532   ;;  %vm1045_vm11 = vcmask 1044480  }
  0x30   : > { %s371_s23 = scalar_select %p370_p5, %s1665_s17, 15  ;;  %vm1748_vm6 = vmor %vm640_vm4, %vm641_vm5  ;;  %vm1046_vm12 = vcmask 1045504   ;;  %vm595_vm13 = vcmask 48152   ;;  %vm617_vm14 = vcmask 72752   ;;  %vm811_vm15 = vcmask 97352  }
  0x31   : > { %s1671_s26 = smul.u32 48, %s1949_s19  ;;  %p516_p9 = scmp.eq.s32.totalorder %s1532_s18, 3  ;;  %vm1793_vm10 = vmor %vm892_vm8, %vm893_vm9  ;;  %vm1001_vm4 = vcmask 220352   ;;  %vm1032_vm5 = vcmask 220160  }
  0x32   : > { %s1407_s28 = smul.u32 3, %s371_s23  ;;  %s1951_s29 = smov (!%p1674_p7, %s379_s29), 15 }
  0x33   : > { %s1692_s9 = scalar_select %p516_p9, 1, 0 }
  0x34   : > { %s1679_s30 = sadd.s32 %s1407_s28, %s1671_s26  ;;  %s1953_s29 = smov (!%p1674_p7, %s1951_s29), 15 }
  0x35   : > { %s1310_s6 = sshll.u32 %s1679_s30, 3  ;;  %s1408_s10 = smul.u32 3, %s1953_s29  ;;  %v518_v24 = vstv %s1692_s9 }
  0x36   : > { %s376_s19 = scalar_lea.vmem %s1918_s1, %s1310_s6  ;;  %s1703_s11 = sadd.s32 4294967295, %s1665_s17  ;;  %vm1717_vm3 = vcmp.eq.s32.totalorder %v518_v24, 1 }
  0x37   : > { %v442_v0 = vld [vmem:[%s376_s19 + $0x18] sm:$0xff]  ;;  %v443_v1 = vld [vmem:[%s376_s19 + $0x20] sm:$0xff]  ;;  %v440_v5 = vld [vmem:[%s376_s19 + $0x8] sm:$0xff]  ;;  %s388_s12 = sadd.s32 %s1408_s10, %s1671_s26  ;;  %p352_p11 = scmp.gt.s32.totalorder %s1703_s11, 0 }
  0x38   : > { %v439_v2 = vld [vmem:[%s376_s19] sm:$0xff]  ;;  %v1374_v3 = vpack.c.bf16 %v442_v0, %v442_v0  ;;  %v1375_v4 = vpack.c.bf16 %v443_v1, %v443_v1  ;;  %v448_v7 = vld [vmem:[%s376_s19 + $0x48] sm:$0xff]  ;;  %v449_v8 = vld [vmem:[%s376_s19 + $0x50] sm:$0xff]  ;;  %v1372_v9 = vpack.c.bf16 %v440_v5, %v440_v5  ;;  %s1315_s13 = sshll.u32 %s388_s12, 3  ;;  %p1303_p12 = scmp.lt.s32.totalorder %s1703_s11, 15 }
  0x39   : > { %v1371_v6 = vpack.c.bf16 %v439_v2, %v439_v2  ;;  %v1380_v10 = vpack.c.bf16 %v448_v7, %v448_v7  ;;  %v1381_v11 = vpack.c.bf16 %v449_v8, %v449_v8  ;;  %v445_v12 = vld [vmem:[%s376_s19 + $0x30] sm:$0xff]  ;;  %v446_v13 = vld [vmem:[%s376_s19 + $0x38] sm:$0xff]  ;;  %v444_v18 = vld [vmem:[%s376_s19 + $0x28] sm:$0x3]  ;;  %s390_s16 = scalar_lea.vmem %s1919_s2, %s1315_s13  ;;  %s1551_s23 = smov 3  }
  0x3a   : > { %v441_v14 = vld [vmem:[%s376_s19 + $0x10] sm:$0x3]  ;;  %507 = vst.msk [vmem:[#allocation2 + $0x18] sm:$0xf] %vm434_vm0, %v1374_v3  ;;  %508 = vst.msk [vmem:[#allocation2 + $0x1c] sm:$0xf] %vm434_vm0, %v1375_v4  ;;  %v1377_v15 = vpack.c.bf16 %v445_v12, %v445_v12  ;;  %v1378_v16 = vpack.c.bf16 %v446_v13, %v446_v13  ;;  %v1376_v21 = vpack.c.bf16 %v444_v18, %v444_v18 }
  0x3b   : > { %504 = vst.msk [vmem:[#allocation2 + $0xc] sm:$0xf] %vm434_vm0, %v1371_v6  ;;  %v1373_v17 = vpack.c.bf16 %v441_v14, %v441_v14  ;;  %v447_v19 = vld [vmem:[%s376_s19 + $0x40] sm:$0x3]  ;;  %v450_v20 = vld [vmem:[%s376_s19 + $0x58] sm:$0x3] }
  0x3c   : > { %505 = vst.msk [vmem:[#allocation2 + $0x10] sm:$0xf] %vm434_vm0, %v1372_v9  ;;  %513 = vst.msk [vmem:[#allocation2 + $0x30] sm:$0xf] %vm434_vm0, %v1380_v10  ;;  %v1379_v22 = vpack.c.bf16 %v447_v19, %v447_v19  ;;  %v1382_v23 = vpack.c.bf16 %v450_v20, %v450_v20  ;;  %v412_v25 = vld [vmem:[%s390_s16] sm:$0xff]  ;;  %v413_v26 = vld [vmem:[%s390_s16 + $0x8] sm:$0xff] }
  0x3d   : > { %514 = vst.msk [vmem:[#allocation2 + $0x34] sm:$0xf] %vm434_vm0, %v1381_v11  ;;  %510 = vst.msk [vmem:[#allocation2 + $0x24] sm:$0xf] %vm434_vm0, %v1377_v15  ;;  %v414_v27 = vld [vmem:[%s390_s16 + $0x10] sm:$0x3]  ;;  %v415_v30 = vpack.c.bf16 %v413_v26, %v412_v25 }
  0x3e   : > { %511 = vst.msk [vmem:[#allocation2 + $0x28] sm:$0xf] %vm434_vm0, %v1378_v16  ;;  %v416_v31 = vpack.c.bf16 %v414_v27, %v414_v27  ;;  %s1725_s17 = scalar_select %p352_p11, %s1703_s11, 0 }
  0x3f   : > { %506 = vst.msk [vmem:[#allocation2 + $0x14] sm:$0x1] %vm437_vm1, %v1373_v17  ;;  %509 = vst.msk [vmem:[#allocation2 + $0x20] sm:$0x1] %vm437_vm1, %v1376_v21  ;;  %v520_v34 = vsel %vm1717_vm3, 0, %v415_v30  ;;  %s1552_s28 = smov 6  }
  0x40   : > { %512 = vst.msk [vmem:[#allocation2 + $0x2c] sm:$0x1] %vm437_vm1, %v1379_v22  ;;  %515 = vst.msk [vmem:[#allocation2 + $0x38] sm:$0x1] %vm437_vm1, %v1382_v23  ;;  %v521_v36 = vsel %vm1717_vm3, 0, %v416_v31  ;;  %v1333_v37 = vcombine.low %v520_v34, %v520_v34  ;;  %v1334_v38 = vcombine.high %v520_v34, %v520_v34  ;;  %s1955_s17 = smov (!%p1303_p12, %s1725_s17), 15 }
  0x41   : > { %v1470_v29 = vld [vmem:[#allocation2 + $0x18] sm:$0xff]   ;;  %v1335_v39 = vcombine.low %v521_v36, %v521_v36  ;;  %s1405_s29 = smul.u32 3, %s1955_s17  ;;  %p417_p13 = scmp.eq.s32.totalorder %s1532_s18, 0  ;;  %vm981_vm3 = vcmask 195752  }
  0x42   : > { %585 = vrot.lane.b32.xlu1 %v1470_v29, %s1551_s23  ;;  %576 = vst.msk [vmem:[#allocation3 + $0x10] sm:$0xff] %vm573_vm2, %v1470_v29  ;;  %v625_v40 = vld [vmem:[#allocation2 + $0xc] sm:$0xf]  ;;  %v628_v47 = vld [vmem:[#allocation2 + $0x18] sm:$0xf]  ;;  %s1554_s11 = smov 12  }
  0x43   : > { %v1471_v32 = vld [vmem:[#allocation2 + $0xc] sm:$0xff]   ;;  %534 = vst.msk [vmem:[#allocation2 + $0x3c] sm:$0xf] %vm434_vm0, %v1333_v37  ;;  %535 = vst.msk [vmem:[#allocation2 + $0x40] sm:$0xf] %vm434_vm0, %v1334_v38  ;;  %v668_v43 = vshrl.u32 %v625_v40, 16  ;;  %s360_s27 = sadd.s32 %s1671_s26, %s1405_s29 }
  0x44   : > { %v1472_v33 = vld [vmem:[#allocation2 + $0x30] sm:$0xff]   ;;  %583 = vrot.lane.b32.xlu0 %v1471_v32, %s1551_s23  ;;  %575 = vst.msk [vmem:[#allocation3 + $0x8] sm:$0xff] %vm573_vm2, %v1471_v32  ;;  %v671_v44 = vshll.u32 %v625_v40, 16  ;;  %v629_v49 = vld [vmem:[#allocation2 + $0x1c] sm:$0xf]  ;;  %v692_v51 = vshrl.u32 %v628_v47, 16 }
  0x45   : > { %v1731_v35 = vld [vmem:[#allocation2 + $0x24] sm:$0xff]   ;;  %v626_v41 = vld [vmem:[#allocation2 + $0x10] sm:$0xf]  ;;  %536 = vst.msk [vmem:[#allocation2 + $0x44] sm:$0x1] %vm437_vm1, %v1335_v39  ;;  %v670_v52 = vrot.slane %v668_v43, 4 }
  0x46   : > { %v627_v42 = vld [vmem:[#allocation2 + $0x14] sm:$0x1]  ;;  %577 = vst.msk [vmem:[#allocation3 + $0x18] sm:$0xff] %vm573_vm2, %v1731_v35  ;;  %v677_v45 = vshll.u32 %v626_v41, 16  ;;  %v681_v46 = vshrl.u32 %v626_v41, 16  ;;  %589 = vrot.lane.b32.xlu1 %v1472_v33, %s1551_s23  ;;  %v673_v53 = vrot.slane %v671_v44, 5 }
  0x47   : > { %v687_v48 = vshll.u32 %v627_v42, 16  ;;  %v630_v50 = vld [vmem:[#allocation2 + $0x20] sm:$0x1]  ;;  %v631_v56 = vld [vmem:[#allocation2 + $0x24] sm:$0xf]  ;;  %v694_v58 = vrot.slane %v692_v51, 4 }
  0x48   : > { %587 = vrot.lane.b32.xlu0 %v1731_v35, %s1551_s23  ;;  %v679_v54 = vrot.slane %v677_v45, 5  ;;  %v683_v55 = vrot.slane %v681_v46, 4  ;;  %v695_v59 = vshll.u32 %v628_v47, 16  ;;  %v701_v60 = vshll.u32 %v629_v49, 16  ;;  %v632_v1 = vld [vmem:[#allocation2 + $0x28] sm:$0xf] }
  0x49   : > { %v689_v57 = vrot.slane %v687_v48, 5  ;;  %v674_v61 = vor.u32 %v673_v53, %v670_v52  ;;  %v705_v63 = vshrl.u32 %v629_v49, 16  ;;  %v711_v0 = vshll.u32 %v630_v50, 16  ;;  %v633_v5 = vld [vmem:[#allocation2 + $0x2c] sm:$0x1]  ;;  %s1308_s7 = sshll.u32 %s360_s27, 3  ;;  %s1876_s27 = scalar_lea.vmem %s1922_s5, %s1310_s6 }
  0x4a   : > { %v684_v62 = vor.u32 %v683_v55, %v679_v54  ;;  %609 = vrot.lane.b32.xlu1 %v1472_v33, %s1552_s28  ;;  %v697_v3 = vrot.slane %v695_v59, 5  ;;  %v703_v4 = vrot.slane %v701_v60, 5  ;;  %v716_v6 = vshrl.u32 %v631_v56, 16  ;;  %v634_v12 = vld [vmem:[#allocation2 + $0x30] sm:$0xf]  ;;  %v1474_v13 = vld [vmem:[#allocation2 + $0x3c] sm:$0xff]   ;;  %s362_s9 = scalar_lea.vmem %s1917_s0, %s1308_s7 }
  0x4b   : > { %v719_v7 = vshll.u32 %v631_v56, 16  ;;  %v675_v8 = vrot.slane %v674_v61, 4  ;;  %v707_v10 = vrot.slane %v705_v63, 4  ;;  %v713_v11 = vrot.slane %v711_v0, 5  ;;  %v635_v24 = vld [vmem:[#allocation2 + $0x34] sm:$0xf] }
  0x4c   : > { %605 = vrot.lane.b32.xlu0 %v1470_v29, %s1552_s28  ;;  %v685_v9 = vrot.slane %v684_v62, 4  ;;  %v698_v14 = vor.u32 %v697_v3, %v694_v58  ;;  %v718_v15 = vrot.slane %v716_v6, 4  ;;  %v725_v22 = vshll.u32 %v632_v1, 16  ;;  %v636_v28 = vld [vmem:[#allocation2 + $0x38] sm:$0x1]  ;;  %s1553_s26 = smov 9  }
  0x4d   : > { %v680_v16 = vsel %vm1748_vm6, %v675_v8, %v679_v54  ;;  %v708_v18 = vor.u32 %v707_v10, %v703_v4  ;;  %v721_v19 = vrot.slane %v719_v7, 5  ;;  %v729_v23 = vshrl.u32 %v632_v1, 16  ;;  %v637_v34 = vld [vmem:[#allocation2 + $0x3c] sm:$0xf]  ;;  %v638_v43 = vld [vmem:[#allocation2 + $0x40] sm:$0xf] }
  0x4e   : > { %v690_v17 = vsel %vm1748_vm6, %v685_v9, %v689_v57  ;;  %611 = vrot.lane.b32.xlu1 %v1474_v13, %s1552_s28  ;;  %v699_v21 = vrot.slane %v698_v14, 4  ;;  %v735_v27 = vshll.u32 %v633_v5, 16  ;;  %v740_v29 = vshrl.u32 %v634_v12, 16  ;;  %v639_v51 = vld [vmem:[#allocation2 + $0x44] sm:$0x1]  ;;  %v408_v57 = vld [vmem:[%s362_s9 + $0x8] sm:$0xff] }
  0x4f   : > { %v1343_v20 = vcombine.low %v680_v16, %v690_v17  ;;  %v709_v25 = vrot.slane %v708_v18, 4  ;;  %v722_v26 = vor.u32 %v721_v19, %v718_v15  ;;  %v727_v31 = vrot.slane %v725_v22, 5  ;;  %v407_v53 = vld [vmem:[%s362_s9] sm:$0xff]  ;;  %s418_s10 = scalar_select %p417_p13, 1, 0 }
  0x50   : > { %607 = vrot.lane.b32.xlu0 %v1731_v35, %s1552_s28  ;;  %v704_v30 = vsel %vm1748_vm6, %v699_v21, %v703_v4  ;;  %v731_v32 = vrot.slane %v729_v23, 4  ;;  %v743_v33 = vshll.u32 %v634_v12, 16  ;;  %v737_v35 = vrot.slane %v735_v27, 5  ;;  %v409_v62 = vld [vmem:[%s362_s9 + $0x10] sm:$0x3]  ;;  %s1555_s18 = smov 15  }
  0x51   : > { %v714_v36 = vsel %vm1748_vm6, %v709_v25, %v713_v11  ;;  %v723_v37 = vrot.slane %v722_v26, 4  ;;  %v742_v38 = vrot.slane %v740_v29, 4  ;;  %v749_v42 = vshll.u32 %v635_v24, 16  ;;  %v863_v16 = vld [vmem:[#allocation2 + $0x1c] sm:$0xf]  ;;  %s1556_s12 = smov 18  }
  0x52   : > { %v1344_v39 = vcombine.low %v704_v30, %v714_v36  ;;  %v732_v40 = vor.u32 %v731_v32, %v727_v31  ;;  %v745_v41 = vrot.slane %v743_v33, 5  ;;  %v753_v45 = vshrl.u32 %v635_v24, 16  ;;  %v862_v21 = vld [vmem:[#allocation2 + $0x18] sm:$0xe]  ;;  %v866_v26 = vld [vmem:[#allocation2 + $0x28] sm:$0xf] }
  0x53   : > { %v728_v44 = vsel %vm1748_vm6, %v723_v37, %v727_v31  ;;  %v759_v46 = vshll.u32 %v636_v28, 16  ;;  %v764_v47 = vshrl.u32 %v637_v34, 16  ;;  %v751_v50 = vrot.slane %v749_v42, 5  ;;  %v864_v27 = vld [vmem:[#allocation2 + $0x20] sm:$0x1]  ;;  %s1557_s13 = smov 21  }
  0x54   : > { %801 = vrot.lane.b32.xlu0 %v1343_v20, %s1553_s26  ;;  %803 = vrot.lane.b32.xlu1 %v1344_v39, %s1553_s26  ;;  %v733_v48 = vrot.slane %v732_v40, 4  ;;  %v746_v49 = vor.u32 %v745_v41, %v742_v38  ;;  %v767_v52 = vshll.u32 %v637_v34, 16  ;;  %v755_v54 = vrot.slane %v753_v45, 4  ;;  %v865_v29 = vld [vmem:[#allocation2 + $0x24] sm:$0xe]  ;;  %s1558_s16 = smov 24  }
  0x55   : > { %v766_v55 = vrot.slane %v764_v47, 4  ;;  %v773_v56 = vshll.u32 %v638_v43, 16  ;;  %v777_v61 = vshrl.u32 %v638_v43, 16  ;;  %v761_v1 = vrot.slane %v759_v46, 5  ;;  %v867_v36 = vld [vmem:[#allocation2 + $0x2c] sm:$0x1] }
  0x56   : > { %v738_v58 = vsel %vm1748_vm6, %v733_v48, %v737_v35  ;;  %v747_v59 = vrot.slane %v746_v49, 4  ;;  %v769_v60 = vrot.slane %v767_v52, 5  ;;  %v756_v0 = vor.u32 %v755_v54, %v751_v50  ;;  %v1797_v38 = vld [vmem:[#allocation2 + $0x10] sm:$0xf] }
  0x57   : > { %v1345_v63 = vcombine.low %v728_v44, %v738_v58  ;;  %v775_v3 = vrot.slane %v773_v56, 5  ;;  %v779_v4 = vrot.slane %v777_v61, 4  ;;  %v410_v5 = vpack.c.bf16 %v408_v57, %v407_v53  ;;  %v869_v44 = vld [vmem:[#allocation2 + $0x34] sm:$0xf] }
  0x58   : > { %819 = vrot.lane.b32.xlu0 %v1343_v20, %s1554_s11  ;;  %v757_v6 = vrot.slane %v756_v0, 4  ;;  %v783_v7 = vshll.u32 %v639_v51, 16  ;;  %v411_v8 = vpack.c.bf16 %v409_v62, %v409_v62  ;;  %v419_v9 = vstv %s418_s10 }
  0x59   : > { %805 = vrot.lane.b32.xlu1 %v1345_v63, %s1553_s26  ;;  %v752_v10 = vsel %vm1748_vm6, %v747_v59, %v751_v50  ;;  %v770_v11 = vor.u32 %v769_v60, %v766_v55  ;;  %v780_v12 = vor.u32 %v779_v4, %v775_v3  ;;  %vm420_vm7 = vcmp.eq.s32.totalorder %v419_v9, 1  ;;  %v859_v60 = vld [vmem:[#allocation2 + $0xc] sm:$0xe] }
  0x5a   : > { %v762_v13 = vsel %vm1748_vm6, %v757_v6, %v761_v1  ;;  %v421_v14 = vsel %vm420_vm7, 0, %v410_v5  ;;  %v422_v15 = vsel %vm420_vm7, 0, %v411_v8  ;;  %v785_v24 = vrot.slane %v783_v7, 5  ;;  %v868_v7 = vld [vmem:[#allocation2 + $0x30] sm:$0xe] }
  0x5b   : > { %v1318_v17 = vcombine.low %v421_v14, %v421_v14  ;;  %v1346_v18 = vcombine.low %v752_v10, %v762_v13  ;;  %v1319_v19 = vcombine.high %v421_v14, %v421_v14  ;;  %v1320_v20 = vcombine.low %v422_v15, %v422_v15  ;;  %v870_v13 = vld [vmem:[#allocation2 + $0x38] sm:$0x1] }
  0x5c   : > { %821 = vrot.lane.b32.xlu0 %v1344_v39, %s1554_s11  ;;  %v771_v22 = vrot.slane %v770_v11, 4  ;;  %v781_v23 = vrot.slane %v780_v12, 4  ;;  %v911_v25 = vrot.slane %v863_v16, 5  ;;  %v1350_v28 = vrot.slane %v862_v21, 9 }
  0x5d   : > { %823 = vrot.lane.b32.xlu1 %v1345_v63, %s1554_s11  ;;  %435 = vst.msk [vmem:[#allocation2] sm:$0xf] %vm434_vm0, %v1318_v17  ;;  %436 = vst.msk [vmem:[#allocation2 + $0x4] sm:$0xf] %vm434_vm0, %v1319_v19  ;;  %v918_v30 = vrot.slane %v866_v26, 5  ;;  %v914_v34 = vrot.slane %v864_v27, 5 }
  0x5e   : > { %438 = vst.msk [vmem:[#allocation2 + $0x8] sm:$0x1] %vm437_vm1, %v1320_v20  ;;  %v776_v31 = vsel %vm1748_vm6, %v771_v22, %v775_v3  ;;  %v786_v32 = vsel %vm1748_vm6, %v781_v23, %v785_v24  ;;  %v913_v33 = vrot.slane %v911_v25, 4  ;;  %v1351_v35 = vrot.slane %v865_v29, 9  ;;  %v861_v3 = vld [vmem:[#allocation2 + $0x14] sm:$0x1] }
  0x5f   : > { %v920_v42 = vrot.slane %v918_v30, 4  ;;  %v921_v43 = vrot.slane %v867_v36, 5  ;;  %v912_v49 = vsel %vm1793_vm10, %v1350_v28, %v911_v25  ;;  %v904_v55 = vrot.slane %v1797_v38, 5  ;;  %v872_v27 = vld [vmem:[#allocation2 + $0x40] sm:$0xf] }
  0x60   : > { %839 = vrot.lane.b32.xlu0 %v1344_v39, %s1555_s18  ;;  %v1347_v39 = vcombine.low %v776_v31, %v786_v32  ;;  %v915_v50 = vsel %vm1793_vm10, %v913_v33, %v914_v34  ;;  %v919_v1 = vsel %vm1793_vm10, %v1351_v35, %v918_v30  ;;  %v925_v8 = vrot.slane %v869_v44, 5  ;;  %v871_v34 = vld [vmem:[#allocation2 + $0x3c] sm:$0xe]  ;;  %v873_v36 = vld [vmem:[#allocation2 + $0x44] sm:$0x1] }
  0x61   : > { %825 = vrot.lane.b32.xlu1 %v1346_v18, %s1554_s11  ;;  %v1806_v0 = vcombine.low %v912_v49, %v915_v50  ;;  %v922_v6 = vsel %vm1793_vm10, %v920_v42, %v921_v43  ;;  %v1349_v17 = vrot.slane %v859_v60, 9  ;;  %v1352_v20 = vrot.slane %v868_v7, 9  ;;  %v1476_v44 = vld [vmem:[%s1920_s3] sm:$0xff]  }
  0x62   : > { %v1357_v16 = vcombine.low %v919_v1, %v922_v6  ;;  %v927_v21 = vrot.slane %v925_v8, 4  ;;  %v928_v22 = vrot.slane %v870_v13, 5  ;;  %v906_v26 = vrot.slane %v904_v55, 4  ;;  %1389 = vmatprep.subr.bf16.mxu0 %v1476_v44  ;;  %1401 = vmatprep.subr.bf16.mxu1 %v1476_v44 }
  0x63   : > { %v926_v30 = vsel %vm1793_vm10, %v1352_v20, %v925_v8  ;;  %v932_v31 = vrot.slane %v872_v27, 5  ;;  %v905_v32 = vsel %vm1793_vm10, %v1349_v17, %v904_v55  ;;  %1390 = vmatpush3.bf16.msra.mxu0 %v1476_v44  ;;  %1403 = vmatpush3.bf16.msra.mxu1 %v1476_v44  ;;  %vm831_vm0 = vcmask 121952  }
  0x64   : > { %841 = vrot.lane.b32.xlu0 %v1345_v63, %s1555_s18  ;;  %v622_v40 = vld [vmem:[#allocation2] sm:$0xf]  ;;  %v623_v45 = vld [vmem:[#allocation2 + $0x4] sm:$0xf]  ;;  %v929_v2 = vsel %vm1793_vm10, %v927_v21, %v928_v22  ;;  %vm851_vm1 = vcmask 146552   ;;  %vm1117_vm7 = vcmask 261120  }
  0x65   : > { %843 = vrot.lane.b32.xlu1 %v1346_v18, %s1555_s18  ;;  %v856_v41 = vld [vmem:[#allocation2] sm:$0xe]  ;;  %v624_v46 = vld [vmem:[#allocation2 + $0x8] sm:$0x1]  ;;  %v644_v47 = vshrl.u32 %v622_v40, 16  ;;  %v647_v48 = vshll.u32 %v622_v40, 16  ;;  %v1358_v35 = vcombine.low %v926_v30, %v929_v2 }
  0x66   : > { %v653_v51 = vshll.u32 %v623_v45, 16  ;;  %v657_v52 = vshrl.u32 %v623_v45, 16  ;;  %v663_v53 = vshll.u32 %v624_v46, 16  ;;  %v857_v54 = vld [vmem:[#allocation2 + $0x4] sm:$0xf]  ;;  %v1348_v5 = vrot.slane %v856_v41, 9 }
  0x67   : > { %v646_v56 = vrot.slane %v644_v47, 4  ;;  %v649_v57 = vrot.slane %v647_v48, 5  ;;  %v858_v58 = vld [vmem:[#allocation2 + $0x8] sm:$0x1]  ;;  %v897_v59 = vrot.slane %v857_v54, 5  ;;  %v1475_v61 = vld [vmem:[#allocation2] sm:$0xff]  }
  0x68   : > { %v655_v62 = vrot.slane %v653_v51, 5  ;;  %v659_v63 = vrot.slane %v657_v52, 4  ;;  %574 = vst.msk [vmem:[#allocation3] sm:$0xff] %vm573_vm2, %v1475_v61  ;;  %v665_v10 = vrot.slane %v663_v53, 5  ;;  %v900_v12 = vrot.slane %v858_v58, 5 }
  0x69   : > { %845 = vrot.lane.b32.xlu1 %v1347_v39, %s1555_s18  ;;  %v650_v4 = vor.u32 %v649_v57, %v646_v56  ;;  %v899_v11 = vrot.slane %v897_v59, 4  ;;  %v907_v18 = vrot.slane %v861_v3, 5  ;;  %v898_v24 = vsel %vm1793_vm10, %v1348_v5, %v897_v59  ;;  %v1477_v46 = vld [vmem:[%s1920_s3 + $0x8] sm:$0x3f]  }
  0x6a   : > { %v660_v9 = vor.u32 %v659_v63, %v655_v62  ;;  %v1353_v39 = vrot.slane %v871_v34, 9  ;;  %v934_v40 = vrot.slane %v932_v31, 4  ;;  %v935_v41 = vrot.slane %v873_v36, 5 }
  0x6b   : > { %v651_v14 = vrot.slane %v650_v4, 4  ;;  %v901_v25 = vsel %vm1793_vm10, %v899_v11, %v900_v12  ;;  %v908_v33 = vsel %vm1793_vm10, %v906_v26, %v907_v18  ;;  %v1559_v47 = vmov 65535  }
  0x6c   : > { %v661_v15 = vrot.slane %v660_v9, 4  ;;  %v1354_v29 = vcombine.low %v898_v24, %v901_v25  ;;  %v1355_v38 = vcombine.low %v905_v32, %v908_v33  ;;  %v933_v42 = vsel %vm1793_vm10, %v1353_v39, %v932_v31  ;;  %v1360_v24 = vld [vmem:[#allocation4] ss:$0 sm:$0xff] }
  0x6d   : > { %953 = vrot.lane.b32.xlu1 %v1806_v0, %s1556_s12  ;;  %v656_v19 = vsel %vm1748_vm6, %v651_v14, %v655_v62  ;;  %v936_v43 = vsel %vm1793_vm10, %v934_v40, %v935_v41  ;;  %v1047_v48 = vsel %vm1045_vm11, 4294967295, %v1559_v47  ;;  %vm961_vm2 = vcmask 171152  }
  0x6e   : > { %v666_v23 = vsel %vm1748_vm6, %v661_v15, %v665_v10  ;;  %v1359_v45 = vcombine.low %v933_v42, %v936_v43  ;;  %v1048_v37 = vsel %vm1046_vm12, %v1047_v48, 0  ;;  %vm1126_vm6 = vcmask 253952  }
  0x6f   : > { %v1342_v28 = vcombine.low %v656_v19, %v666_v23  ;;  %v1050_v49 = vand.u32 %v1477_v46, %v1048_v37  ;;  %v1560_v23 = vmov 0.0  }
  0x70   : > { %1127 = vst.msk [vmem:[%s1876_s27] sm:$0x1] %vm1126_vm6, %v1560_v23  ;;  %1128 = vst.msk [vmem:[%s1876_s27 + $0x18] sm:$0x1] %vm1126_vm6, %v1560_v23 }
  0x71   : > { %955 = vrot.lane.b32.xlu1 %v1357_v16, %s1556_s12  ;;  %799 = vrot.lane.b32.xlu0 %v1342_v28, %s1553_s26  ;;  %1129 = vst.msk [vmem:[%s1876_s27 + $0x30] sm:$0x1] %vm1126_vm6, %v1560_v23  ;;  %1130 = vst.msk [vmem:[%s1876_s27 + $0x48] sm:$0x1] %vm1126_vm6, %v1560_v23 }
  0x72   : > { %1391 = vmatprep.subr.bf16.mxu0 %v1050_v49  ;;  %1402 = vmatprep.subr.bf16.mxu1 %v1050_v49  ;;  %1131 = vst.msk [vmem:[%s1876_s27 + $0x11] sm:$0x1] %vm1126_vm6, %v1560_v23  ;;  %1132 = vst.msk [vmem:[%s1876_s27 + $0x29] sm:$0x1] %vm1126_vm6, %v1560_v23 }
  0x73   : > { %1392 = vmatpush3.bf16.msra.mxu0 %v1050_v49  ;;  %1404 = vmatpush3.bf16.msra.mxu1 %v1050_v49  ;;  %1133 = vst.msk [vmem:[%s1876_s27 + $0x41] sm:$0x1] %vm1126_vm6, %v1560_v23  ;;  %1134 = vst.msk [vmem:[%s1876_s27 + $0x59] sm:$0x1] %vm1126_vm6, %v1560_v23 }
  0x75   : > { %973 = vrot.lane.b32.xlu1 %v1357_v16, %s1557_s13  ;;  %949 = vrot.lane.b32.xlu0 %v1354_v29, %s1556_s12 }
  0x79   : > { %975 = vrot.lane.b32.xlu1 %v1358_v35, %s1557_s13  ;;  %951 = vrot.lane.b32.xlu0 %v1355_v38, %s1556_s12 }
  0x7d   : > { %993 = vrot.lane.b32.xlu1 %v1358_v35, %s1558_s16  ;;  %969 = vrot.lane.b32.xlu0 %v1355_v38, %s1557_s13 }
  0x81   : > { %995 = vrot.lane.b32.xlu1 %v1359_v45, %s1558_s16  ;;  %971 = vrot.lane.b32.xlu0 %v1806_v0, %s1557_s13 }
  0x85   : > { %989 = vrot.lane.b32.xlu0 %v1806_v0, %s1558_s16 }
  0x89   : > { %991 = vrot.lane.b32.xlu0 %v1357_v16, %s1558_s16 }
  0xb4   : > { %v586_v50 = vpop.permute.xlu1 %585 }
  0xb5   : > { %597 = vst.msk [vmem:[#allocation3 + $0x8] sm:$0xff] %vm595_vm13, %v586_v50 }
  0xb6   : > { %v584_v51 = vpop.permute.xlu0 %583 }
  0xb7   : > { %596 = vst.msk [vmem:[#allocation3] sm:$0xff] %vm595_vm13, %v584_v51 }
  0xb8   : > { %v590_v52 = vpop.permute.xlu1 %589 }
  0xb9   : > { %599 = vst.msk [vmem:[#allocation3 + $0x18] sm:$0xff] %vm595_vm13, %v590_v52 }
  0xba   : > { %v588_v53 = vpop.permute.xlu0 %587 }
  0xbb   : > { %598 = vst.msk [vmem:[#allocation3 + $0x10] sm:$0xff] %vm595_vm13, %v588_v53 }
  0xbc   : > { %v610_v54 = vpop.permute.xlu1 %609 }
  0xbd   : > { %620 = vst.msk [vmem:[#allocation3 + $0x10] sm:$0xff] %vm617_vm14, %v610_v54 }
  0xbe   : > { %v606_v55 = vpop.permute.xlu0 %605 }
  0xbf   : > { %618 = vst.msk [vmem:[#allocation3] sm:$0xff] %vm617_vm14, %v606_v55 }
  0xc0   : > { %v612_v56 = vpop.permute.xlu1 %611 }
  0xc1   : > { %621 = vst.msk [vmem:[#allocation3 + $0x18] sm:$0xff] %vm617_vm14, %v612_v56 }
  0xc2   : > { %v608_v57 = vpop.permute.xlu0 %607 }
  0xc3   : > { %619 = vst.msk [vmem:[#allocation3 + $0x8] sm:$0xff] %vm617_vm14, %v608_v57 }
  0xc6   : > { %v802_v58 = vpop.permute.xlu0 %801  ;;  %v804_v59 = vpop.permute.xlu1 %803 }
  0xc7   : > { %813 = vst.msk [vmem:[#allocation3 + $0x8] sm:$0xff] %vm811_vm15, %v802_v58  ;;  %814 = vst.msk [vmem:[#allocation3 + $0x10] sm:$0xff] %vm811_vm15, %v804_v59 }
  0xca   : > { %v820_v60 = vpop.permute.xlu0 %819 }
  0xcb   : > { %v806_v61 = vpop.permute.xlu1 %805 }
  0xcc   : > { %815 = vst.msk [vmem:[#allocation3 + $0x18] sm:$0xff] %vm811_vm15, %v806_v61 }
  0xce   : > { %v822_v62 = vpop.permute.xlu0 %821 }
  0xcf   : > { %833 = vst.msk [vmem:[#allocation3 + $0x8] sm:$0xff] %vm831_vm0, %v822_v62  ;;  %v824_v63 = vpop.permute.xlu1 %823 }
  0xd0   : > { %834 = vst.msk [vmem:[#allocation3 + $0x10] sm:$0xff] %vm831_vm0, %v824_v63 }
  0xd2   : > { %v840_v0 = vpop.permute.xlu0 %839 }
  0xd3   : > { %v826_v1 = vpop.permute.xlu1 %825 }
  0xd4   : > { %835 = vst.msk [vmem:[#allocation3 + $0x18] sm:$0xff] %vm831_vm0, %v826_v1 }
  0xd6   : > { %v842_v3 = vpop.permute.xlu0 %841 }
  0xd7   : > { %853 = vst.msk [vmem:[#allocation3 + $0x8] sm:$0xff] %vm851_vm1, %v842_v3  ;;  %v844_v4 = vpop.permute.xlu1 %843 }
  0xd8   : > { %854 = vst.msk [vmem:[#allocation3 + $0x10] sm:$0xff] %vm851_vm1, %v844_v4 }
  0xdb   : > { %v846_v5 = vpop.permute.xlu1 %845 }
  0xdc   : > { %855 = vst.msk [vmem:[#allocation3 + $0x18] sm:$0xff] %vm851_vm1, %v846_v5 }
  0xdf   : > { %v954_v6 = vpop.permute.xlu1 %953 }
  0xe0   : > { %964 = vst.msk [vmem:[#allocation3 + $0x10] sm:$0xff] %vm961_vm2, %v954_v6 }
  0xe3   : > { %v956_v7 = vpop.permute.xlu1 %955  ;;  %v800_v8 = vpop.permute.xlu0 %799 }
  0xe4   : > { %965 = vst.msk [vmem:[#allocation3 + $0x18] sm:$0xff] %vm961_vm2, %v956_v7 }
  0xe5   : > { %812 = vst.msk [vmem:[#allocation3] sm:$0xff] %vm811_vm15, %v800_v8 }
  0xe6   : > { %832 = vst.msk [vmem:[#allocation3] sm:$0xff] %vm831_vm0, %v820_v60 }
  0xe7   : > { %852 = vst.msk [vmem:[#allocation3] sm:$0xff] %vm851_vm1, %v840_v0  ;;  %v974_v9 = vpop.permute.xlu1 %973  ;;  %v950_v10 = vpop.permute.xlu0 %949 }
  0xe8   : > { %984 = vst.msk [vmem:[#allocation3 + $0x10] sm:$0xff] %vm981_vm3, %v974_v9 }
  0xe9   : > { %962 = vst.msk [vmem:[#allocation3] sm:$0xff] %vm961_vm2, %v950_v10 }
  0xeb   : > { %v976_v11 = vpop.permute.xlu1 %975  ;;  %v952_v12 = vpop.permute.xlu0 %951 }
  0xec   : > { %985 = vst.msk [vmem:[#allocation3 + $0x18] sm:$0xff] %vm981_vm3, %v976_v11 }
  0xed   : > { %963 = vst.msk [vmem:[#allocation3 + $0x8] sm:$0xff] %vm961_vm2, %v952_v12 }
  0xef   : > { %v994_v13 = vpop.permute.xlu1 %993  ;;  %v970_v14 = vpop.permute.xlu0 %969 }
  0xf0   : > { %1004 = vst.msk [vmem:[#allocation3 + $0x10] sm:$0xff] %vm1001_vm4, %v994_v13 }
  0xf1   : > { %982 = vst.msk [vmem:[#allocation3] sm:$0xff] %vm981_vm3, %v970_v14 }
  0xf3   : > { %v996_v15 = vpop.permute.xlu1 %995  ;;  %v972_v16 = vpop.permute.xlu0 %971 }
  0xf4   : > { %1005 = vst.msk [vmem:[#allocation3 + $0x18] sm:$0xff] %vm1001_vm4, %v996_v15 }
  0xf5   : > { %983 = vst.msk [vmem:[#allocation3 + $0x8] sm:$0xff] %vm981_vm3, %v972_v16 }
  0xf7   : > { %v1008_v17 = vld [vmem:[#allocation3 + $0x10] sm:$0xff]  ;;  %v990_v18 = vpop.permute.xlu0 %989 }
  0xf8   : > { %1397 = vmatprep.mubr.msk.bf16.mxu1 %vm1032_vm5, %v1008_v17  ;;  %1002 = vst.msk [vmem:[#allocation3] sm:$0xff] %vm1001_vm4, %v990_v18 }
  0xfb   : > { %v1009_v19 = vld [vmem:[#allocation3 + $0x18] sm:$0xff]  ;;  %v992_v20 = vpop.permute.xlu0 %991 }
  0xfc   : > { %1398 = vmatmul.mubr.msk.bf16.vlgmr.msra.gmra.mrb[0].mxu1 %vm1032_vm5, %v1009_v19  ;;  %1003 = vst.msk [vmem:[#allocation3 + $0x8] sm:$0xff] %vm1001_vm4, %v992_v20 }
  0xff   : > { %v1006_v21 = vld [vmem:[#allocation3] sm:$0xff] }
 0x100   : > { %1393 = vmatprep.mubr.msk.bf16.mxu0 %vm1032_vm5, %v1006_v21 }
 0x103   : > { %v1007_v22 = vld [vmem:[#allocation3 + $0x8] sm:$0xff] }
 0x104   : > { %1394 = vmatmul.mubr.msk.bf16.vlgmr.msra.gmra.mrb[0].mxu0 %vm1032_vm5, %v1007_v22 }
 0x1cf   : > { %v1399_v25 = vpop.f32.mrb[0].mxu1 }
 0x1d0   : > { %v1111_v26 = vadd.f32 %v1399_v25, %v1360_v24  ;;  %v1102_v27 = vpop.f32.mrb[1].mxu1 }
 0x1d1   : > { %v1103_v28 = vadd.f32 %v1360_v24, %v1102_v27  ;;  %v1400_v29 = vpop.f32.mrb[2].mxu1 }
 0x1d2   : > { %1124 = vst.msk [vmem:[%s1876_s27 + $0x49] sm:$0xff] %vm1117_vm7, %v1111_v26  ;;  %v1114_v30 = vadd.f32 %v1400_v29, %v1360_v24  ;;  %v1105_v2 = vpop.f32.mrb[3].mxu1 }
 0x1d3   : > { %1122 = vst.msk [vmem:[%s1876_s27 + $0x31] sm:$0xff] %vm1117_vm7, %v1103_v28  ;;  %v1106_v31 = vadd.f32 %v1360_v24, %v1105_v2 }
 0x1d4   : > { %1125 = vst.msk [vmem:[%s1876_s27 + $0x51] sm:$0xff] %vm1117_vm7, %v1114_v30 }
 0x1d5   : > { %1123 = vst.msk [vmem:[%s1876_s27 + $0x39] sm:$0xff] %vm1117_vm7, %v1106_v31 }
 0x1d7   : > { %v1395_v32 = vpop.f32.mrb[0].mxu0 }
 0x1d8   : > { %v1095_v33 = vadd.f32 %v1395_v32, %v1360_v24  ;;  %v1086_v34 = vpop.f32.mrb[1].mxu0 }
 0x1d9   : > { %v1087_v36 = vadd.f32 %v1360_v24, %v1086_v34  ;;  %v1396_v35 = vpop.f32.mrb[2].mxu0 }
 0x1da   : > { %1120 = vst.msk [vmem:[%s1876_s27 + $0x19] sm:$0xff] %vm1117_vm7, %v1095_v33  ;;  %v1098_v38 = vadd.f32 %v1396_v35, %v1360_v24  ;;  %v1089_v39 = vpop.f32.mrb[3].mxu0 }
 0x1db   : > { %1118 = vst.msk [vmem:[%s1876_s27 + $0x1] sm:$0xff] %vm1117_vm7, %v1087_v36  ;;  %v1090_v40 = vadd.f32 %v1360_v24, %v1089_v39 }
 0x1dc   : > { %1121 = vst.msk [vmem:[%s1876_s27 + $0x21] sm:$0xff] %vm1117_vm7, %v1098_v38 }
 0x1dd   : > { %1119 = vst.msk [vmem:[%s1876_s27 + $0x9] sm:$0xff] %vm1117_vm7, %v1090_v40 }
 0x1de PF: > { %s16_s22 = sadd.s32 1, %s1548_s22   ;;  %s1938_s18 = smov %s1540_s20 }
 0x1df   : > { %p13_p0 = scmp.ge.s32.totalorder %s16_s22, 10   ;;  %s1939_s19 = smov %s1544_s21 }
 0x1e0   : > { %s1940_s20 = smov %s1943_s24  ;;  %s1941_s21 = smov %s1947_s25 }
 0x1e1   :  { %15 = sbr.rel (!%p13_p0) target bundleno = 3 (0x3), region = 83 }
 0x1e8   :  { %1167 = vsyncpa [#allocation5], 1 }
 0x1e9   :  { %1169 = vsyncpa [#allocation5 + $0x1], 1 }

// kernel: _lambda_.9
= control target key start
LH: loop header
LB: loop body
LE: loop exit
PB: predicated region body
PF: predicated region fallthrough
CT: control target
= control target key end

     0   :  { %s1873_s21 = smov 0   ;;  %s1875_s22 = smov 0   ;;  %s2292_s0 = inlined_call_operand.vmem [shape: f32[2,16,18,32], index: 0, kind: input, shape index: {}, may-alias: {0,1,2}]   ;;  %s2293_s1 = inlined_call_operand.vmem [shape: f32[2,16,18,32], index: 1, kind: input, shape index: {}, may-alias: {0,1,2}]   ;;  %s2294_s2 = inlined_call_operand.vmem [shape: f32[2,16,18,32], index: 2, kind: input, shape index: {}, may-alias: {0,1,2}]   ;;  %s2295_s3 = inlined_call_operand.vmem [shape: bf16[288,32], index: 3, kind: input, shape index: {}]   ;;  %s2296_s4 = inlined_call_operand.vmem [shape: f32[1,32], index: 4, kind: input, shape index: {}]   ;;  %s2297_s5 = inlined_call_operand.vmem [shape: f32[2,16,18,32], index: 5, kind: input, shape index: {}]   ;;  %s2298_s6 = inlined_call_operand.vmem [shape: f32[2,16,18,32], index: 6, kind: output, shape index: {}]  }
   0x1   :  { %s1877_s23 = smov 0   ;;  %s1879_s24 = smov 0  }
   0x2   :  { %s1881_s25 = smov 0  }
   0x3 LB: > { %s25_s26 = sadd.s32 1, %s1824_s23  ;;  %s28_s27 = sadd.s32 1, %s1828_s24  ;;  %s1832_s25 = sphi %s1881_s25, %s16_s25   ;;  %s1828_s24 = sphi %s1879_s24, %s2309_s24   ;;  %s1824_s23 = sphi %s1877_s23, %s2308_s23   ;;  %s1820_s22 = sphi %s1875_s22, %s2307_s22   ;;  %s1816_s21 = sphi %s1873_s21, %s2306_s21  }
   0x4   : > { %p26_p0 = scmp.ge.s32.totalorder %s25_s26, 4  ;;  %p1547_p1 = scmp.ge.s32.totalorder %s1832_s25, 1 }
   0x5   : > { %p316_p2 = scmp.lt.s32.totalorder %s1832_s25, 9 }
   0x6   : > { %s2311_s26 = smov (%p26_p0, %s25_s26), 0  ;;  %s2313_s27 = smov (!%p26_p0, %s28_s27), %s1828_s24 }
   0x7   : > { %p317_p3 = pnand %p1547_p1, %p316_p2  ;;  %p30_p4 = scmp.ge.s32.totalorder %s2313_s27, 2 }
   0x8   : > { %s1548_s28 = sshll.u32 (!%p317_p3), %s1816_s21, 2  ;;  %p396_p5 = scmp.lt.s32.totalorder (!%p317_p3), %s1820_s22, 1  ;;  %vm487_vm0 = vcmask (!%p317_p3), 257024   ;;  %vm490_vm1 = vcmask (!%p317_p3), 253952   ;;  %vm935_vm2 = vcmask (!%p317_p3), 1042432   ;;  %vm936_vm3 = vcmask (!%p317_p3), 1046532  }
   0x9   : > { %s2315_s27 = smov (%p30_p4, %s2313_s27), 0  ;;  %320 = sbr.rel (%p317_p3) target bundleno = 442 (0x1ba), region = 44 }
   0xa   : > { %p412_p6 = scmp.lt.s32.totalorder (!%p317_p3), %s1548_s28, 15  ;;  %s421_s8 = sadd.s32 (!%p317_p3), 4, %s1548_s28  ;;  %v1776_v24 = vld [vmem:[%s2295_s3 + $0x40] sm:$0xff] (!%p317_p3)   ;;  %vm626_vm4 = vcmask (!%p317_p3), 261120   ;;  %vm1966_vm5 = vmor (!%p317_p3), %vm935_vm2, %vm936_vm3  ;;  %v1778_v28 = vld [vmem:[%s2295_s3 + $0x48] sm:$0xff] (!%p317_p3)   ;;  %vm648_vm11 = vcmask (!%p317_p3), 523520  }
   0xb   : > { %p569_p7 = scmp.eq.s32.totalorder (!%p317_p3), %s1816_s21, 3  ;;  %p1910_p8 = scmp.lt.s32.totalorder (!%p317_p3), %s421_s8, 15  ;;  %1648 = vmatprep.subr.bf16.mxu0 (!%p317_p3), %v1776_v24  ;;  %1706 = vmatprep.subr.bf16.mxu1 (!%p317_p3), %v1776_v24  ;;  %v1777_v27 = vld [vmem:[%s2295_s3] sm:$0xff] (!%p317_p3)   ;;  %vm693_vm7 = vsmask.f32 (!%p317_p3), 3328  ;;  %vm670_vm12 = vcmask (!%p317_p3), 785920  }
   0xc   : > { %s1916_s12 = sadd.s32 (!%p317_p3), 4294967295, %s1548_s28  ;;  %1649 = vmatpush3.bf16.msra.mxu0 (!%p317_p3), %v1777_v27  ;;  %1714 = vmatpush3.bf16.msra.mxu1 (!%p317_p3), %v1777_v27  ;;  %vm694_vm8 = vsmask.f32 (!%p317_p3), 7440  ;;  %p470_p11 = scmp.eq.s32.totalorder (!%p317_p3), %s1816_s21, 0  ;;  %vm864_vm13 = vcmask (!%p317_p3), 1048320  }
   0xd   : > { %p394_p9 = scmp.gt.s32.totalorder (!%p317_p3), %s1916_s12, 0  ;;  %p1550_p10 = scmp.lt.s32.totalorder (!%p317_p3), %s1916_s12, 15  ;;  %1650 = vmatprep.subr.bf16.mxu0 (!%p317_p3), %v1778_v28  ;;  %1707 = vmatprep.subr.bf16.mxu1 (!%p317_p3), %v1778_v28  ;;  %vm2055_vm9 = vmor (!%p317_p3), %vm693_vm7, %vm694_vm8 }
  0x10   : > { %s2317_s22 = smov (!%p396_p5, %s1820_s22), 1  ;;  %s2319_s8 = smov (!%p1910_p8, %s421_s8), 15 }
  0x11   : > { %s413_s29 = scalar_select %p412_p6, %s1548_s28, 15 }
  0x12   : > { %s1906_s30 = smul.u32 48, %s2317_s22  ;;  %s2321_s8 = smov (!%p1910_p8, %s2319_s8), 15 }
  0x13   : > { %s1724_s7 = smul.u32 3, %s413_s29 }
  0x14   : > { %s1937_s16 = scalar_select %p569_p7, 1, 0 }
  0x15   : > { %s416_s9 = sadd.s32 %s1724_s7, %s1906_s30  ;;  %s1725_s17 = smul.u32 3, %s2321_s8 }
  0x16   : > { %s1914_s11 = sshll.u32 %s416_s9, 3  ;;  %v571_v26 = vstv %s1937_s16  ;;  %s1834_s16 = smov 64  }
  0x17   : > { %s1922_s15 = scalar_lea.vmem %s2293_s1, %s1914_s11  ;;  %s430_s22 = sadd.s32 %s1725_s17, %s1906_s30  ;;  %vm1984_vm6 = vcmp.eq.s32.totalorder %v571_v26, 1 }
  0x18   : > { %v495_v0 = vld [vmem:[%s1922_s15 + $0x18] sm:$0xff]  ;;  %v496_v1 = vld [vmem:[%s1922_s15 + $0x20] sm:$0xff]  ;;  %v493_v5 = vld [vmem:[%s1922_s15 + $0x8] sm:$0xff]  ;;  %s395_s20 = scalar_select %p394_p9, %s1916_s12, 0 }
  0x19   : > { %v492_v2 = vld [vmem:[%s1922_s15] sm:$0xff]  ;;  %v1639_v3 = vpack.c.bf16 %v495_v0, %v495_v0  ;;  %v1640_v4 = vpack.c.bf16 %v496_v1, %v496_v1  ;;  %v501_v7 = vld [vmem:[%s1922_s15 + $0x48] sm:$0xff]  ;;  %v502_v8 = vld [vmem:[%s1922_s15 + $0x50] sm:$0xff]  ;;  %v1637_v9 = vpack.c.bf16 %v493_v5, %v493_v5  ;;  %s1562_s28 = sshll.u32 %s430_s22, 3  ;;  %s1835_s12 = smov 32  }
  0x1a   : > { %v1636_v6 = vpack.c.bf16 %v492_v2, %v492_v2  ;;  %v1645_v10 = vpack.c.bf16 %v501_v7, %v501_v7  ;;  %v1646_v11 = vpack.c.bf16 %v502_v8, %v502_v8  ;;  %v494_v12 = vld [vmem:[%s1922_s15 + $0x10] sm:$0x3]  ;;  %v499_v14 = vld [vmem:[%s1922_s15 + $0x38] sm:$0xff]  ;;  %v500_v16 = vld [vmem:[%s1922_s15 + $0x40] sm:$0x3]  ;;  %s432_s14 = scalar_lea.vmem %s2294_s2, %s1562_s28  ;;  %s2323_s20 = smov (!%p1550_p10, %s395_s20), 15 }
  0x1b   : > { %v498_v13 = vld [vmem:[%s1922_s15 + $0x30] sm:$0xff]  ;;  %560 = vst.msk [vmem:[#allocation2 + $0x18] sm:$0xf] %vm487_vm0, %v1639_v3  ;;  %561 = vst.msk [vmem:[#allocation2 + $0x1c] sm:$0xf] %vm487_vm0, %v1640_v4  ;;  %v1638_v15 = vpack.c.bf16 %v494_v12, %v494_v12  ;;  %v1643_v18 = vpack.c.bf16 %v499_v14, %v499_v14  ;;  %v1644_v21 = vpack.c.bf16 %v500_v16, %v500_v16  ;;  %v465_v29 = vld [vmem:[%s432_s14] sm:$0xff]  ;;  %s2226_s28 = scalar_lea.vmem %s2298_s6, %s1914_s11  ;;  %s2251_s9 = scalar_lea.vmem %s2297_s5, %s1914_s11 }
  0x1c   : > { %557 = vst.msk [vmem:[#allocation2 + $0xc] sm:$0xf] %vm487_vm0, %v1636_v6  ;;  %v1642_v17 = vpack.c.bf16 %v498_v13, %v498_v13  ;;  %v503_v19 = vld [vmem:[%s1922_s15 + $0x58] sm:$0x3]  ;;  %v497_v20 = vld [vmem:[%s1922_s15 + $0x28] sm:$0x3] }
  0x1d   : > { %558 = vst.msk [vmem:[#allocation2 + $0x10] sm:$0xf] %vm487_vm0, %v1637_v9  ;;  %566 = vst.msk [vmem:[#allocation2 + $0x30] sm:$0xf] %vm487_vm0, %v1645_v10  ;;  %v1647_v22 = vpack.c.bf16 %v503_v19, %v503_v19  ;;  %v1641_v23 = vpack.c.bf16 %v497_v20, %v497_v20  ;;  %v466_v30 = vld [vmem:[%s432_s14 + $0x8] sm:$0xff]  ;;  %s1722_s15 = smul.u32 3, %s2323_s20 }
  0x1e   : > { %567 = vst.msk [vmem:[#allocation2 + $0x34] sm:$0xf] %vm487_vm0, %v1646_v11  ;;  %563 = vst.msk [vmem:[#allocation2 + $0x24] sm:$0xf] %vm487_vm0, %v1642_v17  ;;  %v467_v31 = vld [vmem:[%s432_s14 + $0x10] sm:$0x3]  ;;  %v468_v34 = vpack.c.bf16 %v466_v30, %v465_v29 }
  0x1f   : > { %559 = vst.msk [vmem:[#allocation2 + $0x14] sm:$0x1] %vm490_vm1, %v1638_v15  ;;  %565 = vst.msk [vmem:[#allocation2 + $0x2c] sm:$0x1] %vm490_vm1, %v1644_v21  ;;  %v469_v36 = vpack.c.bf16 %v467_v31, %v467_v31  ;;  %s1999_s17 = sadd.s32 %s1906_s30, %s1722_s15  ;;  %s1836_s22 = smov 96   ;;  %v1779_v31 = vld [vmem:[%s2295_s3 + $0x8] sm:$0xff]  }
  0x20   : > { %564 = vst.msk [vmem:[#allocation2 + $0x28] sm:$0xf] %vm487_vm0, %v1643_v18  ;;  %v573_v38 = vsel %vm1984_vm6, 0, %v468_v34  ;;  %s1555_s30 = sshll.u32 %s1999_s17, 3  ;;  %1651 = vmatpush3.bf16.msra.mxu0 %v1779_v31  ;;  %1715 = vmatpush3.bf16.msra.mxu1 %v1779_v31 }
  0x21   : > { %568 = vst.msk [vmem:[#allocation2 + $0x38] sm:$0x1] %vm490_vm1, %v1647_v22  ;;  %562 = vst.msk [vmem:[#allocation2 + $0x20] sm:$0x1] %vm490_vm1, %v1641_v23  ;;  %v1582_v42 = vcombine.low %v573_v38, %v573_v38  ;;  %v1583_v43 = vcombine.high %v573_v38, %v573_v38  ;;  %v574_v52 = vsel %vm1984_vm6, 0, %v469_v36  ;;  %s2027_s20 = scalar_lea.vmem %s2292_s0, %s1555_s30 }
  0x22   : > { %v1770_v33 = vld [vmem:[#allocation2 + $0x18] sm:$0xff]   ;;  %v1584_v59 = vcombine.low %v574_v52, %v574_v52  ;;  %v460_v23 = vld [vmem:[%s2027_s20] sm:$0xff]  ;;  %v461_v30 = vld [vmem:[%s2027_s20 + $0x8] sm:$0xff]  ;;  %s471_s7 = scalar_select %p470_p11, 1, 0 }
  0x23   : > { %658 = vrot.lane.b32.xlu1 %v1770_v33, %s1834_s16  ;;  %629 = vst.msk [vmem:[#allocation3 + $0x30] sm:$0xff] %vm626_vm4, %v1770_v33  ;;  %v902_v39 = vld [vmem:[#allocation2 + $0xc] sm:$0xe]  ;;  %v681_v15 = vld [vmem:[#allocation2 + $0x18] sm:$0xf] }
  0x24   : > { %v1771_v35 = vld [vmem:[#allocation2 + $0xc] sm:$0xff]   ;;  %v1598_v44 = vrot.slane %v902_v39, 9  ;;  %587 = vst.msk [vmem:[#allocation2 + $0x3c] sm:$0xf] %vm487_vm0, %v1582_v42  ;;  %588 = vst.msk [vmem:[#allocation2 + $0x40] sm:$0xf] %vm487_vm0, %v1583_v43 }
  0x25   : > { %v1992_v37 = vld [vmem:[#allocation2 + $0x30] sm:$0xff]   ;;  %636 = vrot.lane.b32.xlu0 %v1771_v35, %s1835_s12  ;;  %628 = vst.msk [vmem:[#allocation3 + $0x18] sm:$0xff] %vm626_vm4, %v1771_v35  ;;  %v908_v47 = vld [vmem:[#allocation2 + $0x24] sm:$0xe]  ;;  %v682_v16 = vld [vmem:[#allocation2 + $0x1c] sm:$0xf] }
  0x26   : > { %v903_v40 = vld [vmem:[#allocation2 + $0x10] sm:$0xf]  ;;  %v904_v41 = vld [vmem:[#allocation2 + $0x14] sm:$0x1]  ;;  %v910_v50 = vld [vmem:[#allocation2 + $0x2c] sm:$0x1] }
  0x27   : > { %v947_v45 = vrot.slane %v903_v40, 5  ;;  %v950_v46 = vrot.slane %v904_v41, 5  ;;  %v2001_v48 = vld [vmem:[#allocation2 + $0x24] sm:$0xff]   ;;  %v1600_v51 = vrot.slane %v908_v47, 9  ;;  %642 = vrot.lane.b32.xlu1 %v1992_v37, %s1835_s12  ;;  %v964_v56 = vrot.slane %v910_v50, 5 }
  0x28   : > { %v909_v49 = vld [vmem:[#allocation2 + $0x28] sm:$0xf]  ;;  %630 = vst.msk [vmem:[#allocation3 + $0x48] sm:$0xff] %vm626_vm4, %v2001_v48  ;;  %v911_v57 = vld [vmem:[#allocation2 + $0x30] sm:$0xe]  ;;  %v745_v28 = vshrl.u32 %v681_v15, 16 }
  0x29   : > { %v948_v53 = vsel %vm1966_vm5, %v1598_v44, %v947_v45  ;;  %v949_v54 = vrot.slane %v947_v45, 4  ;;  %v961_v55 = vrot.slane %v909_v49, 5  ;;  %v912_v58 = vld [vmem:[#allocation2 + $0x34] sm:$0xf]  ;;  %v913_v63 = vld [vmem:[#allocation2 + $0x38] sm:$0x1] }
  0x2a   : > { %v1601_v0 = vrot.slane %v911_v57, 9  ;;  %v684_v1 = vld [vmem:[#allocation2 + $0x24] sm:$0xf]  ;;  %v968_v3 = vrot.slane %v912_v58, 5  ;;  %v971_v4 = vrot.slane %v913_v63, 5  ;;  %v748_v29 = vshll.u32 %v681_v15, 16 }
  0x2b   : > { %v951_v60 = vsel %vm1966_vm5, %v949_v54, %v950_v46  ;;  %v962_v61 = vsel %vm1966_vm5, %v1600_v51, %v961_v55  ;;  %v963_v62 = vrot.slane %v961_v55, 4  ;;  %589 = vst.msk [vmem:[#allocation2 + $0x44] sm:$0x1] %vm490_vm1, %v1584_v59  ;;  %v685_v5 = vld [vmem:[#allocation2 + $0x28] sm:$0xf]  ;;  %638 = vrot.lane.b32.xlu1 %v1770_v33, %s1835_s12  ;;  %v769_v8 = vshrl.u32 %v684_v1, 16 }
  0x2c   : > { %v2018_v2 = vcombine.low %v948_v53, %v951_v60  ;;  %v686_v7 = vld [vmem:[#allocation2 + $0x2c] sm:$0x1]  ;;  %v772_v9 = vshll.u32 %v684_v1, 16  ;;  %v778_v10 = vshll.u32 %v685_v5, 16  ;;  %v969_v12 = vsel %vm1966_vm5, %v1601_v0, %v968_v3  ;;  %v683_v22 = vld [vmem:[#allocation2 + $0x20] sm:$0x1] }
  0x2d   : > { %v965_v6 = vsel %vm1966_vm5, %v963_v62, %v964_v56  ;;  %v970_v13 = vrot.slane %v968_v3, 4  ;;  %v782_v14 = vshrl.u32 %v685_v5, 16  ;;  %v771_v17 = vrot.slane %v769_v8, 4  ;;  %v1774_v26 = vld [vmem:[#allocation2 + $0x3c] sm:$0xff]   ;;  %v462_v36 = vld [vmem:[%s2027_s20 + $0x10] sm:$0x3] }
  0x2e   : > { %1011 = vrot.lane.b32.xlu0 %v2018_v2, %s1836_s22  ;;  %v2032_v11 = vcombine.low %v962_v61, %v965_v6  ;;  %v774_v19 = vrot.slane %v772_v9, 5  ;;  %v780_v20 = vrot.slane %v778_v10, 5  ;;  %v788_v27 = vshll.u32 %v686_v7, 16  ;;  %v690_v47 = vld [vmem:[#allocation2 + $0x3c] sm:$0xf]  ;;  %v1780_v53 = vld [vmem:[%s2295_s3 + $0x50] sm:$0xff]  }
  0x2f   : > { %v972_v18 = vsel %vm1966_vm5, %v970_v13, %v971_v4  ;;  %v784_v21 = vrot.slane %v782_v14, 4  ;;  %660 = vrot.lane.b32.xlu1 %v2001_v48, %s1834_s16  ;;  %v754_v34 = vshll.u32 %v682_v16, 16  ;;  %v758_v35 = vshrl.u32 %v682_v16, 16  ;;  %v691_v58 = vld [vmem:[#allocation2 + $0x40] sm:$0xf]  ;;  %1652 = vmatprep.subr.bf16.mxu0 %v1780_v53  ;;  %v1781_v0 = vld [vmem:[%s2295_s3 + $0x10] sm:$0xff]  }
  0x30   : > { %1035 = vst.msk [vmem:[#allocation3 + $0x28] sm:$0xff] %vm626_vm4, %v2032_v11  ;;  %v1607_v24 = vcombine.low %v969_v12, %v972_v18  ;;  %v775_v32 = vor.u32 %v774_v19, %v771_v17  ;;  %v790_v39 = vrot.slane %v788_v27, 5  ;;  %v747_v40 = vrot.slane %v745_v28, 4  ;;  %v905_v63 = vld [vmem:[#allocation2 + $0x18] sm:$0xe]  ;;  %1708 = vmatprep.subr.bf16.mxu1 %v1780_v53  ;;  %1653 = vmatpush3.bf16.msra.mxu0 %v1781_v0 }
  0x31   : > { %v785_v33 = vor.u32 %v784_v21, %v780_v20  ;;  %v750_v41 = vrot.slane %v748_v29, 5  ;;  %v764_v42 = vshll.u32 %v683_v22, 16  ;;  %v756_v45 = vrot.slane %v754_v34, 5  ;;  %v906_v6 = vld [vmem:[#allocation2 + $0x1c] sm:$0xf]  ;;  %1716 = vmatpush3.bf16.msra.mxu1 %v1781_v0 }
  0x32   : > { %998 = vrot.lane.b32.xlu0 %v2032_v11, %s1834_s16  ;;  %1036 = vst.msk [vmem:[#allocation3 + $0x40] sm:$0xff] %vm626_vm4, %v1607_v24  ;;  %v776_v43 = vrot.slane %v775_v32, 4  ;;  %v760_v46 = vrot.slane %v758_v35, 4  ;;  %v463_v51 = vpack.c.bf16 %v461_v30, %v460_v23  ;;  %v464_v52 = vpack.c.bf16 %v462_v36, %v462_v36  ;;  %v692_v59 = vld [vmem:[#allocation2 + $0x44] sm:$0x1]  ;;  %v1782_v14 = vld [vmem:[%s2295_s3 + $0x58] sm:$0xff]  }
  0x33   : > { %v786_v44 = vrot.slane %v785_v33, 4  ;;  %664 = vrot.lane.b32.xlu1 %v1774_v26, %s1834_s16  ;;  %v751_v49 = vor.u32 %v750_v41, %v747_v40  ;;  %v766_v50 = vrot.slane %v764_v42, 5  ;;  %v472_v57 = vstv %s471_s7  ;;  %v907_v12 = vld [vmem:[#allocation2 + $0x20] sm:$0x1]  ;;  %v678_v13 = vld [vmem:[#allocation2 + $0xc] sm:$0xf]  ;;  %1654 = vmatprep.subr.bf16.mxu0 %v1782_v14 }
  0x34   : > { %v781_v54 = vsel %vm2055_vm9, %v776_v43, %v780_v20  ;;  %v761_v56 = vor.u32 %v760_v46, %v756_v45  ;;  %vm473_vm10 = vcmp.eq.s32.totalorder %v472_v57, 1  ;;  %v817_v62 = vshrl.u32 %v690_v47, 16  ;;  %v679_v19 = vld [vmem:[#allocation2 + $0x10] sm:$0xf]  ;;  %v1783_v20 = vld [vmem:[%s2295_s3 + $0x18] sm:$0xff]   ;;  %1709 = vmatprep.subr.bf16.mxu1 %v1782_v14  ;;  %v1785_v41 = vld [vmem:[%s2295_s3 + $0x20] sm:$0xff]  }
  0x35   : > { %v791_v55 = vsel %vm2055_vm9, %v786_v44, %v790_v39  ;;  %v752_v61 = vrot.slane %v751_v49, 4  ;;  %v474_v3 = vsel %vm473_vm10, 0, %v463_v51  ;;  %v475_v4 = vsel %vm473_vm10, 0, %v464_v52  ;;  %v2099_v32 = vld [vmem:[#allocation2 + $0x14] sm:$0x1]  ;;  %1655 = vmatpush3.bf16.msra.mxu0 %v1783_v20  ;;  %1717 = vmatpush3.bf16.msra.mxu1 %v1783_v20  ;;  %v1786_v46 = vld [vmem:[%s2295_s3 + $0x68] sm:$0xff]  }
  0x36   : > { %1017 = vrot.lane.b32.xlu0 %v1607_v24, %s1836_s22  ;;  %v2068_v60 = vcombine.low %v781_v54, %v791_v55  ;;  %v762_v1 = vrot.slane %v761_v56, 4  ;;  %v820_v5 = vshll.u32 %v690_v47, 16  ;;  %v1567_v8 = vcombine.low %v474_v3, %v474_v3  ;;  %v1784_v24 = vld [vmem:[%s2295_s3 + $0x60] sm:$0xff]   ;;  %v1787_v51 = vld [vmem:[%s2295_s3 + $0x28] sm:$0xff]   ;;  %v1788_v56 = vld [vmem:[%s2295_s3 + $0x70] sm:$0xff]  }
  0x37   : > { %v757_v7 = vsel %vm2055_vm9, %v752_v61, %v756_v45  ;;  %v1568_v9 = vcombine.high %v474_v3, %v474_v3  ;;  %v1569_v10 = vcombine.low %v475_v4, %v475_v4  ;;  %v819_v16 = vrot.slane %v817_v62, 4  ;;  %1656 = vmatprep.subr.bf16.mxu0 %v1784_v24  ;;  %1710 = vmatprep.subr.bf16.mxu1 %v1784_v24 }
  0x38   : > { %858 = vrot.lane.b32.xlu1 %v2068_v60, %s1836_s22  ;;  %878 = vst.msk [vmem:[#allocation3 + $0x38] sm:$0xff] %vm626_vm4, %v2068_v60  ;;  %v767_v15 = vsel %vm2055_vm9, %v762_v1, %v766_v50  ;;  %v822_v17 = vrot.slane %v820_v5, 5  ;;  %v826_v18 = vshll.u32 %v691_v58, 16  ;;  %v836_v22 = vshll.u32 %v692_v59, 16 }
  0x39   : > { %v2089_v21 = vcombine.low %v757_v7, %v767_v15  ;;  %488 = vst.msk [vmem:[#allocation2] sm:$0xf] %vm487_vm0, %v1567_v8  ;;  %489 = vst.msk [vmem:[#allocation2 + $0x4] sm:$0xf] %vm487_vm0, %v1568_v9  ;;  %v1599_v23 = vrot.slane %v905_v63, 9  ;;  %v954_v28 = vrot.slane %v906_v6, 5  ;;  %1657 = vmatpush3.bf16.msra.mxu0 %v1785_v41  ;;  %1718 = vmatpush3.bf16.msra.mxu1 %v1785_v41 }
  0x3a   : > { %994 = vrot.lane.b32.xlu0 %v2018_v2, %s1834_s16  ;;  %491 = vst.msk [vmem:[#allocation2 + $0x8] sm:$0x1] %vm490_vm1, %v1569_v10  ;;  %v830_v2 = vshrl.u32 %v691_v58, 16  ;;  %v823_v26 = vor.u32 %v822_v17, %v819_v16  ;;  %v828_v27 = vrot.slane %v826_v18, 5  ;;  %v957_v29 = vrot.slane %v907_v12, 5  ;;  %1658 = vmatprep.subr.bf16.mxu0 %v1786_v46 }
  0x3b   : > { %877 = vst.msk [vmem:[#allocation3 + $0x20] sm:$0xff] %vm626_vm4, %v2089_v21  ;;  %v838_v31 = vrot.slane %v836_v22, 5  ;;  %v721_v33 = vshrl.u32 %v678_v13, 16  ;;  %v724_v34 = vshll.u32 %v678_v13, 16  ;;  %v955_v36 = vsel %vm1966_vm5, %v1599_v23, %v954_v28  ;;  %v687_v10 = vld [vmem:[#allocation2 + $0x30] sm:$0xf]  ;;  %1711 = vmatprep.subr.bf16.mxu1 %v1786_v46 }
  0x3c   : > { %v832_v30 = vrot.slane %v830_v2, 4  ;;  %v824_v35 = vrot.slane %v823_v26, 4  ;;  %v956_v39 = vrot.slane %v954_v28, 4  ;;  %v730_v40 = vshll.u32 %v679_v19, 16  ;;  %v688_v16 = vld [vmem:[#allocation2 + $0x34] sm:$0xf] }
  0x3d   : > { %v723_v43 = vrot.slane %v721_v33, 4  ;;  %v726_v44 = vrot.slane %v724_v34, 5  ;;  %v734_v45 = vshrl.u32 %v679_v19, 16  ;;  %v740_v55 = vshll.u32 %v2099_v32, 16  ;;  %v689_v17 = vld [vmem:[#allocation2 + $0x38] sm:$0x1]  ;;  %1659 = vmatpush3.bf16.msra.mxu0 %v1787_v51  ;;  %1719 = vmatpush3.bf16.msra.mxu1 %v1787_v51 }
  0x3e   : > { %883 = vrot.lane.b32.xlu0 %v2089_v21, %s1835_s12  ;;  %v833_v42 = vor.u32 %v832_v30, %v828_v27  ;;  %v829_v47 = vsel %vm2055_vm9, %v824_v35, %v828_v27  ;;  %v958_v49 = vsel %vm1966_vm5, %v956_v39, %v957_v29  ;;  %v2115_v50 = vrot.slane %v730_v40, 5  ;;  %1660 = vmatprep.subr.bf16.mxu0 %v1788_v56  ;;  %v1789_v27 = vld [vmem:[%s2295_s3 + $0x30] sm:$0xff]   ;;  %v1790_v32 = vld [vmem:[%s2295_s3 + $0x78] sm:$0xff]  }
  0x3f   : > { %v2120_v53 = vcombine.low %v955_v36, %v958_v49  ;;  %v736_v54 = vrot.slane %v734_v45, 4  ;;  %v727_v61 = vor.u32 %v726_v44, %v723_v43  ;;  %1712 = vmatprep.subr.bf16.mxu1 %v1788_v56  ;;  %v742_v34 = vrot.slane %v740_v55, 5 }
  0x40   : > { %v834_v52 = vrot.slane %v833_v42, 4  ;;  %v899_v57 = vld [vmem:[#allocation2] sm:$0xe]  ;;  %v900_v58 = vld [vmem:[#allocation2 + $0x4] sm:$0xf]  ;;  %v793_v35 = vshrl.u32 %v687_v10, 16 }
  0x41   : > { %v901_v59 = vld [vmem:[#allocation2 + $0x8] sm:$0x1]  ;;  %v1597_v62 = vrot.slane %v899_v57, 9  ;;  %v940_v63 = vrot.slane %v900_v58, 5  ;;  %v675_v1 = vld [vmem:[#allocation2] sm:$0xf]  ;;  %v737_v9 = vor.u32 %v736_v54, %v2115_v50  ;;  %1661 = vmatpush3.bf16.msra.mxu0 %v1789_v27  ;;  %1720 = vmatpush3.bf16.msra.mxu1 %v1789_v27 }
  0x42   : > { %885 = vrot.lane.b32.xlu0 %v2068_v60, %s1835_s12  ;;  %v943_v0 = vrot.slane %v901_v59, 5  ;;  %v839_v3 = vsel %vm2055_vm9, %v834_v52, %v838_v31  ;;  %1034 = vst.msk [vmem:[#allocation3 + $0x10] sm:$0xff] %vm626_vm4, %v2120_v53  ;;  %v1775_v4 = vld [vmem:[#allocation2] sm:$0xff]   ;;  %v677_v6 = vld [vmem:[#allocation2 + $0x8] sm:$0x1]  ;;  %v697_v7 = vshrl.u32 %v675_v1, 16  ;;  %1662 = vmatprep.subr.bf16.mxu0 %v1790_v32 }
  0x43   : > { %v676_v5 = vld [vmem:[#allocation2 + $0x4] sm:$0xf]  ;;  %v700_v8 = vshll.u32 %v675_v1, 16  ;;  %v1596_v60 = vcombine.low %v829_v47, %v839_v3  ;;  %v941_v12 = vsel %vm1966_vm5, %v1597_v62, %v940_v63  ;;  %v942_v13 = vrot.slane %v940_v63, 4  ;;  %627 = vst.msk [vmem:[#allocation3] sm:$0xff] %vm626_vm4, %v1775_v4  ;;  %v1791_v47 = vld [vmem:[%s2295_s3 + $0x38] sm:$0xff]   ;;  %1713 = vmatprep.subr.bf16.mxu1 %v1790_v32 }
  0x44   : > { %v706_v14 = vshll.u32 %v676_v5, 16  ;;  %v710_v15 = vshrl.u32 %v676_v5, 16  ;;  %v699_v18 = vrot.slane %v697_v7, 4  ;;  %v716_v20 = vshll.u32 %v677_v6, 16  ;;  %v2161_v54 = vld [vmem:[%s2295_s3 + $0x80] sm:$0xff]   ;;  %v1043_v32 = vld [vmem:[#allocation3 + $0x28] sm:$0xff] }
  0x45   : > { %v702_v19 = vrot.slane %v700_v8, 5  ;;  %v728_v2 = vrot.slane %v727_v61, 4  ;;  %v944_v22 = vsel %vm1966_vm5, %v942_v13, %v943_v0  ;;  %v738_v26 = vrot.slane %v737_v9, 4  ;;  %1663 = vmatpush3.bf16.msra.mxu0 %v1791_v47  ;;  %1721 = vmatpush3.bf16.msra.mxu1 %v1791_v47  ;;  %v915_v63 = vld [vmem:[#allocation2 + $0x40] sm:$0xf] }
  0x46   : > { %889 = vrot.lane.b32.xlu0 %v1596_v60, %s1835_s12  ;;  %v708_v23 = vrot.slane %v706_v14, 5  ;;  %v712_v24 = vrot.slane %v710_v15, 4  ;;  %v1603_v28 = vcombine.low %v941_v12, %v944_v22  ;;  %v718_v30 = vrot.slane %v716_v20, 5  ;;  %1694 = vmatprep.subr.bf16.mxu1 %v2161_v54  ;;  %v914_v4 = vld [vmem:[#allocation2 + $0x3c] sm:$0xe] }
  0x47   : > { %v703_v29 = vor.u32 %v702_v19, %v699_v18  ;;  %v733_v31 = vsel %vm2055_vm9, %v728_v2, %v2115_v50  ;;  %v796_v36 = vshll.u32 %v687_v10, 16  ;;  %v802_v40 = vshll.u32 %v688_v16, 16  ;;  %v916_v5 = vld [vmem:[#allocation2 + $0x44] sm:$0x1] }
  0x48   : > { %v713_v33 = vor.u32 %v712_v24, %v708_v23  ;;  %992 = vrot.lane.b32.xlu1 %v1603_v28, %s1834_s16  ;;  %v806_v41 = vshrl.u32 %v688_v16, 16  ;;  %v812_v42 = vshll.u32 %v689_v17, 16  ;;  %v743_v44 = vsel %vm2055_vm9, %v738_v26, %v742_v34  ;;  %v1793_v24 = vld [vmem:[%s2295_s3 + $0x88] sm:$0xff]  }
  0x49   : > { %v704_v39 = vrot.slane %v703_v29, 4  ;;  %v795_v45 = vrot.slane %v793_v35, 4  ;;  %v798_v46 = vrot.slane %v796_v36, 5  ;;  %v1592_v50 = vcombine.low %v733_v31, %v743_v44  ;;  %v1040_v26 = vld [vmem:[#allocation3 + $0x10] sm:$0xff]  ;;  %v1046_v35 = vld [vmem:[#allocation3 + $0x40] sm:$0xff] }
  0x4a   : > { %1013 = vrot.lane.b32.xlu0 %v2120_v53, %s1836_s22  ;;  %v714_v43 = vrot.slane %v713_v33, 4  ;;  %v804_v51 = vrot.slane %v802_v40, 5  ;;  %v808_v52 = vrot.slane %v806_v41, 4  ;;  %v814_v59 = vrot.slane %v812_v42, 5 }
  0x4b   : > { %v709_v49 = vsel %vm2055_vm9, %v704_v39, %v708_v23  ;;  %v799_v56 = vor.u32 %v798_v46, %v795_v45  ;;  %876 = vst.msk [vmem:[#allocation3 + $0x8] sm:$0xff] %vm626_vm4, %v1592_v50  ;;  %v975_v1 = vrot.slane %v915_v63, 5  ;;  %v1602_v7 = vrot.slane %v914_v4, 9 }
  0x4c   : > { %v719_v55 = vsel %vm2055_vm9, %v714_v43, %v718_v30  ;;  %v809_v58 = vor.u32 %v808_v52, %v804_v51  ;;  %v978_v60 = vrot.slane %v916_v5, 5  ;;  %v1837_v46 = vmov 0.0   ;;  %v1343_v5 = vld [vmem:[%s2251_s9 + $0x1] sm:$0xff] }
  0x4d   : > { %v1591_v57 = vcombine.low %v709_v49, %v719_v55  ;;  %v800_v61 = vrot.slane %v799_v56, 4  ;;  %v977_v8 = vrot.slane %v975_v1, 4  ;;  %v976_v9 = vsel %vm1966_vm5, %v1602_v7, %v975_v1  ;;  %1367 = vst.msk [vmem:[%s2226_s28] sm:$0x1] %vm490_vm1, %v1837_v46  ;;  %1368 = vst.msk [vmem:[%s2226_s28 + $0x18] sm:$0x1] %vm490_vm1, %v1837_v46 }
  0x4e   : > { %v810_v62 = vrot.slane %v809_v58, 4  ;;  %1369 = vst.msk [vmem:[%s2226_s28 + $0x30] sm:$0x1] %vm490_vm1, %v1837_v46  ;;  %1370 = vst.msk [vmem:[%s2226_s28 + $0x48] sm:$0x1] %vm490_vm1, %v1837_v46 }
  0x4f   : > { %852 = vrot.lane.b32.xlu1 %v1591_v57, %s1836_s22  ;;  %v805_v0 = vsel %vm2055_vm9, %v800_v61, %v804_v51  ;;  %v979_v10 = vsel %vm1966_vm5, %v977_v8, %v978_v60  ;;  %1371 = vst.msk [vmem:[%s2226_s28 + $0x11] sm:$0x1] %vm490_vm1, %v1837_v46  ;;  %1372 = vst.msk [vmem:[%s2226_s28 + $0x29] sm:$0x1] %vm490_vm1, %v1837_v46  ;;  %v1609_v57 = vld [vmem:[%s2296_s4] ss:$0 sm:$0xff] }
  0x50   : > { %v815_v3 = vsel %vm2055_vm9, %v810_v62, %v814_v59  ;;  %v1608_v38 = vcombine.low %v976_v9, %v979_v10  ;;  %1373 = vst.msk [vmem:[%s2226_s28 + $0x41] sm:$0x1] %vm490_vm1, %v1837_v46  ;;  %1374 = vst.msk [vmem:[%s2226_s28 + $0x59] sm:$0x1] %vm490_vm1, %v1837_v46  ;;  %v1344_v8 = vld [vmem:[%s2251_s9 + $0x9] sm:$0xff] }
  0x51   : > { %v1595_v6 = vcombine.low %v805_v0, %v815_v3 }
  0x52   : > { %1037 = vst.msk [vmem:[#allocation3 + $0x58] sm:$0xff] %vm626_vm4, %v1608_v38 }
  0x53   : > { %854 = vrot.lane.b32.xlu1 %v1592_v50, %s1836_s22  ;;  %887 = vrot.lane.b32.xlu0 %v1595_v6, %s1835_s12  ;;  %879 = vst.msk [vmem:[#allocation3 + $0x50] sm:$0xff] %vm626_vm4, %v1595_v6 }
  0x57   : > { %640 = vrot.lane.b32.xlu1 %v2001_v48, %s1835_s12  ;;  %996 = vrot.lane.b32.xlu0 %v2120_v53, %s1834_s16 }
  0x59   : > { %v1049_v42 = vld [vmem:[#allocation3 + $0x58] sm:$0xff] }
  0x5b   : > { %662 = vrot.lane.b32.xlu1 %v1992_v37, %s1834_s16  ;;  %1015 = vrot.lane.b32.xlu0 %v2032_v11, %s1836_s22 }
  0x5f   : > { %856 = vrot.lane.b32.xlu1 %v2089_v21, %s1836_s22 }
  0x95   : > { %v659_v25 = vpop.permute.xlu1 %658 }
  0x97   : > { %v637_v12 = vpop.permute.xlu0 %636 }
  0x98   : > { %649 = vst.msk [vmem:[#allocation3] sm:$0xff] %vm648_vm11, %v637_v12 }
  0x99   : > { %671 = vst.msk [vmem:[#allocation3] sm:$0xff] %vm670_vm12, %v659_v25  ;;  %v643_v48 = vpop.permute.xlu1 %642 }
  0x9a   : > { %652 = vst.msk [vmem:[#allocation3 + $0x48] sm:$0xff] %vm648_vm11, %v643_v48  ;;  %v1349_v48 = vld [vmem:[%s2251_s9 + $0x49] sm:$0xff] }
  0x9d   : > { %v639_v53 = vpop.permute.xlu1 %638 }
  0x9e   : > { %650 = vst.msk [vmem:[#allocation3 + $0x18] sm:$0xff] %vm648_vm11, %v639_v53 }
  0xa0   : > { %v1012_v13 = vpop.permute.xlu0 %1011 }
  0xa1   : > { %v661_v37 = vpop.permute.xlu1 %660 }
  0xa2   : > { %672 = vst.msk [vmem:[#allocation3 + $0x18] sm:$0xff] %vm670_vm12, %v661_v37 }
  0xa4   : > { %v999_v11 = vpop.permute.xlu0 %998 }
  0xa5   : > { %v665_v21 = vpop.permute.xlu1 %664 }
  0xa6   : > { %674 = vst.msk [vmem:[#allocation3 + $0x48] sm:$0xff] %vm670_vm12, %v665_v21 }
  0xa8   : > { %v1018_v14 = vpop.permute.xlu0 %1017 }
  0xaa   : > { %v859_v15 = vpop.permute.xlu1 %858 }
  0xab   : > { %868 = vst.msk [vmem:[#allocation3 + $0x48] sm:$0xff] %vm864_vm13, %v859_v15 }
  0xac   : > { %v995_v16 = vpop.permute.xlu0 %994 }
  0xb0   : > { %v884_v17 = vpop.permute.xlu0 %883 }
  0xb1   : > { %895 = vst.msk [vmem:[#allocation3 + $0x8] sm:$0xff] %vm648_vm11, %v884_v17  ;;  %v1350_v17 = vld [vmem:[%s2251_s9 + $0x51] sm:$0xff] }
  0xb2   : > { %v1047_v27 = vld [vmem:[#allocation3 + $0x48] sm:$0xff] }
  0xb4   : > { %v886_v18 = vpop.permute.xlu0 %885 }
  0xb5   : > { %896 = vst.msk [vmem:[#allocation3 + $0x20] sm:$0xff] %vm648_vm11, %v886_v18 }
  0xb6   : > { %1005 = vst.msk [vmem:[#allocation3 + $0x20] sm:$0xff] %vm670_vm12, %v995_v16 }
  0xb8   : > { %v890_v19 = vpop.permute.xlu0 %889 }
  0xb9   : > { %898 = vst.msk [vmem:[#allocation3 + $0x50] sm:$0xff] %vm648_vm11, %v890_v19 }
  0xba   : > { %1007 = vst.msk [vmem:[#allocation3 + $0x50] sm:$0xff] %vm670_vm12, %v999_v11  ;;  %v993_v20 = vpop.permute.xlu1 %992 }
  0xbb   : > { %1026 = vst.msk [vmem:[#allocation3 + $0x50] sm:$0xff] %vm864_vm13, %v1018_v14 }
  0xbc   : > { %v1014_v2 = vpop.permute.xlu0 %1013  ;;  %1004 = vst.msk [vmem:[#allocation3 + $0x8] sm:$0xff] %vm670_vm12, %v993_v20 }
  0xbd   : > { %1024 = vst.msk [vmem:[#allocation3 + $0x20] sm:$0xff] %vm864_vm13, %v1014_v2  ;;  %1023 = vst.msk [vmem:[#allocation3 + $0x8] sm:$0xff] %vm864_vm13, %v1012_v13 }
  0xc1   : > { %v853_v22 = vpop.permute.xlu1 %852 }
  0xc2   : > { %v1048_v23 = vld [vmem:[#allocation3 + $0x50] sm:$0xff]  ;;  %865 = vst.msk [vmem:[#allocation3] sm:$0xff] %vm864_vm13, %v853_v22 }
  0xc3   : > { %1269 = vmatprep.mubr.bf16.mxu1 %v1048_v23  ;;  %v1345_v23 = vld [vmem:[%s2251_s9 + $0x19] sm:$0xff] }
  0xc4   : > { %1270 = vmatmul.mubr.bf16.vlgmr.msra.gmra.mrb[0].mxu1 %v1047_v27  ;;  %v1039_v28 = vld [vmem:[#allocation3 + $0x8] sm:$0xff]  ;;  %v1042_v31 = vld [vmem:[#allocation3 + $0x20] sm:$0xff] }
  0xc5   : > { %1695 = vmatpush3.bf16.msra.mxu1 %v2161_v54  ;;  %1698 = vmatprep.mubr.msk.bf16.mxu1 %vm626_vm4, %v1040_v26  ;;  %v855_v29 = vpop.permute.xlu1 %854  ;;  %v888_v30 = vpop.permute.xlu0 %887 }
  0xc6   : > { %1245 = vmatprep.mubr.bf16.mxu0 %v1039_v28  ;;  %1696 = vmatprep.subr.bf16.mxu1 %v1793_v24  ;;  %866 = vst.msk [vmem:[#allocation3 + $0x18] sm:$0xff] %vm864_vm13, %v855_v29  ;;  %v1346_v28 = vld [vmem:[%s2251_s9 + $0x21] sm:$0xff] }
  0xc7   : > { %897 = vst.msk [vmem:[#allocation3 + $0x38] sm:$0xff] %vm648_vm11, %v888_v30 }
  0xc9   : > { %1697 = vmatpush3.bf16.msra.mxu1 %v1793_v24  ;;  %v1038_v33 = vld [vmem:[#allocation3] sm:$0xff]  ;;  %v641_v34 = vpop.permute.xlu1 %640  ;;  %v997_v36 = vpop.permute.xlu0 %996 }
  0xca   : > { %1246 = vmatmul.mubr.bf16.vlgmr.msra.gmra.mrb[0].mxu0 %v1038_v33  ;;  %651 = vst.msk [vmem:[#allocation3 + $0x30] sm:$0xff] %vm648_vm11, %v641_v34 }
  0xcb   : > { %1006 = vst.msk [vmem:[#allocation3 + $0x38] sm:$0xff] %vm670_vm12, %v997_v36  ;;  %1253 = vmatprep.mubr.bf16.mxu0 %v1042_v31 }
  0xcc   : > { %1699 = vmatmul.mubr.msk.bf16.vlgmr.msra.gmra.mrb[4].mxu1 %vm626_vm4, %v1043_v32 }
  0xcd   : > { %1702 = vmatprep.mubr.msk.bf16.mxu1 %vm626_vm4, %v1046_v35  ;;  %v663_v39 = vpop.permute.xlu1 %662  ;;  %v1016_v40 = vpop.permute.xlu0 %1015  ;;  %v1041_v41 = vld [vmem:[#allocation3 + $0x18] sm:$0xff] }
  0xce   : > { %673 = vst.msk [vmem:[#allocation3 + $0x30] sm:$0xff] %vm670_vm12, %v663_v39 }
  0xcf   : > { %1025 = vst.msk [vmem:[#allocation3 + $0x38] sm:$0xff] %vm864_vm13, %v1016_v40 }
  0xd1   : > { %v857_v43 = vpop.permute.xlu1 %856 }
  0xd2   : > { %1254 = vmatmul.mubr.bf16.gmra.mrb[4].mxu0 %v1041_v41  ;;  %867 = vst.msk [vmem:[#allocation3 + $0x30] sm:$0xff] %vm864_vm13, %v857_v43  ;;  %v1347_v41 = vld [vmem:[%s2251_s9 + $0x31] sm:$0xff] }
  0xd4   : > { %1703 = vmatmul.mubr.msk.bf16.gmra.mrb[8].mxu1 %vm626_vm4, %v1049_v42 }
  0xd6   : > { %v1045_v44 = vld [vmem:[#allocation3 + $0x38] sm:$0xff] }
  0xd7   : > { %1261 = vmatprep.mubr.bf16.mxu0 %v1045_v44  ;;  %v1348_v44 = vld [vmem:[%s2251_s9 + $0x39] sm:$0xff] }
  0xd9   : > { %v1044_v45 = vld [vmem:[#allocation3 + $0x30] sm:$0xff] }
  0xda   : > { %1262 = vmatmul.mubr.bf16.gmra.mrb[8].mxu0 %v1044_v45 }
 0x197   : > { %v1682_v47 = vpop.f32.mrb[0].mxu1 }
 0x198   : > { %v1683_v49 = vpop.f32.mrb[1].mxu1 }
 0x199   : > { %v1684_v50 = vadd.f32 %v1683_v49, %v1682_v47  ;;  %v1685_v51 = vpop.f32.mrb[2].mxu1 }
 0x19a   : > { %v1686_v52 = vpop.f32.mrb[3].mxu1 }
 0x19b   : > { %v1687_v54 = vadd.f32 %v1686_v52, %v1685_v51  ;;  %v1272_v38 = vadd.f32 %v1684_v50, %v1609_v57 }
 0x19d   : > { %v1664_v55 = vpop.f32.mrb[0].mxu0  ;;  %v1275_v14 = vadd.f32 %v1687_v54, %v1609_v57 }
 0x19e   : > { %v1665_v56 = vpop.f32.mrb[1].mxu0 }
 0x19f   : > { %v1700_v58 = vpop.f32.mrb[4].mxu1  ;;  %v1666_v59 = vadd.f32 %v1665_v56, %v1664_v55  ;;  %v1667_v61 = vpop.f32.mrb[2].mxu0 }
 0x1a0   : > { %v1312_v62 = vpop.f32.mrb[5].mxu1  ;;  %v1668_v63 = vpop.f32.mrb[3].mxu0 }
 0x1a1   : > { %v1701_v0 = vpop.f32.mrb[6].mxu1  ;;  %v1669_v1 = vadd.f32 %v1668_v63, %v1667_v61  ;;  %v1248_v3 = vadd.f32 %v1666_v59, %v1609_v57 }
 0x1a2   : > { %v1315_v4 = vpop.f32.mrb[7].mxu1 }
 0x1a3   : > { %v1313_v6 = vadd.f32 %v1312_v62, %v1248_v3  ;;  %v1251_v7 = vadd.f32 %v1669_v1, %v1609_v57 }
 0x1a5   : > { %v1670_v60 = vpop.f32.mrb[4].mxu0  ;;  %v1351_v9 = vadd.f32 %v1343_v5, %v1313_v6  ;;  %v1316_v10 = vadd.f32 %v1315_v4, %v1251_v7 }
 0x1a6   : > { %v1671_v25 = vpop.f32.mrb[5].mxu0 }
 0x1a7   : > { %v1704_v12 = vpop.f32.mrb[8].mxu1  ;;  %v1672_v53 = vadd.f32 %v1671_v25, %v1670_v60  ;;  %v1673_v13 = vpop.f32.mrb[6].mxu0  ;;  %1359 = vst.msk [vmem:[%s2226_s28 + $0x1] sm:$0xff] %vm626_vm4, %v1351_v9  ;;  %v1352_v37 = vadd.f32 %v1344_v8, %v1316_v10 }
 0x1a8   : > { %v1337_v11 = vadd.f32 %v1704_v12, %v1272_v38  ;;  %v1328_v21 = vpop.f32.mrb[9].mxu1  ;;  %v1674_v15 = vpop.f32.mrb[7].mxu0 }
 0x1a9   : > { %v1705_v16 = vpop.f32.mrb[10].mxu1  ;;  %v1675_v18 = vadd.f32 %v1674_v15, %v1673_v13  ;;  %v1256_v19 = vadd.f32 %v1672_v53, %v1609_v57  ;;  %1360 = vst.msk [vmem:[%s2226_s28 + $0x9] sm:$0xff] %vm626_vm4, %v1352_v37 }
 0x1aa   : > { %v1357_v20 = vadd.f32 %v1349_v48, %v1337_v11  ;;  %v1340_v2 = vadd.f32 %v1705_v16, %v1275_v14  ;;  %v1331_v22 = vpop.f32.mrb[11].mxu1 }
 0x1ab   : > { %v1321_v24 = vadd.f32 %v1700_v58, %v1256_v19  ;;  %v1259_v26 = vadd.f32 %v1675_v18, %v1609_v57 }
 0x1ac   : > { %1365 = vst.msk [vmem:[%s2226_s28 + $0x49] sm:$0xff] %vm626_vm4, %v1357_v20  ;;  %v1358_v27 = vadd.f32 %v1350_v17, %v1340_v2 }
 0x1ad   : > { %v1353_v29 = vadd.f32 %v1345_v23, %v1321_v24  ;;  %v1324_v30 = vadd.f32 %v1701_v0, %v1259_v26  ;;  %v1676_v31 = vpop.f32.mrb[8].mxu0 }
 0x1ae   : > { %1366 = vst.msk [vmem:[%s2226_s28 + $0x51] sm:$0xff] %vm626_vm4, %v1358_v27  ;;  %v1677_v32 = vpop.f32.mrb[9].mxu0 }
 0x1af   : > { %1361 = vst.msk [vmem:[%s2226_s28 + $0x19] sm:$0xff] %vm626_vm4, %v1353_v29  ;;  %v1354_v33 = vadd.f32 %v1346_v28, %v1324_v30  ;;  %v1678_v34 = vadd.f32 %v1677_v32, %v1676_v31  ;;  %v1679_v35 = vpop.f32.mrb[10].mxu0 }
 0x1b0   : > { %v1680_v36 = vpop.f32.mrb[11].mxu0 }
 0x1b1   : > { %1362 = vst.msk [vmem:[%s2226_s28 + $0x21] sm:$0xff] %vm626_vm4, %v1354_v33  ;;  %v1681_v39 = vadd.f32 %v1680_v36, %v1679_v35  ;;  %v1264_v40 = vadd.f32 %v1678_v34, %v1609_v57 }
 0x1b3   : > { %v1329_v42 = vadd.f32 %v1328_v21, %v1264_v40  ;;  %v1267_v43 = vadd.f32 %v1681_v39, %v1609_v57 }
 0x1b5   : > { %v1355_v45 = vadd.f32 %v1347_v41, %v1329_v42  ;;  %v1332_v46 = vadd.f32 %v1331_v22, %v1267_v43 }
 0x1b7   : > { %1363 = vst.msk [vmem:[%s2226_s28 + $0x31] sm:$0xff] %vm626_vm4, %v1355_v45  ;;  %v1356_v47 = vadd.f32 %v1348_v44, %v1332_v46 }
 0x1b9   : > { %1364 = vst.msk [vmem:[%s2226_s28 + $0x39] sm:$0xff] %vm626_vm4, %v1356_v47 }
 0x1ba PF: > { %s16_s25 = sadd.s32 1, %s1832_s25   ;;  %s2306_s21 = smov %s1824_s23 }
 0x1bb   : > { %p13_p12 = scmp.ge.s32.totalorder %s16_s25, 10   ;;  %s2307_s22 = smov %s1828_s24 }
 0x1bc   : > { %s2308_s23 = smov %s2311_s26  ;;  %s2309_s24 = smov %s2315_s27 }
 0x1bd   :  { %15 = sbr.rel (!%p13_p12) target bundleno = 3 (0x3), region = 85 }

// kernel: _lambda_.10
= control target key start
LH: loop header
LB: loop body
LE: loop exit
PB: predicated region body
PF: predicated region fallthrough
CT: control target
= control target key end

     0   :  { %s1763_s18 = smov 0   ;;  %s1765_s19 = smov 0   ;;  %s2155_s0 = inlined_call_operand.vmem [shape: f32[2,16,18,32], index: 0, kind: input, shape index: {}, may-alias: {0,1,2}]   ;;  %s2156_s1 = inlined_call_operand.vmem [shape: f32[2,16,18,32], index: 1, kind: input, shape index: {}, may-alias: {0,1,2}]   ;;  %s2157_s2 = inlined_call_operand.vmem [shape: f32[2,16,18,32], index: 2, kind: input, shape index: {}, may-alias: {0,1,2}]   ;;  %s2158_s3 = inlined_call_operand.vmem [shape: bf16[288,128], index: 3, kind: input, shape index: {}]   ;;  %s2159_s4 = inlined_call_operand.vmem [shape: f32[1,128], index: 4, kind: input, shape index: {}]   ;;  %s2160_s5 = inlined_call_operand.vmem [shape: f32[2,16,18,128], index: 5, kind: output, shape index: {}]  }
   0x1   :  { %s1767_s20 = smov 0   ;;  %s1769_s21 = smov 0  }
   0x2   :  { %s1771_s22 = smov 0  }
   0x3 LB: > { %s24_s23 = sadd.s32 1, %s1719_s20  ;;  %s27_s24 = sadd.s32 1, %s1723_s21  ;;  %s1727_s22 = sphi %s1771_s22, %s15_s22   ;;  %s1723_s21 = sphi %s1769_s21, %s2171_s21   ;;  %s1719_s20 = sphi %s1767_s20, %s2170_s20   ;;  %s1715_s19 = sphi %s1765_s19, %s2169_s19   ;;  %s1711_s18 = sphi %s1763_s18, %s2168_s18  }
   0x4   : > { %p25_p0 = scmp.ge.s32.totalorder %s24_s23, 4  ;;  %p1444_p1 = scmp.ge.s32.totalorder %s1727_s22, 1 }
   0x5   : > { %p273_p2 = scmp.lt.s32.totalorder %s1727_s22, 9 }
   0x6   : > { %s2173_s23 = smov (%p25_p0, %s24_s23), 0  ;;  %s2175_s24 = smov (!%p25_p0, %s27_s24), %s1723_s21 }
   0x7   : > { %p274_p3 = pnand %p1444_p1, %p273_p2  ;;  %p29_p4 = scmp.ge.s32.totalorder %s2175_s24, 2 }
   0x8   : > { %s1445_s25 = sshll.u32 (!%p274_p3), %s1711_s18, 2  ;;  %p341_p5 = scmp.lt.s32.totalorder (!%p274_p3), %s1715_s19, 1  ;;  %vm421_vm0 = vcmask (!%p274_p3), 257024   ;;  %vm424_vm1 = vcmask (!%p274_p3), 253952   ;;  %vm869_vm2 = vcmask (!%p274_p3), 1042432   ;;  %vm870_vm3 = vcmask (!%p274_p3), 1046532  }
   0x9   : > { %s2177_s24 = smov (%p29_p4, %s2175_s24), 0  ;;  %277 = sbr.rel (%p274_p3) target bundleno = 440 (0x1b8), region = 40 }
   0xa   : > { %p357_p6 = scmp.lt.s32.totalorder (!%p274_p3), %s1445_s25, 15  ;;  %s366_s29 = sadd.s32 (!%p274_p3), 4, %s1445_s25  ;;  %v1671_v24 = vld [vmem:[%s2158_s3 + $0x40] sm:$0xff] (!%p274_p3)   ;;  %vm560_vm4 = vcmask (!%p274_p3), 261120   ;;  %vm1858_vm5 = vmor (!%p274_p3), %vm869_vm2, %vm870_vm3  ;;  %v1673_v28 = vld [vmem:[%s2158_s3 + $0x48] sm:$0xff] (!%p274_p3)   ;;  %vm582_vm11 = vcmask (!%p274_p3), 523520  }
   0xb   : > { %p503_p7 = scmp.eq.s32.totalorder (!%p274_p3), %s1711_s18, 3  ;;  %p1802_p8 = scmp.lt.s32.totalorder (!%p274_p3), %s366_s29, 15  ;;  %1543 = vmatprep.subr.bf16.mxu0 (!%p274_p3), %v1671_v24  ;;  %1601 = vmatprep.subr.bf16.mxu1 (!%p274_p3), %v1671_v24  ;;  %v1672_v27 = vld [vmem:[%s2158_s3] sm:$0xff] (!%p274_p3)   ;;  %vm627_vm7 = vsmask.f32 (!%p274_p3), 3328  ;;  %vm604_vm12 = vcmask (!%p274_p3), 785920  }
   0xc   : > { %s1807_s8 = sadd.s32 (!%p274_p3), 4294967295, %s1445_s25  ;;  %1544 = vmatpush3.bf16.msra.mxu0 (!%p274_p3), %v1672_v27  ;;  %1609 = vmatpush3.bf16.msra.mxu1 (!%p274_p3), %v1672_v27  ;;  %vm628_vm8 = vsmask.f32 (!%p274_p3), 7440  ;;  %p404_p11 = scmp.eq.s32.totalorder (!%p274_p3), %s1711_s18, 0  ;;  %vm798_vm13 = vcmask (!%p274_p3), 1048320  }
   0xd   : > { %p339_p9 = scmp.gt.s32.totalorder (!%p274_p3), %s1807_s8, 0  ;;  %p1447_p10 = scmp.lt.s32.totalorder (!%p274_p3), %s1807_s8, 15  ;;  %1545 = vmatprep.subr.bf16.mxu0 (!%p274_p3), %v1673_v28  ;;  %1602 = vmatprep.subr.bf16.mxu1 (!%p274_p3), %v1673_v28  ;;  %vm1947_vm9 = vmor (!%p274_p3), %vm627_vm7, %vm628_vm8 }
  0x10   : > { %s2179_s19 = smov (!%p341_p5, %s1715_s19), 1  ;;  %s2181_s29 = smov (!%p1802_p8, %s366_s29), 15 }
  0x11   : > { %s358_s26 = scalar_select %p357_p6, %s1445_s25, 15 }
  0x12   : > { %s1796_s27 = smul.u32 48, %s2179_s19  ;;  %s2183_s29 = smov (!%p1802_p8, %s2181_s29), 15 }
  0x13   : > { %s1619_s28 = smul.u32 3, %s358_s26 }
  0x14   : > { %s1829_s12 = scalar_select %p503_p7, 1, 0 }
  0x15   : > { %s1800_s30 = sadd.s32 %s1619_s28, %s1796_s27  ;;  %s1620_s13 = smul.u32 3, %s2183_s29 }
  0x16   : > { %s1454_s7 = sshll.u32 %s1800_s30, 3  ;;  %v505_v26 = vstv %s1829_s12  ;;  %s1729_s12 = smov 64  }
  0x17   : > { %s1814_s11 = scalar_lea.vmem %s2156_s1, %s1454_s7  ;;  %s375_s17 = sadd.s32 %s1620_s13, %s1796_s27  ;;  %vm1876_vm6 = vcmp.eq.s32.totalorder %v505_v26, 1 }
  0x18   : > { %v429_v0 = vld [vmem:[%s1814_s11 + $0x18] sm:$0xff]  ;;  %v430_v1 = vld [vmem:[%s1814_s11 + $0x20] sm:$0xff]  ;;  %v427_v5 = vld [vmem:[%s1814_s11 + $0x8] sm:$0xff]  ;;  %s340_s16 = scalar_select %p339_p9, %s1807_s8, 0 }
  0x19   : > { %v426_v2 = vld [vmem:[%s1814_s11] sm:$0xff]  ;;  %v1534_v3 = vpack.c.bf16 %v429_v0, %v429_v0  ;;  %v1535_v4 = vpack.c.bf16 %v430_v1, %v430_v1  ;;  %v435_v7 = vld [vmem:[%s1814_s11 + $0x48] sm:$0xff]  ;;  %v436_v8 = vld [vmem:[%s1814_s11 + $0x50] sm:$0xff]  ;;  %v1532_v9 = vpack.c.bf16 %v427_v5, %v427_v5  ;;  %s1459_s19 = sshll.u32 %s375_s17, 3  ;;  %s1730_s8 = smov 32  }
  0x1a   : > { %v1531_v6 = vpack.c.bf16 %v426_v2, %v426_v2  ;;  %v1540_v10 = vpack.c.bf16 %v435_v7, %v435_v7  ;;  %v1541_v11 = vpack.c.bf16 %v436_v8, %v436_v8  ;;  %v428_v12 = vld [vmem:[%s1814_s11 + $0x10] sm:$0x3]  ;;  %v433_v14 = vld [vmem:[%s1814_s11 + $0x38] sm:$0xff]  ;;  %v434_v16 = vld [vmem:[%s1814_s11 + $0x40] sm:$0x3]  ;;  %s377_s10 = scalar_lea.vmem %s2157_s2, %s1459_s19  ;;  %s2185_s16 = smov (!%p1447_p10, %s340_s16), 15 }
  0x1b   : > { %v432_v13 = vld [vmem:[%s1814_s11 + $0x30] sm:$0xff]  ;;  %494 = vst.msk [vmem:[#allocation2 + $0x18] sm:$0xf] %vm421_vm0, %v1534_v3  ;;  %495 = vst.msk [vmem:[#allocation2 + $0x1c] sm:$0xf] %vm421_vm0, %v1535_v4  ;;  %v1533_v15 = vpack.c.bf16 %v428_v12, %v428_v12  ;;  %v1538_v18 = vpack.c.bf16 %v433_v14, %v433_v14  ;;  %v1539_v21 = vpack.c.bf16 %v434_v16, %v434_v16  ;;  %v399_v29 = vld [vmem:[%s377_s10] sm:$0xff]  ;;  %s2119_s19 = scalar_lea.vmem %s2160_s5, %s1454_s7 }
  0x1c   : > { %491 = vst.msk [vmem:[#allocation2 + $0xc] sm:$0xf] %vm421_vm0, %v1531_v6  ;;  %v1537_v17 = vpack.c.bf16 %v432_v13, %v432_v13  ;;  %v437_v19 = vld [vmem:[%s1814_s11 + $0x58] sm:$0x3]  ;;  %v431_v20 = vld [vmem:[%s1814_s11 + $0x28] sm:$0x3] }
  0x1d   : > { %492 = vst.msk [vmem:[#allocation2 + $0x10] sm:$0xf] %vm421_vm0, %v1532_v9  ;;  %500 = vst.msk [vmem:[#allocation2 + $0x30] sm:$0xf] %vm421_vm0, %v1540_v10  ;;  %v1542_v22 = vpack.c.bf16 %v437_v19, %v437_v19  ;;  %v1536_v23 = vpack.c.bf16 %v431_v20, %v431_v20  ;;  %v400_v30 = vld [vmem:[%s377_s10 + $0x8] sm:$0xff]  ;;  %s1617_s11 = smul.u32 3, %s2185_s16 }
  0x1e   : > { %501 = vst.msk [vmem:[#allocation2 + $0x34] sm:$0xf] %vm421_vm0, %v1541_v11  ;;  %497 = vst.msk [vmem:[#allocation2 + $0x24] sm:$0xf] %vm421_vm0, %v1537_v17  ;;  %v401_v31 = vld [vmem:[%s377_s10 + $0x10] sm:$0x3]  ;;  %v402_v34 = vpack.c.bf16 %v400_v30, %v399_v29 }
  0x1f   : > { %493 = vst.msk [vmem:[#allocation2 + $0x14] sm:$0x1] %vm424_vm1, %v1533_v15  ;;  %499 = vst.msk [vmem:[#allocation2 + $0x2c] sm:$0x1] %vm424_vm1, %v1539_v21  ;;  %v403_v36 = vpack.c.bf16 %v401_v31, %v401_v31  ;;  %s1891_s13 = sadd.s32 %s1796_s27, %s1617_s11  ;;  %s1731_s17 = smov 96   ;;  %v1674_v31 = vld [vmem:[%s2158_s3 + $0x8] sm:$0xff]  }
  0x20   : > { %498 = vst.msk [vmem:[#allocation2 + $0x28] sm:$0xf] %vm421_vm0, %v1538_v18  ;;  %v507_v38 = vsel %vm1876_vm6, 0, %v402_v34  ;;  %s1452_s27 = sshll.u32 %s1891_s13, 3  ;;  %1546 = vmatpush3.bf16.msra.mxu0 %v1674_v31  ;;  %1610 = vmatpush3.bf16.msra.mxu1 %v1674_v31 }
  0x21   : > { %502 = vst.msk [vmem:[#allocation2 + $0x38] sm:$0x1] %vm424_vm1, %v1542_v22  ;;  %496 = vst.msk [vmem:[#allocation2 + $0x20] sm:$0x1] %vm424_vm1, %v1536_v23  ;;  %v1477_v42 = vcombine.low %v507_v38, %v507_v38  ;;  %v1478_v43 = vcombine.high %v507_v38, %v507_v38  ;;  %v508_v52 = vsel %vm1876_vm6, 0, %v403_v36  ;;  %s1919_s16 = scalar_lea.vmem %s2155_s0, %s1452_s27 }
  0x22   : > { %v1665_v33 = vld [vmem:[#allocation2 + $0x18] sm:$0xff]   ;;  %v1479_v59 = vcombine.low %v508_v52, %v508_v52  ;;  %v394_v23 = vld [vmem:[%s1919_s16] sm:$0xff]  ;;  %v395_v30 = vld [vmem:[%s1919_s16 + $0x8] sm:$0xff]  ;;  %s405_s26 = scalar_select %p404_p11, 1, 0 }
  0x23   : > { %592 = vrot.lane.b32.xlu1 %v1665_v33, %s1729_s12  ;;  %563 = vst.msk [vmem:[#allocation3 + $0x30] sm:$0xff] %vm560_vm4, %v1665_v33  ;;  %v836_v39 = vld [vmem:[#allocation2 + $0xc] sm:$0xe]  ;;  %v615_v15 = vld [vmem:[#allocation2 + $0x18] sm:$0xf] }
  0x24   : > { %v1666_v35 = vld [vmem:[#allocation2 + $0xc] sm:$0xff]   ;;  %v1493_v44 = vrot.slane %v836_v39, 9  ;;  %521 = vst.msk [vmem:[#allocation2 + $0x3c] sm:$0xf] %vm421_vm0, %v1477_v42  ;;  %522 = vst.msk [vmem:[#allocation2 + $0x40] sm:$0xf] %vm421_vm0, %v1478_v43 }
  0x25   : > { %v1884_v37 = vld [vmem:[#allocation2 + $0x30] sm:$0xff]   ;;  %570 = vrot.lane.b32.xlu0 %v1666_v35, %s1730_s8  ;;  %562 = vst.msk [vmem:[#allocation3 + $0x18] sm:$0xff] %vm560_vm4, %v1666_v35  ;;  %v842_v47 = vld [vmem:[#allocation2 + $0x24] sm:$0xe]  ;;  %v616_v16 = vld [vmem:[#allocation2 + $0x1c] sm:$0xf] }
  0x26   : > { %v837_v40 = vld [vmem:[#allocation2 + $0x10] sm:$0xf]  ;;  %v838_v41 = vld [vmem:[#allocation2 + $0x14] sm:$0x1]  ;;  %v844_v50 = vld [vmem:[#allocation2 + $0x2c] sm:$0x1] }
  0x27   : > { %v881_v45 = vrot.slane %v837_v40, 5  ;;  %v884_v46 = vrot.slane %v838_v41, 5  ;;  %v1893_v48 = vld [vmem:[#allocation2 + $0x24] sm:$0xff]   ;;  %v1495_v51 = vrot.slane %v842_v47, 9  ;;  %576 = vrot.lane.b32.xlu1 %v1884_v37, %s1730_s8  ;;  %v898_v56 = vrot.slane %v844_v50, 5 }
  0x28   : > { %v843_v49 = vld [vmem:[#allocation2 + $0x28] sm:$0xf]  ;;  %564 = vst.msk [vmem:[#allocation3 + $0x48] sm:$0xff] %vm560_vm4, %v1893_v48  ;;  %v845_v57 = vld [vmem:[#allocation2 + $0x30] sm:$0xe]  ;;  %v679_v28 = vshrl.u32 %v615_v15, 16 }
  0x29   : > { %v882_v53 = vsel %vm1858_vm5, %v1493_v44, %v881_v45  ;;  %v883_v54 = vrot.slane %v881_v45, 4  ;;  %v895_v55 = vrot.slane %v843_v49, 5  ;;  %v846_v58 = vld [vmem:[#allocation2 + $0x34] sm:$0xf]  ;;  %v847_v63 = vld [vmem:[#allocation2 + $0x38] sm:$0x1] }
  0x2a   : > { %v1496_v0 = vrot.slane %v845_v57, 9  ;;  %v618_v1 = vld [vmem:[#allocation2 + $0x24] sm:$0xf]  ;;  %v902_v3 = vrot.slane %v846_v58, 5  ;;  %v905_v4 = vrot.slane %v847_v63, 5  ;;  %v682_v29 = vshll.u32 %v615_v15, 16 }
  0x2b   : > { %v885_v60 = vsel %vm1858_vm5, %v883_v54, %v884_v46  ;;  %v896_v61 = vsel %vm1858_vm5, %v1495_v51, %v895_v55  ;;  %v897_v62 = vrot.slane %v895_v55, 4  ;;  %523 = vst.msk [vmem:[#allocation2 + $0x44] sm:$0x1] %vm424_vm1, %v1479_v59  ;;  %v619_v5 = vld [vmem:[#allocation2 + $0x28] sm:$0xf]  ;;  %572 = vrot.lane.b32.xlu1 %v1665_v33, %s1730_s8  ;;  %v703_v8 = vshrl.u32 %v618_v1, 16 }
  0x2c   : > { %v1910_v2 = vcombine.low %v882_v53, %v885_v60  ;;  %v620_v7 = vld [vmem:[#allocation2 + $0x2c] sm:$0x1]  ;;  %v706_v9 = vshll.u32 %v618_v1, 16  ;;  %v712_v10 = vshll.u32 %v619_v5, 16  ;;  %v903_v12 = vsel %vm1858_vm5, %v1496_v0, %v902_v3  ;;  %v617_v22 = vld [vmem:[#allocation2 + $0x20] sm:$0x1] }
  0x2d   : > { %v899_v6 = vsel %vm1858_vm5, %v897_v62, %v898_v56  ;;  %v904_v13 = vrot.slane %v902_v3, 4  ;;  %v716_v14 = vshrl.u32 %v619_v5, 16  ;;  %v705_v17 = vrot.slane %v703_v8, 4  ;;  %v1669_v26 = vld [vmem:[#allocation2 + $0x3c] sm:$0xff]   ;;  %v396_v36 = vld [vmem:[%s1919_s16 + $0x10] sm:$0x3] }
  0x2e   : > { %945 = vrot.lane.b32.xlu0 %v1910_v2, %s1731_s17  ;;  %v1924_v11 = vcombine.low %v896_v61, %v899_v6  ;;  %v708_v19 = vrot.slane %v706_v9, 5  ;;  %v714_v20 = vrot.slane %v712_v10, 5  ;;  %v722_v27 = vshll.u32 %v620_v7, 16  ;;  %v624_v47 = vld [vmem:[#allocation2 + $0x3c] sm:$0xf]  ;;  %v1675_v53 = vld [vmem:[%s2158_s3 + $0x50] sm:$0xff]  }
  0x2f   : > { %v906_v18 = vsel %vm1858_vm5, %v904_v13, %v905_v4  ;;  %v718_v21 = vrot.slane %v716_v14, 4  ;;  %594 = vrot.lane.b32.xlu1 %v1893_v48, %s1729_s12  ;;  %v688_v34 = vshll.u32 %v616_v16, 16  ;;  %v692_v35 = vshrl.u32 %v616_v16, 16  ;;  %v625_v58 = vld [vmem:[#allocation2 + $0x40] sm:$0xf]  ;;  %1547 = vmatprep.subr.bf16.mxu0 %v1675_v53  ;;  %v1676_v0 = vld [vmem:[%s2158_s3 + $0x10] sm:$0xff]  }
  0x30   : > { %969 = vst.msk [vmem:[#allocation3 + $0x28] sm:$0xff] %vm560_vm4, %v1924_v11  ;;  %v1502_v24 = vcombine.low %v903_v12, %v906_v18  ;;  %v709_v32 = vor.u32 %v708_v19, %v705_v17  ;;  %v724_v39 = vrot.slane %v722_v27, 5  ;;  %v681_v40 = vrot.slane %v679_v28, 4  ;;  %v839_v63 = vld [vmem:[#allocation2 + $0x18] sm:$0xe]  ;;  %1603 = vmatprep.subr.bf16.mxu1 %v1675_v53  ;;  %1548 = vmatpush3.bf16.msra.mxu0 %v1676_v0 }
  0x31   : > { %v719_v33 = vor.u32 %v718_v21, %v714_v20  ;;  %v684_v41 = vrot.slane %v682_v29, 5  ;;  %v698_v42 = vshll.u32 %v617_v22, 16  ;;  %v690_v45 = vrot.slane %v688_v34, 5  ;;  %v840_v6 = vld [vmem:[#allocation2 + $0x1c] sm:$0xf]  ;;  %1611 = vmatpush3.bf16.msra.mxu1 %v1676_v0 }
  0x32   : > { %932 = vrot.lane.b32.xlu0 %v1924_v11, %s1729_s12  ;;  %970 = vst.msk [vmem:[#allocation3 + $0x40] sm:$0xff] %vm560_vm4, %v1502_v24  ;;  %v710_v43 = vrot.slane %v709_v32, 4  ;;  %v694_v46 = vrot.slane %v692_v35, 4  ;;  %v397_v51 = vpack.c.bf16 %v395_v30, %v394_v23  ;;  %v398_v52 = vpack.c.bf16 %v396_v36, %v396_v36  ;;  %v626_v59 = vld [vmem:[#allocation2 + $0x44] sm:$0x1]  ;;  %v1677_v14 = vld [vmem:[%s2158_s3 + $0x58] sm:$0xff]  }
  0x33   : > { %v720_v44 = vrot.slane %v719_v33, 4  ;;  %598 = vrot.lane.b32.xlu1 %v1669_v26, %s1729_s12  ;;  %v685_v49 = vor.u32 %v684_v41, %v681_v40  ;;  %v700_v50 = vrot.slane %v698_v42, 5  ;;  %v406_v57 = vstv %s405_s26  ;;  %v841_v12 = vld [vmem:[#allocation2 + $0x20] sm:$0x1]  ;;  %v612_v13 = vld [vmem:[#allocation2 + $0xc] sm:$0xf]  ;;  %1549 = vmatprep.subr.bf16.mxu0 %v1677_v14 }
  0x34   : > { %v715_v54 = vsel %vm1947_vm9, %v710_v43, %v714_v20  ;;  %v695_v56 = vor.u32 %v694_v46, %v690_v45  ;;  %vm407_vm10 = vcmp.eq.s32.totalorder %v406_v57, 1  ;;  %v751_v62 = vshrl.u32 %v624_v47, 16  ;;  %v613_v19 = vld [vmem:[#allocation2 + $0x10] sm:$0xf]  ;;  %v1678_v20 = vld [vmem:[%s2158_s3 + $0x18] sm:$0xff]   ;;  %1604 = vmatprep.subr.bf16.mxu1 %v1677_v14  ;;  %v1680_v41 = vld [vmem:[%s2158_s3 + $0x20] sm:$0xff]  }
  0x35   : > { %v725_v55 = vsel %vm1947_vm9, %v720_v44, %v724_v39  ;;  %v686_v61 = vrot.slane %v685_v49, 4  ;;  %v408_v3 = vsel %vm407_vm10, 0, %v397_v51  ;;  %v409_v4 = vsel %vm407_vm10, 0, %v398_v52  ;;  %v1991_v32 = vld [vmem:[#allocation2 + $0x14] sm:$0x1]  ;;  %1550 = vmatpush3.bf16.msra.mxu0 %v1678_v20  ;;  %1612 = vmatpush3.bf16.msra.mxu1 %v1678_v20  ;;  %v1681_v46 = vld [vmem:[%s2158_s3 + $0x68] sm:$0xff]  }
  0x36   : > { %951 = vrot.lane.b32.xlu0 %v1502_v24, %s1731_s17  ;;  %v1960_v60 = vcombine.low %v715_v54, %v725_v55  ;;  %v696_v1 = vrot.slane %v695_v56, 4  ;;  %v754_v5 = vshll.u32 %v624_v47, 16  ;;  %v1462_v8 = vcombine.low %v408_v3, %v408_v3  ;;  %v1679_v24 = vld [vmem:[%s2158_s3 + $0x60] sm:$0xff]   ;;  %v1682_v51 = vld [vmem:[%s2158_s3 + $0x28] sm:$0xff]   ;;  %v1683_v56 = vld [vmem:[%s2158_s3 + $0x70] sm:$0xff]  }
  0x37   : > { %v691_v7 = vsel %vm1947_vm9, %v686_v61, %v690_v45  ;;  %v1463_v9 = vcombine.high %v408_v3, %v408_v3  ;;  %v1464_v10 = vcombine.low %v409_v4, %v409_v4  ;;  %v753_v16 = vrot.slane %v751_v62, 4  ;;  %1551 = vmatprep.subr.bf16.mxu0 %v1679_v24  ;;  %1605 = vmatprep.subr.bf16.mxu1 %v1679_v24 }
  0x38   : > { %792 = vrot.lane.b32.xlu1 %v1960_v60, %s1731_s17  ;;  %812 = vst.msk [vmem:[#allocation3 + $0x38] sm:$0xff] %vm560_vm4, %v1960_v60  ;;  %v701_v15 = vsel %vm1947_vm9, %v696_v1, %v700_v50  ;;  %v756_v17 = vrot.slane %v754_v5, 5  ;;  %v760_v18 = vshll.u32 %v625_v58, 16  ;;  %v770_v22 = vshll.u32 %v626_v59, 16 }
  0x39   : > { %v1981_v21 = vcombine.low %v691_v7, %v701_v15  ;;  %422 = vst.msk [vmem:[#allocation2] sm:$0xf] %vm421_vm0, %v1462_v8  ;;  %423 = vst.msk [vmem:[#allocation2 + $0x4] sm:$0xf] %vm421_vm0, %v1463_v9  ;;  %v1494_v23 = vrot.slane %v839_v63, 9  ;;  %v888_v28 = vrot.slane %v840_v6, 5  ;;  %1552 = vmatpush3.bf16.msra.mxu0 %v1680_v41  ;;  %1613 = vmatpush3.bf16.msra.mxu1 %v1680_v41 }
  0x3a   : > { %928 = vrot.lane.b32.xlu0 %v1910_v2, %s1729_s12  ;;  %425 = vst.msk [vmem:[#allocation2 + $0x8] sm:$0x1] %vm424_vm1, %v1464_v10  ;;  %v764_v2 = vshrl.u32 %v625_v58, 16  ;;  %v757_v26 = vor.u32 %v756_v17, %v753_v16  ;;  %v762_v27 = vrot.slane %v760_v18, 5  ;;  %v891_v29 = vrot.slane %v841_v12, 5  ;;  %1553 = vmatprep.subr.bf16.mxu0 %v1681_v46 }
  0x3b   : > { %811 = vst.msk [vmem:[#allocation3 + $0x20] sm:$0xff] %vm560_vm4, %v1981_v21  ;;  %v772_v31 = vrot.slane %v770_v22, 5  ;;  %v655_v33 = vshrl.u32 %v612_v13, 16  ;;  %v658_v34 = vshll.u32 %v612_v13, 16  ;;  %v889_v36 = vsel %vm1858_vm5, %v1494_v23, %v888_v28  ;;  %v621_v10 = vld [vmem:[#allocation2 + $0x30] sm:$0xf]  ;;  %1606 = vmatprep.subr.bf16.mxu1 %v1681_v46 }
  0x3c   : > { %v766_v30 = vrot.slane %v764_v2, 4  ;;  %v758_v35 = vrot.slane %v757_v26, 4  ;;  %v890_v39 = vrot.slane %v888_v28, 4  ;;  %v664_v40 = vshll.u32 %v613_v19, 16  ;;  %v622_v16 = vld [vmem:[#allocation2 + $0x34] sm:$0xf] }
  0x3d   : > { %v657_v43 = vrot.slane %v655_v33, 4  ;;  %v660_v44 = vrot.slane %v658_v34, 5  ;;  %v668_v45 = vshrl.u32 %v613_v19, 16  ;;  %v674_v55 = vshll.u32 %v1991_v32, 16  ;;  %v623_v17 = vld [vmem:[#allocation2 + $0x38] sm:$0x1]  ;;  %1554 = vmatpush3.bf16.msra.mxu0 %v1682_v51  ;;  %1614 = vmatpush3.bf16.msra.mxu1 %v1682_v51 }
  0x3e   : > { %817 = vrot.lane.b32.xlu0 %v1981_v21, %s1730_s8  ;;  %v767_v42 = vor.u32 %v766_v30, %v762_v27  ;;  %v763_v47 = vsel %vm1947_vm9, %v758_v35, %v762_v27  ;;  %v892_v49 = vsel %vm1858_vm5, %v890_v39, %v891_v29  ;;  %v2007_v50 = vrot.slane %v664_v40, 5  ;;  %1555 = vmatprep.subr.bf16.mxu0 %v1683_v56  ;;  %v1684_v27 = vld [vmem:[%s2158_s3 + $0x30] sm:$0xff]   ;;  %v1685_v32 = vld [vmem:[%s2158_s3 + $0x78] sm:$0xff]  }
  0x3f   : > { %v2012_v53 = vcombine.low %v889_v36, %v892_v49  ;;  %v670_v54 = vrot.slane %v668_v45, 4  ;;  %v661_v61 = vor.u32 %v660_v44, %v657_v43  ;;  %1607 = vmatprep.subr.bf16.mxu1 %v1683_v56  ;;  %v676_v34 = vrot.slane %v674_v55, 5 }
  0x40   : > { %v768_v52 = vrot.slane %v767_v42, 4  ;;  %v833_v57 = vld [vmem:[#allocation2] sm:$0xe]  ;;  %v834_v58 = vld [vmem:[#allocation2 + $0x4] sm:$0xf]  ;;  %v727_v35 = vshrl.u32 %v621_v10, 16 }
  0x41   : > { %v835_v59 = vld [vmem:[#allocation2 + $0x8] sm:$0x1]  ;;  %v1492_v62 = vrot.slane %v833_v57, 9  ;;  %v874_v63 = vrot.slane %v834_v58, 5  ;;  %v609_v1 = vld [vmem:[#allocation2] sm:$0xf]  ;;  %v671_v9 = vor.u32 %v670_v54, %v2007_v50  ;;  %1556 = vmatpush3.bf16.msra.mxu0 %v1684_v27  ;;  %1615 = vmatpush3.bf16.msra.mxu1 %v1684_v27 }
  0x42   : > { %819 = vrot.lane.b32.xlu0 %v1960_v60, %s1730_s8  ;;  %v877_v0 = vrot.slane %v835_v59, 5  ;;  %v773_v3 = vsel %vm1947_vm9, %v768_v52, %v772_v31  ;;  %968 = vst.msk [vmem:[#allocation3 + $0x10] sm:$0xff] %vm560_vm4, %v2012_v53  ;;  %v1670_v4 = vld [vmem:[#allocation2] sm:$0xff]   ;;  %v611_v6 = vld [vmem:[#allocation2 + $0x8] sm:$0x1]  ;;  %v631_v7 = vshrl.u32 %v609_v1, 16  ;;  %1557 = vmatprep.subr.bf16.mxu0 %v1685_v32 }
  0x43   : > { %v610_v5 = vld [vmem:[#allocation2 + $0x4] sm:$0xf]  ;;  %v634_v8 = vshll.u32 %v609_v1, 16  ;;  %v1491_v60 = vcombine.low %v763_v47, %v773_v3  ;;  %v875_v12 = vsel %vm1858_vm5, %v1492_v62, %v874_v63  ;;  %v876_v13 = vrot.slane %v874_v63, 4  ;;  %561 = vst.msk [vmem:[#allocation3] sm:$0xff] %vm560_vm4, %v1670_v4  ;;  %v1686_v47 = vld [vmem:[%s2158_s3 + $0x38] sm:$0xff]   ;;  %1608 = vmatprep.subr.bf16.mxu1 %v1685_v32 }
  0x44   : > { %v640_v14 = vshll.u32 %v610_v5, 16  ;;  %v644_v15 = vshrl.u32 %v610_v5, 16  ;;  %v633_v18 = vrot.slane %v631_v7, 4  ;;  %v650_v20 = vshll.u32 %v611_v6, 16  ;;  %v2053_v54 = vld [vmem:[%s2158_s3 + $0x80] sm:$0xff]   ;;  %v977_v32 = vld [vmem:[#allocation3 + $0x28] sm:$0xff] }
  0x45   : > { %v636_v19 = vrot.slane %v634_v8, 5  ;;  %v662_v2 = vrot.slane %v661_v61, 4  ;;  %v878_v22 = vsel %vm1858_vm5, %v876_v13, %v877_v0  ;;  %v672_v26 = vrot.slane %v671_v9, 4  ;;  %1558 = vmatpush3.bf16.msra.mxu0 %v1686_v47  ;;  %1616 = vmatpush3.bf16.msra.mxu1 %v1686_v47  ;;  %v849_v63 = vld [vmem:[#allocation2 + $0x40] sm:$0xf] }
  0x46   : > { %823 = vrot.lane.b32.xlu0 %v1491_v60, %s1730_s8  ;;  %v642_v23 = vrot.slane %v640_v14, 5  ;;  %v646_v24 = vrot.slane %v644_v15, 4  ;;  %v1498_v28 = vcombine.low %v875_v12, %v878_v22  ;;  %v652_v30 = vrot.slane %v650_v20, 5  ;;  %1589 = vmatprep.subr.bf16.mxu1 %v2053_v54  ;;  %v848_v4 = vld [vmem:[#allocation2 + $0x3c] sm:$0xe] }
  0x47   : > { %v637_v29 = vor.u32 %v636_v19, %v633_v18  ;;  %v667_v31 = vsel %vm1947_vm9, %v662_v2, %v2007_v50  ;;  %v730_v36 = vshll.u32 %v621_v10, 16  ;;  %v736_v40 = vshll.u32 %v622_v16, 16  ;;  %v850_v5 = vld [vmem:[#allocation2 + $0x44] sm:$0x1] }
  0x48   : > { %v647_v33 = vor.u32 %v646_v24, %v642_v23  ;;  %926 = vrot.lane.b32.xlu1 %v1498_v28, %s1729_s12  ;;  %v740_v41 = vshrl.u32 %v622_v16, 16  ;;  %v746_v42 = vshll.u32 %v623_v17, 16  ;;  %v677_v44 = vsel %vm1947_vm9, %v672_v26, %v676_v34  ;;  %v1688_v24 = vld [vmem:[%s2158_s3 + $0x88] sm:$0xff]  }
  0x49   : > { %v638_v39 = vrot.slane %v637_v29, 4  ;;  %v729_v45 = vrot.slane %v727_v35, 4  ;;  %v732_v46 = vrot.slane %v730_v36, 5  ;;  %v1487_v50 = vcombine.low %v667_v31, %v677_v44  ;;  %v974_v26 = vld [vmem:[#allocation3 + $0x10] sm:$0xff]  ;;  %v980_v35 = vld [vmem:[#allocation3 + $0x40] sm:$0xff] }
  0x4a   : > { %947 = vrot.lane.b32.xlu0 %v2012_v53, %s1731_s17  ;;  %v648_v43 = vrot.slane %v647_v33, 4  ;;  %v738_v51 = vrot.slane %v736_v40, 5  ;;  %v742_v52 = vrot.slane %v740_v41, 4  ;;  %v748_v59 = vrot.slane %v746_v42, 5 }
  0x4b   : > { %v643_v49 = vsel %vm1947_vm9, %v638_v39, %v642_v23  ;;  %v733_v56 = vor.u32 %v732_v46, %v729_v45  ;;  %810 = vst.msk [vmem:[#allocation3 + $0x8] sm:$0xff] %vm560_vm4, %v1487_v50  ;;  %v909_v1 = vrot.slane %v849_v63, 5  ;;  %v1497_v7 = vrot.slane %v848_v4, 9 }
  0x4c   : > { %v653_v55 = vsel %vm1947_vm9, %v648_v43, %v652_v30  ;;  %v743_v58 = vor.u32 %v742_v52, %v738_v51  ;;  %v912_v60 = vrot.slane %v850_v5, 5  ;;  %v1732_v46 = vmov 0.0  }
  0x4d   : > { %v1486_v57 = vcombine.low %v643_v49, %v653_v55  ;;  %v734_v61 = vrot.slane %v733_v56, 4  ;;  %v911_v8 = vrot.slane %v909_v1, 4  ;;  %v910_v9 = vsel %vm1858_vm5, %v1497_v7, %v909_v1  ;;  %1285 = vst [vmem:[%s2119_s19] sm:$0x1] %v1732_v46  ;;  %1286 = vst [vmem:[%s2119_s19 + $0x18] sm:$0x1] %v1732_v46 }
  0x4e   : > { %v744_v62 = vrot.slane %v743_v58, 4  ;;  %1287 = vst [vmem:[%s2119_s19 + $0x30] sm:$0x1] %v1732_v46  ;;  %1288 = vst [vmem:[%s2119_s19 + $0x48] sm:$0x1] %v1732_v46 }
  0x4f   : > { %786 = vrot.lane.b32.xlu1 %v1486_v57, %s1731_s17  ;;  %v739_v0 = vsel %vm1947_vm9, %v734_v61, %v738_v51  ;;  %v913_v10 = vsel %vm1858_vm5, %v911_v8, %v912_v60  ;;  %1289 = vst [vmem:[%s2119_s19 + $0x11] sm:$0x1] %v1732_v46  ;;  %1290 = vst [vmem:[%s2119_s19 + $0x29] sm:$0x1] %v1732_v46  ;;  %v1504_v57 = vld [vmem:[%s2159_s4] ss:$0 sm:$0xff] }
  0x50   : > { %v749_v3 = vsel %vm1947_vm9, %v744_v62, %v748_v59  ;;  %v1503_v38 = vcombine.low %v910_v9, %v913_v10  ;;  %1291 = vst [vmem:[%s2119_s19 + $0x41] sm:$0x1] %v1732_v46  ;;  %1292 = vst [vmem:[%s2119_s19 + $0x59] sm:$0x1] %v1732_v46 }
  0x51   : > { %v1490_v6 = vcombine.low %v739_v0, %v749_v3 }
  0x52   : > { %971 = vst.msk [vmem:[#allocation3 + $0x58] sm:$0xff] %vm560_vm4, %v1503_v38 }
  0x53   : > { %788 = vrot.lane.b32.xlu1 %v1487_v50, %s1731_s17  ;;  %821 = vrot.lane.b32.xlu0 %v1490_v6, %s1730_s8  ;;  %813 = vst.msk [vmem:[#allocation3 + $0x50] sm:$0xff] %vm560_vm4, %v1490_v6 }
  0x57   : > { %574 = vrot.lane.b32.xlu1 %v1893_v48, %s1730_s8  ;;  %930 = vrot.lane.b32.xlu0 %v2012_v53, %s1729_s12 }
  0x59   : > { %v983_v42 = vld [vmem:[#allocation3 + $0x58] sm:$0xff] }
  0x5b   : > { %596 = vrot.lane.b32.xlu1 %v1884_v37, %s1729_s12  ;;  %949 = vrot.lane.b32.xlu0 %v1924_v11, %s1731_s17 }
  0x5f   : > { %790 = vrot.lane.b32.xlu1 %v1981_v21, %s1731_s17 }
  0x95   : > { %v593_v25 = vpop.permute.xlu1 %592 }
  0x97   : > { %v571_v12 = vpop.permute.xlu0 %570 }
  0x98   : > { %583 = vst.msk [vmem:[#allocation3] sm:$0xff] %vm582_vm11, %v571_v12 }
  0x99   : > { %605 = vst.msk [vmem:[#allocation3] sm:$0xff] %vm604_vm12, %v593_v25  ;;  %v577_v48 = vpop.permute.xlu1 %576 }
  0x9a   : > { %586 = vst.msk [vmem:[#allocation3 + $0x48] sm:$0xff] %vm582_vm11, %v577_v48 }
  0x9d   : > { %v573_v53 = vpop.permute.xlu1 %572 }
  0x9e   : > { %584 = vst.msk [vmem:[#allocation3 + $0x18] sm:$0xff] %vm582_vm11, %v573_v53 }
  0xa0   : > { %v946_v13 = vpop.permute.xlu0 %945 }
  0xa1   : > { %v595_v37 = vpop.permute.xlu1 %594 }
  0xa2   : > { %606 = vst.msk [vmem:[#allocation3 + $0x18] sm:$0xff] %vm604_vm12, %v595_v37 }
  0xa4   : > { %v933_v11 = vpop.permute.xlu0 %932 }
  0xa5   : > { %v599_v21 = vpop.permute.xlu1 %598 }
  0xa6   : > { %608 = vst.msk [vmem:[#allocation3 + $0x48] sm:$0xff] %vm604_vm12, %v599_v21 }
  0xa8   : > { %v952_v14 = vpop.permute.xlu0 %951 }
  0xaa   : > { %v793_v15 = vpop.permute.xlu1 %792 }
  0xab   : > { %802 = vst.msk [vmem:[#allocation3 + $0x48] sm:$0xff] %vm798_vm13, %v793_v15 }
  0xac   : > { %v929_v16 = vpop.permute.xlu0 %928 }
  0xb0   : > { %v818_v17 = vpop.permute.xlu0 %817 }
  0xb1   : > { %829 = vst.msk [vmem:[#allocation3 + $0x8] sm:$0xff] %vm582_vm11, %v818_v17 }
  0xb2   : > { %v981_v27 = vld [vmem:[#allocation3 + $0x48] sm:$0xff] }
  0xb4   : > { %v820_v18 = vpop.permute.xlu0 %819 }
  0xb5   : > { %830 = vst.msk [vmem:[#allocation3 + $0x20] sm:$0xff] %vm582_vm11, %v820_v18 }
  0xb6   : > { %939 = vst.msk [vmem:[#allocation3 + $0x20] sm:$0xff] %vm604_vm12, %v929_v16 }
  0xb8   : > { %v824_v19 = vpop.permute.xlu0 %823 }
  0xb9   : > { %832 = vst.msk [vmem:[#allocation3 + $0x50] sm:$0xff] %vm582_vm11, %v824_v19 }
  0xba   : > { %941 = vst.msk [vmem:[#allocation3 + $0x50] sm:$0xff] %vm604_vm12, %v933_v11  ;;  %v927_v20 = vpop.permute.xlu1 %926 }
  0xbb   : > { %960 = vst.msk [vmem:[#allocation3 + $0x50] sm:$0xff] %vm798_vm13, %v952_v14 }
  0xbc   : > { %v948_v2 = vpop.permute.xlu0 %947  ;;  %938 = vst.msk [vmem:[#allocation3 + $0x8] sm:$0xff] %vm604_vm12, %v927_v20 }
  0xbd   : > { %958 = vst.msk [vmem:[#allocation3 + $0x20] sm:$0xff] %vm798_vm13, %v948_v2  ;;  %957 = vst.msk [vmem:[#allocation3 + $0x8] sm:$0xff] %vm798_vm13, %v946_v13 }
  0xc1   : > { %v787_v22 = vpop.permute.xlu1 %786 }
  0xc2   : > { %v982_v23 = vld [vmem:[#allocation3 + $0x50] sm:$0xff]  ;;  %799 = vst.msk [vmem:[#allocation3] sm:$0xff] %vm798_vm13, %v787_v22 }
  0xc3   : > { %1203 = vmatprep.mubr.bf16.mxu1 %v982_v23 }
  0xc4   : > { %1204 = vmatmul.mubr.bf16.vlgmr.msra.gmra.mrb[0].mxu1 %v981_v27  ;;  %v973_v28 = vld [vmem:[#allocation3 + $0x8] sm:$0xff]  ;;  %v976_v31 = vld [vmem:[#allocation3 + $0x20] sm:$0xff] }
  0xc5   : > { %1590 = vmatpush3.bf16.msra.mxu1 %v2053_v54  ;;  %1593 = vmatprep.mubr.msk.bf16.mxu1 %vm560_vm4, %v974_v26  ;;  %v789_v29 = vpop.permute.xlu1 %788  ;;  %v822_v30 = vpop.permute.xlu0 %821 }
  0xc6   : > { %1179 = vmatprep.mubr.bf16.mxu0 %v973_v28  ;;  %1591 = vmatprep.subr.bf16.mxu1 %v1688_v24  ;;  %800 = vst.msk [vmem:[#allocation3 + $0x18] sm:$0xff] %vm798_vm13, %v789_v29 }
  0xc7   : > { %831 = vst.msk [vmem:[#allocation3 + $0x38] sm:$0xff] %vm582_vm11, %v822_v30 }
  0xc9   : > { %1592 = vmatpush3.bf16.msra.mxu1 %v1688_v24  ;;  %v972_v33 = vld [vmem:[#allocation3] sm:$0xff]  ;;  %v575_v34 = vpop.permute.xlu1 %574  ;;  %v931_v36 = vpop.permute.xlu0 %930 }
  0xca   : > { %1180 = vmatmul.mubr.bf16.vlgmr.msra.gmra.mrb[0].mxu0 %v972_v33  ;;  %585 = vst.msk [vmem:[#allocation3 + $0x30] sm:$0xff] %vm582_vm11, %v575_v34 }
  0xcb   : > { %940 = vst.msk [vmem:[#allocation3 + $0x38] sm:$0xff] %vm604_vm12, %v931_v36  ;;  %1187 = vmatprep.mubr.bf16.mxu0 %v976_v31 }
  0xcc   : > { %1594 = vmatmul.mubr.msk.bf16.vlgmr.msra.gmra.mrb[4].mxu1 %vm560_vm4, %v977_v32 }
  0xcd   : > { %1597 = vmatprep.mubr.msk.bf16.mxu1 %vm560_vm4, %v980_v35  ;;  %v597_v39 = vpop.permute.xlu1 %596  ;;  %v950_v40 = vpop.permute.xlu0 %949  ;;  %v975_v41 = vld [vmem:[#allocation3 + $0x18] sm:$0xff] }
  0xce   : > { %607 = vst.msk [vmem:[#allocation3 + $0x30] sm:$0xff] %vm604_vm12, %v597_v39 }
  0xcf   : > { %959 = vst.msk [vmem:[#allocation3 + $0x38] sm:$0xff] %vm798_vm13, %v950_v40 }
  0xd1   : > { %v791_v43 = vpop.permute.xlu1 %790 }
  0xd2   : > { %1188 = vmatmul.mubr.bf16.gmra.mrb[4].mxu0 %v975_v41  ;;  %801 = vst.msk [vmem:[#allocation3 + $0x30] sm:$0xff] %vm798_vm13, %v791_v43 }
  0xd4   : > { %1598 = vmatmul.mubr.msk.bf16.gmra.mrb[8].mxu1 %vm560_vm4, %v983_v42 }
  0xd6   : > { %v979_v44 = vld [vmem:[#allocation3 + $0x38] sm:$0xff] }
  0xd7   : > { %1195 = vmatprep.mubr.bf16.mxu0 %v979_v44 }
  0xd9   : > { %v978_v45 = vld [vmem:[#allocation3 + $0x30] sm:$0xff] }
  0xda   : > { %1196 = vmatmul.mubr.bf16.gmra.mrb[8].mxu0 %v978_v45 }
 0x197   : > { %v1577_v47 = vpop.f32.mrb[0].mxu1 }
 0x198   : > { %v1578_v49 = vpop.f32.mrb[1].mxu1 }
 0x199   : > { %v1579_v50 = vadd.f32 %v1578_v49, %v1577_v47  ;;  %v1580_v51 = vpop.f32.mrb[2].mxu1 }
 0x19a   : > { %v1581_v52 = vpop.f32.mrb[3].mxu1 }
 0x19b   : > { %v1582_v54 = vadd.f32 %v1581_v52, %v1580_v51  ;;  %v1206_v60 = vadd.f32 %v1579_v50, %v1504_v57 }
 0x19d   : > { %v1559_v55 = vpop.f32.mrb[0].mxu0  ;;  %v1209_v53 = vadd.f32 %v1582_v54, %v1504_v57 }
 0x19e   : > { %v1560_v56 = vpop.f32.mrb[1].mxu0 }
 0x19f   : > { %v1595_v58 = vpop.f32.mrb[4].mxu1  ;;  %v1561_v59 = vadd.f32 %v1560_v56, %v1559_v55  ;;  %v1562_v61 = vpop.f32.mrb[2].mxu0 }
 0x1a0   : > { %v1246_v62 = vpop.f32.mrb[5].mxu1  ;;  %v1563_v63 = vpop.f32.mrb[3].mxu0 }
 0x1a1   : > { %v1596_v0 = vpop.f32.mrb[6].mxu1  ;;  %v1564_v1 = vadd.f32 %v1563_v63, %v1562_v61  ;;  %v1182_v3 = vadd.f32 %v1561_v59, %v1504_v57 }
 0x1a2   : > { %v1249_v4 = vpop.f32.mrb[7].mxu1 }
 0x1a3   : > { %v1247_v5 = vadd.f32 %v1246_v62, %v1182_v3  ;;  %v1185_v6 = vadd.f32 %v1564_v1, %v1504_v57 }
 0x1a5   : > { %v1565_v7 = vpop.f32.mrb[4].mxu0  ;;  %1277 = vst [vmem:[%s2119_s19 + $0x1] sm:$0xff] %v1247_v5  ;;  %v1250_v8 = vadd.f32 %v1249_v4, %v1185_v6 }
 0x1a6   : > { %v1566_v9 = vpop.f32.mrb[5].mxu0 }
 0x1a7   : > { %v1599_v10 = vpop.f32.mrb[8].mxu1  ;;  %v1567_v38 = vadd.f32 %v1566_v9, %v1565_v7  ;;  %v1568_v25 = vpop.f32.mrb[6].mxu0  ;;  %1278 = vst [vmem:[%s2119_s19 + $0x9] sm:$0xff] %v1250_v8 }
 0x1a8   : > { %v1271_v12 = vadd.f32 %v1599_v10, %v1206_v60  ;;  %v1262_v48 = vpop.f32.mrb[9].mxu1  ;;  %v1569_v13 = vpop.f32.mrb[7].mxu0 }
 0x1a9   : > { %v1600_v37 = vpop.f32.mrb[10].mxu1  ;;  %v1570_v11 = vadd.f32 %v1569_v13, %v1568_v25  ;;  %v1190_v21 = vadd.f32 %v1567_v38, %v1504_v57 }
 0x1aa   : > { %1283 = vst [vmem:[%s2119_s19 + $0x49] sm:$0xff] %v1271_v12  ;;  %v1274_v14 = vadd.f32 %v1600_v37, %v1209_v53  ;;  %v1265_v15 = vpop.f32.mrb[11].mxu1 }
 0x1ab   : > { %v1255_v16 = vadd.f32 %v1595_v58, %v1190_v21  ;;  %v1193_v17 = vadd.f32 %v1570_v11, %v1504_v57 }
 0x1ac   : > { %1284 = vst [vmem:[%s2119_s19 + $0x51] sm:$0xff] %v1274_v14 }
 0x1ad   : > { %1279 = vst [vmem:[%s2119_s19 + $0x19] sm:$0xff] %v1255_v16  ;;  %v1258_v18 = vadd.f32 %v1596_v0, %v1193_v17  ;;  %v1571_v19 = vpop.f32.mrb[8].mxu0 }
 0x1ae   : > { %v1572_v20 = vpop.f32.mrb[9].mxu0 }
 0x1af   : > { %1280 = vst [vmem:[%s2119_s19 + $0x21] sm:$0xff] %v1258_v18  ;;  %v1573_v2 = vadd.f32 %v1572_v20, %v1571_v19  ;;  %v1574_v22 = vpop.f32.mrb[10].mxu0 }
 0x1b0   : > { %v1575_v23 = vpop.f32.mrb[11].mxu0 }
 0x1b1   : > { %v1576_v24 = vadd.f32 %v1575_v23, %v1574_v22  ;;  %v1198_v26 = vadd.f32 %v1573_v2, %v1504_v57 }
 0x1b3   : > { %v1263_v27 = vadd.f32 %v1262_v48, %v1198_v26  ;;  %v1201_v28 = vadd.f32 %v1576_v24, %v1504_v57 }
 0x1b5   : > { %1281 = vst [vmem:[%s2119_s19 + $0x31] sm:$0xff] %v1263_v27  ;;  %v1266_v29 = vadd.f32 %v1265_v15, %v1201_v28 }
 0x1b7   : > { %1282 = vst [vmem:[%s2119_s19 + $0x39] sm:$0xff] %v1266_v29 }
 0x1b8 PF: > { %s15_s22 = sadd.s32 1, %s1727_s22   ;;  %s2168_s18 = smov %s1719_s20 }
 0x1b9   : > { %p12_p12 = scmp.ge.s32.totalorder %s15_s22, 10   ;;  %s2169_s19 = smov %s1723_s21 }
 0x1ba   : > { %s2170_s20 = smov %s2173_s23  ;;  %s2171_s21 = smov %s2177_s24 }
 0x1bb   :  { %14 = sbr.rel (!%p12_p12) target bundleno = 3 (0x3), region = 78 }

// kernel: _lambda_.7
= control target key start
LH: loop header
LB: loop body
LE: loop exit
PB: predicated region body
PF: predicated region fallthrough
CT: control target
= control target key end

     0   :  { %s3672_s30 = smov 0   ;;  %s3674_s10 = smov 0   ;;  %s4563_s0 = inlined_call_operand.vmem [shape: f32[2,16,18,32], index: 0, kind: input, shape index: {}, may-alias: {0,1,2,3,4}]   ;;  %s4564_s1 = inlined_call_operand.vmem [shape: f32[2,16,18,32], index: 1, kind: input, shape index: {}, may-alias: {0,1,2,3,4}]   ;;  %s4565_s2 = inlined_call_operand.vmem [shape: f32[2,16,18,32], index: 2, kind: input, shape index: {}, may-alias: {0,1,2,3,4}]   ;;  %s4566_s3 = inlined_call_operand.vmem [shape: f32[2,16,18,32], index: 3, kind: input, shape index: {}, may-alias: {0,1,2,3,4}]   ;;  %s4567_s4 = inlined_call_operand.vmem [shape: f32[2,16,18,32], index: 4, kind: input, shape index: {}, may-alias: {0,1,2,3,4}]   ;;  %s4568_s5 = inlined_call_operand.vmem [shape: bf16[288,32], index: 5, kind: input, shape index: {}]   ;;  %s4569_s6 = inlined_call_operand.vmem [shape: f32[1,32], index: 6, kind: input, shape index: {}]   ;;  %s4570_s7 = inlined_call_operand.vmem [shape: bf16[288,32], index: 7, kind: input, shape index: {}]   ;;  %s4571_s8 = inlined_call_operand.vmem [shape: f32[1,32], index: 8, kind: input, shape index: {}]   ;;  %s4572_s9 = inlined_call_operand.vmem [shape: f32[2,16,18,32], index: 9, kind: output, shape index: {}]  }
   0x1   :  { %s3676_s11 = smov 0   ;;  %s3678_s12 = smov 0  }
   0x2   :  { %s3680_s13 = smov 0  }
   0x3 LB: > { %s28_s14 = sadd.s32 1, %s3606_s11  ;;  %s31_s15 = sadd.s32 1, %s3610_s12  ;;  %s3614_s13 = sphi %s3680_s13, %s19_s13   ;;  %s3610_s12 = sphi %s3678_s12, %s4599_s12   ;;  %s3606_s11 = sphi %s3676_s11, %s4598_s11   ;;  %s3602_s10 = sphi %s3674_s10, %s4597_s10   ;;  %s3598_s30 = sphi %s3672_s30, %s4596_s30  }
   0x4   : > { %p29_p0 = scmp.ge.s32.totalorder %s28_s14, 4  ;;  %p3112_p1 = scmp.ge.s32.totalorder %s3614_s13, 1 }
   0x5   : > { %p469_p2 = scmp.lt.s32.totalorder %s3614_s13, 9 }
   0x6   : > { %s4601_s14 = smov (%p29_p0, %s28_s14), 0  ;;  %s4603_s15 = smov (!%p29_p0, %s31_s15), %s3610_s12 }
   0x7   : > { %p470_p3 = pnand %p3112_p1, %p469_p2  ;;  %p33_p4 = scmp.ge.s32.totalorder %s4603_s15, 2 }
   0x8   : > { %s3705_s16 = sshll.u32 (!%p470_p3), %s3598_s30, 2  ;;  %p581_p5 = scmp.lt.s32.totalorder (!%p470_p3), %s3602_s10, 1  ;;  %vm706_vm0 = vcmask (!%p470_p3), 257024   ;;  %vm709_vm1 = vcmask (!%p470_p3), 253952   ;;  %vm1340_vm2 = vcmask (!%p470_p3), 1042432   ;;  %vm1341_vm3 = vcmask (!%p470_p3), 1046532  }
   0x9   : > { %s4605_s15 = smov (%p33_p4, %s4603_s15), 0  ;;  %473 = sbr.rel (%p470_p3) target bundleno = 905 (0x389), region = 56 }
   0xa   : > { %p620_p6 = scmp.lt.s32.totalorder (!%p470_p3), %s3705_s16, 15  ;;  %s3712_s20 = sadd.s32 (!%p470_p3), 4294967295, %s3705_s16  ;;  %vm921_vm4 = vcmask (!%p470_p3), 261120   ;;  %v3533_v24 = vld [vmem:[%s4568_s5 + $0x40] sm:$0xff] (!%p470_p3)   ;;  %vm3778_vm5 = vmor (!%p470_p3), %vm1340_vm2, %vm1341_vm3  ;;  %vm1012_vm6 = vsmask.f32 (!%p470_p3), 3328 }
   0xb   : > { %s3715_s21 = sadd.s32 (!%p470_p3), 4294967294, %s3705_s16  ;;  %p598_p7 = scmp.gt.s32.totalorder (!%p470_p3), %s3712_s20, 0  ;;  %v3534_v25 = vld [vmem:[%s4568_s5] sm:$0xff] (!%p470_p3)   ;;  %vm1013_vm7 = vsmask.f32 (!%p470_p3), 7440  ;;  %3340 = vmatprep.subr.bf16.mxu0 (!%p470_p3), %v3533_v24  ;;  %vm951_vm13 = vcmask (!%p470_p3), 523520  }
   0xc   : > { %p3121_p8 = scmp.lt.s32.totalorder (!%p470_p3), %s3712_s20, 15  ;;  %p712_p9 = scmp.lt.s32.totalorder (!%p470_p3), %s3712_s20, 0  ;;  %3341 = vmatpush3.bf16.msra.mxu0 (!%p470_p3), %v3534_v25  ;;  %vm3830_vm9 = vmor (!%p470_p3), %vm1012_vm6, %vm1013_vm7  ;;  %vm981_vm14 = vcmask (!%p470_p3), 785920   ;;  %vm1243_vm15 = vcmask (!%p470_p3), 1048320   ;;  %vm1845_vm2 = vsmask.f32 (!%p470_p3), 256 }
   0xd   : > { %p577_p10 = scmp.gt.s32.totalorder (!%p470_p3), %s3715_s21, 0  ;;  %p3114_p12 = scmp.lt.s32.totalorder (!%p470_p3), %s3715_s21, 15  ;;  %vm4172_vm3 = vmand (!%p470_p3), %vm709_vm1, %vm1845_vm2  ;;  %vm1865_vm6 = vsmask.f32 (!%p470_p3), 7938 }
   0xe   : > { %p684_p0 = scmp.lt.s32.totalorder (!%p470_p3), %s3715_s21, 0  ;;  %s3616_s28 = smov (!%p470_p3), 64   ;;  %vm4182_vm7 = vmand (!%p470_p3), %vm709_vm1, %vm1865_vm6 }
   0xf   : > { %s3618_s24 = smov (!%p470_p3), 96   ;;  %s3836_s25 = sadd.s32 (!%p470_p3), 4, %s3705_s16 }
  0x10   : > { %s4607_s10 = smov (!%p581_p5, %s3602_s10), 1  ;;  %p630_p1 = scmp.gt.s32.totalorder %s3836_s25, 0 }
  0x11   : > { %s621_s17 = scalar_select %p620_p6, %s3705_s16, 15 }
  0x12   : > { %s3709_s18 = smul.u32 48, %s4607_s10  ;;  %p3130_p2 = scmp.lt.s32.totalorder %s3836_s25, 15 }
  0x13   : > { %s3477_s19 = smul.u32 3, %s621_s17  ;;  %p816_p3 = scmp.gt.s32.totalorder %s3836_s25, 15 }
  0x14   : > { %s599_s10 = scalar_select %p598_p7, %s3712_s20, 0 }
  0x15   : > { %s624_s22 = sadd.s32 %s3477_s19, %s3709_s18 }
  0x16   : > { %s3128_s23 = sshll.u32 %s624_s22, 3  ;;  %s4609_s10 = smov (!%p3121_p8, %s599_s10), 15 }
  0x17   : > { %s3723_s26 = scalar_lea.vmem %s4565_s2, %s3128_s23  ;;  %s3728_s29 = scalar_lea.vmem %s4572_s9, %s3128_s23 }
  0x18   : > { %v738_v0 = vld [vmem:[%s3723_s26] sm:$0xff]  ;;  %v739_v1 = vld [vmem:[%s3723_s26 + $0x8] sm:$0xff]  ;;  %v740_v2 = vld [vmem:[%s3723_s26 + $0x10] sm:$0x3]  ;;  %s3749_s17 = scalar_select %p712_p9, 1, 0 }
  0x19   : > { %v3316_v3 = vpack.c.bf16 %v738_v0, %v738_v0  ;;  %v3317_v4 = vpack.c.bf16 %v739_v1, %v739_v1  ;;  %v3318_v5 = vpack.c.bf16 %v740_v2, %v740_v2  ;;  %v741_v6 = vld [vmem:[%s3723_s26 + $0x18] sm:$0xff]  ;;  %v742_v7 = vld [vmem:[%s3723_s26 + $0x20] sm:$0xff]  ;;  %v743_v8 = vld [vmem:[%s3723_s26 + $0x28] sm:$0x3]  ;;  %p604_p11 = scmp.lt.s32.totalorder %s4609_s10, 15  ;;  %s4573_s23 = smov 32  }
  0x1a   : > { %v3319_v9 = vpack.c.bf16 %v741_v6, %v741_v6  ;;  %v3320_v10 = vpack.c.bf16 %v742_v7, %v742_v7  ;;  %v3321_v11 = vpack.c.bf16 %v743_v8, %v743_v8  ;;  %v744_v12 = vld [vmem:[%s3723_s26 + $0x30] sm:$0xff]  ;;  %v745_v13 = vld [vmem:[%s3723_s26 + $0x38] sm:$0xff]  ;;  %v746_v14 = vld [vmem:[%s3723_s26 + $0x40] sm:$0x3]  ;;  %s578_s19 = scalar_select %p577_p10, %s3715_s21, 0  ;;  %v719_v44 = vstv %s3749_s17 }
  0x1b   : > { %803 = vst.msk [vmem:[#allocation2 + $0x18] sm:$0xf] %vm706_vm0, %v3316_v3  ;;  %804 = vst.msk [vmem:[#allocation2 + $0x1c] sm:$0xf] %vm706_vm0, %v3317_v4  ;;  %v3322_v15 = vpack.c.bf16 %v744_v12, %v744_v12  ;;  %v3323_v16 = vpack.c.bf16 %v745_v13, %v745_v13  ;;  %v3324_v17 = vpack.c.bf16 %v746_v14, %v746_v14  ;;  %v747_v18 = vld [vmem:[%s3723_s26 + $0x48] sm:$0xff]  ;;  %v748_v19 = vld [vmem:[%s3723_s26 + $0x50] sm:$0xff] }
  0x1c   : > { %805 = vst.msk [vmem:[#allocation2 + $0x20] sm:$0x1] %vm709_vm1, %v3318_v5  ;;  %v749_v20 = vld [vmem:[%s3723_s26 + $0x58] sm:$0x3]  ;;  %808 = vst.msk [vmem:[#allocation2 + $0x2c] sm:$0x1] %vm709_vm1, %v3321_v11  ;;  %v3325_v21 = vpack.c.bf16 %v747_v18, %v747_v18  ;;  %v3326_v22 = vpack.c.bf16 %v748_v19, %v748_v19 }
  0x1d   : > { %806 = vst.msk [vmem:[#allocation2 + $0x24] sm:$0xf] %vm706_vm0, %v3319_v9  ;;  %807 = vst.msk [vmem:[#allocation2 + $0x28] sm:$0xf] %vm706_vm0, %v3320_v10  ;;  %v3327_v23 = vpack.c.bf16 %v749_v20, %v749_v20  ;;  %s4611_s10 = smov (!%p604_p11, %s4609_s10), 15  ;;  %s4613_s19 = smov (!%p3114_p12, %s578_s19), 15 }
  0x1e   : > { %809 = vst.msk [vmem:[#allocation2 + $0x30] sm:$0xf] %vm706_vm0, %v3322_v15  ;;  %810 = vst.msk [vmem:[#allocation2 + $0x34] sm:$0xf] %vm706_vm0, %v3323_v16  ;;  %s3476_s20 = smul.u32 3, %s4611_s10  ;;  %p583_p13 = scmp.lt.s32.totalorder %s4613_s19, 15 }
  0x1f   : > { %811 = vst.msk [vmem:[#allocation2 + $0x38] sm:$0x1] %vm709_vm1, %v3324_v17  ;;  %814 = vst.msk [vmem:[#allocation2 + $0x44] sm:$0x1] %vm709_vm1, %v3327_v23  ;;  %vm3812_vm8 = vcmp.eq.s32.totalorder %v719_v44, 1  ;;  %p3241_p9 = scmp.ne.s32.totalorder %s3598_s30, 0 }
  0x20   : > { %812 = vst.msk [vmem:[#allocation2 + $0x3c] sm:$0xf] %vm706_vm0, %v3325_v21  ;;  %813 = vst.msk [vmem:[#allocation2 + $0x40] sm:$0xf] %vm706_vm0, %v3326_v22  ;;  %s608_s27 = sadd.s32 %s3476_s20, %s3709_s18  ;;  %s4615_s19 = smov (!%p583_p13, %s4613_s19), 15 }
  0x21   : > { %s3126_s10 = sshll.u32 %s608_s27, 3 }
  0x22   : > { %v1298_v27 = vld [vmem:[#allocation2 + $0x18] sm:$0xe]  ;;  %v1299_v28 = vld [vmem:[#allocation2 + $0x1c] sm:$0xf]  ;;  %s3805_s22 = scalar_lea.vmem %s4564_s1, %s3126_s10  ;;  %s3474_s10 = smul.u32 3, %s4615_s19 }
  0x23   : > { %v1300_v29 = vld [vmem:[#allocation2 + $0x20] sm:$0x1]  ;;  %v3190_v30 = vrot.slane %v1298_v27, 9  ;;  %v1359_v31 = vrot.slane %v1299_v28, 5  ;;  %v3526_v33 = vld [vmem:[#allocation2 + $0x18] sm:$0xff]   ;;  %v714_v12 = vld [vmem:[%s3805_s22 + $0x8] sm:$0xff] }
  0x24   : > { %v1362_v32 = vrot.slane %v1300_v29, 5  ;;  %v1301_v34 = vld [vmem:[#allocation2 + $0x24] sm:$0xe]  ;;  %v1302_v35 = vld [vmem:[#allocation2 + $0x28] sm:$0xf]  ;;  %963 = vrot.lane.b32.xlu1 %v3526_v33, %s3616_s28  ;;  %924 = vst.msk [vmem:[#allocation3 + $0x30] sm:$0xff] %vm921_vm4, %v3526_v33  ;;  %s587_s21 = sadd.s32 %s3709_s18, %s3474_s10 }
  0x25   : > { %v1360_v36 = vsel %vm3778_vm5, %v3190_v30, %v1359_v31  ;;  %v1361_v37 = vrot.slane %v1359_v31, 4  ;;  %v1303_v38 = vld [vmem:[#allocation2 + $0x2c] sm:$0x1]  ;;  %v3191_v39 = vrot.slane %v1301_v34, 9  ;;  %v1366_v40 = vrot.slane %v1302_v35, 5  ;;  %v3789_v41 = vld [vmem:[#allocation2 + $0x24] sm:$0xff]  }
  0x26   : > { %v1369_v42 = vrot.slane %v1303_v38, 5  ;;  %v3791_v43 = vld [vmem:[#allocation2 + $0x30] sm:$0xff]   ;;  %925 = vst.msk [vmem:[#allocation3 + $0x48] sm:$0xff] %vm921_vm4, %v3789_v41  ;;  %v994_v48 = vld [vmem:[#allocation2 + $0x18] sm:$0xf]  ;;  %v713_v3 = vld [vmem:[%s3805_s22] sm:$0xff] }
  0x27   : > { %v1363_v45 = vsel %vm3778_vm5, %v1361_v37, %v1362_v32  ;;  %v1367_v46 = vsel %vm3778_vm5, %v3191_v39, %v1366_v40  ;;  %v1368_v47 = vrot.slane %v1366_v40, 4  ;;  %v995_v49 = vld [vmem:[#allocation2 + $0x1c] sm:$0xf]  ;;  %v996_v51 = vld [vmem:[#allocation2 + $0x20] sm:$0x1]  ;;  %v1064_v52 = vshrl.u32 %v994_v48, 16 }
  0x28   : > { %v3198_v50 = vcombine.low %v1360_v36, %v1363_v45  ;;  %v1067_v53 = vshll.u32 %v994_v48, 16  ;;  %v1073_v54 = vshll.u32 %v995_v49, 16  ;;  %926 = vst.msk [vmem:[#allocation3 + $0x60] sm:$0xff] %vm921_vm4, %v3791_v43  ;;  %v3807_v55 = vld [vmem:[#allocation2 + $0x3c] sm:$0xff]   ;;  %935 = vrot.lane.b32.xlu1 %v3526_v33, %s4573_s23  ;;  %v1077_v57 = vshrl.u32 %v995_v49, 16  ;;  %s3119_s19 = sshll.u32 %s587_s21, 3 }
  0x29   : > { %v1370_v56 = vsel %vm3778_vm5, %v1368_v47, %v1369_v42  ;;  %v1083_v58 = vshll.u32 %v996_v51, 16  ;;  %v997_v59 = vld [vmem:[#allocation2 + $0x24] sm:$0xf]  ;;  %v998_v60 = vld [vmem:[#allocation2 + $0x28] sm:$0xf]  ;;  %v1066_v63 = vrot.slane %v1064_v52, 4  ;;  %v716_v19 = vpack.c.bf16 %v714_v12, %v713_v3 }
  0x2a   : > { %1446 = vrot.lane.b32.xlu0 %v3198_v50, %s3618_s24  ;;  %1477 = vst.msk [vmem:[#allocation3 + $0x10] sm:$0xff] %vm921_vm4, %v3198_v50  ;;  %v3818_v62 = vcombine.low %v1367_v46, %v1370_v56  ;;  %v1069_v0 = vrot.slane %v1067_v53, 5  ;;  %v1075_v1 = vrot.slane %v1073_v54, 5  ;;  %v999_v2 = vld [vmem:[#allocation2 + $0x2c] sm:$0x1]  ;;  %927 = vst.msk [vmem:[#allocation3 + $0x78] sm:$0xff] %vm921_vm4, %v3807_v55 }
  0x2b   : > { %v1079_v4 = vrot.slane %v1077_v57, 4  ;;  %v1085_v5 = vrot.slane %v1083_v58, 5  ;;  %v1088_v6 = vshrl.u32 %v997_v59, 16  ;;  %v1091_v7 = vshll.u32 %v997_v59, 16  ;;  %v1000_v17 = vld [vmem:[#allocation2 + $0x30] sm:$0xf] }
  0x2c   : > { %1478 = vst.msk [vmem:[#allocation3 + $0x28] sm:$0xff] %vm921_vm4, %v3818_v62  ;;  %v1070_v8 = vor.u32 %v1069_v0, %v1066_v63  ;;  %v1097_v9 = vshll.u32 %v998_v60, 16  ;;  %v1101_v10 = vshrl.u32 %v998_v60, 16  ;;  %v1107_v11 = vshll.u32 %v999_v2, 16  ;;  %965 = vrot.lane.b32.xlu1 %v3789_v41, %s3616_s28  ;;  %v1001_v18 = vld [vmem:[#allocation2 + $0x34] sm:$0xf] }
  0x2d   : > { %v1080_v14 = vor.u32 %v1079_v4, %v1075_v1  ;;  %v1090_v15 = vrot.slane %v1088_v6, 4  ;;  %v1093_v16 = vrot.slane %v1091_v7, 5  ;;  %v1002_v27 = vld [vmem:[#allocation2 + $0x38] sm:$0x1]  ;;  %v1112_v28 = vshrl.u32 %v1000_v17, 16 }
  0x2e   : > { %1421 = vrot.lane.b32.xlu0 %v3198_v50, %s3616_s28  ;;  %v1071_v20 = vrot.slane %v1070_v8, 4  ;;  %v1099_v21 = vrot.slane %v1097_v9, 5  ;;  %v1103_v22 = vrot.slane %v1101_v10, 4  ;;  %v1109_v23 = vrot.slane %v1107_v11, 5  ;;  %v715_v34 = vld [vmem:[%s3805_s22 + $0x10] sm:$0x3]  ;;  %s589_s22 = scalar_lea.vmem %s4563_s0, %s3119_s19 }
  0x2f   : > { %v1081_v24 = vrot.slane %v1080_v14, 4  ;;  %v1094_v25 = vor.u32 %v1093_v16, %v1090_v15  ;;  %v1115_v29 = vshll.u32 %v1000_v17, 16  ;;  %v1121_v32 = vshll.u32 %v1001_v18, 16  ;;  %s3846_s27 = scalar_select %p684_p0, 1, 0  ;;  %v686_v2 = vld [vmem:[%s589_s22 + $0x8] sm:$0xff] }
  0x30   : > { %v1076_v30 = vsel %vm3830_vm9, %v1071_v20, %v1075_v1  ;;  %v1104_v31 = vor.u32 %v1103_v22, %v1099_v21  ;;  %v1125_v33 = vshrl.u32 %v1001_v18, 16  ;;  %937 = vrot.lane.b32.xlu1 %v3789_v41, %s4573_s23  ;;  %v1114_v37 = vrot.slane %v1112_v28, 4  ;;  %v1003_v52 = vld [vmem:[#allocation2 + $0x3c] sm:$0xf]  ;;  %v1004_v58 = vld [vmem:[#allocation2 + $0x40] sm:$0xf] }
  0x31   : > { %v1086_v35 = vsel %vm3830_vm9, %v1081_v24, %v1085_v5  ;;  %v1095_v36 = vrot.slane %v1094_v25, 4  ;;  %v1117_v38 = vrot.slane %v1115_v29, 5  ;;  %v1123_v42 = vrot.slane %v1121_v32, 5  ;;  %v685_v1 = vld [vmem:[%s589_s22] sm:$0xff]  ;;  %v687_v3 = vld [vmem:[%s589_s22 + $0x10] sm:$0x3] }
  0x32   : > { %1448 = vrot.lane.b32.xlu0 %v3818_v62, %s3618_s24  ;;  %v3182_v39 = vcombine.low %v1076_v30, %v1086_v35  ;;  %v1105_v40 = vrot.slane %v1104_v31, 4  ;;  %v1127_v44 = vrot.slane %v1125_v33, 4  ;;  %v1131_v47 = vshll.u32 %v1002_v27, 16  ;;  %v1005_v4 = vld [vmem:[#allocation2 + $0x44] sm:$0x1]  ;;  %v3535_v10 = vld [vmem:[%s4568_s5 + $0x48] sm:$0xff]  }
  0x33   : > { %v1100_v45 = vsel %vm3830_vm9, %v1095_v36, %v1099_v21  ;;  %v1118_v46 = vor.u32 %v1117_v38, %v1114_v37  ;;  %v717_v41 = vpack.c.bf16 %v715_v34, %v715_v34  ;;  %v721_v50 = vsel %vm3812_vm8, 0, %v716_v19  ;;  %v1304_v8 = vld [vmem:[#allocation2 + $0x30] sm:$0xe]  ;;  %v1305_v9 = vld [vmem:[#allocation2 + $0x34] sm:$0xf]  ;;  %3342 = vmatprep.subr.bf16.mxu0 %v3535_v10  ;;  %v3536_v27 = vld [vmem:[%s4568_s5 + $0x8] sm:$0xff]  }
  0x34   : > { %1260 = vst.msk [vmem:[#allocation3 + $0x20] sm:$0xff] %vm921_vm4, %v3182_v39  ;;  %v1110_v48 = vsel %vm3830_vm9, %v1105_v40, %v1109_v23  ;;  %v1128_v49 = vor.u32 %v1127_v44, %v1123_v42  ;;  %v691_v51 = vstv %s3846_s27  ;;  %967 = vrot.lane.b32.xlu1 %v3791_v43, %s3616_s28  ;;  %v1133_v56 = vrot.slane %v1131_v47, 5  ;;  %s631_s27 = scalar_select %p630_p1, %s3836_s25, 0  ;;  %v1306_v16 = vld [vmem:[#allocation2 + $0x38] sm:$0x1]  ;;  %v3537_v28 = vld [vmem:[%s4568_s5 + $0x50] sm:$0xff]   ;;  %3343 = vmatpush3.bf16.msra.mxu0 %v3536_v27 }
  0x35   : > { %v3865_v53 = vcombine.low %v1100_v45, %v1110_v48  ;;  %v1119_v54 = vrot.slane %v1118_v46, 4  ;;  %v722_v57 = vsel %vm3812_vm8, 0, %v717_v41  ;;  %v3151_v60 = vcombine.low %v721_v50, %v721_v50  ;;  %s3889_s10 = scalar_select %p816_p3, 1, 0  ;;  %v3908_v21 = vld [vmem:[#allocation2 + $0x3c] sm:$0xe]  ;;  %3344 = vmatprep.subr.bf16.mxu0 %v3537_v28 }
  0x36   : > { %1268 = vrot.lane.b32.xlu0 %v3182_v39, %s4573_s23  ;;  %v1129_v59 = vrot.slane %v1128_v49, 4  ;;  %v3152_v63 = vcombine.high %v721_v50, %v721_v50  ;;  %v3153_v0 = vcombine.low %v722_v57, %v722_v57  ;;  %v688_v5 = vpack.c.bf16 %v686_v2, %v685_v1  ;;  %s4617_s27 = smov (!%p3130_p2, %s631_s27), 15  ;;  %s3913_s25 = sadd.s32 5, %s3705_s16  ;;  %v3925_v33 = vld [vmem:[#allocation2 + $0x40] sm:$0xf]  ;;  %v3538_v37 = vld [vmem:[%s4568_s5 + $0x10] sm:$0xff]  }
  0x37   : > { %1261 = vst.msk [vmem:[#allocation3 + $0x38] sm:$0xff] %vm921_vm4, %v3865_v53  ;;  %v1124_v61 = vsel %vm3830_vm9, %v1119_v54, %v1123_v42  ;;  %v689_v6 = vpack.c.bf16 %v687_v3, %v687_v3  ;;  %vm3883_vm10 = vcmp.eq.s32.totalorder %v691_v51, 1  ;;  %v1136_v12 = vshrl.u32 %v1003_v52, 16  ;;  %p636_p4 = scmp.lt.s32.totalorder %s4617_s27, 15  ;;  %p651_p5 = scmp.gt.s32.totalorder %s3913_s25, 0  ;;  %v3540_v46 = vld [vmem:[%s4568_s5 + $0x18] sm:$0xff]  }
  0x38   : > { %v1134_v11 = vsel %vm3830_vm9, %v1129_v59, %v1133_v56  ;;  %735 = vst.msk [vmem:[#allocation2 + $0xc] sm:$0xf] %vm706_vm0, %v3151_v60  ;;  %736 = vst.msk [vmem:[#allocation2 + $0x10] sm:$0xf] %vm706_vm0, %v3152_v63  ;;  %v1139_v14 = vshll.u32 %v1003_v52, 16  ;;  %v1145_v15 = vshll.u32 %v1004_v58, 16  ;;  %1229 = vrot.lane.b32.xlu1 %v3182_v39, %s3618_s24  ;;  %v823_v48 = vstv %s3889_s10  ;;  %3345 = vmatpush3.bf16.msra.mxu0 %v3538_v37 }
  0x39   : > { %737 = vst.msk [vmem:[#allocation2 + $0x14] sm:$0x1] %vm709_vm1, %v3153_v0  ;;  %v3901_v17 = vcombine.low %v1124_v61, %v1134_v11  ;;  %v693_v18 = vsel %vm3883_vm10, 0, %v688_v5  ;;  %v694_v19 = vsel %vm3883_vm10, 0, %v689_v6  ;;  %v1149_v20 = vshrl.u32 %v1004_v58, 16  ;;  %s4619_s27 = smov (!%p636_p4, %s4617_s27), 15  ;;  %vm4237_vm10 = vmand %vm706_vm0, %vm1865_vm6 }
  0x3a   : > { %1270 = vrot.lane.b32.xlu0 %v3865_v53, %s4573_s23  ;;  %v3147_v22 = vcombine.low %v693_v18, %v693_v18  ;;  %v3148_v23 = vcombine.high %v693_v18, %v693_v18  ;;  %v3149_v24 = vcombine.low %v694_v19, %v694_v19  ;;  %v1138_v25 = vrot.slane %v1136_v12, 4  ;;  %p3137_p6 = scmp.lt.s32.totalorder %s3913_s25, 15  ;;  %v3539_v39 = vld [vmem:[%s4568_s5 + $0x58] sm:$0xff]   ;;  %s3478_s22 = smul.u32 3, %s4619_s27  ;;  %v3541_v50 = vld [vmem:[%s4568_s5 + $0x60] sm:$0xff]   ;;  %v3551_v3 = vld [vmem:[%s4568_s5 + $0x88] sm:$0xff]  }
  0x3b   : > { %1262 = vst.msk [vmem:[#allocation3 + $0x50] sm:$0xff] %vm921_vm4, %v3901_v17  ;;  %v1141_v29 = vrot.slane %v1139_v14, 5  ;;  %v3923_v30 = vrot.slane %v1145_v15, 5  ;;  %v1151_v31 = vrot.slane %v1149_v20, 4  ;;  %v1155_v32 = vshll.u32 %v1005_v4, 16  ;;  %p843_p7 = scmp.gt.s32.totalorder %s3913_s25, 15  ;;  %3346 = vmatprep.subr.bf16.mxu0 %v3539_v39 }
  0x3c   : > { %707 = vst.msk [vmem:[#allocation2] sm:$0xf] %vm706_vm0, %v3147_v22  ;;  %708 = vst.msk [vmem:[#allocation2 + $0x4] sm:$0xf] %vm706_vm0, %v3148_v23  ;;  %v3192_v34 = vrot.slane %v1304_v8, 9  ;;  %v1373_v35 = vrot.slane %v1305_v9, 5  ;;  %s640_s27 = sadd.s32 %s3478_s22, %s3709_s18  ;;  %3347 = vmatpush3.bf16.msra.mxu0 %v3540_v46 }
  0x3d   : > { %710 = vst.msk [vmem:[#allocation2 + $0x8] sm:$0x1] %vm709_vm1, %v3149_v24  ;;  %v1376_v36 = vrot.slane %v1306_v16, 5  ;;  %v1142_v38 = vor.u32 %v1141_v29, %v1138_v25  ;;  %v1152_v40 = vor.u32 %v1151_v31, %v3923_v30  ;;  %v3942_v42 = vrot.slane %v1155_v32, 5  ;;  %s3135_s10 = sshll.u32 %s640_s27, 3  ;;  %v3542_v4 = vld [vmem:[%s4568_s5 + $0x20] sm:$0xff]   ;;  %3348 = vmatprep.subr.bf16.mxu0 %v3541_v50 }
  0x3e   : > { %1272 = vrot.lane.b32.xlu0 %v3901_v17, %s4573_s23  ;;  %v1375_v44 = vrot.slane %v1373_v35, 4  ;;  %v3193_v45 = vrot.slane %v3908_v21, 9  ;;  %v1374_v41 = vsel %vm3778_vm5, %v3192_v34, %v1373_v35  ;;  %v1380_v49 = vrot.slane %v3925_v33, 5  ;;  %s3973_s20 = scalar_select %p651_p5, %s3913_s25, 0  ;;  %v3544_v9 = vld [vmem:[%s4568_s5 + $0x68] sm:$0xff]   ;;  %v3546_v50 = vld [vmem:[%s4568_s5 + $0x70] sm:$0xff]  }
  0x3f   : > { %v3529_v47 = vld [vmem:[#allocation2 + $0xc] sm:$0xff]   ;;  %v1143_v59 = vrot.slane %v1142_v38, 4  ;;  %v1153_v0 = vrot.slane %v1152_v40, 4  ;;  %vm3966_vm11 = vcmp.eq.s32.totalorder %v823_v48, 1  ;;  %s642_s17 = scalar_lea.vmem %s4566_s3, %s3135_s10  ;;  %vm1921_vm8 = vsmask.f32 4368 }
  0x40   : > { %v1295_v51 = vld [vmem:[#allocation2 + $0xc] sm:$0xe]  ;;  %v1296_v52 = vld [vmem:[#allocation2 + $0x10] sm:$0xf]  ;;  %v1297_v54 = vld [vmem:[#allocation2 + $0x14] sm:$0x1]  ;;  %v1377_v56 = vsel %vm3778_vm5, %v1375_v44, %v1376_v36  ;;  %v3987_v8 = vsel %vm3778_vm5, %v3193_v45, %v1380_v49  ;;  %3349 = vmatpush3.bf16.msra.mxu0 %v3542_v4 }
  0x41   : > { %923 = vst.msk [vmem:[#allocation3 + $0x18] sm:$0xff] %vm921_vm4, %v3529_v47  ;;  %v3189_v57 = vrot.slane %v1295_v51, 9  ;;  %v1352_v58 = vrot.slane %v1296_v52, 5  ;;  %v3960_v60 = vld [vmem:[#allocation2 + $0xc] sm:$0xf]  ;;  %v1355_v63 = vrot.slane %v1297_v54, 5  ;;  %v3964_v2 = vcombine.low %v1374_v41, %v1377_v56  ;;  %3350 = vmatprep.subr.bf16.mxu0 %v3544_v9 }
  0x42   : > { %933 = vrot.lane.b32.xlu0 %v3529_v47, %s4573_s23  ;;  %v1040_v1 = vshrl.u32 %v3960_v60, 16  ;;  %v1148_v21 = vsel %vm3830_vm9, %v1143_v59, %v3923_v30  ;;  %v1158_v22 = vsel %vm3830_vm9, %v1153_v0, %v3942_v42  ;;  %v992_v23 = vld [vmem:[#allocation2 + $0x10] sm:$0xf]  ;;  %v993_v29 = vld [vmem:[#allocation2 + $0x14] sm:$0x1]  ;;  %v817_v31 = vld [vmem:[%s642_s17] sm:$0xff] }
  0x43   : > { %v1292_v61 = vld [vmem:[#allocation2] sm:$0xe]  ;;  %v1293_v5 = vld [vmem:[#allocation2 + $0x4] sm:$0xf]  ;;  %v1353_v7 = vsel %vm3778_vm5, %v3189_v57, %v1352_v58  ;;  %v1354_v14 = vrot.slane %v1352_v58, 4  ;;  %1479 = vst.msk [vmem:[#allocation3 + $0x40] sm:$0xff] %vm921_vm4, %v3964_v2  ;;  %v4012_v44 = vcombine.low %v1148_v21, %v1158_v22 }
  0x44   : > { %v1294_v6 = vld [vmem:[#allocation2 + $0x8] sm:$0x1]  ;;  %v3188_v10 = vrot.slane %v1292_v61, 9  ;;  %v1345_v11 = vrot.slane %v1293_v5, 5  ;;  %v988_v15 = vld [vmem:[#allocation2] sm:$0xf] }
  0x45   : > { %v1348_v12 = vrot.slane %v1294_v6, 5  ;;  %v989_v16 = vld [vmem:[#allocation2 + $0x4] sm:$0xf]  ;;  %v990_v18 = vld [vmem:[#allocation2 + $0x8] sm:$0x1]  ;;  %v1016_v19 = vshrl.u32 %v988_v15, 16  ;;  %v1356_v27 = vsel %vm3778_vm5, %v1354_v14, %v1355_v63 }
  0x46   : > { %v1019_v20 = vshll.u32 %v988_v15, 16  ;;  %v1346_v24 = vsel %vm3778_vm5, %v3188_v10, %v1345_v11  ;;  %v1347_v25 = vrot.slane %v1345_v11, 4  ;;  %v1025_v28 = vshll.u32 %v989_v16, 16  ;;  %v818_v30 = vld [vmem:[%s642_s17 + $0x8] sm:$0xff]  ;;  %v819_v38 = vld [vmem:[%s642_s17 + $0x10] sm:$0x3] }
  0x47   : > { %v3545_v32 = vld [vmem:[%s4568_s5 + $0x28] sm:$0xff]   ;;  %v3197_v34 = vcombine.low %v1353_v7, %v1356_v27  ;;  %v1018_v35 = vrot.slane %v1016_v19, 4  ;;  %v1029_v37 = vshrl.u32 %v989_v16, 16  ;;  %s4621_s20 = smov (!%p3137_p6, %s3973_s20), 15  ;;  %v1035_v42 = vshll.u32 %v990_v18, 16  ;;  %v3543_v48 = vld [vmem:[#allocation2] sm:$0xff]  }
  0x48   : > { %v1021_v36 = vrot.slane %v1019_v20, 5  ;;  %v1349_v39 = vsel %vm3778_vm5, %v1347_v25, %v1348_v12  ;;  %v1027_v40 = vrot.slane %v1025_v28, 5  ;;  %s4016_s22 = scalar_select %p843_p7, 1, 0  ;;  %v1042_v41 = vrot.slane %v1040_v1, 4  ;;  %1263 = vst.msk [vmem:[#allocation3 + $0x68] sm:$0xff] %vm921_vm4, %v4012_v44  ;;  %3351 = vmatpush3.bf16.msra.mxu0 %v3545_v32 }
  0x49   : > { %v3196_v45 = vcombine.low %v1346_v24, %v1349_v39  ;;  %1444 = vrot.lane.b32.xlu0 %v3197_v34, %s3618_s24  ;;  %v1031_v47 = vrot.slane %v1029_v37, 4  ;;  %p657_p8 = scmp.lt.s32.totalorder %s4621_s20, 15  ;;  %v1037_v51 = vrot.slane %v1035_v42, 5  ;;  %v1043_v52 = vshll.u32 %v3960_v60, 16  ;;  %v3547_v57 = vld [vmem:[%s4568_s5 + $0x30] sm:$0xff]   ;;  %922 = vst.msk [vmem:[#allocation3] sm:$0xff] %vm921_vm4, %v3543_v48  ;;  %3352 = vmatprep.subr.bf16.mxu0 %v3546_v50 }
  0x4a   : > { %v1022_v46 = vor.u32 %v1021_v36, %v1018_v35  ;;  %v1049_v54 = vshll.u32 %v992_v23, 16  ;;  %v1053_v56 = vshrl.u32 %v992_v23, 16  ;;  %v1059_v63 = vshll.u32 %v993_v29, 16  ;;  %v1309_v1 = vld [vmem:[#allocation2 + $0x44] sm:$0x1]  ;;  %v3548_v60 = vld [vmem:[%s4568_s5 + $0x78] sm:$0xff]  }
  0x4b   : > { %1417 = vrot.lane.b32.xlu1 %v3196_v45, %s3616_s28  ;;  %v1032_v59 = vor.u32 %v1031_v47, %v1027_v40  ;;  %v820_v0 = vpack.c.bf16 %v818_v30, %v817_v31  ;;  %s4623_s20 = smov (!%p657_p8, %s4621_s20), 15  ;;  %v1045_v4 = vrot.slane %v1043_v52, 5  ;;  %v821_v6 = vpack.c.bf16 %v819_v38, %v819_v38  ;;  %v3549_v7 = vld [vmem:[%s4568_s5 + $0x80] sm:$0xff]   ;;  %v3550_v19 = vld [vmem:[%s4568_s5 + $0x38] sm:$0xff]   ;;  %s4586_s23 = smov 32  }
  0x4c   : > { %v1023_v58 = vrot.slane %v1022_v46, 4  ;;  %v1051_v61 = vrot.slane %v1049_v54, 5  ;;  %v1055_v5 = vrot.slane %v1053_v56, 4  ;;  %v1061_v11 = vrot.slane %v1059_v63, 5  ;;  %s3479_s21 = smul.u32 3, %s4623_s20  ;;  %3446 = vmatprep.subr.bf16.mxu1 %v3549_v7  ;;  %3353 = vmatpush3.bf16.msra.mxu0 %v3547_v57 }
  0x4d   : > { %v1033_v10 = vrot.slane %v1032_v59, 4  ;;  %1419 = vrot.lane.b32.xlu0 %v3197_v34, %s3616_s28  ;;  %v825_v12 = vsel %vm3966_vm11, 0, %v820_v0  ;;  %v1046_v14 = vor.u32 %v1045_v4, %v1042_v41  ;;  %v826_v16 = vsel %vm3966_vm11, 0, %v821_v6  ;;  %3447 = vmatpush3.bf16.msra.mxu1 %v3549_v7  ;;  %vm4244_vm11 = vmor %vm1845_vm2, %vm1921_vm8 }
  0x4e   : > { %v1028_v9 = vsel %vm3830_vm9, %v1023_v58, %v1027_v40  ;;  %v1056_v15 = vor.u32 %v1055_v5, %v1051_v61  ;;  %v3166_v18 = vcombine.low %v825_v12, %v825_v12  ;;  %v3167_v21 = vcombine.high %v825_v12, %v825_v12  ;;  %s661_s20 = sadd.s32 %s3479_s21, %s3709_s18  ;;  %3354 = vmatprep.subr.bf16.mxu0 %v3548_v60  ;;  %v1488_v40 = vld [vmem:[#allocation3 + $0x28] sm:$0xff] }
  0x4f   : > { %v1038_v20 = vsel %vm3830_vm9, %v1033_v10, %v1037_v51  ;;  %v3168_v22 = vcombine.low %v826_v16, %v826_v16  ;;  %v1382_v23 = vrot.slane %v1380_v49, 4  ;;  %v1047_v25 = vrot.slane %v1046_v14, 4  ;;  %s3142_s27 = sshll.u32 %s661_s20, 3  ;;  %v1485_v49 = vld [vmem:[#allocation3 + $0x10] sm:$0xff]  ;;  %3448 = vmatprep.subr.bf16.mxu1 %v3551_v3 }
  0x50   : > { %v3180_v24 = vcombine.low %v1028_v9, %v1038_v20  ;;  %v1057_v27 = vrot.slane %v1056_v15, 4  ;;  %839 = vst.msk [vmem:[#allocation2 + $0x48] sm:$0xf] %vm706_vm0, %v3166_v18  ;;  %v1383_v28 = vrot.slane %v1309_v1, 5  ;;  %840 = vst.msk [vmem:[#allocation2 + $0x4c] sm:$0xf] %vm706_vm0, %v3167_v21  ;;  %s663_s21 = scalar_lea.vmem %s4567_s4, %s3142_s27  ;;  %v850_v33 = vstv %s4016_s22  ;;  %3355 = vmatpush3.bf16.msra.mxu0 %v3550_v19  ;;  %3450 = vmatprep.mubr.msk.bf16.mxu1 %vm921_vm4, %v1485_v49 }
  0x51   : > { %1274 = vrot.lane.b32.xlu0 %v4012_v44, %s4586_s23  ;;  %841 = vst.msk [vmem:[#allocation2 + $0x50] sm:$0x1] %vm709_vm1, %v3168_v22  ;;  %v1052_v29 = vsel %vm3830_vm9, %v1047_v25, %v1051_v61  ;;  %v844_v32 = vld [vmem:[%s663_s21] sm:$0xff]  ;;  %v845_v34 = vld [vmem:[%s663_s21 + $0x8] sm:$0xff]  ;;  %v846_v35 = vld [vmem:[%s663_s21 + $0x10] sm:$0x3]  ;;  %3449 = vmatpush3.bf16.msra.mxu1 %v3551_v3 }
  0x52   : > { %1225 = vrot.lane.b32.xlu1 %v3180_v24, %s3618_s24  ;;  %v1062_v31 = vsel %vm3830_vm9, %v1057_v27, %v1061_v11  ;;  %v1384_v30 = vsel %vm3778_vm5, %v1382_v23, %v1383_v28  ;;  %vm851_vm12 = vcmp.eq.s32.totalorder %v850_v33, 1  ;;  %v847_v38 = vpack.c.bf16 %v845_v34, %v844_v32  ;;  %v1491_v22 = vld [vmem:[#allocation3 + $0x40] sm:$0xff] }
  0x53   : > { %v3181_v36 = vcombine.low %v1052_v29, %v1062_v31  ;;  %v4072_v37 = vcombine.low %v3987_v8, %v1384_v30  ;;  %v848_v39 = vpack.c.bf16 %v846_v35, %v846_v35 }
  0x54   : > { %v852_v42 = vsel %vm851_vm12, 0, %v847_v38  ;;  %3451 = vmatmul.mubr.msk.bf16.vlgmr.msra.gmra.mrb[0].mxu1 %vm921_vm4, %v1488_v40 }
  0x55   : > { %1259 = vst.msk [vmem:[#allocation3 + $0x8] sm:$0xff] %vm921_vm4, %v3181_v36  ;;  %1423 = vrot.lane.b32.xlu0 %v3818_v62, %s3616_s28  ;;  %1480 = vst.msk [vmem:[#allocation3 + $0x58] sm:$0xff] %vm921_vm4, %v4072_v37  ;;  %v853_v45 = vsel %vm851_vm12, 0, %v848_v39  ;;  %v3169_v8 = vcombine.low %v852_v42, %v852_v42  ;;  %v3170_v46 = vcombine.high %v852_v42, %v852_v42  ;;  %3454 = vmatprep.mubr.msk.bf16.mxu1 %vm921_vm4, %v1491_v22 }
  0x56   : > { %939 = vrot.lane.b32.xlu1 %v3791_v43, %s4586_s23  ;;  %v3171_v47 = vcombine.low %v853_v45, %v853_v45 }
  0x57   : > { %v1006_v41 = vld [vmem:[#allocation2 + $0x48] sm:$0xf]  ;;  %v1007_v50 = vld [vmem:[#allocation2 + $0x4c] sm:$0xf]  ;;  %866 = vst.msk [vmem:[#allocation2 + $0x54] sm:$0xf] %vm706_vm0, %v3169_v8 }
  0x58   : > { %v1310_v48 = vld [vmem:[#allocation2 + $0x48] sm:$0xe]  ;;  %v1008_v51 = vld [vmem:[#allocation2 + $0x50] sm:$0x1]  ;;  %v1160_v52 = vshrl.u32 %v1006_v41, 16  ;;  %v1163_v54 = vshll.u32 %v1006_v41, 16 }
  0x59   : > { %867 = vst.msk [vmem:[#allocation2 + $0x58] sm:$0xf] %vm706_vm0, %v3170_v46  ;;  %1450 = vrot.lane.b32.xlu0 %v3964_v2, %s3618_s24  ;;  %v1169_v43 = vshll.u32 %v1007_v50, 16  ;;  %v1173_v62 = vshrl.u32 %v1007_v50, 16  ;;  %v1179_v56 = vshll.u32 %v1008_v51, 16  ;;  %v3194_v60 = vrot.slane %v1310_v48, 9 }
  0x5a   : > { %868 = vst.msk [vmem:[#allocation2 + $0x5c] sm:$0x1] %vm709_vm1, %v3171_v47  ;;  %1227 = vrot.lane.b32.xlu1 %v3181_v36, %s3618_s24  ;;  %v1162_v57 = vrot.slane %v1160_v52, 4  ;;  %v1165_v58 = vrot.slane %v1163_v54, 5  ;;  %v1311_v59 = vld [vmem:[#allocation2 + $0x4c] sm:$0xf] }
  0x5b   : > { %v1312_v63 = vld [vmem:[#allocation2 + $0x50] sm:$0x1]  ;;  %v1171_v0 = vrot.slane %v1169_v43, 5  ;;  %v1175_v1 = vrot.slane %v1173_v62, 4  ;;  %v1387_v61 = vrot.slane %v1311_v59, 5  ;;  %v1181_v6 = vrot.slane %v1179_v56, 5 }
  0x5c   : > { %v1166_v4 = vor.u32 %v1165_v58, %v1162_v57  ;;  %v1390_v7 = vrot.slane %v1312_v63, 5  ;;  %v1494_v29 = vld [vmem:[#allocation3 + $0x58] sm:$0xff]  ;;  %v3531_v45 = vld [vmem:[#allocation2 + $0x48] sm:$0xff]  }
  0x5d   : > { %v1176_v5 = vor.u32 %v1175_v1, %v1171_v0  ;;  %v1389_v10 = vrot.slane %v1387_v61, 4  ;;  %v1388_v15 = vsel %vm3778_vm5, %v3194_v60, %v1387_v61  ;;  %3455 = vmatmul.mubr.msk.bf16.gmra.mrb[4].mxu1 %vm921_vm4, %v1494_v29 }
  0x5e   : > { %969 = vrot.lane.b32.xlu1 %v3807_v55, %s3616_s28  ;;  %v1167_v9 = vrot.slane %v1166_v4, 4  ;;  %v1009_v12 = vld [vmem:[#allocation2 + $0x54] sm:$0xf] }
  0x5f   : > { %v1177_v11 = vrot.slane %v1176_v5, 4  ;;  %v1184_v19 = vshrl.u32 %v1009_v12, 16  ;;  %v1187_v20 = vshll.u32 %v1009_v12, 16  ;;  %v1391_v25 = vsel %vm3778_vm5, %v1389_v10, %v1390_v7  ;;  %v1313_v34 = vld [vmem:[#allocation2 + $0x54] sm:$0xe] }
  0x60   : > { %v1010_v14 = vld [vmem:[#allocation2 + $0x58] sm:$0xf]  ;;  %v1172_v16 = vsel %vm3830_vm9, %v1167_v9, %v1171_v0  ;;  %v3202_v32 = vcombine.low %v1388_v15, %v1391_v25  ;;  %v3195_v38 = vrot.slane %v1313_v34, 9 }
  0x61   : > { %v1011_v18 = vld [vmem:[#allocation2 + $0x5c] sm:$0x1]  ;;  %v1193_v21 = vshll.u32 %v1010_v14, 16  ;;  %v1182_v23 = vsel %vm3830_vm9, %v1177_v11, %v1181_v6  ;;  %v1197_v3 = vshrl.u32 %v1010_v14, 16  ;;  %v1186_v28 = vrot.slane %v1184_v19, 4 }
  0x62   : > { %v1203_v24 = vshll.u32 %v1011_v18, 16  ;;  %1231 = vrot.lane.b32.xlu1 %v3865_v53, %s3618_s24  ;;  %v3186_v27 = vcombine.low %v1172_v16, %v1182_v23  ;;  %v1189_v33 = vrot.slane %v1187_v20, 5  ;;  %v1314_v31 = vld [vmem:[#allocation2 + $0x58] sm:$0xf]  ;;  %v1315_v35 = vld [vmem:[#allocation2 + $0x5c] sm:$0x1] }
  0x63   : > { %v1195_v49 = vrot.slane %v1193_v21, 5  ;;  %v1199_v30 = vrot.slane %v1197_v3, 4  ;;  %v1394_v39 = vrot.slane %v1314_v31, 5  ;;  %v1397_v53 = vrot.slane %v1315_v35, 5  ;;  %1481 = vst.msk [vmem:[#allocation3 + $0x70] sm:$0xff] %vm921_vm4, %v3202_v32 }
  0x64   : > { %1276 = vrot.lane.b32.xlu0 %v3186_v27, %s4586_s23  ;;  %1264 = vst.msk [vmem:[#allocation3 + $0x80] sm:$0xff] %vm921_vm4, %v3186_v27  ;;  %v1190_v36 = vor.u32 %v1189_v33, %v1186_v28  ;;  %v1205_v42 = vrot.slane %v1203_v24, 5 }
  0x65   : > { %v1200_v40 = vor.u32 %v1199_v30, %v1195_v49  ;;  %v1395_v46 = vsel %vm3778_vm5, %v3195_v38, %v1394_v39  ;;  %v1396_v47 = vrot.slane %v1394_v39, 4 }
  0x66   : > { %941 = vrot.lane.b32.xlu1 %v3807_v55, %s4586_s23  ;;  %v1191_v8 = vrot.slane %v1190_v36, 4 }
  0x67   : > { %v1201_v41 = vrot.slane %v1200_v40, 4  ;;  %v1398_v48 = vsel %vm3778_vm5, %v1396_v47, %v1397_v53 }
  0x68   : > { %1425 = vrot.lane.b32.xlu0 %v3964_v2, %s3616_s28  ;;  %v1196_v50 = vsel %vm3830_vm9, %v1191_v8, %v1195_v49  ;;  %v3203_v55 = vcombine.low %v1395_v46, %v1398_v48  ;;  %v3532_v2 = vld [vmem:[#allocation2 + $0x54] sm:$0xff]  }
  0x69   : > { %v1206_v51 = vsel %vm3830_vm9, %v1201_v41, %v1205_v42  ;;  %v1867_v48 = vld [vmem:[#allocation4 + $0x8] sm:$0x1] }
  0x6a   : > { %971 = vrot.lane.b32.xlu1 %v3531_v45, %s3616_s28  ;;  %1482 = vst.msk [vmem:[#allocation3 + $0x88] sm:$0xff] %vm921_vm4, %v3203_v55  ;;  %v3187_v52 = vcombine.low %v1196_v50, %v1206_v51  ;;  %v1497_v54 = vld [vmem:[#allocation3 + $0x70] sm:$0xff]  ;;  %v1868_v51 = vsel %vm4182_vm7, 0, %v1867_v48 }
  0x6b   : > { %3458 = vmatprep.mubr.msk.bf16.mxu1 %vm921_vm4, %v1497_v54  ;;  %1869 = vst [vmem:[#allocation4 + $0x8] sm:$0x1] %v1868_v51 }
  0x6c   : > { %1452 = vrot.lane.b32.xlu0 %v4072_v37, %s3618_s24 }
  0x6e   : > { %1233 = vrot.lane.b32.xlu1 %v3901_v17, %s3618_s24 }
  0x70   : > { %1278 = vrot.lane.b32.xlu0 %v3187_v52, %s4586_s23  ;;  %v1850_v52 = vld [vmem:[#allocation4 + $0xc] sm:$0x1] }
  0x71   : > { %v1500_v43 = vld [vmem:[#allocation3 + $0x88] sm:$0xff]  ;;  %v1851_v54 = vsel %vm4172_vm3, 0, %v1850_v52 }
  0x72   : > { %943 = vrot.lane.b32.xlu1 %v3531_v45, %s4586_s23  ;;  %3459 = vmatmul.mubr.msk.bf16.gmra.mrb[8].mxu1 %vm921_vm4, %v1500_v43  ;;  %v1847_v45 = vld [vmem:[#allocation4] sm:$0x1]  ;;  %1852 = vst [vmem:[#allocation4 + $0xc] sm:$0x1] %v1851_v54 }
  0x73   : > { %v1848_v46 = vsel %vm4172_vm3, 0, %v1847_v45 }
  0x74   : > { %1427 = vrot.lane.b32.xlu0 %v4072_v37, %s3616_s28  ;;  %1849 = vst [vmem:[#allocation4] sm:$0x1] %v1848_v46 }
  0x76   : > { %973 = vrot.lane.b32.xlu1 %v3532_v2, %s3616_s28  ;;  %v1870_v2 = vld [vmem:[#allocation4 + $0x14] sm:$0x1] }
  0x77   : > { %v1871_v43 = vsel %vm4182_vm7, 0, %v1870_v2 }
  0x78   : > { %1454 = vrot.lane.b32.xlu0 %v3202_v32, %s3618_s24  ;;  %1872 = vst [vmem:[#allocation4 + $0x14] sm:$0x1] %v1871_v43 }
  0x7a   : > { %1235 = vrot.lane.b32.xlu1 %v4012_v44, %s3618_s24 }
  0x7b   : > { %v2045_v48 = vld [vmem:[#allocation4] sm:$0xf] }
  0x96   : > { %v964_v17 = vpop.permute.xlu1 %963 }
  0x9a   : > { %v936_v62 = vpop.permute.xlu1 %935 }
  0x9b   : > { %953 = vst.msk [vmem:[#allocation3 + $0x18] sm:$0xff] %vm951_vm13, %v936_v62 }
  0x9c   : > { %v1447_v56 = vpop.permute.xlu0 %1446 }
  0x9e   : > { %v966_v57 = vpop.permute.xlu1 %965 }
  0x9f   : > { %983 = vst.msk [vmem:[#allocation3 + $0x18] sm:$0xff] %vm981_vm14, %v966_v57  ;;  %v1853_v57 = vld [vmem:[#allocation4 + $0x18] sm:$0x1] }
  0xa0   : > { %v1422_v58 = vpop.permute.xlu0 %1421 }
  0xa2   : > { %v938_v59 = vpop.permute.xlu1 %937 }
  0xa3   : > { %954 = vst.msk [vmem:[#allocation3 + $0x30] sm:$0xff] %vm951_vm13, %v938_v59  ;;  %v1854_v59 = vsel %vm4172_vm3, 0, %v1853_v57 }
  0xa4   : > { %v1449_v37 = vpop.permute.xlu0 %1448  ;;  %1855 = vst [vmem:[#allocation4 + $0x18] sm:$0x1] %v1854_v59 }
  0xa6   : > { %v968_v63 = vpop.permute.xlu1 %967 }
  0xa7   : > { %984 = vst.msk [vmem:[#allocation3 + $0x30] sm:$0xff] %vm981_vm14, %v968_v63 }
  0xa8   : > { %v1269_v0 = vpop.permute.xlu0 %1268 }
  0xa9   : > { %1286 = vst.msk [vmem:[#allocation3 + $0x8] sm:$0xff] %vm951_vm13, %v1269_v0  ;;  %v1856_v0 = vld [vmem:[#allocation4 + $0x24] sm:$0x1] }
  0xaa   : > { %v1230_v44 = vpop.permute.xlu1 %1229 }
  0xab   : > { %1246 = vst.msk [vmem:[#allocation3 + $0x30] sm:$0xff] %vm1243_vm15, %v1230_v44  ;;  %v1857_v44 = vsel %vm4172_vm3, 0, %v1856_v0 }
  0xac   : > { %v1271_v1 = vpop.permute.xlu0 %1270  ;;  %1858 = vst [vmem:[#allocation4 + $0x24] sm:$0x1] %v1857_v44 }
  0xad   : > { %1287 = vst.msk [vmem:[#allocation3 + $0x20] sm:$0xff] %vm951_vm13, %v1271_v1  ;;  %v1876_v1 = vld [vmem:[#allocation4 + $0x2c] sm:$0x1] }
  0xb0   : > { %v1273_v60 = vpop.permute.xlu0 %1272 }
  0xb1   : > { %1288 = vst.msk [vmem:[#allocation3 + $0x38] sm:$0xff] %vm951_vm13, %v1273_v60  ;;  %v1877_v60 = vsel %vm4182_vm7, 0, %v1876_v1 }
  0xb2   : > { %1437 = vst.msk [vmem:[#allocation3 + $0x38] sm:$0xff] %vm981_vm14, %v1422_v58  ;;  %v1489_v27 = vld [vmem:[#allocation3 + $0x30] sm:$0xff]  ;;  %1878 = vst [vmem:[#allocation4 + $0x2c] sm:$0x1] %v1877_v60 }
  0xb3   : > { %1464 = vst.msk [vmem:[#allocation3 + $0x38] sm:$0xff] %vm1243_vm15, %v1449_v37  ;;  %v1873_v37 = vld [vmem:[#allocation4 + $0x20] sm:$0x1] }
  0xb4   : > { %v934_v4 = vpop.permute.xlu0 %933  ;;  %v1874_v63 = vsel %vm4182_vm7, 0, %v1873_v37 }
  0xb5   : > { %952 = vst.msk [vmem:[#allocation3] sm:$0xff] %vm951_vm13, %v934_v4  ;;  %1875 = vst [vmem:[#allocation4 + $0x20] sm:$0x1] %v1874_v63 }
  0xb6   : > { %982 = vst.msk [vmem:[#allocation3] sm:$0xff] %vm981_vm14, %v964_v17 }
  0xba   : > { %v1490_v22 = vld [vmem:[#allocation3 + $0x38] sm:$0xff] }
  0xbb   : > { %v1445_v61 = vpop.permute.xlu0 %1444 }
  0xbd   : > { %v1418_v5 = vpop.permute.xlu1 %1417 }
  0xbe   : > { %1435 = vst.msk [vmem:[#allocation3 + $0x8] sm:$0xff] %vm981_vm14, %v1418_v5 }
  0xbf   : > { %1462 = vst.msk [vmem:[#allocation3 + $0x8] sm:$0xff] %vm1243_vm15, %v1445_v61  ;;  %v1420_v6 = vpop.permute.xlu0 %1419 }
  0xc0   : > { %1436 = vst.msk [vmem:[#allocation3 + $0x20] sm:$0xff] %vm981_vm14, %v1420_v6 }
  0xc1   : > { %1463 = vst.msk [vmem:[#allocation3 + $0x20] sm:$0xff] %vm1243_vm15, %v1447_v56 }
  0xc3   : > { %v1275_v7 = vpop.permute.xlu0 %1274 }
  0xc4   : > { %v1226_v9 = vpop.permute.xlu1 %1225  ;;  %1289 = vst.msk [vmem:[#allocation3 + $0x50] sm:$0xff] %vm951_vm13, %v1275_v7  ;;  %v1859_v7 = vld [vmem:[#allocation4 + $0x30] sm:$0x1] }
  0xc5   : > { %1244 = vst.msk [vmem:[#allocation3] sm:$0xff] %vm1243_vm15, %v1226_v9  ;;  %v1860_v9 = vsel %vm4172_vm3, 0, %v1859_v7 }
  0xc6   : > { %v1484_v10 = vld [vmem:[#allocation3 + $0x8] sm:$0xff]  ;;  %1861 = vst [vmem:[#allocation4 + $0x30] sm:$0x1] %v1860_v9 }
  0xc7   : > { %1702 = vmatprep.mubr.bf16.mxu0 %v1484_v10  ;;  %v1424_v11 = vpop.permute.xlu0 %1423  ;;  %v1879_v10 = vld [vmem:[#allocation4 + $0x38] sm:$0x1] }
  0xc8   : > { %v940_v12 = vpop.permute.xlu1 %939  ;;  %1438 = vst.msk [vmem:[#allocation3 + $0x50] sm:$0xff] %vm981_vm14, %v1424_v11  ;;  %v1487_v14 = vld [vmem:[#allocation3 + $0x20] sm:$0xff]  ;;  %v1880_v11 = vsel %vm4182_vm7, 0, %v1879_v10 }
  0xc9   : > { %955 = vst.msk [vmem:[#allocation3 + $0x48] sm:$0xff] %vm951_vm13, %v940_v12  ;;  %1881 = vst [vmem:[#allocation4 + $0x38] sm:$0x1] %v1880_v11  ;;  %v1862_v12 = vld [vmem:[#allocation4 + $0x3c] sm:$0x1] }
  0xcb   : > { %v1451_v15 = vpop.permute.xlu0 %1450 }
  0xcc   : > { %v1228_v16 = vpop.permute.xlu1 %1227  ;;  %v1483_v18 = vld [vmem:[#allocation3] sm:$0xff]  ;;  %1465 = vst.msk [vmem:[#allocation3 + $0x50] sm:$0xff] %vm1243_vm15, %v1451_v15  ;;  %v1882_v15 = vld [vmem:[#allocation4 + $0x44] sm:$0x1] }
  0xcd   : > { %1245 = vst.msk [vmem:[#allocation3 + $0x18] sm:$0xff] %vm1243_vm15, %v1228_v16  ;;  %1703 = vmatmul.mubr.bf16.vlgmr.msra.gmra.mrb[0].mxu0 %v1483_v18  ;;  %v1883_v16 = vsel %vm4182_vm7, 0, %v1882_v15 }
  0xce   : > { %1710 = vmatprep.mubr.bf16.mxu0 %v1487_v14  ;;  %v1863_v14 = vsel %vm4172_vm3, 0, %v1862_v12  ;;  %1884 = vst [vmem:[#allocation4 + $0x44] sm:$0x1] %v1883_v16 }
  0xcf   : > { %1864 = vst [vmem:[#allocation4 + $0x3c] sm:$0x1] %v1863_v14 }
  0xd0   : > { %v970_v19 = vpop.permute.xlu1 %969 }
  0xd1   : > { %985 = vst.msk [vmem:[#allocation3 + $0x48] sm:$0xff] %vm981_vm14, %v970_v19 }
  0xd3   : > { %v1493_v28 = vld [vmem:[#allocation3 + $0x50] sm:$0xff] }
  0xd4   : > { %v1232_v20 = vpop.permute.xlu1 %1231  ;;  %v1486_v21 = vld [vmem:[#allocation3 + $0x18] sm:$0xff] }
  0xd5   : > { %1247 = vst.msk [vmem:[#allocation3 + $0x48] sm:$0xff] %vm1243_vm15, %v1232_v20  ;;  %1711 = vmatmul.mubr.bf16.gmra.mrb[4].mxu0 %v1486_v21  ;;  %v4229_v20 = vld [vmem:[%s4569_s6] ss:$0 sm:$0xff] }
  0xd6   : > { %1718 = vmatprep.mubr.bf16.mxu0 %v1490_v22  ;;  %v1277_v23 = vpop.permute.xlu0 %1276 }
  0xd7   : > { %1290 = vst.msk [vmem:[#allocation3 + $0x68] sm:$0xff] %vm951_vm13, %v1277_v23 }
  0xd8   : > { %v942_v3 = vpop.permute.xlu1 %941 }
  0xd9   : > { %956 = vst.msk [vmem:[#allocation3 + $0x60] sm:$0xff] %vm951_vm13, %v942_v3 }
  0xda   : > { %v1426_v24 = vpop.permute.xlu0 %1425 }
  0xdb   : > { %1439 = vst.msk [vmem:[#allocation3 + $0x68] sm:$0xff] %vm981_vm14, %v1426_v24 }
  0xdc   : > { %v972_v25 = vpop.permute.xlu1 %971  ;;  %v1492_v30 = vld [vmem:[#allocation3 + $0x48] sm:$0xff] }
  0xdd   : > { %986 = vst.msk [vmem:[#allocation3 + $0x60] sm:$0xff] %vm981_vm14, %v972_v25  ;;  %1719 = vmatmul.mubr.bf16.gmra.mrb[8].mxu0 %v1489_v27 }
  0xde   : > { %1726 = vmatprep.mubr.bf16.mxu0 %v1493_v28  ;;  %v1453_v33 = vpop.permute.xlu0 %1452 }
  0xdf   : > { %1466 = vst.msk [vmem:[#allocation3 + $0x68] sm:$0xff] %vm1243_vm15, %v1453_v33 }
  0xe0   : > { %v1234_v49 = vpop.permute.xlu1 %1233 }
  0xe1   : > { %1248 = vst.msk [vmem:[#allocation3 + $0x60] sm:$0xff] %vm1243_vm15, %v1234_v49 }
  0xe2   : > { %v1279_v29 = vpop.permute.xlu0 %1278 }
  0xe3   : > { %1291 = vst.msk [vmem:[#allocation3 + $0x80] sm:$0xff] %vm951_vm13, %v1279_v29 }
  0xe4   : > { %v944_v31 = vpop.permute.xlu1 %943 }
  0xe5   : > { %957 = vst.msk [vmem:[#allocation3 + $0x78] sm:$0xff] %vm951_vm13, %v944_v31  ;;  %1727 = vmatmul.mubr.bf16.gmra.mrb[12].mxu0 %v1492_v30 }
  0xe6   : > { %v1428_v32 = vpop.permute.xlu0 %1427  ;;  %v1496_v34 = vld [vmem:[#allocation3 + $0x68] sm:$0xff] }
  0xe7   : > { %1440 = vst.msk [vmem:[#allocation3 + $0x80] sm:$0xff] %vm981_vm14, %v1428_v32  ;;  %1734 = vmatprep.mubr.bf16.mxu0 %v1496_v34 }
  0xe8   : > { %v974_v35 = vpop.permute.xlu1 %973  ;;  %v1495_v39 = vld [vmem:[#allocation3 + $0x60] sm:$0xff] }
  0xe9   : > { %987 = vst.msk [vmem:[#allocation3 + $0x78] sm:$0xff] %vm981_vm14, %v974_v35 }
  0xea   : > { %v1455_v36 = vpop.permute.xlu0 %1454 }
  0xeb   : > { %1467 = vst.msk [vmem:[#allocation3 + $0x80] sm:$0xff] %vm1243_vm15, %v1455_v36 }
  0xec   : > { %v1236_v38 = vpop.permute.xlu1 %1235 }
  0xed   : > { %1249 = vst.msk [vmem:[#allocation3 + $0x78] sm:$0xff] %vm1243_vm15, %v1236_v38  ;;  %1735 = vmatmul.mubr.bf16.gmra.mrb[16].mxu0 %v1495_v39 }
  0xf2   : > { %v1499_v53 = vld [vmem:[#allocation3 + $0x80] sm:$0xff] }
  0xf3   : > { %1742 = vmatprep.mubr.bf16.mxu0 %v1499_v53 }
  0xf4   : > { %v1498_v40 = vld [vmem:[#allocation3 + $0x78] sm:$0xff] }
  0xf5   : > { %1743 = vmatmul.mubr.bf16.gmra.mrb[20].mxu0 %v1498_v40 }
 0x127   : > { %v4176_v8 = vpop.f32.mrb[0].mxu1 }
 0x128   : > { %v1785_v41 = vpop.f32.mrb[1].mxu1 }
 0x129   : > { %v4186_v50 = vpop.f32.mrb[2].mxu1 }
 0x12a   : > { %v1788_v55 = vpop.f32.mrb[3].mxu1 }
 0x130   : > { %v4194_v17 = vpop.f32.mrb[4].mxu1 }
 0x131   : > { %v4196_v62 = vpop.f32.mrb[5].mxu1 }
 0x132   : > { %v4198_v56 = vpop.f32.mrb[6].mxu1 }
 0x133   : > { %v4200_v58 = vpop.f32.mrb[7].mxu1 }
 0x145   : > { %v4210_v4 = vpop.f32.mrb[8].mxu1 }
 0x146   : > { %v4212_v61 = vpop.f32.mrb[9].mxu1 }
 0x147   : > { %v4214_v5 = vpop.f32.mrb[10].mxu1 }
 0x148   : > { %v4216_v6 = vpop.f32.mrb[11].mxu1 }
 0x1a0   : > { %v3356_v18 = vpop.f32.mrb[0].mxu0 }
 0x1a1   : > { %v3357_v19 = vpop.f32.mrb[1].mxu0 }
 0x1a2   : > { %v3358_v21 = vadd.f32 %v3357_v19, %v3356_v18  ;;  %v3359_v22 = vpop.f32.mrb[2].mxu0 }
 0x1a3   : > { %v3360_v23 = vpop.f32.mrb[3].mxu0 }
 0x1a4   : > { %v3361_v3 = vadd.f32 %v3360_v23, %v3359_v22  ;;  %v1705_v24 = vadd.f32 %v3358_v21, %v4229_v20  ;;  %v2052_v22 = vld [vmem:[#allocation4 + $0xc] sm:$0xf] }
 0x1a6   : > { %v1786_v25 = vadd.f32 %v1785_v41, %v1705_v24  ;;  %v1708_v27 = vadd.f32 %v3361_v3, %v4229_v20 }
 0x1a8   : > { %v1832_v28 = vmax.f32 %v1786_v25, 0.0  ;;  %v1789_v33 = vadd.f32 %v1788_v55, %v1708_v27  ;;  %v3362_v49 = vpop.f32.mrb[4].mxu0 }
 0x1a9   : > { %v3363_v29 = vpop.f32.mrb[5].mxu0 }
 0x1aa   : > { %v3328_v31 = vpack.c.bf16 %v1832_v28, %v1832_v28  ;;  %v1833_v30 = vmax.f32 %v1789_v33, 0.0  ;;  %v3364_v32 = vadd.f32 %v3363_v29, %v3362_v49  ;;  %v3365_v34 = vpop.f32.mrb[6].mxu0 }
 0x1ab   : > { %v3366_v35 = vpop.f32.mrb[7].mxu0 }
 0x1ac   : > { %v1924_v36 = vshrl.u32 %v3328_v31, 16  ;;  %v3329_v38 = vpack.c.bf16 %v1833_v30, %v1833_v30  ;;  %v1713_v39 = vadd.f32 %v3364_v32, %v4229_v20  ;;  %v3367_v53 = vadd.f32 %v3366_v35, %v3365_v34  ;;  %v2056_v34 = vld [vmem:[#allocation4 + $0x14] sm:$0x1] }
 0x1ad   : > { %v1927_v45 = vshll.u32 %v3328_v31, 16 }
 0x1ae   : > { %v1926_v40 = vrot.slane %v1924_v36, 7  ;;  %v1932_v46 = vshrl.u32 %v3329_v38, 16  ;;  %v1794_v47 = vadd.f32 %v4176_v8, %v1713_v39  ;;  %v1716_v51 = vadd.f32 %v3367_v53, %v4229_v20  ;;  %v2049_v8 = vld [vmem:[#allocation4 + $0x8] sm:$0x1] }
 0x1af   : > { %v1935_v54 = vshll.u32 %v3329_v38, 16 }
 0x1b0   : > { %v1929_v55 = vor.u32 %v1927_v45, %v1926_v40  ;;  %v1934_v52 = vrot.slane %v1932_v46, 7  ;;  %v1834_v2 = vmax.f32 %v1794_v47, 0.0  ;;  %v3368_v43 = vpop.f32.mrb[8].mxu0  ;;  %v1930_v57 = vrot.slane %v1926_v40, 4 }
 0x1b1   : > { %v1797_v37 = vadd.f32 %v4186_v50, %v1716_v51  ;;  %v3369_v63 = vpop.f32.mrb[9].mxu0 }
 0x1b2   : > { %v2046_v0 = vsel %vm4237_vm10, %v1929_v55, %v2045_v48  ;;  %v1937_v44 = vor.u32 %v1935_v54, %v1934_v52  ;;  %v1939_v1 = vrot.slane %v1934_v52, 4  ;;  %v3330_v60 = vpack.c.bf16 %v1834_v2, %v1834_v2  ;;  %v3371_v7 = vpop.f32.mrb[10].mxu0 }
 0x1b3   : > { %2047 = vst [vmem:[#allocation4] sm:$0xf] %v2046_v0  ;;  %v1835_v9 = vmax.f32 %v1797_v37, 0.0  ;;  %v3370_v10 = vadd.f32 %v3369_v63, %v3368_v43  ;;  %v3372_v11 = vpop.f32.mrb[11].mxu0  ;;  %v2059_v43 = vld [vmem:[#allocation4 + $0x18] sm:$0xf] }
 0x1b4   : > { %v1938_v12 = vsel %vm4244_vm11, %v1930_v57, %v1937_v44  ;;  %v2050_v14 = vsel %vm4172_vm3, %v1939_v1, %v2049_v8  ;;  %v1941_v15 = vshrl.u32 %v3330_v60, 16  ;;  %v3373_v16 = vadd.f32 %v3372_v11, %v3371_v7 }
 0x1b5   : > { %2048 = vst.msk [vmem:[#allocation4 + $0x4] sm:$0xf] %vm706_vm0, %v1938_v12  ;;  %2051 = vst [vmem:[#allocation4 + $0x8] sm:$0x1] %v2050_v14  ;;  %v3331_v50 = vpack.c.bf16 %v1835_v9, %v1835_v9  ;;  %v1721_v18 = vadd.f32 %v3370_v10, %v4229_v20  ;;  %v1944_v21 = vshll.u32 %v3330_v60, 16 }
 0x1b6   : > { %v1943_v19 = vrot.slane %v1941_v15, 7  ;;  %v1724_v24 = vadd.f32 %v3373_v16, %v4229_v20  ;;  %v2063_v12 = vld [vmem:[#allocation4 + $0x20] sm:$0x1] }
 0x1b7   : > { %v1949_v23 = vshrl.u32 %v3331_v50, 16  ;;  %v1802_v3 = vadd.f32 %v4196_v62, %v1721_v18  ;;  %v1952_v33 = vshll.u32 %v3331_v50, 16 }
 0x1b8   : > { %v1946_v25 = vor.u32 %v1944_v21, %v1943_v19  ;;  %v3374_v27 = vpop.f32.mrb[12].mxu0  ;;  %v1805_v29 = vadd.f32 %v4200_v58, %v1724_v24  ;;  %v1947_v30 = vrot.slane %v1943_v19, 4 }
 0x1b9   : > { %v1951_v28 = vrot.slane %v1949_v23, 7  ;;  %v1836_v49 = vmax.f32 %v1802_v3, 0.0  ;;  %v3375_v31 = vpop.f32.mrb[13].mxu0 }
 0x1ba   : > { %v2053_v32 = vsel %vm4237_vm10, %v1946_v25, %v2052_v22  ;;  %v3376_v35 = vadd.f32 %v3375_v31, %v3374_v27  ;;  %v3377_v36 = vpop.f32.mrb[14].mxu0  ;;  %v1837_v53 = vmax.f32 %v1805_v29, 0.0  ;;  %v2066_v25 = vld [vmem:[#allocation4 + $0x24] sm:$0xf] }
 0x1bb   : > { %2054 = vst [vmem:[#allocation4 + $0xc] sm:$0xf] %v2053_v32  ;;  %v1954_v38 = vor.u32 %v1952_v33, %v1951_v28  ;;  %v1956_v62 = vrot.slane %v1951_v28, 4  ;;  %v3332_v39 = vpack.c.bf16 %v1836_v49, %v1836_v49  ;;  %v3378_v40 = vpop.f32.mrb[15].mxu0 }
 0x1bc   : > { %v1729_v45 = vadd.f32 %v3376_v35, %v4229_v20  ;;  %v3379_v46 = vadd.f32 %v3378_v40, %v3377_v36  ;;  %v3333_v51 = vpack.c.bf16 %v1837_v53, %v1837_v53 }
 0x1bd   : > { %v1955_v58 = vsel %vm4244_vm11, %v1947_v30, %v1954_v38  ;;  %v2057_v47 = vsel %vm4172_vm3, %v1956_v62, %v2056_v34  ;;  %v1958_v48 = vshrl.u32 %v3332_v39, 16  ;;  %v1961_v2 = vshll.u32 %v3332_v39, 16  ;;  %v2070_v62 = vld [vmem:[#allocation4 + $0x2c] sm:$0x1] }
 0x1be   : > { %2055 = vst.msk [vmem:[#allocation4 + $0x10] sm:$0xf] %vm706_vm0, %v1955_v58  ;;  %2058 = vst [vmem:[#allocation4 + $0x14] sm:$0x1] %v2057_v47  ;;  %v1810_v55 = vadd.f32 %v4194_v17, %v1729_v45  ;;  %v1732_v52 = vadd.f32 %v3379_v46, %v4229_v20  ;;  %v1966_v57 = vshrl.u32 %v3333_v51, 16  ;;  %v1969_v44 = vshll.u32 %v3333_v51, 16 }
 0x1bf   : > { %v1960_v54 = vrot.slane %v1958_v48, 7 }
 0x1c0   : > { %v1838_v8 = vmax.f32 %v1810_v55, 0.0  ;;  %v1813_v37 = vadd.f32 %v4198_v56, %v1732_v52  ;;  %v3380_v63 = vpop.f32.mrb[16].mxu0  ;;  %v1968_v60 = vrot.slane %v1966_v57, 7 }
 0x1c1   : > { %v1963_v0 = vor.u32 %v1961_v2, %v1960_v54  ;;  %v3381_v1 = vpop.f32.mrb[17].mxu0  ;;  %v1964_v15 = vrot.slane %v1960_v54, 4 }
 0x1c2   : > { %v3334_v7 = vpack.c.bf16 %v1838_v8, %v1838_v8  ;;  %v1839_v9 = vmax.f32 %v1813_v37, 0.0  ;;  %v3382_v10 = vadd.f32 %v3381_v1, %v3380_v63  ;;  %v3383_v11 = vpop.f32.mrb[18].mxu0  ;;  %v1971_v50 = vor.u32 %v1969_v44, %v1968_v60  ;;  %v2073_v8 = vld [vmem:[#allocation4 + $0x30] sm:$0xf] }
 0x1c3   : > { %v2060_v17 = vsel %vm4237_vm10, %v1963_v0, %v2059_v43  ;;  %v3384_v14 = vpop.f32.mrb[19].mxu0  ;;  %v1973_v16 = vrot.slane %v1968_v60, 4 }
 0x1c4   : > { %2061 = vst [vmem:[#allocation4 + $0x18] sm:$0xf] %v2060_v17  ;;  %v1975_v18 = vshrl.u32 %v3334_v7, 16  ;;  %v3335_v56 = vpack.c.bf16 %v1839_v9, %v1839_v9  ;;  %v3385_v19 = vadd.f32 %v3384_v14, %v3383_v11  ;;  %v1737_v21 = vadd.f32 %v3382_v10, %v4229_v20  ;;  %v2077_v11 = vld [vmem:[#allocation4 + $0x38] sm:$0x1] }
 0x1c5   : > { %v1972_v22 = vsel %vm4244_vm11, %v1964_v15, %v1971_v50  ;;  %v2064_v23 = vsel %vm4172_vm3, %v1973_v16, %v2063_v12  ;;  %v1978_v24 = vshll.u32 %v3334_v7, 16 }
 0x1c6   : > { %v1977_v3 = vrot.slane %v1975_v18, 7  ;;  %2062 = vst.msk [vmem:[#allocation4 + $0x1c] sm:$0xf] %vm706_vm0, %v1972_v22  ;;  %2065 = vst [vmem:[#allocation4 + $0x20] sm:$0x1] %v2064_v23  ;;  %v1983_v27 = vshrl.u32 %v3335_v56, 16  ;;  %v1818_v28 = vadd.f32 %v4212_v61, %v1737_v21  ;;  %v1740_v33 = vadd.f32 %v3385_v19, %v4229_v20 }
 0x1c7   : > { %v1986_v30 = vshll.u32 %v3335_v56, 16  ;;  %v2080_v18 = vld [vmem:[#allocation4 + $0x3c] sm:$0xf] }
 0x1c8   : > { %v1980_v49 = vor.u32 %v1978_v24, %v1977_v3  ;;  %v3386_v29 = vpop.f32.mrb[20].mxu0  ;;  %v1985_v31 = vrot.slane %v1983_v27, 7  ;;  %v1840_v32 = vmax.f32 %v1818_v28, 0.0  ;;  %v1821_v34 = vadd.f32 %v4216_v6, %v1740_v33 }
 0x1c9   : > { %v3387_v35 = vpop.f32.mrb[21].mxu0  ;;  %v1981_v36 = vrot.slane %v1977_v3, 4  ;;  %v2084_v3 = vld [vmem:[#allocation4 + $0x44] sm:$0x1] }
 0x1ca   : > { %v2067_v38 = vsel %vm4237_vm10, %v1980_v49, %v2066_v25  ;;  %v3388_v39 = vadd.f32 %v3387_v35, %v3386_v29  ;;  %v3389_v53 = vpop.f32.mrb[22].mxu0  ;;  %v1988_v40 = vor.u32 %v1986_v30, %v1985_v31  ;;  %v1990_v61 = vrot.slane %v1985_v31, 4 }
 0x1cb   : > { %2068 = vst [vmem:[#allocation4 + $0x24] sm:$0xf] %v2067_v38  ;;  %v3336_v45 = vpack.c.bf16 %v1840_v32, %v1840_v32  ;;  %v1841_v46 = vmax.f32 %v1821_v34, 0.0  ;;  %v3390_v58 = vpop.f32.mrb[23].mxu0  ;;  %v3619_v49 = vmov (!%p3241_p9), 0  }
 0x1cc   : > { %v1745_v47 = vadd.f32 %v3388_v39, %v4229_v20  ;;  %v3391_v48 = vadd.f32 %v3390_v58, %v3389_v53  ;;  %v1989_v6 = vsel %vm4244_vm11, %v1981_v36, %v1988_v40  ;;  %v2071_v51 = vsel %vm4172_vm3, %v1990_v61, %v2070_v62  ;;  %2091 = vst.msk [vmem:[#allocation4] sm:$0xf] (!%p3241_p9), %vm706_vm0, %v3619_v49 }
 0x1cd   : > { %v1992_v55 = vshrl.u32 %v3336_v45, 16  ;;  %2069 = vst.msk [vmem:[#allocation4 + $0x28] sm:$0xf] %vm706_vm0, %v1989_v6  ;;  %2072 = vst [vmem:[#allocation4 + $0x2c] sm:$0x1] %v2071_v51  ;;  %v3337_v52 = vpack.c.bf16 %v1841_v46, %v1841_v46  ;;  %v1995_v57 = vshll.u32 %v3336_v45, 16 }
 0x1ce   : > { %v1826_v54 = vadd.f32 %v4210_v4, %v1745_v47  ;;  %v1748_v2 = vadd.f32 %v3391_v48, %v4229_v20  ;;  %2092 = vst.msk [vmem:[#allocation4 + $0x4] sm:$0xf] (!%p3241_p9), %vm706_vm0, %v3619_v49 }
 0x1cf   : > { %v1994_v43 = vrot.slane %v1992_v55, 7  ;;  %v2000_v37 = vshrl.u32 %v3337_v52, 16  ;;  %v2003_v60 = vshll.u32 %v3337_v52, 16  ;;  %2093 = vst.msk [vmem:[#allocation4 + $0x8] sm:$0x1] (!%p3241_p9), %vm709_vm1, %v3619_v49 }
 0x1d0   : > { %v1842_v63 = vmax.f32 %v1826_v54, 0.0  ;;  %v1829_v0 = vadd.f32 %v4214_v5, %v1748_v2 }
 0x1d1   : > { %v1997_v44 = vor.u32 %v1995_v57, %v1994_v43  ;;  %v2002_v1 = vrot.slane %v2000_v37, 7  ;;  %v1998_v17 = vrot.slane %v1994_v43, 4 }
 0x1d2   : > { %v3338_v7 = vpack.c.bf16 %v1842_v63, %v1842_v63  ;;  %v1843_v9 = vmax.f32 %v1829_v0, 0.0 }
 0x1d3   : > { %v2074_v10 = vsel %vm4237_vm10, %v1997_v44, %v2073_v8  ;;  %v2005_v4 = vor.u32 %v2003_v60, %v2002_v1  ;;  %v2007_v20 = vrot.slane %v2002_v1, 4 }
 0x1d4   : > { %2075 = vst [vmem:[#allocation4 + $0x30] sm:$0xf] %v2074_v10  ;;  %v2009_v12 = vshrl.u32 %v3338_v7, 16  ;;  %v3339_v14 = vpack.c.bf16 %v1843_v9, %v1843_v9  ;;  %v2012_v16 = vshll.u32 %v3338_v7, 16 }
 0x1d5   : > { %v2006_v15 = vsel %vm4244_vm11, %v1998_v17, %v2005_v4  ;;  %v2078_v5 = vsel %vm4172_vm3, %v2007_v20, %v2077_v11 }
 0x1d6   : > { %v2011_v50 = vrot.slane %v2009_v12, 7  ;;  %2076 = vst.msk [vmem:[#allocation4 + $0x34] sm:$0xf] %vm706_vm0, %v2006_v15  ;;  %2079 = vst [vmem:[#allocation4 + $0x38] sm:$0x1] %v2078_v5  ;;  %v2017_v56 = vshrl.u32 %v3339_v14, 16 }
 0x1d7   : > { %v2020_v22 = vshll.u32 %v3339_v14, 16  ;;  %2090 = sbr.rel (%p3241_p9) target bundleno = 478 (0x1de), region = 60 }
 0x1d8   : > { %v2014_v19 = vor.u32 %v2012_v16, %v2011_v50  ;;  %v2019_v21 = vrot.slane %v2017_v56, 7  ;;  %v2015_v24 = vrot.slane %v2011_v50, 4 }
 0x1da   : > { %v2081_v23 = vsel %vm4237_vm10, %v2014_v19, %v2080_v18  ;;  %v2022_v25 = vor.u32 %v2020_v22, %v2019_v21  ;;  %v2024_v27 = vrot.slane %v2019_v21, 4 }
 0x1db   : > { %2082 = vst [vmem:[#allocation4 + $0x3c] sm:$0xf] %v2081_v23 }
 0x1dc   : > { %v2023_v28 = vsel %vm4244_vm11, %v2015_v24, %v2022_v25  ;;  %v2085_v33 = vsel %vm4172_vm3, %v2024_v27, %v2084_v3 }
 0x1dd   : > { %2083 = vst.msk [vmem:[#allocation4 + $0x40] sm:$0xf] %vm706_vm0, %v2023_v28  ;;  %2086 = vst [vmem:[#allocation4 + $0x44] sm:$0x1] %v2085_v33 }
 0x1de PF: > { %p3242_p10 = scmp.ne.s32.totalorder %s3598_s30, 3 }
 0x1df   : > { %v3620_v41 = vmov (!%p3242_p10), 0  }
 0x1e0   : > { %2097 = sbr.rel (%p3242_p10) target bundleno = 487 (0x1e7), region = 64  ;;  %2099 = vst.msk [vmem:[#allocation4 + $0x3c] sm:$0xf] (!%p3242_p10), %vm706_vm0, %v3620_v41  ;;  %2100 = vst.msk [vmem:[#allocation4 + $0x40] sm:$0xf] (!%p3242_p10), %vm706_vm0, %v3620_v41 }
 0x1e1   : > { %2101 = vst.msk [vmem:[#allocation4 + $0x44] sm:$0x1] (!%p3242_p10), %vm709_vm1, %v3620_v41 }
 0x1e7 PF: > { %v3552_v42 = vld [vmem:[#allocation4 + $0x18] sm:$0xff]   ;;  %v3553_v59 = vld [vmem:[#allocation4 + $0xc] sm:$0xff]   ;;  %v2409_v30 = vld [vmem:[#allocation4 + $0x14] sm:$0x1]  ;;  %s4595_s25 = smov 32  }
 0x1e8   : > { %2168 = vrot.lane.b32.xlu1 %v3552_v42, %s3616_s28  ;;  %2140 = vst.msk [vmem:[#allocation5 + $0x30] sm:$0xff] %vm921_vm4, %v3552_v42  ;;  %v2407_v29 = vld [vmem:[#allocation4 + $0xc] sm:$0xe]  ;;  %v2408_v31 = vld [vmem:[#allocation4 + $0x10] sm:$0xf]  ;;  %2147 = vrot.lane.b32.xlu0 %v3553_v59, %s4595_s25  ;;  %2139 = vst.msk [vmem:[#allocation5 + $0x18] sm:$0xff] %vm921_vm4, %v3553_v59 }
 0x1e9   : > { %v3256_v32 = vrot.slane %v2407_v29, 9  ;;  %v2449_v34 = vrot.slane %v2408_v31, 5  ;;  %v2452_v35 = vrot.slane %v2409_v30, 5  ;;  %v2404_v36 = vld [vmem:[#allocation4] sm:$0xe]  ;;  %v4319_v38 = vld [vmem:[#allocation4 + $0x24] sm:$0xff]  }
 0x1ea   : > { %v2405_v62 = vld [vmem:[#allocation4 + $0x4] sm:$0xf]  ;;  %v2406_v39 = vld [vmem:[#allocation4 + $0x8] sm:$0x1]  ;;  %v3255_v53 = vrot.slane %v2404_v36, 9  ;;  %2141 = vst.msk [vmem:[#allocation5 + $0x48] sm:$0xff] %vm921_vm4, %v4319_v38 }
 0x1eb   : > { %v2450_v40 = vsel %vm3778_vm5, %v3256_v32, %v2449_v34  ;;  %v2451_v61 = vrot.slane %v2449_v34, 4  ;;  %v2442_v45 = vrot.slane %v2405_v62, 5  ;;  %v2445_v46 = vrot.slane %v2406_v39, 5  ;;  %v2190_v58 = vld [vmem:[#allocation4 + $0x18] sm:$0xf]  ;;  %v3557_v44 = vld [vmem:[%s4570_s7 + $0x40] sm:$0xff]  }
 0x1ec   : > { %2149 = vrot.lane.b32.xlu1 %v3552_v42, %s4595_s25  ;;  %v2191_v47 = vld [vmem:[#allocation4 + $0x1c] sm:$0xf]  ;;  %v2192_v48 = vld [vmem:[#allocation4 + $0x20] sm:$0x1]  ;;  %v2251_v6 = vshrl.u32 %v2190_v58, 16  ;;  %v2254_v51 = vshll.u32 %v2190_v58, 16  ;;  %3400 = vmatprep.subr.bf16.mxu1 %v3557_v44 }
 0x1ed   : > { %v2453_v55 = vsel %vm3778_vm5, %v2451_v61, %v2452_v35  ;;  %v2443_v52 = vsel %vm3778_vm5, %v3255_v53, %v2442_v45  ;;  %v2444_v54 = vrot.slane %v2442_v45, 4  ;;  %v2260_v2 = vshll.u32 %v2191_v47, 16  ;;  %v2184_v43 = vld [vmem:[#allocation4] sm:$0xf]  ;;  %v2185_v0 = vld [vmem:[#allocation4 + $0x4] sm:$0xf] }
 0x1ee   : > { %v4330_v57 = vcombine.low %v2450_v40, %v2453_v55  ;;  %v2253_v8 = vrot.slane %v2251_v6, 4  ;;  %v2256_v37 = vrot.slane %v2254_v51, 5  ;;  %v2264_v63 = vshrl.u32 %v2191_v47, 16  ;;  %v2186_v9 = vld [vmem:[#allocation4 + $0x8] sm:$0x1]  ;;  %v3558_v11 = vld [vmem:[%s4570_s7] sm:$0xff]  }
 0x1ef   : > { %v2446_v1 = vsel %vm3778_vm5, %v2444_v54, %v2445_v46  ;;  %v2262_v60 = vrot.slane %v2260_v2, 5  ;;  %v2270_v7 = vshll.u32 %v2192_v48, 16  ;;  %v2203_v10 = vshrl.u32 %v2184_v43, 16  ;;  %v2193_v14 = vld [vmem:[#allocation4 + $0x24] sm:$0xf]  ;;  %3401 = vmatpush3.bf16.msra.mxu1 %v3558_v11  ;;  %v3559_v23 = vld [vmem:[%s4570_s7 + $0x48] sm:$0xff]  }
 0x1f0   : > { %2513 = vrot.lane.b32.xlu0 %v4330_v57, %s3618_s24  ;;  %v3261_v17 = vcombine.low %v2443_v52, %v2446_v1  ;;  %v2257_v4 = vor.u32 %v2256_v37, %v2253_v8  ;;  %v2266_v20 = vrot.slane %v2264_v63, 4  ;;  %v2206_v12 = vshll.u32 %v2184_v43, 16  ;;  %v2194_v15 = vld [vmem:[#allocation4 + $0x28] sm:$0xf]  ;;  %v2195_v25 = vld [vmem:[#allocation4 + $0x2c] sm:$0x1]  ;;  %3402 = vmatprep.subr.bf16.mxu1 %v3559_v23 }
 0x1f1   : > { %v2272_v5 = vrot.slane %v2270_v7, 5  ;;  %v2205_v50 = vrot.slane %v2203_v10, 4  ;;  %v2212_v16 = vshll.u32 %v2185_v0, 16  ;;  %v2216_v18 = vshrl.u32 %v2185_v0, 16  ;;  %v2410_v59 = vld [vmem:[#allocation4 + $0x18] sm:$0xe] }
 0x1f2   : > { %2494 = vrot.lane.b32.xlu1 %v3261_v17, %s3616_s28  ;;  %v2258_v56 = vrot.slane %v2257_v4, 4  ;;  %v2267_v19 = vor.u32 %v2266_v20, %v2262_v60  ;;  %v2208_v21 = vrot.slane %v2206_v12, 5  ;;  %v2222_v22 = vshll.u32 %v2186_v9, 16  ;;  %v2411_v34 = vld [vmem:[#allocation4 + $0x1c] sm:$0xf]  ;;  %v3561_v61 = vld [vmem:[%s4570_s7 + $0x50] sm:$0xff]  }
 0x1f3   : > { %v2214_v3 = vrot.slane %v2212_v16, 5  ;;  %v2218_v24 = vrot.slane %v2216_v18, 4  ;;  %v2275_v27 = vshrl.u32 %v2193_v14, 16  ;;  %v2278_v28 = vshll.u32 %v2193_v14, 16  ;;  %v3560_v35 = vld [vmem:[%s4570_s7 + $0x8] sm:$0xff]   ;;  %v3562_v43 = vld [vmem:[%s4570_s7 + $0x10] sm:$0xff]  }
 0x1f4   : > { %v2263_v33 = vsel %vm3830_vm9, %v2258_v56, %v2262_v60  ;;  %v2268_v49 = vrot.slane %v2267_v19, 4  ;;  %v2209_v41 = vor.u32 %v2208_v21, %v2205_v50  ;;  %v2224_v42 = vrot.slane %v2222_v22, 5  ;;  %v2412_v40 = vld [vmem:[#allocation4 + $0x20] sm:$0x1]  ;;  %v2187_v48 = vld [vmem:[#allocation4 + $0xc] sm:$0xf]  ;;  %3403 = vmatpush3.bf16.msra.mxu1 %v3560_v35 }
 0x1f5   : > { %v2219_v29 = vor.u32 %v2218_v24, %v2214_v3  ;;  %v2277_v31 = vrot.slane %v2275_v27, 4  ;;  %v2280_v30 = vrot.slane %v2278_v28, 5  ;;  %v2284_v32 = vshll.u32 %v2194_v15, 16  ;;  %v2188_v6 = vld [vmem:[#allocation4 + $0x10] sm:$0xf]  ;;  %3404 = vmatprep.subr.bf16.mxu1 %v3561_v61  ;;  %v3563_v1 = vld [vmem:[%s4570_s7 + $0x58] sm:$0xff]  }
 0x1f6   : > { %v2273_v36 = vsel %vm3830_vm9, %v2268_v49, %v2272_v5  ;;  %v2210_v62 = vrot.slane %v2209_v41, 4  ;;  %v2288_v39 = vshrl.u32 %v2194_v15, 16  ;;  %v2294_v53 = vshll.u32 %v2195_v25, 16  ;;  %v2189_v2 = vld [vmem:[#allocation4 + $0x14] sm:$0x1]  ;;  %v3564_v22 = vld [vmem:[#allocation4] sm:$0xff]  }
 0x1f7   : > { %v4356_v45 = vcombine.low %v2263_v33, %v2273_v36  ;;  %v2220_v46 = vrot.slane %v2219_v29, 4  ;;  %v2281_v58 = vor.u32 %v2280_v30, %v2277_v31  ;;  %v2286_v47 = vrot.slane %v2284_v32, 5  ;;  %v2196_v44 = vld [vmem:[#allocation4 + $0x30] sm:$0xf]  ;;  %v2197_v50 = vld [vmem:[#allocation4 + $0x34] sm:$0xf] }
 0x1f8   : > { %v2215_v51 = vsel %vm3830_vm9, %v2210_v62, %v2214_v3  ;;  %v2290_v55 = vrot.slane %v2288_v39, 4  ;;  %v2296_v52 = vrot.slane %v2294_v53, 5  ;;  %v3257_v54 = vrot.slane %v2410_v59, 9  ;;  %3405 = vmatpush3.bf16.msra.mxu1 %v3562_v43  ;;  %v2198_v19 = vld [vmem:[#allocation4 + $0x38] sm:$0x1]  ;;  %v3565_v33 = vld [vmem:[%s4570_s7 + $0x18] sm:$0xff]  }
 0x1f9   : > { %2388 = vrot.lane.b32.xlu0 %v4356_v45, %s4595_s25  ;;  %2382 = vst.msk [vmem:[#allocation5 + $0x20] sm:$0xff] %vm921_vm4, %v4356_v45  ;;  %v2225_v8 = vsel %vm3830_vm9, %v2220_v46, %v2224_v42  ;;  %v2282_v37 = vrot.slane %v2281_v58, 4  ;;  %v2456_v63 = vrot.slane %v2411_v34, 5  ;;  %v2459_v0 = vrot.slane %v2412_v40, 5  ;;  %3406 = vmatprep.subr.bf16.mxu1 %v3563_v1  ;;  %v2413_v27 = vld [vmem:[#allocation4 + $0x24] sm:$0xe] }
 0x1fa   : > { %v3249_v60 = vcombine.low %v2215_v51, %v2225_v8  ;;  %v2291_v7 = vor.u32 %v2290_v55, %v2286_v47  ;;  %v2227_v9 = vshrl.u32 %v2187_v48, 16  ;;  %v2230_v10 = vshll.u32 %v2187_v48, 16  ;;  %v2414_v28 = vld [vmem:[#allocation4 + $0x28] sm:$0xf]  ;;  %v2415_v29 = vld [vmem:[#allocation4 + $0x2c] sm:$0x1] }
 0x1fb   : > { %v2287_v11 = vsel %vm3830_vm9, %v2282_v37, %v2286_v47  ;;  %v2457_v17 = vsel %vm3778_vm5, %v3257_v54, %v2456_v63  ;;  %v2458_v4 = vrot.slane %v2456_v63, 4  ;;  %v2236_v20 = vshll.u32 %v2188_v6, 16  ;;  %2138 = vst.msk [vmem:[#allocation5] sm:$0xff] %vm921_vm4, %v3564_v22  ;;  %v3566_v31 = vld [vmem:[%s4570_s7 + $0x60] sm:$0xff]   ;;  %v2199_v61 = vld [vmem:[#allocation4 + $0x3c] sm:$0xf] }
 0x1fc   : > { %2358 = vrot.lane.b32.xlu1 %v3249_v60, %s3618_s24  ;;  %v2292_v12 = vrot.slane %v2291_v7, 4  ;;  %v2229_v14 = vrot.slane %v2227_v9, 4  ;;  %v2232_v15 = vrot.slane %v2230_v10, 5  ;;  %v2240_v5 = vshrl.u32 %v2188_v6, 16  ;;  %3407 = vmatpush3.bf16.msra.mxu1 %v3565_v33  ;;  %v3567_v36 = vld [vmem:[%s4570_s7 + $0x20] sm:$0xff]   ;;  %v3568_v51 = vld [vmem:[%s4570_s7 + $0x68] sm:$0xff]  }
 0x1fd   : > { %v2460_v16 = vsel %vm3778_vm5, %v2458_v4, %v2459_v0  ;;  %v2238_v18 = vrot.slane %v2236_v20, 5  ;;  %v2246_v56 = vshll.u32 %v2189_v2, 16  ;;  %v2299_v21 = vshrl.u32 %v2196_v44, 16  ;;  %3408 = vmatprep.subr.bf16.mxu1 %v3566_v31  ;;  %v2200_v6 = vld [vmem:[#allocation4 + $0x40] sm:$0xf] }
 0x1fe   : > { %v2297_v23 = vsel %vm3830_vm9, %v2292_v12, %v2296_v52  ;;  %v4381_v3 = vcombine.low %v2457_v17, %v2460_v16  ;;  %v2233_v24 = vor.u32 %v2232_v15, %v2229_v14  ;;  %v2242_v25 = vrot.slane %v2240_v5, 4  ;;  %v2201_v43 = vld [vmem:[#allocation4 + $0x44] sm:$0x1]  ;;  %v2416_v8 = vld [vmem:[#allocation4 + $0x30] sm:$0xe]  ;;  %v3569_v17 = vld [vmem:[%s4570_s7 + $0x28] sm:$0xff]  }
 0x1ff   : > { %v4386_v49 = vcombine.low %v2287_v11, %v2297_v23  ;;  %v2248_v41 = vrot.slane %v2246_v56, 5  ;;  %v2301_v42 = vrot.slane %v2299_v21, 4  ;;  %v2302_v59 = vshll.u32 %v2196_v44, 16  ;;  %v2417_v1 = vld [vmem:[#allocation4 + $0x34] sm:$0xf]  ;;  %v3570_v15 = vld [vmem:[%s4570_s7 + $0x70] sm:$0xff]  }
 0x200   : > { %2170 = vrot.lane.b32.xlu1 %v4319_v38, %s3616_s28  ;;  %2536 = vst.msk [vmem:[#allocation5 + $0x10] sm:$0xff] %vm921_vm4, %v4381_v3  ;;  %v2234_v30 = vrot.slane %v2233_v24, 4  ;;  %v2243_v32 = vor.u32 %v2242_v25, %v2238_v18  ;;  %v2308_v34 = vshll.u32 %v2197_v50, 16  ;;  %v2312_v35 = vshrl.u32 %v2197_v50, 16  ;;  %v2418_v60 = vld [vmem:[#allocation4 + $0x38] sm:$0x1]  ;;  %3409 = vmatpush3.bf16.msra.mxu1 %v3567_v36 }
 0x201   : > { %2390 = vrot.lane.b32.xlu0 %v4386_v49, %s4595_s25  ;;  %2383 = vst.msk [vmem:[#allocation5 + $0x38] sm:$0xff] %vm921_vm4, %v4386_v49  ;;  %v2304_v62 = vrot.slane %v2302_v59, 5  ;;  %v2318_v39 = vshll.u32 %v2198_v19, 16  ;;  %v3258_v53 = vrot.slane %v2413_v27, 9  ;;  %v2463_v40 = vrot.slane %v2414_v28, 5  ;;  %3410 = vmatprep.subr.bf16.mxu1 %v3568_v51  ;;  %v3571_v22 = vld [vmem:[%s4570_s7 + $0x30] sm:$0xff]  }
 0x202   : > { %v2239_v46 = vsel %vm3830_vm9, %v2234_v30, %v2238_v18  ;;  %v2244_v58 = vrot.slane %v2243_v32, 4  ;;  %v2310_v47 = vrot.slane %v2308_v34, 5  ;;  %v2314_v48 = vrot.slane %v2312_v35, 4  ;;  %v3555_v24 = vld [vmem:[#allocation4 + $0x30] sm:$0xff]   ;;  %v3573_v32 = vld [vmem:[%s4570_s7 + $0x38] sm:$0xff]  }
 0x203   : > { %v2305_v55 = vor.u32 %v2304_v62, %v2301_v42  ;;  %v2320_v52 = vrot.slane %v2318_v39, 5  ;;  %v2464_v54 = vsel %vm3778_vm5, %v3258_v53, %v2463_v40  ;;  %v2465_v2 = vrot.slane %v2463_v40, 4  ;;  %v3572_v42 = vld [vmem:[%s4570_s7 + $0x78] sm:$0xff]   ;;  %v3574_v62 = vld [vmem:[%s4570_s7 + $0x80] sm:$0xff]   ;;  %v2420_v13 = vld [vmem:[#allocation4 + $0x40] sm:$0xf] }
 0x204   : > { %v2249_v37 = vsel %vm3830_vm9, %v2244_v58, %v2248_v41  ;;  %v2315_v63 = vor.u32 %v2314_v48, %v2310_v47  ;;  %v2466_v0 = vrot.slane %v2415_v29, 5  ;;  %v2323_v44 = vshrl.u32 %v2199_v61, 16  ;;  %3411 = vmatpush3.bf16.msra.mxu1 %v3569_v17  ;;  %v2421_v40 = vld [vmem:[#allocation4 + $0x44] sm:$0x1] }
 0x205   : > { %2496 = vrot.lane.b32.xlu0 %v4330_v57, %s3616_s28  ;;  %v3250_v7 = vcombine.low %v2239_v46, %v2249_v37  ;;  %v2306_v9 = vrot.slane %v2305_v55, 4  ;;  %v2326_v10 = vshll.u32 %v2199_v61, 16  ;;  %v2332_v11 = vshll.u32 %v2200_v6, 16  ;;  %3412 = vmatprep.subr.bf16.mxu1 %v3570_v15 }
 0x206   : > { %v2316_v4 = vrot.slane %v2315_v63, 4  ;;  %v2467_v20 = vsel %vm3778_vm5, %v2465_v2, %v2466_v0  ;;  %v2325_v12 = vrot.slane %v2323_v44, 4  ;;  %v2336_v14 = vshrl.u32 %v2200_v6, 16  ;;  %v3575_v63 = vld [vmem:[%s4570_s7 + $0x88] sm:$0xff]  }
 0x207   : > { %2360 = vrot.lane.b32.xlu1 %v3250_v7, %s3618_s24  ;;  %2381 = vst.msk [vmem:[#allocation5 + $0x8] sm:$0xff] %vm921_vm4, %v3250_v7  ;;  %v2311_v57 = vsel %vm3830_vm9, %v2306_v9, %v2310_v47  ;;  %v3264_v5 = vcombine.low %v2464_v54, %v2467_v20  ;;  %v2328_v50 = vrot.slane %v2326_v10, 5  ;;  %v2334_v16 = vrot.slane %v2332_v11, 5 }
 0x208   : > { %v2321_v18 = vsel %vm3830_vm9, %v2316_v4, %v2320_v52  ;;  %v2338_v56 = vrot.slane %v2336_v14, 4  ;;  %v2342_v19 = vshll.u32 %v2201_v43, 16  ;;  %v3259_v21 = vrot.slane %v2416_v8, 9  ;;  %3413 = vmatpush3.bf16.msra.mxu1 %v3571_v22  ;;  %v2542_v22 = vld [vmem:[#allocation5 + $0x10] sm:$0xff] }
 0x209   : > { %2515 = vrot.lane.b32.xlu0 %v4381_v3, %s3618_s24  ;;  %v3253_v23 = vcombine.low %v2311_v57, %v2321_v18  ;;  %2537 = vst.msk [vmem:[#allocation5 + $0x28] sm:$0xff] %vm921_vm4, %v3264_v5  ;;  %v2329_v25 = vor.u32 %v2328_v50, %v2325_v12  ;;  %v2470_v27 = vrot.slane %v2417_v1, 5  ;;  %v2473_v28 = vrot.slane %v2418_v60, 5  ;;  %3414 = vmatprep.subr.bf16.mxu1 %v3572_v42 }
 0x20a   : > { %v2339_v33 = vor.u32 %v2338_v56, %v2334_v16  ;;  %v2344_v41 = vrot.slane %v2342_v19, 5  ;;  %v2477_v53 = vrot.slane %v2420_v13, 5  ;;  %v2480_v58 = vrot.slane %v2421_v40, 5 }
 0x20b   : > { %2384 = vst.msk [vmem:[#allocation5 + $0x50] sm:$0xff] %vm921_vm4, %v3253_v23  ;;  %2151 = vrot.lane.b32.xlu1 %v4319_v38, %s4595_s25  ;;  %v2330_v59 = vrot.slane %v2329_v25, 4  ;;  %v2471_v29 = vsel %vm3778_vm5, %v3259_v21, %v2470_v27  ;;  %v2472_v31 = vrot.slane %v2470_v27, 4  ;;  %v3621_v27 = vmov 0.0  }
 0x20c   : > { %v2340_v30 = vrot.slane %v2339_v33, 4  ;;  %3415 = vmatpush3.bf16.msra.mxu1 %v3573_v32  ;;  %v2479_v46 = vrot.slane %v2477_v53, 4  ;;  %2869 = vst.msk [vmem:[%s3728_s29] sm:$0x1] %vm709_vm1, %v3621_v27  ;;  %2870 = vst.msk [vmem:[%s3728_s29 + $0x18] sm:$0x1] %vm709_vm1, %v3621_v27 }
 0x20d   : > { %2392 = vrot.lane.b32.xlu0 %v3253_v23, %s4595_s25  ;;  %v2474_v34 = vsel %vm3778_vm5, %v2472_v31, %v2473_v28  ;;  %v2335_v38 = vsel %vm3830_vm9, %v2330_v59, %v2334_v16  ;;  %3462 = vmatprep.subr.bf16.mxu1 %v3574_v62  ;;  %2871 = vst.msk [vmem:[%s3728_s29 + $0x30] sm:$0x1] %vm709_vm1, %v3621_v27  ;;  %2872 = vst.msk [vmem:[%s3728_s29 + $0x48] sm:$0x1] %vm709_vm1, %v3621_v27 }
 0x20e   : > { %v3265_v35 = vcombine.low %v2471_v29, %v2474_v34  ;;  %v2345_v36 = vsel %vm3830_vm9, %v2340_v30, %v2344_v41  ;;  %v2481_v48 = vsel %vm3778_vm5, %v2479_v46, %v2480_v58  ;;  %2873 = vst.msk [vmem:[%s3728_s29 + $0x11] sm:$0x1] %vm709_vm1, %v3621_v27  ;;  %2874 = vst.msk [vmem:[%s3728_s29 + $0x29] sm:$0x1] %vm709_vm1, %v3621_v27 }
 0x20f   : > { %2172 = vrot.lane.b32.xlu1 %v3555_v24, %s3616_s28  ;;  %v3254_v39 = vcombine.low %v2335_v38, %v2345_v36  ;;  %2875 = vst.msk [vmem:[%s3728_s29 + $0x41] sm:$0x1] %vm709_vm1, %v3621_v27  ;;  %2876 = vst.msk [vmem:[%s3728_s29 + $0x59] sm:$0x1] %vm709_vm1, %v3621_v27 }
 0x210   : > { %2538 = vst.msk [vmem:[#allocation5 + $0x40] sm:$0xff] %vm921_vm4, %v3265_v35  ;;  %v2545_v23 = vld [vmem:[#allocation5 + $0x28] sm:$0xff] }
 0x211   : > { %2498 = vrot.lane.b32.xlu0 %v4381_v3, %s3616_s28  ;;  %v3556_v3 = vld [vmem:[#allocation4 + $0x3c] sm:$0xff]  }
 0x213   : > { %2362 = vrot.lane.b32.xlu1 %v4356_v45, %s3618_s24  ;;  %v2419_v45 = vld [vmem:[#allocation4 + $0x3c] sm:$0xe] }
 0x214   : > { %v3260_v61 = vrot.slane %v2419_v45, 9 }
 0x215   : > { %2517 = vrot.lane.b32.xlu0 %v3264_v5, %s3618_s24 }
 0x216   : > { %v2478_v47 = vsel %vm3778_vm5, %v3260_v61, %v2477_v53 }
 0x217   : > { %2153 = vrot.lane.b32.xlu1 %v3555_v24, %s4595_s25  ;;  %v3266_v6 = vcombine.low %v2478_v47, %v2481_v48  ;;  %v2548_v24 = vld [vmem:[#allocation5 + $0x40] sm:$0xff]  ;;  %v3267_v48 = vld [vmem:[%s4571_s8] ss:$0 sm:$0xff] }
 0x219   : > { %2394 = vrot.lane.b32.xlu0 %v3254_v39, %s4595_s25  ;;  %2539 = vst.msk [vmem:[#allocation5 + $0x58] sm:$0xff] %vm921_vm4, %v3266_v6 }
 0x21b   : > { %2174 = vrot.lane.b32.xlu1 %v3556_v3, %s3616_s28 }
 0x21d   : > { %2500 = vrot.lane.b32.xlu0 %v3264_v5, %s3616_s28 }
 0x21f   : > { %2364 = vrot.lane.b32.xlu1 %v4386_v49, %s3618_s24 }
 0x220   : > { %v2551_v25 = vld [vmem:[#allocation5 + $0x58] sm:$0xff] }
 0x221   : > { %2519 = vrot.lane.b32.xlu0 %v3265_v35, %s3618_s24 }
 0x25a   : > { %v2169_v51 = vpop.permute.xlu1 %2168  ;;  %v2148_v55 = vpop.permute.xlu0 %2147 }
 0x25b   : > { %2159 = vst.msk [vmem:[#allocation5] sm:$0xff] %vm951_vm13, %v2148_v55  ;;  %v2847_v55 = vld [vmem:[%s3723_s26 + $0x19] sm:$0xff] }
 0x25c   : > { %2180 = vst.msk [vmem:[#allocation5] sm:$0xff] %vm981_vm14, %v2169_v51 }
 0x25e   : > { %v2150_v49 = vpop.permute.xlu1 %2149 }
 0x25f   : > { %2160 = vst.msk [vmem:[#allocation5 + $0x18] sm:$0xff] %vm951_vm13, %v2150_v49 }
 0x262   : > { %v2514_v52 = vpop.permute.xlu0 %2513 }
 0x264   : > { %v2495_v54 = vpop.permute.xlu1 %2494 }
 0x26b   : > { %v2389_v2 = vpop.permute.xlu0 %2388 }
 0x26c   : > { %2400 = vst.msk [vmem:[#allocation5 + $0x8] sm:$0xff] %vm951_vm13, %v2389_v2  ;;  %v2845_v2 = vld [vmem:[%s3723_s26 + $0x1] sm:$0xff] }
 0x26d   : > { %2506 = vst.msk [vmem:[#allocation5 + $0x8] sm:$0xff] %vm981_vm14, %v2495_v54 }
 0x26e   : > { %2525 = vst.msk [vmem:[#allocation5 + $0x8] sm:$0xff] %vm1243_vm15, %v2514_v52  ;;  %v2359_v26 = vpop.permute.xlu1 %2358 }
 0x26f   : > { %2370 = vst.msk [vmem:[#allocation5] sm:$0xff] %vm1243_vm15, %v2359_v26 }
 0x272   : > { %v2171_v43 = vpop.permute.xlu1 %2170 }
 0x273   : > { %v2391_v8 = vpop.permute.xlu0 %2390  ;;  %2181 = vst.msk [vmem:[#allocation5 + $0x18] sm:$0xff] %vm981_vm14, %v2171_v43 }
 0x274   : > { %2401 = vst.msk [vmem:[#allocation5 + $0x20] sm:$0xff] %vm951_vm13, %v2391_v8 }
 0x275   : > { %v2541_v37 = vld [vmem:[#allocation5 + $0x8] sm:$0xff] }
 0x276   : > { %2747 = vmatprep.mubr.bf16.mxu1 %v2541_v37  ;;  %v2540_v0 = vld [vmem:[#allocation5] sm:$0xff]  ;;  %v2848_v37 = vld [vmem:[%s3723_s26 + $0x21] sm:$0xff] }
 0x277   : > { %v2497_v44 = vpop.permute.xlu0 %2496  ;;  %2748 = vmatmul.mubr.bf16.vlgmr.msra.gmra.mrb[12].mxu1 %v2540_v0 }
 0x278   : > { %2507 = vst.msk [vmem:[#allocation5 + $0x20] sm:$0xff] %vm981_vm14, %v2497_v44  ;;  %3463 = vmatpush3.bf16.msra.mxu1 %v3574_v62 }
 0x279   : > { %v2361_v1 = vpop.permute.xlu1 %2360  ;;  %3464 = vmatprep.subr.bf16.mxu1 %v3575_v63 }
 0x27a   : > { %2371 = vst.msk [vmem:[#allocation5 + $0x18] sm:$0xff] %vm1243_vm15, %v2361_v1 }
 0x27b   : > { %v2516_v60 = vpop.permute.xlu0 %2515 }
 0x27c   : > { %2526 = vst.msk [vmem:[#allocation5 + $0x20] sm:$0xff] %vm1243_vm15, %v2516_v60  ;;  %3465 = vmatpush3.bf16.msra.mxu1 %v3575_v63  ;;  %v2846_v60 = vld [vmem:[%s3723_s26 + $0x9] sm:$0xff] }
 0x27d   : > { %v2152_v7 = vpop.permute.xlu1 %2151 }
 0x27e   : > { %2161 = vst.msk [vmem:[#allocation5 + $0x30] sm:$0xff] %vm951_vm13, %v2152_v7 }
 0x27f   : > { %v2393_v9 = vpop.permute.xlu0 %2392 }
 0x280   : > { %2402 = vst.msk [vmem:[#allocation5 + $0x38] sm:$0xff] %vm951_vm13, %v2393_v9 }
 0x281   : > { %v2173_v10 = vpop.permute.xlu1 %2172  ;;  %v2543_v11 = vld [vmem:[#allocation5 + $0x18] sm:$0xff] }
 0x282   : > { %2182 = vst.msk [vmem:[#allocation5 + $0x30] sm:$0xff] %vm981_vm14, %v2173_v10 }
 0x283   : > { %v2499_v17 = vpop.permute.xlu0 %2498  ;;  %v2544_v4 = vld [vmem:[#allocation5 + $0x20] sm:$0xff] }
 0x284   : > { %2508 = vst.msk [vmem:[#allocation5 + $0x38] sm:$0xff] %vm981_vm14, %v2499_v17  ;;  %2755 = vmatprep.mubr.bf16.mxu1 %v2544_v4 }
 0x285   : > { %2756 = vmatmul.mubr.bf16.gmra.mrb[16].mxu1 %v2543_v11  ;;  %v2363_v20 = vpop.permute.xlu1 %2362 }
 0x286   : > { %2372 = vst.msk [vmem:[#allocation5 + $0x30] sm:$0xff] %vm1243_vm15, %v2363_v20  ;;  %v2851_v20 = vld [vmem:[%s3723_s26 + $0x49] sm:$0xff] }
 0x287   : > { %v2518_v12 = vpop.permute.xlu0 %2517 }
 0x288   : > { %2527 = vst.msk [vmem:[#allocation5 + $0x38] sm:$0xff] %vm1243_vm15, %v2518_v12 }
 0x289   : > { %v2154_v14 = vpop.permute.xlu1 %2153 }
 0x28a   : > { %2162 = vst.msk [vmem:[#allocation5 + $0x48] sm:$0xff] %vm951_vm13, %v2154_v14 }
 0x28b   : > { %v2395_v15 = vpop.permute.xlu0 %2394 }
 0x28c   : > { %2403 = vst.msk [vmem:[#allocation5 + $0x50] sm:$0xff] %vm951_vm13, %v2395_v15 }
 0x28d   : > { %v2175_v57 = vpop.permute.xlu1 %2174  ;;  %v2546_v5 = vld [vmem:[#allocation5 + $0x30] sm:$0xff] }
 0x28e   : > { %2183 = vst.msk [vmem:[#allocation5 + $0x48] sm:$0xff] %vm981_vm14, %v2175_v57  ;;  %v2849_v57 = vld [vmem:[%s3723_s26 + $0x31] sm:$0xff] }
 0x28f   : > { %v2501_v50 = vpop.permute.xlu0 %2500  ;;  %v2547_v16 = vld [vmem:[#allocation5 + $0x38] sm:$0xff] }
 0x290   : > { %2509 = vst.msk [vmem:[#allocation5 + $0x50] sm:$0xff] %vm981_vm14, %v2501_v50  ;;  %2763 = vmatprep.mubr.bf16.mxu1 %v2547_v16 }
 0x291   : > { %2764 = vmatmul.mubr.bf16.gmra.mrb[20].mxu1 %v2546_v5  ;;  %v2365_v18 = vpop.permute.xlu1 %2364 }
 0x292   : > { %2373 = vst.msk [vmem:[#allocation5 + $0x48] sm:$0xff] %vm1243_vm15, %v2365_v18  ;;  %v2852_v18 = vld [vmem:[%s3723_s26 + $0x51] sm:$0xff] }
 0x293   : > { %v2520_v56 = vpop.permute.xlu0 %2519 }
 0x294   : > { %2528 = vst.msk [vmem:[#allocation5 + $0x50] sm:$0xff] %vm1243_vm15, %v2520_v56 }
 0x299   : > { %v2549_v19 = vld [vmem:[#allocation5 + $0x48] sm:$0xff] }
 0x29b   : > { %v2550_v21 = vld [vmem:[#allocation5 + $0x50] sm:$0xff] }
 0x29c   : > { %2771 = vmatprep.mubr.bf16.mxu1 %v2550_v21 }
 0x29d   : > { %2772 = vmatmul.mubr.bf16.gmra.mrb[24].mxu1 %v2549_v19 }
 0x29e   : > { %3466 = vmatprep.mubr.msk.bf16.mxu1 %vm921_vm4, %v2542_v22 }
 0x2a5   : > { %3467 = vmatmul.mubr.msk.bf16.vlgmr.msra.gmra.mrb[28].mxu1 %vm921_vm4, %v2545_v23  ;;  %v2850_v23 = vld [vmem:[%s3723_s26 + $0x39] sm:$0xff] }
 0x2a6   : > { %3470 = vmatprep.mubr.msk.bf16.mxu1 %vm921_vm4, %v2548_v24 }
 0x2ad   : > { %3471 = vmatmul.mubr.msk.bf16.gmra.mrb[32].mxu1 %vm921_vm4, %v2551_v25 }
 0x34a   : > { %v3416_v28 = vpop.f32.mrb[12].mxu1 }
 0x34b   : > { %v3417_v33 = vpop.f32.mrb[13].mxu1 }
 0x34c   : > { %v3418_v41 = vadd.f32 %v3417_v33, %v3416_v28  ;;  %v3419_v42 = vpop.f32.mrb[14].mxu1 }
 0x34d   : > { %v3420_v59 = vpop.f32.mrb[15].mxu1 }
 0x34e   : > { %v3421_v29 = vadd.f32 %v3420_v59, %v3419_v42  ;;  %v2750_v49 = vadd.f32 %v3418_v41, %v3267_v48 }
 0x350   : > { %v2753_v63 = vadd.f32 %v3421_v29, %v3267_v48 }
 0x358   : > { %v3422_v31 = vpop.f32.mrb[16].mxu1 }
 0x359   : > { %v3423_v30 = vpop.f32.mrb[17].mxu1 }
 0x35a   : > { %v3424_v32 = vadd.f32 %v3423_v30, %v3422_v31  ;;  %v3425_v34 = vpop.f32.mrb[18].mxu1 }
 0x35b   : > { %v3426_v35 = vpop.f32.mrb[19].mxu1 }
 0x35c   : > { %v3427_v38 = vadd.f32 %v3426_v35, %v3425_v34  ;;  %v2758_v6 = vadd.f32 %v3424_v32, %v3267_v48 }
 0x35e   : > { %v2761_v26 = vadd.f32 %v3427_v38, %v3267_v48 }
 0x364   : > { %v3428_v36 = vpop.f32.mrb[20].mxu1 }
 0x365   : > { %v3429_v62 = vpop.f32.mrb[21].mxu1 }
 0x366   : > { %v3430_v39 = vadd.f32 %v3429_v62, %v3428_v36  ;;  %v3431_v3 = vpop.f32.mrb[22].mxu1 }
 0x367   : > { %v3432_v13 = vpop.f32.mrb[23].mxu1 }
 0x368   : > { %v3433_v53 = vadd.f32 %v3432_v13, %v3431_v3  ;;  %v2766_v12 = vadd.f32 %v3430_v39, %v3267_v48 }
 0x36a   : > { %v2769_v56 = vadd.f32 %v3433_v53, %v3267_v48 }
 0x370   : > { %v3434_v45 = vpop.f32.mrb[24].mxu1 }
 0x371   : > { %v3435_v40 = vpop.f32.mrb[25].mxu1 }
 0x372   : > { %v3436_v61 = vadd.f32 %v3435_v40, %v3434_v45  ;;  %v3437_v46 = vpop.f32.mrb[26].mxu1 }
 0x373   : > { %v3438_v58 = vpop.f32.mrb[27].mxu1 }
 0x374   : > { %v3439_v47 = vadd.f32 %v3438_v58, %v3437_v46  ;;  %v2774_v17 = vadd.f32 %v3436_v61, %v3267_v48 }
 0x376   : > { %v2777_v5 = vadd.f32 %v3439_v47, %v3267_v48 }
 0x378   : > { %v3468_v51 = vpop.f32.mrb[28].mxu1 }
 0x379   : > { %v2823_v52 = vadd.f32 %v3468_v51, %v2758_v6  ;;  %v2814_v54 = vpop.f32.mrb[29].mxu1 }
 0x37a   : > { %v2815_v43 = vadd.f32 %v2814_v54, %v2750_v49  ;;  %v3469_v8 = vpop.f32.mrb[30].mxu1 }
 0x37b   : > { %v2855_v0 = vadd.f32 %v2847_v55, %v2823_v52  ;;  %v2826_v44 = vadd.f32 %v3469_v8, %v2761_v26  ;;  %v2817_v1 = vpop.f32.mrb[31].mxu1 }
 0x37c   : > { %v2853_v7 = vadd.f32 %v2845_v2, %v2815_v43  ;;  %v2818_v9 = vadd.f32 %v2817_v1, %v2753_v63 }
 0x37d   : > { %2863 = vst.msk [vmem:[%s3728_s29 + $0x19] sm:$0xff] %vm921_vm4, %v2855_v0  ;;  %v2856_v10 = vadd.f32 %v2848_v37, %v2826_v44 }
 0x37e   : > { %2861 = vst.msk [vmem:[%s3728_s29 + $0x1] sm:$0xff] %vm921_vm4, %v2853_v7  ;;  %v2854_v11 = vadd.f32 %v2846_v60, %v2818_v9 }
 0x37f   : > { %2864 = vst.msk [vmem:[%s3728_s29 + $0x21] sm:$0xff] %vm921_vm4, %v2856_v10 }
 0x380   : > { %2862 = vst.msk [vmem:[%s3728_s29 + $0x9] sm:$0xff] %vm921_vm4, %v2854_v11  ;;  %v3472_v4 = vpop.f32.mrb[32].mxu1 }
 0x381   : > { %v2839_v14 = vadd.f32 %v3472_v4, %v2774_v17  ;;  %v2830_v15 = vpop.f32.mrb[33].mxu1 }
 0x382   : > { %v2831_v50 = vadd.f32 %v2830_v15, %v2766_v12  ;;  %v3473_v16 = vpop.f32.mrb[34].mxu1 }
 0x383   : > { %v2859_v19 = vadd.f32 %v2851_v20, %v2839_v14  ;;  %v2842_v21 = vadd.f32 %v3473_v16, %v2777_v5  ;;  %v2833_v22 = vpop.f32.mrb[35].mxu1 }
 0x384   : > { %v2857_v24 = vadd.f32 %v2849_v57, %v2831_v50  ;;  %v2834_v25 = vadd.f32 %v2833_v22, %v2769_v56 }
 0x385   : > { %2867 = vst.msk [vmem:[%s3728_s29 + $0x49] sm:$0xff] %vm921_vm4, %v2859_v19  ;;  %v2860_v27 = vadd.f32 %v2852_v18, %v2842_v21 }
 0x386   : > { %2865 = vst.msk [vmem:[%s3728_s29 + $0x31] sm:$0xff] %vm921_vm4, %v2857_v24  ;;  %v2858_v28 = vadd.f32 %v2850_v23, %v2834_v25 }
 0x387   : > { %2868 = vst.msk [vmem:[%s3728_s29 + $0x51] sm:$0xff] %vm921_vm4, %v2860_v27 }
 0x388   : > { %2866 = vst.msk [vmem:[%s3728_s29 + $0x39] sm:$0xff] %vm921_vm4, %v2858_v28 }
 0x389 PF: > { %s19_s13 = sadd.s32 1, %s3614_s13   ;;  %s4596_s30 = smov %s3606_s11 }
 0x38a   : > { %p16_p11 = scmp.ge.s32.totalorder %s19_s13, 10   ;;  %s4597_s10 = smov %s3610_s12 }
 0x38b   : > { %s4598_s11 = smov %s4601_s14  ;;  %s4599_s12 = smov %s4605_s15 }
 0x38c   :  { %18 = sbr.rel (!%p16_p11) target bundleno = 3 (0x3), region = 111 }

// kernel: _lambda_.11
= control target key start
LH: loop header
LB: loop body
LE: loop exit
PB: predicated region body
PF: predicated region fallthrough
CT: control target
= control target key end

     0   :  { %s2410_s18 = smov 0   ;;  %s2412_s19 = smov 0   ;;  %s3091_s0 = inlined_call_operand.vmem [shape: f32[2,32,34,32], index: 0, kind: input, shape index: {}, may-alias: {0,1,2}]   ;;  %s3092_s1 = inlined_call_operand.vmem [shape: f32[2,32,34,32], index: 1, kind: input, shape index: {}, may-alias: {0,1,2}]   ;;  %s3093_s2 = inlined_call_operand.vmem [shape: f32[2,32,34,32], index: 2, kind: input, shape index: {}, may-alias: {0,1,2}]   ;;  %s3094_s3 = inlined_call_operand.vmem [shape: bf16[288,3], index: 3, kind: input, shape index: {}]   ;;  %s3095_s4 = inlined_call_operand.vmem [shape: f32[1,3], index: 4, kind: input, shape index: {}]   ;;  %s3096_s5 = inlined_call_operand.vmem [shape: f32[2,32,34,3], index: 5, kind: output, shape index: {}]  }
   0x1   :  { %s2414_s20 = smov 0   ;;  %s2416_s21 = smov 0  }
   0x2   :  { %s2418_s22 = smov 0  }
   0x3 LB: > { %s24_s23 = sadd.s32 1, %s2366_s20  ;;  %s27_s24 = sadd.s32 1, %s2370_s21  ;;  %s2374_s22 = sphi %s2418_s22, %s15_s22   ;;  %s2370_s21 = sphi %s2416_s21, %s3107_s21   ;;  %s2366_s20 = sphi %s2414_s20, %s3106_s20   ;;  %s2362_s19 = sphi %s2412_s19, %s3105_s19   ;;  %s2358_s18 = sphi %s2410_s18, %s3104_s18  }
   0x4   : > { %p25_p0 = scmp.ge.s32.totalorder %s24_s23, 8  ;;  %p2006_p1 = scmp.ge.s32.totalorder %s2374_s22, 1 }
   0x5   : > { %p273_p2 = scmp.lt.s32.totalorder %s2374_s22, 17 }
   0x6   : > { %s3109_s23 = smov (%p25_p0, %s24_s23), 0  ;;  %s3111_s24 = smov (!%p25_p0, %s27_s24), %s2370_s21 }
   0x7   : > { %p274_p3 = pnand %p2006_p1, %p273_p2  ;;  %p29_p4 = scmp.ge.s32.totalorder %s3111_s24, 2 }
   0x8   : > { %s2443_s25 = sshll.u32 (!%p274_p3), %s2358_s18, 2  ;;  %p341_p5 = scmp.lt.s32.totalorder (!%p274_p3), %s2362_s19, 1  ;;  %vm1846_vm0 = vcmask (!%p274_p3), 16384   ;;  %vm435_vm1 = vcmask (!%p274_p3), 257024   ;;  %v2376_v2 = vmov (!%p274_p3), 0.0   ;;  %vm1239_vm2 = vcmask (!%p274_p3), 1042432  }
   0x9   : > { %s3113_s24 = smov (%p29_p4, %s3111_s24), 0  ;;  %277 = sbr.rel (%p274_p3) target bundleno = 498 (0x1f2), region = 40 }
   0xa   : > { %p357_p6 = scmp.lt.s32.totalorder (!%p274_p3), %s2443_s25, 31  ;;  %s366_s29 = sadd.s32 (!%p274_p3), 4, %s2443_s25  ;;  %vm1240_vm3 = vcmask (!%p274_p3), 1046532   ;;  %vm440_vm4 = vcmask (!%p274_p3), 253952   ;;  %v2317_v42 = vld [vmem:[%s3094_s3 + $0x40] sm:$0xff] (!%p274_p3)   ;;  %vm670_vm5 = vcmask (!%p274_p3), 261120  }
   0xb   : > { %p567_p7 = scmp.eq.s32.totalorder (!%p274_p3), %s2358_s18, 7  ;;  %p2452_p8 = scmp.lt.s32.totalorder (!%p274_p3), %s366_s29, 31  ;;  %vm2553_vm6 = vmor (!%p274_p3), %vm1239_vm2, %vm1240_vm3  ;;  %2147 = vmatprep.subr.bf16.mxu0 (!%p274_p3), %v2317_v42  ;;  %2241 = vmatprep.subr.bf16.mxu1 (!%p274_p3), %v2317_v42  ;;  %vm795_vm8 = vsmask.f32 (!%p274_p3), 3328  ;;  %vm796_vm9 = vsmask.f32 (!%p274_p3), 7440 }
   0xc   : > { %s2457_s8 = sadd.s32 (!%p274_p3), 4294967295, %s2443_s25  ;;  %s2378_s9 = smov (!%p274_p3), 32   ;;  %vm2661_vm10 = vmor (!%p274_p3), %vm795_vm8, %vm796_vm9  ;;  %vm713_vm12 = vcmask (!%p274_p3), 523520   ;;  %vm756_vm13 = vcmask (!%p274_p3), 785920   ;;  %vm1110_vm14 = vcmask (!%p274_p3), 1048320   ;;  %vm1829_vm15 = vcmask (!%p274_p3), 23552  }
   0xd   : > { %p339_p9 = scmp.gt.s32.totalorder (!%p274_p3), %s2457_s8, 0  ;;  %p2009_p10 = scmp.lt.s32.totalorder (!%p274_p3), %s2457_s8, 31 }
   0xe   : > { %s2379_s10 = smov (!%p274_p3), 96   ;;  %p410_p11 = scmp.eq.s32.totalorder (!%p274_p3), %s2358_s18, 0 }
  0x10   : > { %s3115_s19 = smov (!%p341_p5, %s2362_s19), 1  ;;  %s3117_s29 = smov (!%p2452_p8, %s366_s29), 31 }
  0x11   : > { %s358_s26 = scalar_select %p357_p6, %s2443_s25, 31 }
  0x12   : > { %s2447_s27 = smul.u32 160, %s3115_s19  ;;  %s3119_s29 = smov (!%p2452_p8, %s3117_s29), 31 }
  0x13   : > { %s2259_s28 = smul.u32 5, %s358_s26 }
  0x14   : > { %s2497_s15 = scalar_select %p567_p7, 1, 0 }
  0x15   : > { %s361_s30 = sadd.s32 %s2259_s28, %s2447_s27  ;;  %s2260_s16 = smul.u32 5, %s3119_s29 }
  0x16   : > { %s2016_s7 = sshll.u32 %s361_s30, 3  ;;  %v569_v35 = vstv %s2497_s15 }
  0x17   : > { %s2462_s11 = scalar_lea.vmem %s3092_s1, %s2016_s7  ;;  %s2467_s14 = scalar_lea.vmem %s3096_s5, %s2016_s7  ;;  %vm2559_vm7 = vcmp.eq.s32.totalorder %v569_v35, 1 }
  0x18   : > { %v447_v0 = vld [vmem:[%s2462_s11 + $0x28] sm:$0xff]  ;;  %v448_v1 = vld [vmem:[%s2462_s11 + $0x30] sm:$0xff]  ;;  %1847 = vst.msk [vmem:[%s2467_s14] sm:$0x1] %vm1846_vm0, %v2376_v2  ;;  %1848 = vst.msk [vmem:[%s2467_s14 + $0x28] sm:$0x1] %vm1846_vm0, %v2376_v2  ;;  %s375_s19 = sadd.s32 %s2260_s16, %s2447_s27 }
  0x19   : > { %1849 = vst.msk [vmem:[%s2467_s14 + $0x50] sm:$0x1] %vm1846_vm0, %v2376_v2  ;;  %1850 = vst.msk [vmem:[%s2467_s14 + $0x78] sm:$0x1] %vm1846_vm0, %v2376_v2  ;;  %v442_v3 = vld [vmem:[%s2462_s11] sm:$0xff]  ;;  %v2132_v4 = vpack.c.bf16 %v447_v0, %v447_v0  ;;  %v2133_v5 = vpack.c.bf16 %v448_v1, %v448_v1  ;;  %v443_v6 = vld [vmem:[%s2462_s11 + $0x8] sm:$0xff] }
  0x1a   : > { %1851 = vst.msk [vmem:[%s2467_s14 + $0x21] sm:$0x1] %vm1846_vm0, %v2376_v2  ;;  %1852 = vst.msk [vmem:[%s2467_s14 + $0x49] sm:$0x1] %vm1846_vm0, %v2376_v2  ;;  %v2127_v7 = vpack.c.bf16 %v442_v3, %v442_v3  ;;  %v457_v8 = vld [vmem:[%s2462_s11 + $0x78] sm:$0xff]  ;;  %v458_v9 = vld [vmem:[%s2462_s11 + $0x80] sm:$0xff]  ;;  %v2128_v10 = vpack.c.bf16 %v443_v6, %v443_v6 }
  0x1b   : > { %1853 = vst.msk [vmem:[%s2467_s14 + $0x71] sm:$0x1] %vm1846_vm0, %v2376_v2  ;;  %1854 = vst.msk [vmem:[%s2467_s14 + $0x99] sm:$0x1] %vm1846_vm0, %v2376_v2  ;;  %v2142_v11 = vpack.c.bf16 %v457_v8, %v457_v8  ;;  %v2143_v12 = vpack.c.bf16 %v458_v9, %v458_v9  ;;  %v444_v13 = vld [vmem:[%s2462_s11 + $0x10] sm:$0xff]  ;;  %v445_v14 = vld [vmem:[%s2462_s11 + $0x18] sm:$0xff] }
  0x1c   : > { %v452_v15 = vld [vmem:[%s2462_s11 + $0x50] sm:$0xff]  ;;  %552 = vst.msk [vmem:[#allocation2 + $0x28] sm:$0xf] %vm435_vm1, %v2132_v4  ;;  %553 = vst.msk [vmem:[#allocation2 + $0x2c] sm:$0xf] %vm435_vm1, %v2133_v5  ;;  %v2129_v16 = vpack.c.bf16 %v444_v13, %v444_v13  ;;  %v2130_v17 = vpack.c.bf16 %v445_v14, %v445_v14  ;;  %v453_v18 = vld [vmem:[%s2462_s11 + $0x58] sm:$0xff] }
  0x1d   : > { %547 = vst.msk [vmem:[#allocation2 + $0x14] sm:$0xf] %vm435_vm1, %v2127_v7  ;;  %v454_v19 = vld [vmem:[%s2462_s11 + $0x60] sm:$0xff]  ;;  %v2137_v20 = vpack.c.bf16 %v452_v15, %v452_v15  ;;  %v449_v21 = vld [vmem:[%s2462_s11 + $0x38] sm:$0xff]  ;;  %548 = vst.msk [vmem:[#allocation2 + $0x18] sm:$0xf] %vm435_vm1, %v2128_v10  ;;  %v2138_v22 = vpack.c.bf16 %v453_v18, %v453_v18 }
  0x1e   : > { %562 = vst.msk [vmem:[#allocation2 + $0x50] sm:$0xf] %vm435_vm1, %v2142_v11  ;;  %563 = vst.msk [vmem:[#allocation2 + $0x54] sm:$0xf] %vm435_vm1, %v2143_v12  ;;  %v2139_v23 = vpack.c.bf16 %v454_v19, %v454_v19  ;;  %v450_v24 = vld [vmem:[%s2462_s11 + $0x40] sm:$0xff]  ;;  %v2134_v25 = vpack.c.bf16 %v449_v21, %v449_v21  ;;  %v459_v26 = vld [vmem:[%s2462_s11 + $0x88] sm:$0xff] }
  0x1f   : > { %v460_v27 = vld [vmem:[%s2462_s11 + $0x90] sm:$0xff]  ;;  %549 = vst.msk [vmem:[#allocation2 + $0x1c] sm:$0xf] %vm435_vm1, %v2129_v16  ;;  %550 = vst.msk [vmem:[#allocation2 + $0x20] sm:$0xf] %vm435_vm1, %v2130_v17  ;;  %v2135_v28 = vpack.c.bf16 %v450_v24, %v450_v24  ;;  %v2144_v29 = vpack.c.bf16 %v459_v26, %v459_v26  ;;  %s2527_s17 = scalar_select %p339_p9, %s2457_s8, 0 }
  0x20   : > { %557 = vst.msk [vmem:[#allocation2 + $0x3c] sm:$0xf] %vm435_vm1, %v2137_v20  ;;  %v2145_v30 = vpack.c.bf16 %v460_v27, %v460_v27  ;;  %v446_v31 = vld [vmem:[%s2462_s11 + $0x20] sm:$0x3]  ;;  %v451_v32 = vld [vmem:[%s2462_s11 + $0x48] sm:$0x3] }
  0x21   : > { %v455_v33 = vld [vmem:[%s2462_s11 + $0x68] sm:$0xff]  ;;  %558 = vst.msk [vmem:[#allocation2 + $0x40] sm:$0xf] %vm435_vm1, %v2138_v22  ;;  %559 = vst.msk [vmem:[#allocation2 + $0x44] sm:$0xf] %vm435_vm1, %v2139_v23  ;;  %v2131_v34 = vpack.c.bf16 %v446_v31, %v446_v31  ;;  %v2136_v36 = vpack.c.bf16 %v451_v32, %v451_v32  ;;  %s2021_s25 = sshll.u32 %s375_s19, 3 }
  0x22   : > { %554 = vst.msk [vmem:[#allocation2 + $0x30] sm:$0xf] %vm435_vm1, %v2134_v25  ;;  %v456_v37 = vld [vmem:[%s2462_s11 + $0x70] sm:$0x3]  ;;  %v2140_v38 = vpack.c.bf16 %v455_v33, %v455_v33  ;;  %v461_v39 = vld [vmem:[%s2462_s11 + $0x98] sm:$0x3]  ;;  %s2547_s6 = scalar_lea.vmem %s3093_s2, %s2021_s25 }
  0x23   : > { %555 = vst.msk [vmem:[#allocation2 + $0x34] sm:$0xf] %vm435_vm1, %v2135_v28  ;;  %564 = vst.msk [vmem:[#allocation2 + $0x58] sm:$0xf] %vm435_vm1, %v2144_v29  ;;  %v2141_v40 = vpack.c.bf16 %v456_v37, %v456_v37  ;;  %v2146_v41 = vpack.c.bf16 %v461_v39, %v461_v39  ;;  %v402_v44 = vld [vmem:[%s2547_s6] sm:$0xff]  ;;  %v403_v45 = vld [vmem:[%s2547_s6 + $0x8] sm:$0xff] }
  0x24   : > { %565 = vst.msk [vmem:[#allocation2 + $0x5c] sm:$0xf] %vm435_vm1, %v2145_v30  ;;  %560 = vst.msk [vmem:[#allocation2 + $0x48] sm:$0xf] %vm435_vm1, %v2140_v38  ;;  %v2565_v47 = vld [vmem:[#allocation2 + $0x28] sm:$0xff]   ;;  %v407_v48 = vpack.c.bf16 %v403_v45, %v402_v44  ;;  %v2306_v49 = vld [vmem:[#allocation2 + $0x14] sm:$0xff]  }
  0x25   : > { %551 = vst.msk [vmem:[#allocation2 + $0x24] sm:$0x1] %vm440_vm4, %v2131_v34  ;;  %556 = vst.msk [vmem:[#allocation2 + $0x38] sm:$0x1] %vm440_vm4, %v2136_v36  ;;  %s3121_s17 = smov (!%p2009_p10, %s2527_s17), 31  ;;  %s2377_s7 = smov 64   ;;  %689 = vrot.lane.b32.xlu0 %v2306_v49, %s2378_s9 }
  0x26   : > { %561 = vst.msk [vmem:[#allocation2 + $0x4c] sm:$0x1] %vm440_vm4, %v2141_v40  ;;  %566 = vst.msk [vmem:[#allocation2 + $0x60] sm:$0x1] %vm440_vm4, %v2146_v41  ;;  %732 = vrot.lane.b32.xlu1 %v2565_v47, %s2377_s7  ;;  %v2307_v50 = vld [vmem:[#allocation2 + $0x50] sm:$0xff]   ;;  %v571_v51 = vsel %vm2559_vm7, 0, %v407_v48 }
  0x27   : > { %675 = vst.msk [vmem:[#allocation3 + $0x60] sm:$0xff] %vm670_vm5, %v2565_v47  ;;  %673 = vst.msk [vmem:[#allocation3 + $0x30] sm:$0xff] %vm670_vm5, %v2306_v49  ;;  %v1184_v52 = vld [vmem:[#allocation2 + $0x14] sm:$0xe]  ;;  %v1185_v53 = vld [vmem:[#allocation2 + $0x18] sm:$0xf]  ;;  %v2049_v55 = vcombine.low %v571_v51, %v571_v51  ;;  %v2050_v56 = vcombine.high %v571_v51, %v571_v51 }
  0x28   : > { %v1186_v54 = vld [vmem:[#allocation2 + $0x1c] sm:$0xf]  ;;  %v2079_v57 = vrot.slane %v1184_v52, 9  ;;  %v1257_v58 = vrot.slane %v1185_v53, 5  ;;  %v1195_v62 = vld [vmem:[#allocation2 + $0x40] sm:$0xf] }
  0x29   : > { %v1260_v59 = vrot.slane %v1186_v54, 5  ;;  %v2308_v60 = vld [vmem:[#allocation2 + $0x1c] sm:$0xff]   ;;  %593 = vst.msk [vmem:[#allocation2 + $0x64] sm:$0xf] %vm435_vm1, %v2049_v55  ;;  %594 = vst.msk [vmem:[#allocation2 + $0x68] sm:$0xf] %vm435_vm1, %v2050_v56 }
  0x2a   : > { %v1194_v61 = vld [vmem:[#allocation2 + $0x3c] sm:$0xe]  ;;  %701 = vrot.lane.b32.xlu1 %v2307_v50, %s2378_s9  ;;  %v1258_v63 = vsel %vm2553_vm6, %v2079_v57, %v1257_v58  ;;  %v1259_v0 = vrot.slane %v1257_v58, 4  ;;  %674 = vst.msk [vmem:[#allocation3 + $0x48] sm:$0xff] %vm670_vm5, %v2308_v60  ;;  %v2586_v1 = vld [vmem:[#allocation2 + $0x44] sm:$0xf] }
  0x2b   : > { %v2081_v2 = vrot.slane %v1194_v61, 9  ;;  %v1283_v3 = vrot.slane %v1195_v62, 5  ;;  %v2588_v4 = vld [vmem:[#allocation2 + $0x30] sm:$0xff]   ;;  %v1286_v5 = vrot.slane %v2586_v1, 5  ;;  %s2257_s8 = smul.u32 5, %s3121_s17  ;;  %v1262_v12 = vrot.slane %v1260_v59, 4 }
  0x2c   : > { %v404_v6 = vld [vmem:[%s2547_s6 + $0x10] sm:$0xff]  ;;  %v1261_v7 = vsel %vm2553_vm6, %v1259_v0, %v1260_v59  ;;  %676 = vst.msk [vmem:[#allocation3 + $0x78] sm:$0xff] %vm670_vm5, %v2588_v4  ;;  %v2601_v14 = vld [vmem:[#allocation2 + $0x58] sm:$0xf]  ;;  %v1187_v19 = vld [vmem:[#allocation2 + $0x20] sm:$0xf] }
  0x2d   : > { %v1284_v8 = vsel %vm2553_vm6, %v2081_v2, %v1283_v3  ;;  %v1285_v9 = vrot.slane %v1283_v3, 4  ;;  %v1199_v10 = vld [vmem:[#allocation2 + $0x50] sm:$0xe]  ;;  %v1200_v11 = vld [vmem:[#allocation2 + $0x54] sm:$0xf]  ;;  %v2599_v13 = vcombine.low %v1258_v63, %v1261_v7  ;;  %v1299_v18 = vrot.slane %v2601_v14, 5  ;;  %s2617_s11 = sadd.s32 %s2447_s27, %s2257_s8 }
  0x2e   : > { %v2082_v15 = vrot.slane %v1199_v10, 9  ;;  %v1296_v16 = vrot.slane %v1200_v11, 5  ;;  %691 = vrot.lane.b32.xlu1 %v2308_v60, %s2378_s9  ;;  %v405_v20 = vld [vmem:[%s2547_s6 + $0x18] sm:$0xff]  ;;  %v1188_v24 = vld [vmem:[#allocation2 + $0x24] sm:$0x1]  ;;  %v1263_v25 = vrot.slane %v1187_v19, 5 }
  0x2f   : > { %v1287_v17 = vsel %vm2553_vm6, %v1285_v9, %v1286_v5  ;;  %1382 = vrot.lane.b32.xlu0 %v2599_v13, %s2379_s10  ;;  %v775_v26 = vld [vmem:[#allocation2 + $0x28] sm:$0xf]  ;;  %v2619_v27 = vld [vmem:[#allocation2 + $0x58] sm:$0xff]   ;;  %v1266_v28 = vrot.slane %v1188_v24, 5  ;;  %v408_v29 = vpack.c.bf16 %v405_v20, %v404_v6  ;;  %v776_v33 = vld [vmem:[#allocation2 + $0x2c] sm:$0xf] }
  0x30   : > { %v2612_v21 = vcombine.low %v1284_v8, %v1287_v17  ;;  %v1297_v22 = vsel %vm2553_vm6, %v2082_v15, %v1296_v16  ;;  %v1298_v23 = vrot.slane %v1296_v16, 4  ;;  %v1264_v31 = vsel %vm2553_vm6, %v1262_v12, %v1263_v25  ;;  %v777_v34 = vld [vmem:[#allocation2 + $0x30] sm:$0xf]  ;;  %v780_v40 = vld [vmem:[#allocation2 + $0x3c] sm:$0xf]  ;;  %s2014_s27 = sshll.u32 %s2617_s11, 3 }
  0x31   : > { %v1265_v32 = vrot.slane %v1263_v25, 4  ;;  %v887_v35 = vshrl.u32 %v775_v26, 16  ;;  %v2633_v37 = vsel %vm2559_vm7, 0, %v408_v29  ;;  %v890_v38 = vshll.u32 %v775_v26, 16  ;;  %v781_v48 = vld [vmem:[#allocation2 + $0x40] sm:$0xf]  ;;  %s2656_s15 = scalar_lea.vmem %s3091_s0, %s2014_s27 }
  0x32   : > { %1430 = vst.msk [vmem:[#allocation3 + $0x40] sm:$0xff] %vm670_vm5, %v2612_v21  ;;  %v1300_v30 = vsel %vm2553_vm6, %v1298_v23, %v1299_v18  ;;  %734 = vrot.lane.b32.xlu1 %v2588_v4, %s2377_s7  ;;  %v896_v39 = vshll.u32 %v776_v33, 16  ;;  %v900_v44 = vshrl.u32 %v776_v33, 16  ;;  %v906_v45 = vshll.u32 %v777_v34, 16  ;;  %v2640_v49 = vld [vmem:[#allocation2 + $0x3c] sm:$0xff]   ;;  %v2311_v59 = vld [vmem:[#allocation2 + $0x64] sm:$0xff]  }
  0x33   : > { %v2092_v36 = vcombine.low %v1297_v22, %v1300_v30  ;;  %1356 = vrot.lane.b32.xlu0 %v2612_v21, %s2377_s7  ;;  %v1267_v41 = vsel %vm2553_vm6, %v1265_v32, %v1266_v28  ;;  %v889_v42 = vrot.slane %v887_v35, 4  ;;  %v892_v51 = vrot.slane %v890_v38, 5  ;;  %v2645_v54 = vld [vmem:[#allocation2 + $0x44] sm:$0xf]  ;;  %677 = vst.msk [vmem:[#allocation3 + $0x90] sm:$0xff] %vm670_vm5, %v2640_v49  ;;  %v395_v24 = vld [vmem:[%s2656_s15 + $0x8] sm:$0xff] }
  0x34   : > { %v2643_v50 = vcombine.low %v1264_v31, %v1267_v41  ;;  %v898_v52 = vrot.slane %v896_v39, 5  ;;  %v910_v53 = vshrl.u32 %v777_v34, 16  ;;  %v902_v55 = vrot.slane %v900_v44, 4  ;;  %v778_v0 = vld [vmem:[#allocation2 + $0x34] sm:$0xf]  ;;  %v2666_v10 = vld [vmem:[#allocation2 + $0x44] sm:$0xff]  }
  0x35   : > { %1432 = vst.msk [vmem:[#allocation3 + $0x70] sm:$0xff] %vm670_vm5, %v2092_v36  ;;  %v908_v56 = vrot.slane %v906_v45, 5  ;;  %v931_v57 = vshrl.u32 %v780_v40, 16  ;;  %v934_v58 = vshll.u32 %v780_v40, 16  ;;  %v893_v60 = vor.u32 %v892_v51, %v889_v42  ;;  %v779_v9 = vld [vmem:[#allocation2 + $0x38] sm:$0x1] }
  0x36   : > { %703 = vrot.lane.b32.xlu1 %v2619_v27, %s2378_s9  ;;  %v940_v61 = vshll.u32 %v781_v48, 16  ;;  %v944_v62 = vshrl.u32 %v781_v48, 16  ;;  %v950_v63 = vshll.u32 %v2645_v54, 16  ;;  %v903_v3 = vor.u32 %v902_v55, %v898_v52  ;;  %v394_v23 = vld [vmem:[%s2656_s15] sm:$0xff]  ;;  %678 = vst.msk [vmem:[#allocation3 + $0xa8] sm:$0xff] %vm670_vm5, %v2666_v10  ;;  %v396_v31 = vld [vmem:[%s2656_s15 + $0x10] sm:$0xff] }
  0x37   : > { %1394 = vrot.lane.b32.xlu0 %v2092_v36, %s2379_s10  ;;  %v933_v6 = vrot.slane %v931_v57, 4  ;;  %v936_v7 = vrot.slane %v934_v58, 5  ;;  %v954_v8 = vshrl.u32 %v2645_v54, 16  ;;  %v894_v11 = vrot.slane %v893_v60, 4  ;;  %v2318_v25 = vld [vmem:[%s3094_s3] sm:$0xff]   ;;  %v397_v32 = vld [vmem:[%s2656_s15 + $0x18] sm:$0xff] }
  0x38   : > { %v942_v12 = vrot.slane %v940_v61, 5  ;;  %v946_v15 = vrot.slane %v944_v62, 4  ;;  %v2668_v16 = vrot.slane %v950_v63, 5  ;;  %v904_v17 = vrot.slane %v903_v3, 4  ;;  %s411_s19 = scalar_select %p410_p11, 1, 0  ;;  %2148 = vmatpush3.bf16.msra.mxu0 %v2318_v25  ;;  %2249 = vmatpush3.bf16.msra.mxu1 %v2318_v25 }
  0x39   : > { %v937_v19 = vor.u32 %v936_v7, %v933_v6  ;;  %v912_v20 = vrot.slane %v910_v53, 4  ;;  %v916_v22 = vshll.u32 %v778_v0, 16  ;;  %v899_v26 = vsel %vm2661_vm10, %v894_v11, %v898_v52  ;;  %v398_v38 = vld [vmem:[%s2656_s15 + $0x20] sm:$0x3]  ;;  %v2319_v44 = vld [vmem:[%s3094_s3 + $0x48] sm:$0xff]   ;;  %v2335_v43 = vld [vmem:[#allocation2 + $0x50] sm:$0xff]  }
  0x3a   : > { %744 = vrot.lane.b32.xlu1 %v2311_v59, %s2377_s7  ;;  %v947_v28 = vor.u32 %v946_v15, %v942_v12  ;;  %v920_v29 = vshrl.u32 %v778_v0, 16  ;;  %v926_v30 = vshll.u32 %v779_v9, 16  ;;  %v909_v33 = vsel %vm2661_vm10, %v904_v17, %v908_v56  ;;  %v2320_v53 = vld [vmem:[%s3094_s3 + $0x8] sm:$0xff]   ;;  %v790_v59 = vld [vmem:[#allocation2 + $0x64] sm:$0xf]  ;;  %2149 = vmatprep.subr.bf16.mxu0 %v2319_v44  ;;  %v2321_v0 = vld [vmem:[%s3094_s3 + $0x50] sm:$0xff]  }
  0x3b   : > { %1384 = vrot.lane.b32.xlu0 %v2643_v50, %s2379_s10  ;;  %v938_v34 = vrot.slane %v937_v19, 4  ;;  %v913_v35 = vor.u32 %v912_v20, %v908_v56  ;;  %v918_v36 = vrot.slane %v916_v22, 5  ;;  %v2689_v39 = vcombine.low %v899_v26, %v909_v33  ;;  %2242 = vmatprep.subr.bf16.mxu1 %v2319_v44  ;;  %v791_v63 = vld [vmem:[#allocation2 + $0x68] sm:$0xf]  ;;  %v406_v11 = vld [vmem:[%s2547_s6 + $0x20] sm:$0x3] }
  0x3c   : > { %v948_v40 = vrot.slane %v947_v28, 4  ;;  %v922_v41 = vrot.slane %v920_v29, 4  ;;  %v928_v42 = vrot.slane %v926_v30, 5  ;;  %v399_v51 = vpack.c.bf16 %v395_v24, %v394_v23  ;;  %2150 = vmatpush3.bf16.msra.mxu0 %v2320_v53  ;;  %2250 = vmatpush3.bf16.msra.mxu1 %v2320_v53  ;;  %v1197_v25 = vld [vmem:[#allocation2 + $0x48] sm:$0xf] }
  0x3d   : > { %v943_v45 = vsel %vm2661_vm10, %v938_v34, %v942_v12  ;;  %v914_v48 = vrot.slane %v913_v35, 4  ;;  %v400_v52 = vpack.c.bf16 %v397_v32, %v396_v31  ;;  %1135 = vst.msk [vmem:[#allocation3 + $0x38] sm:$0xff] %vm670_vm5, %v2689_v39  ;;  %v412_v57 = vstv %s411_s19  ;;  %2151 = vmatprep.subr.bf16.mxu0 %v2321_v0  ;;  %2243 = vmatprep.subr.bf16.mxu1 %v2321_v0  ;;  %v1198_v31 = vld [vmem:[#allocation2 + $0x4c] sm:$0x1] }
  0x3e   : > { %v953_v55 = vsel %vm2661_vm10, %v948_v40, %v2668_v16  ;;  %v923_v56 = vor.u32 %v922_v41, %v918_v36  ;;  %v401_v58 = vpack.c.bf16 %v398_v38, %v398_v38  ;;  %vm413_vm11 = vcmp.eq.s32.totalorder %v412_v57, 1  ;;  %v2322_v38 = vld [vmem:[%s3094_s3 + $0x10] sm:$0xff]  }
  0x3f   : > { %1147 = vrot.lane.b32.xlu0 %v2689_v39, %s2378_s9  ;;  %v2706_v60 = vcombine.low %v943_v45, %v953_v55  ;;  %v919_v61 = vsel %vm2661_vm10, %v914_v48, %v918_v36  ;;  %v2051_v62 = vcombine.low %v2633_v37, %v2633_v37  ;;  %v414_v6 = vsel %vm413_vm11, 0, %v399_v51  ;;  %v2734_v36 = vld [vmem:[#allocation2 + $0x5c] sm:$0xf] }
  0x40   : > { %v924_v3 = vrot.slane %v923_v56, 4  ;;  %v415_v7 = vsel %vm413_vm11, 0, %v400_v52  ;;  %v416_v9 = vsel %vm413_vm11, 0, %v401_v58  ;;  %v2024_v12 = vcombine.low %v414_v6, %v414_v6  ;;  %2152 = vmatpush3.bf16.msra.mxu0 %v2322_v38  ;;  %2251 = vmatpush3.bf16.msra.mxu1 %v2322_v38 }
  0x41   : > { %1098 = vrot.lane.b32.xlu1 %v2706_v60, %s2379_s10  ;;  %1137 = vst.msk [vmem:[#allocation3 + $0x68] sm:$0xff] %vm670_vm5, %v2706_v60  ;;  %v2025_v15 = vcombine.high %v414_v6, %v414_v6  ;;  %v2026_v17 = vcombine.low %v415_v7, %v415_v7  ;;  %v2027_v19 = vcombine.high %v415_v7, %v415_v7  ;;  %v1019_v23 = vshrl.u32 %v790_v59, 16 }
  0x42   : > { %595 = vst.msk [vmem:[#allocation2 + $0x6c] sm:$0xf] %vm435_vm1, %v2051_v62  ;;  %v929_v20 = vsel %vm2661_vm10, %v924_v3, %v928_v42  ;;  %v2028_v22 = vcombine.low %v416_v9, %v416_v9  ;;  %v1022_v24 = vshll.u32 %v790_v59, 16  ;;  %436 = vst.msk [vmem:[#allocation2] sm:$0xf] %vm435_vm1, %v2024_v12  ;;  %v1028_v28 = vshll.u32 %v791_v63, 16 }
  0x43   : > { %v2723_v26 = vcombine.low %v919_v61, %v929_v20  ;;  %437 = vst.msk [vmem:[#allocation2 + $0x4] sm:$0xf] %vm435_vm1, %v2025_v15  ;;  %438 = vst.msk [vmem:[#allocation2 + $0x8] sm:$0xf] %vm435_vm1, %v2026_v17  ;;  %v1032_v29 = vshrl.u32 %v791_v63, 16  ;;  %v409_v30 = vpack.c.bf16 %v406_v11, %v406_v11  ;;  %v1021_v32 = vrot.slane %v1019_v23, 4 }
  0x44   : > { %439 = vst.msk [vmem:[#allocation2 + $0xc] sm:$0xf] %vm435_vm1, %v2027_v19  ;;  %v1024_v33 = vrot.slane %v1022_v24, 5  ;;  %v2052_v34 = vcombine.high %v2633_v37, %v2633_v37  ;;  %v1288_v35 = vrot.slane %v1286_v5, 4  ;;  %v2743_v40 = vrot.slane %v1028_v28, 5  ;;  %v2323_v61 = vld [vmem:[%s3094_s3 + $0x58] sm:$0xff]  }
  0x45   : > { %441 = vst.msk [vmem:[#allocation2 + $0x10] sm:$0x1] %vm440_vm4, %v2028_v22  ;;  %1149 = vrot.lane.b32.xlu0 %v2723_v26, %s2378_s9  ;;  %v1034_v41 = vrot.slane %v1032_v29, 4  ;;  %v573_v37 = vsel %vm2559_vm7, 0, %v409_v30  ;;  %v1289_v1 = vrot.slane %v1197_v25, 5  ;;  %v1292_v45 = vrot.slane %v1198_v31, 5  ;;  %2153 = vmatprep.subr.bf16.mxu0 %v2323_v61 }
  0x46   : > { %1136 = vst.msk [vmem:[#allocation3 + $0x50] sm:$0xff] %vm670_vm5, %v2723_v26  ;;  %v2747_v5 = vld [vmem:[#allocation2 + $0x60] sm:$0x1]  ;;  %v1025_v42 = vor.u32 %v1024_v33, %v1021_v32  ;;  %v2053_v44 = vcombine.low %v573_v37, %v573_v37  ;;  %v1301_v48 = vrot.slane %v1299_v18, 4  ;;  %v1302_v53 = vrot.slane %v2734_v36, 5  ;;  %2244 = vmatprep.subr.bf16.mxu1 %v2323_v61 }
  0x47   : > { %596 = vst.msk [vmem:[#allocation2 + $0x70] sm:$0xf] %vm435_vm1, %v2052_v34  ;;  %v1035_v51 = vor.u32 %v1034_v41, %v2743_v40  ;;  %v1290_v52 = vsel %vm2553_vm6, %v1288_v35, %v1289_v1  ;;  %v1291_v46 = vrot.slane %v1289_v1, 4  ;;  %v1305_v57 = vrot.slane %v2747_v5, 5 }
  0x48   : > { %v1026_v56 = vrot.slane %v1025_v42, 4  ;;  %597 = vst.msk [vmem:[#allocation2 + $0x74] sm:$0x1] %vm440_vm4, %v2053_v44  ;;  %v2774_v23 = vsel %vm2553_vm6, %v1301_v48, %v1302_v53 }
  0x49   : > { %v792_v55 = vld [vmem:[#allocation2 + $0x6c] sm:$0xf]  ;;  %v1036_v58 = vrot.slane %v1035_v51, 4  ;;  %v1293_v18 = vsel %vm2553_vm6, %v1291_v46, %v1292_v45  ;;  %v1179_v62 = vld [vmem:[#allocation2] sm:$0xe] }
  0x4a   : > { %v1038_v59 = vshll.u32 %v792_v55, 16  ;;  %v1042_v14 = vshrl.u32 %v792_v55, 16  ;;  %v1180_v63 = vld [vmem:[#allocation2 + $0x4] sm:$0xf]  ;;  %v1181_v0 = vld [vmem:[#allocation2 + $0x8] sm:$0xf]  ;;  %v2763_v3 = vcombine.low %v1290_v52, %v1293_v18  ;;  %v1031_v20 = vsel %vm2661_vm10, %v1026_v56, %v2743_v40 }
  0x4b   : > { %v2078_v6 = vrot.slane %v1179_v62, 9  ;;  %v1244_v7 = vrot.slane %v1180_v63, 5  ;;  %v1247_v9 = vrot.slane %v1181_v0, 5  ;;  %v1182_v11 = vld [vmem:[#allocation2 + $0xc] sm:$0xf] }
  0x4c   : > { %v1040_v12 = vrot.slane %v1038_v59, 5  ;;  %v1183_v15 = vld [vmem:[#allocation2 + $0x10] sm:$0x1]  ;;  %v1250_v17 = vrot.slane %v1182_v11, 5  ;;  %v765_v19 = vld [vmem:[#allocation2] sm:$0xf] }
  0x4d   : > { %v1044_v22 = vrot.slane %v1042_v14, 4  ;;  %1431 = vst.msk [vmem:[#allocation3 + $0x58] sm:$0xff] %vm670_vm5, %v2763_v3  ;;  %v1245_v24 = vsel %vm2553_vm6, %v2078_v6, %v1244_v7  ;;  %v1246_v25 = vrot.slane %v1244_v7, 4  ;;  %v1249_v28 = vrot.slane %v1247_v9, 4  ;;  %v766_v30 = vld [vmem:[#allocation2 + $0x4] sm:$0xf] }
  0x4e   : > { %v1253_v29 = vrot.slane %v1183_v15, 5  ;;  %v1252_v31 = vrot.slane %v1250_v17, 4  ;;  %v767_v32 = vld [vmem:[#allocation2 + $0x8] sm:$0xf]  ;;  %v799_v33 = vshrl.u32 %v765_v19, 16  ;;  %v802_v34 = vshll.u32 %v765_v19, 16 }
  0x4f   : > { %v808_v35 = vshll.u32 %v766_v30, 16  ;;  %v1248_v38 = vsel %vm2553_vm6, %v1246_v25, %v1247_v9  ;;  %v1251_v40 = vsel %vm2553_vm6, %v1249_v28, %v1250_v17  ;;  %v812_v41 = vshrl.u32 %v766_v30, 16  ;;  %v793_v48 = vld [vmem:[#allocation2 + $0x70] sm:$0xf]  ;;  %v794_v51 = vld [vmem:[#allocation2 + $0x74] sm:$0x1] }
  0x50   : > { %v818_v37 = vshll.u32 %v767_v32, 16  ;;  %v2084_v1 = vcombine.low %v1245_v24, %v1248_v38  ;;  %v1254_v42 = vsel %vm2553_vm6, %v1252_v31, %v1253_v29  ;;  %v801_v44 = vrot.slane %v799_v33, 4  ;;  %v2315_v59 = vld [vmem:[#allocation2] sm:$0xff]   ;;  %v768_v63 = vld [vmem:[#allocation2 + $0xc] sm:$0xf]  ;;  %v2324_v29 = vld [vmem:[%s3094_s3 + $0x18] sm:$0xff]  }
  0x51   : > { %v804_v45 = vrot.slane %v802_v34, 5  ;;  %v2085_v52 = vcombine.low %v1251_v40, %v1254_v42  ;;  %v810_v46 = vrot.slane %v808_v35, 5  ;;  %v814_v55 = vrot.slane %v812_v41, 4  ;;  %v2316_v0 = vld [vmem:[#allocation2 + $0x8] sm:$0xff]   ;;  %v769_v15 = vld [vmem:[#allocation2 + $0x10] sm:$0x1]  ;;  %2154 = vmatpush3.bf16.msra.mxu0 %v2324_v29  ;;  %2252 = vmatpush3.bf16.msra.mxu1 %v2324_v29 }
  0x52   : > { %v820_v56 = vrot.slane %v818_v37, 5  ;;  %1344 = vrot.lane.b32.xlu1 %v2084_v1, %s2377_s7  ;;  %v822_v18 = vshrl.u32 %v767_v32, 16  ;;  %v1041_v61 = vsel %vm2661_vm10, %v1036_v58, %v1040_v12  ;;  %v1045_v62 = vor.u32 %v1044_v22, %v1040_v12  ;;  %671 = vst.msk [vmem:[#allocation3] sm:$0xff] %vm670_vm5, %v2315_v59  ;;  %672 = vst.msk [vmem:[#allocation3 + $0x18] sm:$0xff] %vm670_vm5, %v2316_v0  ;;  %v783_v34 = vld [vmem:[#allocation2 + $0x48] sm:$0xf] }
  0x53   : > { %v805_v14 = vor.u32 %v804_v45, %v801_v44  ;;  %1346 = vrot.lane.b32.xlu0 %v2085_v52, %s2377_s7  ;;  %v815_v6 = vor.u32 %v814_v55, %v810_v46  ;;  %v2076_v7 = vcombine.low %v1031_v20, %v1041_v61  ;;  %v1048_v9 = vshll.u32 %v793_v48, 16  ;;  %v2325_v20 = vld [vmem:[%s3094_s3 + $0x60] sm:$0xff]   ;;  %v1190_v52 = vld [vmem:[#allocation2 + $0x2c] sm:$0xf]  ;;  %v770_v61 = vld [vmem:[#allocation2 + $0x14] sm:$0xf] }
  0x54   : > { %v1052_v11 = vshrl.u32 %v793_v48, 16  ;;  %v1046_v19 = vrot.slane %v1045_v62, 4  ;;  %v1058_v24 = vshll.u32 %v794_v51, 16  ;;  %v824_v25 = vrot.slane %v822_v18, 4  ;;  %v2326_v37 = vld [vmem:[%s3094_s3 + $0x20] sm:$0xff]   ;;  %2155 = vmatprep.subr.bf16.mxu0 %v2325_v20  ;;  %2245 = vmatprep.subr.bf16.mxu1 %v2325_v20 }
  0x55   : > { %v806_v17 = vrot.slane %v805_v14, 4  ;;  %v816_v28 = vrot.slane %v815_v6, 4  ;;  %v1050_v58 = vrot.slane %v1048_v9, 5  ;;  %v828_v22 = vshll.u32 %v768_v63, 16  ;;  %v784_v48 = vld [vmem:[#allocation2 + $0x4c] sm:$0x1]  ;;  %2156 = vmatpush3.bf16.msra.mxu0 %v2326_v37  ;;  %2253 = vmatpush3.bf16.msra.mxu1 %v2326_v37 }
  0x56   : > { %v1054_v12 = vrot.slane %v1052_v11, 4  ;;  %v1060_v31 = vrot.slane %v1058_v24, 5  ;;  %v825_v32 = vor.u32 %v824_v25, %v820_v56  ;;  %v832_v33 = vshrl.u32 %v768_v63, 16  ;;  %v1189_v51 = vld [vmem:[#allocation2 + $0x28] sm:$0xe] }
  0x57   : > { %v811_v30 = vsel %vm2661_vm10, %v806_v17, %v810_v46  ;;  %v821_v35 = vsel %vm2661_vm10, %v816_v28, %v820_v56  ;;  %1159 = vrot.lane.b32.xlu0 %v2076_v7, %s2378_s9  ;;  %v1051_v38 = vsel %vm2661_vm10, %v1046_v19, %v1050_v58  ;;  %v830_v41 = vrot.slane %v828_v22, 5  ;;  %v2327_v46 = vld [vmem:[%s3094_s3 + $0x68] sm:$0xff]   ;;  %v1191_v18 = vld [vmem:[#allocation2 + $0x30] sm:$0xf]  ;;  %v771_v19 = vld [vmem:[#allocation2 + $0x18] sm:$0xf] }
  0x58   : > { %v1055_v40 = vor.u32 %v1054_v12, %v1050_v58  ;;  %v2066_v1 = vcombine.low %v811_v30, %v821_v35  ;;  %v826_v42 = vrot.slane %v825_v32, 4  ;;  %v834_v44 = vrot.slane %v832_v33, 4  ;;  %v772_v24 = vld [vmem:[#allocation2 + $0x1c] sm:$0xf]  ;;  %2157 = vmatprep.subr.bf16.mxu0 %v2327_v46  ;;  %2246 = vmatprep.subr.bf16.mxu1 %v2327_v46  ;;  %v2330_v58 = vld [vmem:[%s3094_s3 + $0x30] sm:$0xff]  }
  0x59   : > { %v838_v45 = vshll.u32 %v769_v15, 16  ;;  %v1304_v56 = vrot.slane %v1302_v53, 4  ;;  %v956_v59 = vrot.slane %v954_v8, 4  ;;  %v960_v14 = vshll.u32 %v783_v34, 16  ;;  %v2328_v53 = vld [vmem:[%s3094_s3 + $0x28] sm:$0xff]   ;;  %v2331_v35 = vld [vmem:[%s3094_s3 + $0x78] sm:$0xff]  }
  0x5a   : > { %v1056_v55 = vrot.slane %v1055_v40, 4  ;;  %1086 = vrot.lane.b32.xlu1 %v2066_v1, %s2379_s10  ;;  %v831_v62 = vsel %vm2661_vm10, %v826_v42, %v830_v41  ;;  %v835_v63 = vor.u32 %v834_v44, %v830_v41  ;;  %v964_v6 = vshrl.u32 %v783_v34, 16  ;;  %v1192_v33 = vld [vmem:[#allocation2 + $0x34] sm:$0xf]  ;;  %v1193_v34 = vld [vmem:[#allocation2 + $0x38] sm:$0x1]  ;;  %2158 = vmatpush3.bf16.msra.mxu0 %v2328_v53 }
  0x5b   : > { %v840_v0 = vrot.slane %v838_v45, 5  ;;  %v1306_v54 = vsel %vm2553_vm6, %v1304_v56, %v1305_v57  ;;  %v957_v8 = vor.u32 %v956_v59, %v2668_v16  ;;  %v962_v36 = vrot.slane %v960_v14, 5  ;;  %v2329_v16 = vld [vmem:[%s3094_s3 + $0x70] sm:$0xff]   ;;  %2254 = vmatpush3.bf16.msra.mxu1 %v2328_v53  ;;  %v773_v56 = vld [vmem:[#allocation2 + $0x20] sm:$0xf] }
  0x5c   : > { %v1061_v7 = vsel %vm2661_vm10, %v1056_v55, %v1060_v31  ;;  %v836_v11 = vrot.slane %v835_v63, 4  ;;  %v2827_v15 = vcombine.low %v2774_v23, %v1306_v54  ;;  %v966_v17 = vrot.slane %v964_v6, 4  ;;  %2159 = vmatprep.subr.bf16.mxu0 %v2329_v16  ;;  %v2312_v1 = vld [vmem:[#allocation2 + $0x6c] sm:$0xff]   ;;  %2247 = vmatprep.subr.bf16.mxu1 %v2329_v16  ;;  %v2332_v63 = vld [vmem:[%s3094_s3 + $0x38] sm:$0xff]  }
  0x5d   : > { %v2077_v9 = vcombine.low %v1051_v38, %v1061_v7  ;;  %v958_v5 = vrot.slane %v957_v8, 4  ;;  %v970_v57 = vshll.u32 %v784_v48, 16  ;;  %v2080_v25 = vrot.slane %v1189_v51, 9 }
  0x5e   : > { %v1270_v28 = vrot.slane %v1190_v52, 5  ;;  %v841_v23 = vsel %vm2661_vm10, %v836_v11, %v840_v0  ;;  %1433 = vst.msk [vmem:[#allocation3 + $0x88] sm:$0xff] %vm670_vm5, %v2827_v15  ;;  %v967_v12 = vor.u32 %v966_v17, %v962_v36  ;;  %v1273_v22 = vrot.slane %v1191_v18, 5  ;;  %2160 = vmatpush3.bf16.msra.mxu0 %v2330_v58  ;;  %v785_v11 = vld [vmem:[#allocation2 + $0x50] sm:$0xf]  ;;  %v2869_v17 = vld [vmem:[%s3094_s3 + $0x80] sm:$0xff]  }
  0x5f   : > { %1161 = vrot.lane.b32.xlu0 %v2077_v9, %s2378_s9  ;;  %v843_v29 = vshrl.u32 %v770_v61, 16  ;;  %v2067_v20 = vcombine.low %v831_v62, %v841_v23  ;;  %v963_v30 = vsel %vm2661_vm10, %v958_v5, %v962_v36  ;;  %v972_v31 = vrot.slane %v970_v57, 5  ;;  %v774_v62 = vld [vmem:[#allocation2 + $0x24] sm:$0x1]  ;;  %2161 = vmatprep.subr.bf16.mxu0 %v2331_v35  ;;  %v786_v23 = vld [vmem:[#allocation2 + $0x54] sm:$0xf] }
  0x60   : > { %v1271_v32 = vsel %vm2553_vm6, %v2080_v25, %v1270_v28  ;;  %v968_v38 = vrot.slane %v967_v12, 4  ;;  %v1272_v40 = vrot.slane %v1270_v28, 4  ;;  %v846_v37 = vshll.u32 %v770_v61, 16  ;;  %2255 = vmatpush3.bf16.msra.mxu1 %v2330_v58 }
  0x61   : > { %v845_v41 = vrot.slane %v843_v29, 4  ;;  %1088 = vrot.lane.b32.xlu1 %v2067_v20, %s2379_s10  ;;  %v852_v42 = vshll.u32 %v771_v19, 16  ;;  %v856_v44 = vshrl.u32 %v771_v19, 16  ;;  %v862_v45 = vshll.u32 %v772_v24, 16  ;;  %2248 = vmatprep.subr.bf16.mxu1 %v2331_v35 }
  0x62   : > { %v866_v48 = vshrl.u32 %v772_v24, 16  ;;  %v973_v51 = vsel %vm2661_vm10, %v968_v38, %v972_v31  ;;  %v1274_v52 = vsel %vm2553_vm6, %v1272_v40, %v1273_v22  ;;  %v848_v46 = vrot.slane %v846_v37, 5  ;;  %2162 = vmatpush3.bf16.msra.mxu0 %v2332_v63 }
  0x63   : > { %1358 = vrot.lane.b32.xlu0 %v2763_v3, %s2377_s7  ;;  %v1275_v55 = vrot.slane %v1273_v22, 4  ;;  %v2854_v59 = vcombine.low %v963_v30, %v973_v51  ;;  %v2856_v14 = vcombine.low %v1271_v32, %v1274_v52  ;;  %v854_v18 = vrot.slane %v852_v42, 5  ;;  %v789_v52 = vld [vmem:[#allocation2 + $0x60] sm:$0x1] }
  0x64   : > { %v858_v61 = vrot.slane %v856_v44, 4  ;;  %v849_v0 = vor.u32 %v848_v46, %v845_v41  ;;  %v864_v6 = vrot.slane %v862_v45, 5  ;;  %v1276_v7 = vrot.slane %v1192_v33, 5  ;;  %2256 = vmatpush3.bf16.msra.mxu1 %v2332_v63 }
  0x65   : > { %v1279_v54 = vrot.slane %v1193_v34, 5  ;;  %746 = vrot.lane.b32.xlu1 %v2312_v1, %s2377_s7  ;;  %1138 = vst.msk [vmem:[#allocation3 + $0x80] sm:$0xff] %vm670_vm5, %v2854_v59  ;;  %1428 = vst.msk [vmem:[#allocation3 + $0x10] sm:$0xff] %vm670_vm5, %v2856_v14  ;;  %v868_v36 = vrot.slane %v866_v48, 4  ;;  %v872_v53 = vshll.u32 %v773_v56, 16  ;;  %v876_v9 = vshrl.u32 %v773_v56, 16  ;;  %2221 = vmatprep.subr.bf16.mxu1 %v2869_v17 }
  0x66   : > { %v859_v8 = vor.u32 %v858_v61, %v854_v18  ;;  %v850_v19 = vrot.slane %v849_v0, 4  ;;  %v1277_v24 = vsel %vm2553_vm6, %v1275_v55, %v1276_v7  ;;  %v1278_v16 = vrot.slane %v1276_v7, 4  ;;  %v788_v34 = vld [vmem:[#allocation2 + $0x5c] sm:$0xf] }
  0x67   : > { %1396 = vrot.lane.b32.xlu0 %v2827_v15, %s2379_s10  ;;  %v882_v5 = vshll.u32 %v774_v62, 16  ;;  %v869_v25 = vor.u32 %v868_v36, %v864_v6  ;;  %v874_v28 = vrot.slane %v872_v53, 5  ;;  %v878_v58 = vrot.slane %v876_v9, 4  ;;  %v787_v15 = vld [vmem:[#allocation2 + $0x58] sm:$0xf] }
  0x68   : > { %v860_v57 = vrot.slane %v859_v8, 4  ;;  %v855_v12 = vsel %vm2661_vm10, %v850_v19, %v854_v18  ;;  %v1280_v22 = vsel %vm2553_vm6, %v1278_v16, %v1279_v54  ;;  %v975_v20 = vshrl.u32 %v785_v11, 16  ;;  %v1205_v16 = vld [vmem:[#allocation2 + $0x68] sm:$0xf] }
  0x69   : > { %v884_v29 = vrot.slane %v882_v5, 5  ;;  %1100 = vrot.lane.b32.xlu1 %v2854_v59, %s2379_s10  ;;  %v2883_v31 = vcombine.low %v1277_v24, %v1280_v22  ;;  %v870_v32 = vrot.slane %v869_v25, 4  ;;  %v879_v33 = vor.u32 %v878_v58, %v874_v28  ;;  %v1206_v25 = vld [vmem:[#allocation2 + $0x6c] sm:$0xf]  ;;  %v1207_v58 = vld [vmem:[#allocation2 + $0x70] sm:$0xf] }
  0x6a   : > { %v865_v30 = vsel %vm2661_vm10, %v860_v57, %v864_v6  ;;  %v977_v38 = vrot.slane %v975_v20, 4  ;;  %v978_v40 = vshll.u32 %v785_v11, 16  ;;  %v984_v41 = vshll.u32 %v786_v23, 16 }
  0x6b   : > { %1151 = vrot.lane.b32.xlu0 %v2706_v60, %s2378_s9  ;;  %v2068_v35 = vcombine.low %v855_v12, %v865_v30  ;;  %1429 = vst.msk [vmem:[#allocation3 + $0x28] sm:$0xff] %vm670_vm5, %v2883_v31  ;;  %v875_v37 = vsel %vm2661_vm10, %v870_v32, %v874_v28  ;;  %v880_v1 = vrot.slane %v879_v33, 4  ;;  %v988_v42 = vshrl.u32 %v786_v23, 16  ;;  %v1204_v12 = vld [vmem:[#allocation2 + $0x64] sm:$0xe] }
  0x6c   : > { %v994_v44 = vshll.u32 %v787_v15, 16  ;;  %v980_v45 = vrot.slane %v978_v40, 5  ;;  %v986_v48 = vrot.slane %v984_v41, 5  ;;  %v998_v51 = vshrl.u32 %v787_v15, 16  ;;  %v1208_v32 = vld [vmem:[#allocation2 + $0x74] sm:$0x1] }
  0x6d   : > { %1133 = vst.msk [vmem:[#allocation3 + $0x8] sm:$0xff] %vm670_vm5, %v2068_v35  ;;  %v1004_v60 = vshll.u32 %v788_v34, 16  ;;  %693 = vrot.lane.b32.xlu1 %v2565_v47, %s2378_s9  ;;  %v885_v46 = vsel %vm2661_vm10, %v880_v1, %v884_v29  ;;  %v990_v55 = vrot.slane %v988_v42, 4  ;;  %v1008_v18 = vshrl.u32 %v788_v34, 16 }
  0x6e   : > { %v996_v56 = vrot.slane %v994_v44, 5  ;;  %v2069_v61 = vcombine.low %v875_v37, %v885_v46  ;;  %v981_v62 = vor.u32 %v980_v45, %v977_v38  ;;  %v1000_v63 = vrot.slane %v998_v51, 4 }
  0x6f   : > { %1348 = vrot.lane.b32.xlu0 %v2599_v13, %s2377_s7  ;;  %v1006_v0 = vrot.slane %v1004_v60, 5  ;;  %v991_v6 = vor.u32 %v990_v55, %v986_v48  ;;  %v1010_v7 = vrot.slane %v1008_v18, 4  ;;  %v1014_v54 = vshll.u32 %v789_v52, 16  ;;  %v2334_v18 = vld [vmem:[%s3094_s3 + $0x88] sm:$0xff]  }
  0x70   : > { %1134 = vst.msk [vmem:[#allocation3 + $0x20] sm:$0xff] %vm670_vm5, %v2069_v61  ;;  %v982_v8 = vrot.slane %v981_v62, 4  ;;  %v1001_v47 = vor.u32 %v1000_v63, %v996_v56  ;;  %v1309_v28 = vrot.slane %v1205_v16, 5  ;;  %v1312_v22 = vrot.slane %v1206_v25, 5 }
  0x71   : > { %736 = vrot.lane.b32.xlu1 %v2640_v49, %s2377_s7  ;;  %v992_v36 = vrot.slane %v991_v6, 4  ;;  %v1011_v53 = vor.u32 %v1010_v7, %v1006_v0  ;;  %v1016_v9 = vrot.slane %v1014_v54, 5  ;;  %v1315_v29 = vrot.slane %v1207_v58, 5 }
  0x72   : > { %v987_v13 = vsel %vm2661_vm10, %v982_v8, %v986_v48  ;;  %v1002_v11 = vrot.slane %v1001_v47, 4  ;;  %v2083_v20 = vrot.slane %v1204_v12, 9  ;;  %v1311_v30 = vrot.slane %v1309_v28, 4 }
  0x73   : > { %1386 = vrot.lane.b32.xlu0 %v2856_v14, %s2379_s10  ;;  %v997_v19 = vsel %vm2661_vm10, %v992_v36, %v996_v56  ;;  %v1012_v24 = vrot.slane %v1011_v53, 4  ;;  %v1314_v33 = vrot.slane %v1312_v22, 4  ;;  %v1317_v34 = vrot.slane %v1315_v29, 4 }
  0x74   : > { %v2074_v5 = vcombine.low %v987_v13, %v997_v19  ;;  %v1007_v57 = vsel %vm2661_vm10, %v1002_v11, %v1006_v0  ;;  %v1318_v38 = vrot.slane %v1208_v32, 5  ;;  %v1310_v2 = vsel %vm2553_vm6, %v2083_v20, %v1309_v28 }
  0x75   : > { %1090 = vrot.lane.b32.xlu1 %v2068_v35, %s2379_s10  ;;  %v1017_v23 = vsel %vm2661_vm10, %v1012_v24, %v1016_v9  ;;  %v1313_v35 = vsel %vm2553_vm6, %v1311_v30, %v1312_v22  ;;  %v1316_v40 = vsel %vm2553_vm6, %v1314_v33, %v1315_v29  ;;  %v1438_v9 = vld [vmem:[#allocation3 + $0x10] sm:$0xff]  ;;  %v1447_v29 = vld [vmem:[#allocation3 + $0x58] sm:$0xff] }
  0x76   : > { %1139 = vst.msk [vmem:[#allocation3 + $0x98] sm:$0xff] %vm670_vm5, %v2074_v5  ;;  %v2075_v15 = vcombine.low %v1007_v57, %v1017_v23  ;;  %v1319_v41 = vsel %vm2553_vm6, %v1317_v34, %v1318_v38  ;;  %v1444_v57 = vld [vmem:[#allocation3 + $0x40] sm:$0xff]  ;;  %v1453_v38 = vld [vmem:[#allocation3 + $0x88] sm:$0xff] }
  0x77   : > { %1153 = vrot.lane.b32.xlu0 %v2854_v59, %s2378_s9  ;;  %v2094_v59 = vcombine.low %v1310_v2, %v1313_v35  ;;  %v2095_v37 = vcombine.low %v1316_v40, %v1319_v41 }
  0x78   : > { %1140 = vst.msk [vmem:[#allocation3 + $0xb0] sm:$0xff] %vm670_vm5, %v2075_v15 }
  0x79   : > { %695 = vrot.lane.b32.xlu1 %v2588_v4, %s2378_s9  ;;  %1434 = vst.msk [vmem:[#allocation3 + $0xa0] sm:$0xff] %vm670_vm5, %v2094_v59  ;;  %1435 = vst.msk [vmem:[#allocation3 + $0xb8] sm:$0xff] %vm670_vm5, %v2095_v37 }
  0x7b   : > { %1350 = vrot.lane.b32.xlu0 %v2643_v50, %s2377_s7 }
  0x7d   : > { %738 = vrot.lane.b32.xlu1 %v2666_v10, %s2377_s7 }
  0x7f   : > { %1388 = vrot.lane.b32.xlu0 %v2883_v31, %s2379_s10 }
  0x80   : > { %v1456_v2 = vld [vmem:[#allocation3 + $0xa0] sm:$0xff] }
  0x81   : > { %1092 = vrot.lane.b32.xlu1 %v2069_v61, %s2379_s10 }
  0x83   : > { %1155 = vrot.lane.b32.xlu0 %v2074_v5, %s2378_s9  ;;  %v1441_v5 = vld [vmem:[#allocation3 + $0x28] sm:$0xff] }
  0x85   : > { %697 = vrot.lane.b32.xlu1 %v2640_v49, %s2378_s9 }
  0x87   : > { %1352 = vrot.lane.b32.xlu0 %v2856_v14, %s2377_s7 }
  0x89   : > { %740 = vrot.lane.b32.xlu1 %v2335_v43, %s2377_s7  ;;  %v1459_v43 = vld [vmem:[#allocation3 + $0xb8] sm:$0xff] }
  0x8b   : > { %1390 = vrot.lane.b32.xlu0 %v2612_v21, %s2379_s10 }
  0x8d   : > { %1094 = vrot.lane.b32.xlu1 %v2689_v39, %s2379_s10 }
  0x8f   : > { %1157 = vrot.lane.b32.xlu0 %v2075_v15, %s2378_s9  ;;  %v1450_v15 = vld [vmem:[#allocation3 + $0x70] sm:$0xff] }
  0x91   : > { %699 = vrot.lane.b32.xlu1 %v2666_v10, %s2378_s9 }
  0x93   : > { %1354 = vrot.lane.b32.xlu0 %v2883_v31, %s2377_s7 }
  0x95   : > { %742 = vrot.lane.b32.xlu1 %v2619_v27, %s2377_s7 }
  0x97   : > { %1392 = vrot.lane.b32.xlu0 %v2763_v3, %s2379_s10  ;;  %v690_v21 = vpop.permute.xlu0 %689 }
  0x98   : > { %v733_v4 = vpop.permute.xlu1 %732  ;;  %714 = vst.msk [vmem:[#allocation3] sm:$0xff] %vm713_vm12, %v690_v21 }
  0x99   : > { %1096 = vrot.lane.b32.xlu1 %v2723_v26, %s2379_s10  ;;  %757 = vst.msk [vmem:[#allocation3] sm:$0xff] %vm756_vm13, %v733_v4 }
  0x9c   : > { %v702_v49 = vpop.permute.xlu1 %701 }
  0x9d   : > { %720 = vst.msk [vmem:[#allocation3 + $0x90] sm:$0xff] %vm713_vm12, %v702_v49 }
  0xa0   : > { %v692_v50 = vpop.permute.xlu1 %691 }
  0xa1   : > { %v1383_v10 = vpop.permute.xlu0 %1382  ;;  %715 = vst.msk [vmem:[#allocation3 + $0x18] sm:$0xff] %vm713_vm12, %v692_v50 }
  0xa4   : > { %v735_v27 = vpop.permute.xlu1 %734 }
  0xa5   : > { %v1357_v39 = vpop.permute.xlu0 %1356  ;;  %758 = vst.msk [vmem:[#allocation3 + $0x18] sm:$0xff] %vm756_vm13, %v735_v27 }
  0xa8   : > { %v704_v3 = vpop.permute.xlu1 %703 }
  0xa9   : > { %v1395_v14 = vpop.permute.xlu0 %1394  ;;  %721 = vst.msk [vmem:[#allocation3 + $0xa8] sm:$0xff] %vm713_vm12, %v704_v3 }
  0xac   : > { %v745_v26 = vpop.permute.xlu1 %744 }
  0xad   : > { %v1385_v31 = vpop.permute.xlu0 %1384  ;;  %763 = vst.msk [vmem:[#allocation3 + $0x90] sm:$0xff] %vm756_vm13, %v745_v26 }
  0xb1   : > { %v1148_v1 = vpop.permute.xlu0 %1147 }
  0xb2   : > { %1171 = vst.msk [vmem:[#allocation3 + $0x8] sm:$0xff] %vm713_vm12, %v1148_v1 }
  0xb3   : > { %v1099_v42 = vpop.permute.xlu1 %1098 }
  0xb4   : > { %1117 = vst.msk [vmem:[#allocation3 + $0x90] sm:$0xff] %vm1110_vm14, %v1099_v42 }
  0xb7   : > { %v1150_v44 = vpop.permute.xlu0 %1149 }
  0xb8   : > { %1172 = vst.msk [vmem:[#allocation3 + $0x20] sm:$0xff] %vm713_vm12, %v1150_v44 }
  0xbb   : > { %v1454_v63 = vld [vmem:[#allocation3 + $0x90] sm:$0xff] }
  0xc4   : > { %v1345_v45 = vpop.permute.xlu1 %1344 }
  0xc5   : > { %1368 = vst.msk [vmem:[#allocation3 + $0x8] sm:$0xff] %vm756_vm13, %v1345_v45  ;;  %v1347_v48 = vpop.permute.xlu0 %1346 }
  0xc6   : > { %1406 = vst.msk [vmem:[#allocation3 + $0x8] sm:$0xff] %vm1110_vm14, %v1383_v10 }
  0xc7   : > { %1369 = vst.msk [vmem:[#allocation3 + $0x20] sm:$0xff] %vm756_vm13, %v1347_v48 }
  0xc8   : > { %1407 = vst.msk [vmem:[#allocation3 + $0x20] sm:$0xff] %vm1110_vm14, %v1385_v31 }
  0xc9   : > { %v1160_v51 = vpop.permute.xlu0 %1159 }
  0xca   : > { %1177 = vst.msk [vmem:[#allocation3 + $0x98] sm:$0xff] %vm713_vm12, %v1160_v51 }
  0xcb   : > { %1374 = vst.msk [vmem:[#allocation3 + $0x98] sm:$0xff] %vm756_vm13, %v1357_v39 }
  0xcc   : > { %v1087_v52 = vpop.permute.xlu1 %1086  ;;  %1412 = vst.msk [vmem:[#allocation3 + $0x98] sm:$0xff] %vm1110_vm14, %v1395_v14 }
  0xcd   : > { %1111 = vst.msk [vmem:[#allocation3] sm:$0xff] %vm1110_vm14, %v1087_v52  ;;  %v1437_v60 = vld [vmem:[#allocation3 + $0x8] sm:$0xff] }
  0xce   : > { %1667 = vmatprep.mubr.bf16.mxu0 %v1437_v60 }
  0xcf   : > { %v1440_v0 = vld [vmem:[#allocation3 + $0x20] sm:$0xff] }
  0xd1   : > { %v1162_v46 = vpop.permute.xlu0 %1161 }
  0xd2   : > { %1178 = vst.msk [vmem:[#allocation3 + $0xb0] sm:$0xff] %vm713_vm12, %v1162_v46 }
  0xd3   : > { %v1089_v55 = vpop.permute.xlu1 %1088  ;;  %v1455_v56 = vld [vmem:[#allocation3 + $0x98] sm:$0xff] }
  0xd4   : > { %1112 = vst.msk [vmem:[#allocation3 + $0x18] sm:$0xff] %vm1110_vm14, %v1089_v55  ;;  %v1436_v62 = vld [vmem:[#allocation3] sm:$0xff]  ;;  %1715 = vmatprep.mubr.bf16.mxu1 %v1455_v56 }
  0xd5   : > { %v1359_v61 = vpop.permute.xlu0 %1358  ;;  %1668 = vmatmul.mubr.bf16.vlgmr.msra.gmra.mrb[0].mxu0 %v1436_v62  ;;  %1716 = vmatmul.mubr.bf16.vlgmr.msra.gmra.mrb[0].mxu1 %v1454_v63 }
  0xd6   : > { %1375 = vst.msk [vmem:[#allocation3 + $0xb0] sm:$0xff] %vm756_vm13, %v1359_v61  ;;  %1675 = vmatprep.mubr.bf16.mxu0 %v1440_v0  ;;  %2222 = vmatpush3.bf16.msra.mxu1 %v2869_v17 }
  0xd7   : > { %v747_v6 = vpop.permute.xlu1 %746  ;;  %2223 = vmatprep.subr.bf16.mxu1 %v2334_v18 }
  0xd8   : > { %764 = vst.msk [vmem:[#allocation3 + $0xa8] sm:$0xff] %vm756_vm13, %v747_v6 }
  0xd9   : > { %v1397_v7 = vpop.permute.xlu0 %1396 }
  0xda   : > { %1413 = vst.msk [vmem:[#allocation3 + $0xb0] sm:$0xff] %vm1110_vm14, %v1397_v7  ;;  %2224 = vmatpush3.bf16.msra.mxu1 %v2334_v18 }
  0xdb   : > { %v1101_v54 = vpop.permute.xlu1 %1100  ;;  %v1439_v8 = vld [vmem:[#allocation3 + $0x18] sm:$0xff] }
  0xdc   : > { %1118 = vst.msk [vmem:[#allocation3 + $0xa8] sm:$0xff] %vm1110_vm14, %v1101_v54 }
  0xdd   : > { %v1152_v47 = vpop.permute.xlu0 %1151  ;;  %1676 = vmatmul.mubr.bf16.gmra.mrb[4].mxu0 %v1439_v8 }
  0xde   : > { %1173 = vst.msk [vmem:[#allocation3 + $0x38] sm:$0xff] %vm713_vm12, %v1152_v47 }
  0xdf   : > { %v694_v36 = vpop.permute.xlu1 %693 }
  0xe0   : > { %716 = vst.msk [vmem:[#allocation3 + $0x30] sm:$0xff] %vm713_vm12, %v694_v36 }
  0xe1   : > { %v1349_v17 = vpop.permute.xlu0 %1348  ;;  %v1458_v53 = vld [vmem:[#allocation3 + $0xb0] sm:$0xff] }
  0xe2   : > { %1370 = vst.msk [vmem:[#allocation3 + $0x38] sm:$0xff] %vm756_vm13, %v1349_v17  ;;  %1723 = vmatprep.mubr.bf16.mxu1 %v1458_v53  ;;  %v3024_v17 = vld [vmem:[%s3095_s4] ss:$0 sm:$0xff] }
  0xe3   : > { %v737_v13 = vpop.permute.xlu1 %736  ;;  %v1457_v11 = vld [vmem:[#allocation3 + $0xa8] sm:$0xff] }
  0xe4   : > { %759 = vst.msk [vmem:[#allocation3 + $0x30] sm:$0xff] %vm756_vm13, %v737_v13  ;;  %1724 = vmatmul.mubr.bf16.gmra.mrb[4].mxu1 %v1457_v11 }
  0xe5   : > { %v1387_v19 = vpop.permute.xlu0 %1386  ;;  %2225 = vmatprep.mubr.msk.bf16.mxu1 %vm670_vm5, %v1438_v9 }
  0xe6   : > { %1408 = vst.msk [vmem:[#allocation3 + $0x38] sm:$0xff] %vm1110_vm14, %v1387_v19 }
  0xe7   : > { %v1091_v24 = vpop.permute.xlu1 %1090 }
  0xe8   : > { %1113 = vst.msk [vmem:[#allocation3 + $0x30] sm:$0xff] %vm1110_vm14, %v1091_v24 }
  0xe9   : > { %v1154_v16 = vpop.permute.xlu0 %1153 }
  0xea   : > { %1174 = vst.msk [vmem:[#allocation3 + $0x50] sm:$0xff] %vm713_vm12, %v1154_v16 }
  0xeb   : > { %v696_v25 = vpop.permute.xlu1 %695 }
  0xec   : > { %717 = vst.msk [vmem:[#allocation3 + $0x48] sm:$0xff] %vm713_vm12, %v696_v25  ;;  %2226 = vmatmul.mubr.msk.bf16.vlgmr.msra.gmra.mrb[8].mxu1 %vm670_vm5, %v1441_v5 }
  0xed   : > { %v1351_v28 = vpop.permute.xlu0 %1350  ;;  %v1443_v58 = vld [vmem:[#allocation3 + $0x38] sm:$0xff]  ;;  %2229 = vmatprep.mubr.msk.bf16.mxu1 %vm670_vm5, %v1444_v57 }
  0xee   : > { %1371 = vst.msk [vmem:[#allocation3 + $0x50] sm:$0xff] %vm756_vm13, %v1351_v28  ;;  %1683 = vmatprep.mubr.bf16.mxu0 %v1443_v58 }
  0xef   : > { %v739_v23 = vpop.permute.xlu1 %738  ;;  %v1442_v12 = vld [vmem:[#allocation3 + $0x30] sm:$0xff] }
  0xf0   : > { %760 = vst.msk [vmem:[#allocation3 + $0x48] sm:$0xff] %vm756_vm13, %v739_v23  ;;  %1684 = vmatmul.mubr.bf16.gmra.mrb[8].mxu0 %v1442_v12 }
  0xf1   : > { %v1389_v22 = vpop.permute.xlu0 %1388 }
  0xf2   : > { %1409 = vst.msk [vmem:[#allocation3 + $0x50] sm:$0xff] %vm1110_vm14, %v1389_v22 }
  0xf3   : > { %v1093_v20 = vpop.permute.xlu1 %1092 }
  0xf4   : > { %1114 = vst.msk [vmem:[#allocation3 + $0x48] sm:$0xff] %vm1110_vm14, %v1093_v20  ;;  %2230 = vmatmul.mubr.msk.bf16.gmra.mrb[12].mxu1 %vm670_vm5, %v1447_v29 }
  0xf5   : > { %v1156_v30 = vpop.permute.xlu0 %1155  ;;  %2233 = vmatprep.mubr.msk.bf16.mxu1 %vm670_vm5, %v1450_v15 }
  0xf6   : > { %1175 = vst.msk [vmem:[#allocation3 + $0x68] sm:$0xff] %vm713_vm12, %v1156_v30 }
  0xf7   : > { %v698_v32 = vpop.permute.xlu1 %697 }
  0xf8   : > { %718 = vst.msk [vmem:[#allocation3 + $0x60] sm:$0xff] %vm713_vm12, %v698_v32 }
  0xf9   : > { %v1353_v33 = vpop.permute.xlu0 %1352  ;;  %v1446_v34 = vld [vmem:[#allocation3 + $0x50] sm:$0xff] }
  0xfa   : > { %1372 = vst.msk [vmem:[#allocation3 + $0x68] sm:$0xff] %vm756_vm13, %v1353_v33  ;;  %1691 = vmatprep.mubr.bf16.mxu0 %v1446_v34 }
  0xfb   : > { %v741_v35 = vpop.permute.xlu1 %740  ;;  %v1445_v59 = vld [vmem:[#allocation3 + $0x48] sm:$0xff] }
  0xfc   : > { %761 = vst.msk [vmem:[#allocation3 + $0x60] sm:$0xff] %vm756_vm13, %v741_v35  ;;  %1692 = vmatmul.mubr.bf16.gmra.mrb[12].mxu0 %v1445_v59  ;;  %2234 = vmatmul.mubr.msk.bf16.gmra.mrb[16].mxu1 %vm670_vm5, %v1453_v38 }
  0xfd   : > { %v1391_v40 = vpop.permute.xlu0 %1390  ;;  %2237 = vmatprep.mubr.msk.bf16.mxu1 %vm670_vm5, %v1456_v2 }
  0xfe   : > { %1410 = vst.msk [vmem:[#allocation3 + $0x68] sm:$0xff] %vm1110_vm14, %v1391_v40 }
  0xff   : > { %v1095_v41 = vpop.permute.xlu1 %1094 }
 0x100   : > { %1115 = vst.msk [vmem:[#allocation3 + $0x60] sm:$0xff] %vm1110_vm14, %v1095_v41 }
 0x101   : > { %v1158_v37 = vpop.permute.xlu0 %1157 }
 0x102   : > { %1176 = vst.msk [vmem:[#allocation3 + $0x80] sm:$0xff] %vm713_vm12, %v1158_v37 }
 0x103   : > { %v700_v4 = vpop.permute.xlu1 %699 }
 0x104   : > { %719 = vst.msk [vmem:[#allocation3 + $0x78] sm:$0xff] %vm713_vm12, %v700_v4  ;;  %2238 = vmatmul.mubr.msk.bf16.gmra.mrb[20].mxu1 %vm670_vm5, %v1459_v43 }
 0x105   : > { %v1355_v21 = vpop.permute.xlu0 %1354  ;;  %v1449_v49 = vld [vmem:[#allocation3 + $0x68] sm:$0xff] }
 0x106   : > { %1373 = vst.msk [vmem:[#allocation3 + $0x80] sm:$0xff] %vm756_vm13, %v1355_v21  ;;  %1699 = vmatprep.mubr.bf16.mxu0 %v1449_v49 }
 0x107   : > { %v743_v50 = vpop.permute.xlu1 %742  ;;  %v1448_v10 = vld [vmem:[#allocation3 + $0x60] sm:$0xff] }
 0x108   : > { %762 = vst.msk [vmem:[#allocation3 + $0x78] sm:$0xff] %vm756_vm13, %v743_v50  ;;  %1700 = vmatmul.mubr.bf16.gmra.mrb[16].mxu0 %v1448_v10 }
 0x109   : > { %v1393_v27 = vpop.permute.xlu0 %1392 }
 0x10a   : > { %1411 = vst.msk [vmem:[#allocation3 + $0x80] sm:$0xff] %vm1110_vm14, %v1393_v27 }
 0x10b   : > { %v1097_v39 = vpop.permute.xlu1 %1096 }
 0x10c   : > { %1116 = vst.msk [vmem:[#allocation3 + $0x78] sm:$0xff] %vm1110_vm14, %v1097_v39 }
 0x111   : > { %v1452_v3 = vld [vmem:[#allocation3 + $0x80] sm:$0xff] }
 0x112   : > { %1707 = vmatprep.mubr.bf16.mxu0 %v1452_v3 }
 0x113   : > { %v1451_v14 = vld [vmem:[#allocation3 + $0x78] sm:$0xff] }
 0x114   : > { %1708 = vmatmul.mubr.bf16.gmra.mrb[20].mxu0 %v1451_v14 }
 0x1a8   : > { %v2163_v26 = vpop.f32.mrb[0].mxu0  ;;  %v2199_v31 = vpop.f32.mrb[0].mxu1 }
 0x1a9   : > { %v2164_v1 = vpop.f32.mrb[1].mxu0  ;;  %v2200_v42 = vpop.f32.mrb[1].mxu1 }
 0x1aa   : > { %v2165_v44 = vadd.f32 %v2164_v1, %v2163_v26  ;;  %v2166_v45 = vpop.f32.mrb[2].mxu0  ;;  %v3017_v48 = vadd.f32 %v2200_v42, %v2199_v31  ;;  %v2202_v51 = vpop.f32.mrb[2].mxu1 }
 0x1ab   : > { %v2167_v52 = vpop.f32.mrb[3].mxu0  ;;  %v2203_v60 = vpop.f32.mrb[3].mxu1 }
 0x1ac   : > { %v2168_v46 = vadd.f32 %v2167_v52, %v2166_v45  ;;  %v3019_v55 = vadd.f32 %v2203_v60, %v2202_v51  ;;  %v1670_v13 = vadd.f32 %v2165_v44, %v3024_v17  ;;  %v1718_v42 = vadd.f32 %v3017_v48, %v3024_v17 }
 0x1ae   : > { %v1673_v57 = vadd.f32 %v2168_v46, %v3024_v17  ;;  %v1721_v46 = vadd.f32 %v3019_v55, %v3024_v17 }
 0x1b0   : > { %v2169_v56 = vpop.f32.mrb[4].mxu0 }
 0x1b1   : > { %v2170_v18 = vpop.f32.mrb[5].mxu0 }
 0x1b2   : > { %v2171_v61 = vadd.f32 %v2170_v18, %v2169_v56  ;;  %v2172_v62 = vpop.f32.mrb[6].mxu0 }
 0x1b3   : > { %v2173_v63 = vpop.f32.mrb[7].mxu0 }
 0x1b4   : > { %v2174_v0 = vadd.f32 %v2173_v63, %v2172_v62  ;;  %v1678_v53 = vadd.f32 %v2171_v61, %v3024_v17 }
 0x1b6   : > { %v1681_v24 = vadd.f32 %v2174_v0, %v3024_v17 }
 0x1b7   : > { %v2205_v6 = vpop.f32.mrb[4].mxu1 }
 0x1b8   : > { %v2206_v7 = vpop.f32.mrb[5].mxu1 }
 0x1b9   : > { %v2207_v54 = vadd.f32 %v2206_v7, %v2205_v6  ;;  %v2208_v8 = vpop.f32.mrb[6].mxu1 }
 0x1ba   : > { %v2209_v47 = vpop.f32.mrb[7].mxu1 }
 0x1bb   : > { %v2210_v36 = vadd.f32 %v2209_v47, %v2208_v8  ;;  %v1726_v26 = vadd.f32 %v2207_v54, %v3024_v17 }
 0x1bd   : > { %v1729_v51 = vadd.f32 %v2210_v36, %v3024_v17 }
 0x1bf   : > { %v2227_v9 = vpop.f32.mrb[8].mxu1 }
 0x1c0   : > { %v1775_v11 = vadd.f32 %v2227_v9, %v1678_v53  ;;  %v1766_v19 = vpop.f32.mrb[9].mxu1 }
 0x1c1   : > { %v1767_v16 = vadd.f32 %v1766_v19, %v1670_v13  ;;  %v2228_v5 = vpop.f32.mrb[10].mxu1 }
 0x1c2   : > { %1832 = vst.msk [vmem:[%s2467_s14 + $0x11] sm:$0xff] %vm1829_vm15, %v1775_v11  ;;  %v1778_v25 = vadd.f32 %v2228_v5, %v1681_v24  ;;  %v1769_v28 = vpop.f32.mrb[11].mxu1 }
 0x1c3   : > { %1830 = vst.msk [vmem:[%s2467_s14 + $0x1] sm:$0xff] %vm1829_vm15, %v1767_v16  ;;  %v1770_v58 = vadd.f32 %v1769_v28, %v1673_v57  ;;  %v2175_v23 = vpop.f32.mrb[8].mxu0 }
 0x1c4   : > { %1833 = vst.msk [vmem:[%s2467_s14 + $0x19] sm:$0xff] %vm1829_vm15, %v1778_v25  ;;  %v2176_v12 = vpop.f32.mrb[9].mxu0 }
 0x1c5   : > { %1831 = vst.msk [vmem:[%s2467_s14 + $0x9] sm:$0xff] %vm1829_vm15, %v1770_v58  ;;  %v2177_v22 = vadd.f32 %v2176_v12, %v2175_v23  ;;  %v2178_v29 = vpop.f32.mrb[10].mxu0 }
 0x1c6   : > { %v2179_v15 = vpop.f32.mrb[11].mxu0 }
 0x1c7   : > { %v2180_v20 = vadd.f32 %v2179_v15, %v2178_v29  ;;  %v2231_v30 = vpop.f32.mrb[12].mxu1  ;;  %v1686_v32 = vadd.f32 %v2177_v22, %v3024_v17 }
 0x1c8   : > { %v1782_v33 = vpop.f32.mrb[13].mxu1 }
 0x1c9   : > { %v1783_v34 = vadd.f32 %v1782_v33, %v1686_v32  ;;  %v2232_v38 = vpop.f32.mrb[14].mxu1  ;;  %v1689_v2 = vadd.f32 %v2180_v20, %v3024_v17 }
 0x1ca   : > { %v1785_v35 = vpop.f32.mrb[15].mxu1 }
 0x1cb   : > { %1834 = vst.msk [vmem:[%s2467_s14 + $0x29] sm:$0xff] %vm1829_vm15, %v1783_v34  ;;  %v1786_v59 = vadd.f32 %v1785_v35, %v1689_v2 }
 0x1cd   : > { %1835 = vst.msk [vmem:[%s2467_s14 + $0x31] sm:$0xff] %vm1829_vm15, %v1786_v59 }
 0x1cf   : > { %v2181_v40 = vpop.f32.mrb[12].mxu0  ;;  %v2235_v41 = vpop.f32.mrb[16].mxu1 }
 0x1d0   : > { %v2182_v37 = vpop.f32.mrb[13].mxu0  ;;  %v1798_v43 = vpop.f32.mrb[17].mxu1 }
 0x1d1   : > { %v2183_v4 = vadd.f32 %v2182_v37, %v2181_v40  ;;  %v2184_v21 = vpop.f32.mrb[14].mxu0  ;;  %v2236_v49 = vpop.f32.mrb[18].mxu1 }
 0x1d2   : > { %v2185_v50 = vpop.f32.mrb[15].mxu0  ;;  %v1801_v10 = vpop.f32.mrb[19].mxu1 }
 0x1d3   : > { %v1694_v27 = vadd.f32 %v2183_v4, %v3024_v17  ;;  %v2186_v39 = vadd.f32 %v2185_v50, %v2184_v21 }
 0x1d5   : > { %v1791_v3 = vadd.f32 %v2231_v30, %v1694_v27  ;;  %v1697_v14 = vadd.f32 %v2186_v39, %v3024_v17 }
 0x1d7   : > { %1836 = vst.msk [vmem:[%s2467_s14 + $0x39] sm:$0xff] %vm1829_vm15, %v1791_v3  ;;  %v1794_v31 = vadd.f32 %v2232_v38, %v1697_v14  ;;  %v2239_v1 = vpop.f32.mrb[20].mxu1 }
 0x1d8   : > { %v1823_v44 = vadd.f32 %v2239_v1, %v1726_v26  ;;  %v1814_v45 = vpop.f32.mrb[21].mxu1 }
 0x1d9   : > { %1837 = vst.msk [vmem:[%s2467_s14 + $0x41] sm:$0xff] %vm1829_vm15, %v1794_v31  ;;  %v1815_v52 = vadd.f32 %v1814_v45, %v1718_v42  ;;  %v2240_v60 = vpop.f32.mrb[22].mxu1 }
 0x1da   : > { %1844 = vst.msk [vmem:[%s2467_s14 + $0x89] sm:$0xff] %vm1829_vm15, %v1823_v44  ;;  %v1826_v56 = vadd.f32 %v2240_v60, %v1729_v51  ;;  %v1817_v18 = vpop.f32.mrb[23].mxu1 }
 0x1db   : > { %1842 = vst.msk [vmem:[%s2467_s14 + $0x79] sm:$0xff] %vm1829_vm15, %v1815_v52  ;;  %v1818_v48 = vadd.f32 %v1817_v18, %v1721_v46  ;;  %v2187_v61 = vpop.f32.mrb[16].mxu0 }
 0x1dc   : > { %1845 = vst.msk [vmem:[%s2467_s14 + $0x91] sm:$0xff] %vm1829_vm15, %v1826_v56  ;;  %v2188_v62 = vpop.f32.mrb[17].mxu0 }
 0x1dd   : > { %1843 = vst.msk [vmem:[%s2467_s14 + $0x81] sm:$0xff] %vm1829_vm15, %v1818_v48  ;;  %v2189_v63 = vadd.f32 %v2188_v62, %v2187_v61  ;;  %v2190_v0 = vpop.f32.mrb[18].mxu0 }
 0x1de   : > { %v2191_v6 = vpop.f32.mrb[19].mxu0 }
 0x1df   : > { %v1702_v55 = vadd.f32 %v2189_v63, %v3024_v17  ;;  %v2192_v7 = vadd.f32 %v2191_v6, %v2190_v0 }
 0x1e1   : > { %v1799_v54 = vadd.f32 %v1798_v43, %v1702_v55  ;;  %v1705_v8 = vadd.f32 %v2192_v7, %v3024_v17 }
 0x1e3   : > { %1838 = vst.msk [vmem:[%s2467_s14 + $0x51] sm:$0xff] %vm1829_vm15, %v1799_v54  ;;  %v1802_v47 = vadd.f32 %v1801_v10, %v1705_v8 }
 0x1e5   : > { %1839 = vst.msk [vmem:[%s2467_s14 + $0x59] sm:$0xff] %vm1829_vm15, %v1802_v47 }
 0x1e7   : > { %v2193_v36 = vpop.f32.mrb[20].mxu0 }
 0x1e8   : > { %v2194_v53 = vpop.f32.mrb[21].mxu0 }
 0x1e9   : > { %v2195_v9 = vadd.f32 %v2194_v53, %v2193_v36  ;;  %v2196_v13 = vpop.f32.mrb[22].mxu0 }
 0x1ea   : > { %v2197_v11 = vpop.f32.mrb[23].mxu0 }
 0x1eb   : > { %v1710_v19 = vadd.f32 %v2195_v9, %v3024_v17  ;;  %v2198_v24 = vadd.f32 %v2197_v11, %v2196_v13 }
 0x1ed   : > { %v1807_v16 = vadd.f32 %v2235_v41, %v1710_v19  ;;  %v1713_v5 = vadd.f32 %v2198_v24, %v3024_v17 }
 0x1ef   : > { %1840 = vst.msk [vmem:[%s2467_s14 + $0x61] sm:$0xff] %vm1829_vm15, %v1807_v16  ;;  %v1810_v57 = vadd.f32 %v2236_v49, %v1713_v5 }
 0x1f1   : > { %1841 = vst.msk [vmem:[%s2467_s14 + $0x69] sm:$0xff] %vm1829_vm15, %v1810_v57 }
 0x1f2 PF: > { %s15_s22 = sadd.s32 1, %s2374_s22   ;;  %s3104_s18 = smov %s2366_s20 }
 0x1f3   : > { %p12_p12 = scmp.ge.s32.totalorder %s15_s22, 18   ;;  %s3105_s19 = smov %s2370_s21 }
 0x1f4   : > { %s3106_s20 = smov %s3109_s23  ;;  %s3107_s21 = smov %s3113_s24 }
 0x1f5   :  { %14 = sbr.rel (!%p12_p12) target bundleno = 3 (0x3), region = 78 }

</bundles_post_ra>
